<compile_context>
chip_gen: v6e
topology: v6e:2x2x1
jax: 0.10.0
libtpu: 0.0.40
codegen_flags: <defaults>
</compile_context>

<pallas_src>
import jax
import jax.numpy as jnp
from jax.experimental import pallas as pl
from jax.experimental.pallas import tpu as pltpu


def _downsample_kernel(xt_ref, xm_ref, xb_ref, w_ref, o_ref):
    """Fused pad + 3x3 conv (no bias) + PixelUnshuffle(2) + flatten, one row tile.

    xt_ref: (1, 1,     W, C)   input row just above the tile (zeroed on tile 0)
    xm_ref: (1, ftile, W, C)   the tile's input rows
    xb_ref: (1, 1,     W, C)   input row just below the tile (zeroed on last tile)
    w_ref : (3, C, 3*Cout)     w_ref[ky][i, kx*Cout + o] = conv_weight[o, i, ky, kx]
    o_ref : (1, th2*W2, 4*Cout)
    """
    ftile, W, C = xm_ref.shape[1], xm_ref.shape[2], xm_ref.shape[3]
    Cout = w_ref.shape[2] // 3
    th2, W2 = ftile // 2, W // 2
    Wp = W + 2

    i = pl.program_id(1)
    top = xt_ref[0]
    bot = xb_ref[0]
    # halo rows are clamped in the index_map at the image borders; zero them here
    top = jnp.where(i == 0, jnp.zeros_like(top), top)
    bot = jnp.where(i == pl.num_programs(1) - 1, jnp.zeros_like(bot), bot)

    # build the padded window in VMEM: (ftile+2, W+2, C)
    rows = jnp.concatenate([top, xm_ref[0], bot], axis=0)        # (ftile+2, W, C)
    zcol = jnp.zeros((ftile + 2, 1, C), rows.dtype)
    xfull = jnp.concatenate([zcol, rows, zcol], axis=1)          # (ftile+2, W+2, C)

    # 3x3 conv: fold the three kx taps into the output-channel (N) dimension,
    # so the MXU sees 3 matmuls of (ftile*Wp, C) @ (C, 3*Cout) instead of 9
    # thin (.., C) @ (C, Cout) ones. f32 accumulation.
    y = jnp.zeros((ftile * Wp, 3 * Cout), jnp.float32)
    for ky in range(3):
        lhs = xfull[ky:ky + ftile].reshape(ftile * Wp, C)
        y = y + jnp.dot(lhs, w_ref[ky], preferred_element_type=jnp.float32)
    y = y.reshape(ftile, Wp, 3 * Cout)

    # combine the kx taps with shifted adds on the (half-width) conv output
    conv = (y[:, 0:W,     0:Cout] +
            y[:, 1:W + 1, Cout:2 * Cout] +
            y[:, 2:W + 2, 2 * Cout:3 * Cout])                    # (ftile, W, Cout)

    # PixelUnshuffle(2) + 'b c h w -> b (h w) c', fused in VMEM:
    #   out[hh*W2 + ww, c*4 + dy*2 + dx] = conv[2*hh + dy, 2*ww + dx, c]
    y5 = conv.reshape(th2, 2, W2, 2, Cout)
    parts = [y5[:, dy, :, dx, :] for dy in (0, 1) for dx in (0, 1)]
    out = jnp.stack(parts, axis=-1)                              # (th2, W2, Cout, 4)
    o_ref[0] = out.reshape(th2 * W2, 4 * Cout).astype(o_ref.dtype)


def downsample(x, H, W, conv_weight, *, tile_vmem_bytes=1 * 1024 * 1024):
    """Pallas TPU forward of Downsample.

    x           : (B, H*W, C) float32
    conv_weight : (C//2, C, 3, 3) float32 (PyTorch OIHW layout, bias=False)
    returns     : (B, (H//2)*(W//2), 2*C) with x's dtype
    """
    B, L, C = x.shape
    assert L == H * W and C % 2 == 0 and H % 2 == 0 and W % 2 == 0
    Cout = C // 2
    H2, W2 = H // 2, W // 2

    # channels-last image view; (B, H*W, C) -> (B, H, W, C) is a free reshape,
    # and the padding=1 border is handled entirely inside the kernel.
    x_img = x.reshape(B, H, W, C)

    # (Cout, Cin, 3, 3) -> (3, Cin, 3*Cout): tap layout [ky][i, kx*Cout + o],
    # pre-transposed on the host so the kernel never touches weight layout.
    w3 = jnp.transpose(conv_weight, (2, 1, 3, 0)).reshape(3, C, 3 * Cout)

    # coarse-row tile: largest divisor of H2 whose main input block fits the
    # VMEM budget and keeps the output block 8-sublane aligned.
    itemsize = jnp.dtype(x.dtype).itemsize
    candidates = [d for d in range(1, H2 + 1)
                  if H2 % d == 0 and (d == H2 or (d * W2) % 8 == 0)]
    fitting = [d for d in candidates if 2 * d * W * C * itemsize <= tile_vmem_bytes]
    th2 = max(fitting) if fitting else min(candidates)
    ftile = 2 * th2
    n_tiles = H2 // th2

    return pl.pallas_call(
        _downsample_kernel,
        out_shape=jax.ShapeDtypeStruct((B, H2 * W2, 4 * Cout), x.dtype),
        grid=(B, n_tiles),
        in_specs=[
            # 1-row halo above the tile (clamped at the border, zeroed in-kernel)
            pl.BlockSpec((1, 1, W, C),
                         lambda b, i: (b, jnp.maximum(i * ftile - 1, 0), 0, 0)),
            # main rows of the tile
            pl.BlockSpec((1, ftile, W, C), lambda b, i: (b, i, 0, 0)),
            # 1-row halo below the tile (clamped at the border, zeroed in-kernel)
            pl.BlockSpec((1, 1, W, C),
                         lambda b, i: (b, jnp.minimum((i + 1) * ftile, H - 1), 0, 0)),
            # conv taps, constant across the grid (DMA'd once)
            pl.BlockSpec((3, C, 3 * Cout), lambda b, i: (0, 0, 0)),
        ],
        out_specs=pl.BlockSpec((1, th2 * W2, 4 * Cout), lambda b, i: (b, i, 0)),
        compiler_params=pltpu.CompilerParams(
            dimension_semantics=("parallel", "parallel")),
    )(x_img, x_img, x_img, w3)


def _reference(x, H, W, conv_weight):
    """Plain-JAX transcription of the PyTorch forward (self-check only)."""
    B, L, C = x.shape
    Cout = C // 2
    img = jnp.transpose(x.reshape(B, H, W, C), (0, 3, 1, 2))          # NCHW
    y = jax.lax.conv_general_dilated(
        img, conv_weight, window_strides=(1, 1), padding=((1, 1), (1, 1)),
        dimension_numbers=("NCHW", "OIHW", "NCHW"),
        precision=jax.lax.Precision.HIGHEST)                          # (B, Cout, H, W)
    H2, W2 = H // 2, W // 2
    y = y.reshape(B, Cout, H2, 2, W2, 2)
    y = jnp.transpose(y, (0, 1, 3, 5, 2, 4)).reshape(B, 4 * Cout, H2, W2)
    return jnp.transpose(y, (0, 2, 3, 1)).reshape(B, H2 * W2, 4 * Cout)


if __name__ == "__main__":
    B, C, H, W = 2, 16, 16, 16

    key = jax.random.PRNGKey(0)
    kx, kw = jax.random.split(key)
    x = jax.random.normal(kx, (B, H * W, C), jnp.float32)
    conv_weight = jax.random.normal(kw, (C // 2, C, 3, 3), jnp.float32) * 0.1

    out = jax.block_until_ready(downsample(x, H, W, conv_weight))
    assert out.shape == (B, (H // 2) * (W // 2), 2 * C), out.shape
    assert out.dtype == jnp.float32, out.dtype

    ref = _reference(x, H, W, conv_weight)
    err = float(jnp.max(jnp.abs(out - ref)))
    assert err < 2e-2, f"max abs err {err}"
    print("KERNEL_OK")
</pallas_src>

<mosaic_0001>
module attributes {stable_mosaic.version = 11 : i64} {
  func.func @_downsample_kernel(%arg0: i32, %arg1: i32, %arg2: memref<1x1x16x16xf32, #tpu.memory_space<vmem>>, %arg3: memref<1x16x16x16xf32, #tpu.memory_space<vmem>>, %arg4: memref<1x1x16x16xf32, #tpu.memory_space<vmem>>, %arg5: memref<3x16x24xf32, #tpu.memory_space<vmem>>, %arg6: memref<1x64x32xf32, #tpu.memory_space<vmem>>) attributes {dimension_semantics = [#tpu.dimension_semantics<parallel>, #tpu.dimension_semantics<parallel>], iteration_bounds = array<i64: 2, 1>, scalar_prefetch = 0 : i64, scratch_operands = 0 : i64, tpu.core_type = #tpu.core_type<tc>, window_params = [{transform_indices = @transform_0, window_bounds = array<i64: 1, 1, 16, 16>}, {transform_indices = @transform_1, window_bounds = array<i64: 1, 16, 16, 16>}, {transform_indices = @transform_2, window_bounds = array<i64: 1, 1, 16, 16>}, {pipeline_mode = #tpu.pipeline_mode<synchronous>, transform_indices = @transform_3, window_bounds = array<i64: 3, 16, 24>}, {transform_indices = @transform_4, window_bounds = array<i64: 1, 64, 32>}]} {
    %c0 = arith.constant 0 : index
    %c0_0 = arith.constant 0 : index
    %c0_1 = arith.constant 0 : index
    %c0_2 = arith.constant 0 : index
    %0 = vector.load %arg2[%c0, %c0_0, %c0_1, %c0_2] : memref<1x1x16x16xf32, #tpu.memory_space<vmem>>, vector<1x1x16x16xf32>
    %1 = vector.shape_cast %0 : vector<1x1x16x16xf32> to vector<1x16x16xf32>
    %c0_3 = arith.constant 0 : index
    %c0_4 = arith.constant 0 : index
    %c0_5 = arith.constant 0 : index
    %c0_6 = arith.constant 0 : index
    %2 = vector.load %arg4[%c0_3, %c0_4, %c0_5, %c0_6] : memref<1x1x16x16xf32, #tpu.memory_space<vmem>>, vector<1x1x16x16xf32>
    %3 = vector.shape_cast %2 : vector<1x1x16x16xf32> to vector<1x16x16xf32>
    %c0_i32 = arith.constant 0 : i32
    %4 = arith.cmpi eq, %arg1, %c0_i32 : i32
    %cst = arith.constant 0.000000e+00 : f32
    %5 = vector.broadcast %cst : f32 to vector<1x16x16xf32>
    %6 = arith.select %4, %5, %1 : vector<1x16x16xf32>
    %c0_i32_7 = arith.constant 0 : i32
    %7 = arith.cmpi eq, %arg1, %c0_i32_7 : i32
    %cst_8 = arith.constant 0.000000e+00 : f32
    %8 = vector.broadcast %cst_8 : f32 to vector<1x16x16xf32>
    %9 = arith.select %7, %8, %3 : vector<1x16x16xf32>
    %c0_9 = arith.constant 0 : index
    %c0_10 = arith.constant 0 : index
    %c0_11 = arith.constant 0 : index
    %c0_12 = arith.constant 0 : index
    %10 = vector.load %arg3[%c0_9, %c0_10, %c0_11, %c0_12] : memref<1x16x16x16xf32, #tpu.memory_space<vmem>>, vector<1x16x16x16xf32>
    %11 = vector.shape_cast %10 : vector<1x16x16x16xf32> to vector<16x16x16xf32>
    %12 = tpu.concatenate %6, %11, %9 in 0 : vector<1x16x16xf32>, vector<16x16x16xf32>, vector<1x16x16xf32> -> vector<18x16x16xf32>
    %cst_13 = arith.constant 0.000000e+00 : f32
    %13 = vector.broadcast %cst_13 : f32 to vector<18x1x16xf32>
    %14 = tpu.concatenate %13, %12, %13 in 1 : vector<18x1x16xf32>, vector<18x16x16xf32>, vector<18x1x16xf32> -> vector<18x18x16xf32>
    %cst_14 = arith.constant 0.000000e+00 : f32
    %15 = vector.broadcast %cst_14 : f32 to vector<288x24xf32>
    %16 = vector.extract_strided_slice %14 {offsets = [0, 0, 0], sizes = [16, 18, 16], strides = [1, 1, 1]} : vector<18x18x16xf32> to vector<16x18x16xf32>
    %17 = vector.shape_cast %16 : vector<16x18x16xf32> to vector<288x16xf32>
    %c0_15 = arith.constant 0 : index
    %c0_16 = arith.constant 0 : index
    %c0_17 = arith.constant 0 : index
    %18 = vector.load %arg5[%c0_15, %c0_16, %c0_17] : memref<3x16x24xf32, #tpu.memory_space<vmem>>, vector<1x16x24xf32>
    %19 = vector.shape_cast %18 : vector<1x16x24xf32> to vector<16x24xf32>
    %cst_18 = arith.constant dense<0.000000e+00> : vector<288x24xf32>
    %20 = tpu.matmul %17, %19, %cst_18 {dimension_numbers = #tpu.dot_dimension_numbers<[1], [0], [0], [1], [0, 0, 1, 1], [], []>} : vector<288x16xf32>, vector<16x24xf32>, vector<288x24xf32> -> vector<288x24xf32>
    %21 = arith.addf %15, %20 : vector<288x24xf32>
    %22 = vector.extract_strided_slice %14 {offsets = [1, 0, 0], sizes = [16, 18, 16], strides = [1, 1, 1]} : vector<18x18x16xf32> to vector<16x18x16xf32>
    %23 = vector.shape_cast %22 : vector<16x18x16xf32> to vector<288x16xf32>
    %c1 = arith.constant 1 : index
    %c0_19 = arith.constant 0 : index
    %c0_20 = arith.constant 0 : index
    %24 = vector.load %arg5[%c1, %c0_19, %c0_20] : memref<3x16x24xf32, #tpu.memory_space<vmem>>, vector<1x16x24xf32>
    %25 = vector.shape_cast %24 : vector<1x16x24xf32> to vector<16x24xf32>
    %cst_21 = arith.constant dense<0.000000e+00> : vector<288x24xf32>
    %26 = tpu.matmul %23, %25, %cst_21 {dimension_numbers = #tpu.dot_dimension_numbers<[1], [0], [0], [1], [0, 0, 1, 1], [], []>} : vector<288x16xf32>, vector<16x24xf32>, vector<288x24xf32> -> vector<288x24xf32>
    %27 = arith.addf %21, %26 : vector<288x24xf32>
    %28 = vector.extract_strided_slice %14 {offsets = [2, 0, 0], sizes = [16, 18, 16], strides = [1, 1, 1]} : vector<18x18x16xf32> to vector<16x18x16xf32>
    %29 = vector.shape_cast %28 : vector<16x18x16xf32> to vector<288x16xf32>
    %c2 = arith.constant 2 : index
    %c0_22 = arith.constant 0 : index
    %c0_23 = arith.constant 0 : index
    %30 = vector.load %arg5[%c2, %c0_22, %c0_23] : memref<3x16x24xf32, #tpu.memory_space<vmem>>, vector<1x16x24xf32>
    %31 = vector.shape_cast %30 : vector<1x16x24xf32> to vector<16x24xf32>
    %cst_24 = arith.constant dense<0.000000e+00> : vector<288x24xf32>
    %32 = tpu.matmul %29, %31, %cst_24 {dimension_numbers = #tpu.dot_dimension_numbers<[1], [0], [0], [1], [0, 0, 1, 1], [], []>} : vector<288x16xf32>, vector<16x24xf32>, vector<288x24xf32> -> vector<288x24xf32>
    %33 = arith.addf %27, %32 : vector<288x24xf32>
    %34 = vector.shape_cast %33 : vector<288x24xf32> to vector<16x18x24xf32>
    %35 = vector.extract_strided_slice %34 {offsets = [0, 0, 0], sizes = [16, 16, 8], strides = [1, 1, 1]} : vector<16x18x24xf32> to vector<16x16x8xf32>
    %36 = vector.extract_strided_slice %34 {offsets = [0, 1, 8], sizes = [16, 16, 8], strides = [1, 1, 1]} : vector<16x18x24xf32> to vector<16x16x8xf32>
    %37 = arith.addf %35, %36 : vector<16x16x8xf32>
    %38 = vector.extract_strided_slice %34 {offsets = [0, 2, 16], sizes = [16, 16, 8], strides = [1, 1, 1]} : vector<16x18x24xf32> to vector<16x16x8xf32>
    %39 = arith.addf %37, %38 : vector<16x16x8xf32>
    %40 = vector.shape_cast %39 : vector<16x16x8xf32> to vector<8x2x8x2x8xf32>
    %41 = vector.extract_strided_slice %40 {offsets = [0, 0, 0, 0, 0], sizes = [8, 1, 8, 1, 8], strides = [1, 1, 1, 1, 1]} : vector<8x2x8x2x8xf32> to vector<8x1x8x1x8xf32>
    %42 = vector.shape_cast %41 : vector<8x1x8x1x8xf32> to vector<8x8x8xf32>
    %43 = vector.extract_strided_slice %40 {offsets = [0, 0, 0, 1, 0], sizes = [8, 1, 8, 1, 8], strides = [1, 1, 1, 1, 1]} : vector<8x2x8x2x8xf32> to vector<8x1x8x1x8xf32>
    %44 = vector.shape_cast %43 : vector<8x1x8x1x8xf32> to vector<8x8x8xf32>
    %45 = vector.extract_strided_slice %40 {offsets = [0, 1, 0, 0, 0], sizes = [8, 1, 8, 1, 8], strides = [1, 1, 1, 1, 1]} : vector<8x2x8x2x8xf32> to vector<8x1x8x1x8xf32>
    %46 = vector.shape_cast %45 : vector<8x1x8x1x8xf32> to vector<8x8x8xf32>
    %47 = vector.extract_strided_slice %40 {offsets = [0, 1, 0, 1, 0], sizes = [8, 1, 8, 1, 8], strides = [1, 1, 1, 1, 1]} : vector<8x2x8x2x8xf32> to vector<8x1x8x1x8xf32>
    %48 = vector.shape_cast %47 : vector<8x1x8x1x8xf32> to vector<8x8x8xf32>
    %49 = vector.shape_cast %42 : vector<8x8x8xf32> to vector<8x8x8x1xf32>
    %50 = vector.shape_cast %44 : vector<8x8x8xf32> to vector<8x8x8x1xf32>
    %51 = vector.shape_cast %46 : vector<8x8x8xf32> to vector<8x8x8x1xf32>
    %52 = vector.shape_cast %48 : vector<8x8x8xf32> to vector<8x8x8x1xf32>
    %53 = tpu.concatenate %49, %50, %51, %52 in 3 : vector<8x8x8x1xf32>, vector<8x8x8x1xf32>, vector<8x8x8x1xf32>, vector<8x8x8x1xf32> -> vector<8x8x8x4xf32>
    %54 = vector.shape_cast %53 : vector<8x8x8x4xf32> to vector<64x32xf32>
    %c0_25 = arith.constant 0 : index
    %c0_26 = arith.constant 0 : index
    %c0_27 = arith.constant 0 : index
    %55 = vector.load %arg6[%c0_25, %c0_26, %c0_27] : memref<1x64x32xf32, #tpu.memory_space<vmem>>, vector<1x64x32xf32>
    %56 = vector.shape_cast %55 : vector<1x64x32xf32> to vector<64x32xf32>
    %57 = vector.shape_cast %54 : vector<64x32xf32> to vector<1x64x32xf32>
    tpu.vector_store %arg6[%c0_25, %c0_26, %c0_27], %57 {strides = array<i32>} : memref<1x64x32xf32, #tpu.memory_space<vmem>>, vector<1x64x32xf32>,
    return
  }
  func.func @transform_0(%arg0: i32, %arg1: i32) -> (i32, i32, i32, i32) {
    %c16_i32 = arith.constant 16 : i32
    %0 = arith.muli %arg1, %c16_i32 : i32
    %c1_i32 = arith.constant 1 : i32
    %1 = arith.subi %0, %c1_i32 : i32
    %c0_i32 = arith.constant 0 : i32
    %2 = arith.maxsi %1, %c0_i32 : i32
    %c0_i32_0 = arith.constant 0 : i32
    %c0_i32_1 = arith.constant 0 : i32
    %c0_i32_2 = arith.constant 0 : i32
    return %arg0, %2, %c0_i32_0, %c0_i32_1 : i32, i32, i32, i32
  }
  func.func @transform_1(%arg0: i32, %arg1: i32) -> (i32, i32, i32, i32) {
    %c0_i32 = arith.constant 0 : i32
    %c0_i32_0 = arith.constant 0 : i32
    %c0_i32_1 = arith.constant 0 : i32
    return %arg0, %arg1, %c0_i32, %c0_i32_0 : i32, i32, i32, i32
  }
  func.func @transform_2(%arg0: i32, %arg1: i32) -> (i32, i32, i32, i32) {
    %c1_i32 = arith.constant 1 : i32
    %0 = arith.addi %arg1, %c1_i32 : i32
    %c16_i32 = arith.constant 16 : i32
    %1 = arith.muli %0, %c16_i32 : i32
    %c15_i32 = arith.constant 15 : i32
    %2 = arith.minsi %1, %c15_i32 : i32
    %c0_i32 = arith.constant 0 : i32
    %c0_i32_0 = arith.constant 0 : i32
    %c0_i32_1 = arith.constant 0 : i32
    return %arg0, %2, %c0_i32, %c0_i32_0 : i32, i32, i32, i32
  }
  func.func @transform_3(%arg0: i32, %arg1: i32) -> (i32, i32, i32) {
    %c0_i32 = arith.constant 0 : i32
    %c0_i32_0 = arith.constant 0 : i32
    %c0_i32_1 = arith.constant 0 : i32
    %c0_i32_2 = arith.constant 0 : i32
    return %c0_i32, %c0_i32_0, %c0_i32_1 : i32, i32, i32
  }
  func.func @transform_4(%arg0: i32, %arg1: i32) -> (i32, i32, i32) {
    %c0_i32 = arith.constant 0 : i32
    %c0_i32_0 = arith.constant 0 : i32
    return %arg0, %arg1, %c0_i32 : i32, i32, i32
  }
}

</mosaic_0001>

<bundles_post_ra>
// kernel: tpu_custom_call.1
= control target key start
LH: loop header
LB: loop body
LE: loop exit
PB: predicated region body
PF: predicated region fallthrough
CT: control target
= control target key end

     0   :  { %s16413_s0 = inlined_call_operand.hbm [shape: f32[2,16,16,16], index: 0, kind: input, shape index: {}]   ;;  %s16414_s1 = inlined_call_operand.hbm [shape: f32[2,16,16,16], index: 1, kind: input, shape index: {}]   ;;  %s16415_s2 = inlined_call_operand.hbm [shape: f32[2,16,16,16], index: 2, kind: input, shape index: {}]   ;;  %s16416_s3 = inlined_call_operand.hbm [shape: f32[3,16,24], index: 3, kind: input, shape index: {}]   ;;  %s16417_s4 = inlined_call_operand.vmem [shape: f32[2,64,32], index: 4, kind: output, shape index: {}]  }
   0x1   :  { %16771 = sst [smem:[#allocation303_spill]] %s16413_s0 }
   0x2   :  { %16772 = sst [smem:[#allocation304_spill]] %s16414_s1 }
   0x3   :  { %16773 = sst [smem:[#allocation305_spill]] %s16416_s3 }
   0x4   :  { %9 = vsyncpa [#allocation3], 0 }
   0x5   :  { %11 = vsyncpa [#allocation3 + $0x1], 0 }
   0x6   :  { %12 = vsyncpa [#allocation5], 0 }
   0x7   :  { %14 = vsyncpa [#allocation5 + $0x1], 0 }
   0x8   :  { %15 = vsyncpa [#allocation8], 0  ;;  %s10166_s15 = smov 0   ;;  %s10168_s16 = smov 0  }
   0x9   :  { %s10170_s17 = smov 0   ;;  %s10172_s18 = smov 0  }
   0xa   :  { %s10174_s19 = smov 0   ;;  %s10176_s20 = smov 0  }
   0xb LB: > { %s33_s21 = sadd.s32 1, %s10117_s19  ;;  %s50_s22 = sadd.s32 1, %s10109_s17  ;;  %s10121_s20 = sphi %s10176_s20, %s21_s20   ;;  %s10117_s19 = sphi %s10174_s19, %s18184_s19   ;;  %s10113_s18 = sphi %s10172_s18, %s18183_s18   ;;  %s10109_s17 = sphi %s10170_s17, %s18182_s17   ;;  %s10105_s16 = sphi %s10168_s16, %s18181_s16   ;;  %s10101_s15 = sphi %s10166_s15, %s18180_s15  }
   0xc   : > { %p35_p0 = scmp.ge.s32.totalorder %s33_s21, 2  ;;  %p57_p1 = scmp.ne.s32.totalorder %s10109_s17, %s10105_s16 }
   0xd   : > { %p58_p2 = scmp.eq.s32.totalorder %s10121_s20, 0  ;;  %p9888_p5 = scmp.lt.s32.totalorder %s10121_s20, 2 }
   0xe   : > { %s18186_s21 = smov (%p35_p0, %s33_s21), 0  ;;  %s10207_s24 = sand.u32 1, %s10109_s17  }
   0xf   : > { %16774 = sst [smem:[#allocation12_spill]] %s18186_s21  ;;  %p59_p3 = por %p58_p2, %p57_p1 }
  0x10   : > { %s45_s23 = ssub.s32 %s10117_s19, %s18186_s21  ;;  %s10210_s25 = sshll.u32 %s10117_s19, 12 }
  0x11   : > { %p48_p4 = scmp.eq.s32.totalorder %s45_s23, 0  ;;  %p10215_p6 = pnand %p9888_p5, %p59_p3 }
  0x12   : > { %s240_s28 = sand.u32 1, %s10121_s20   ;;  %s9426_s29 = sshll.u32 %s10207_s24, 8 }
  0x13   : > { %s10213_s26 = scalar_select %p48_p4, %s10109_s17, %s50_s22  }
  0x14   : > { %s16776_s1 = sld [smem:[#allocation304_spill]]  ;;  %s244_s7 = scalar_lea.vmem [#allocation4], %s9426_s29 }
  0x15   : > { %s254_s8 = sshll.u32 %s244_s7, 4  ;;  %s10225_s9 = scalar_lea.sflag [#allocation5], %s240_s28  ;;  %s255_s8 = int_to_ptr.vmem [resolvable:$true] %s254_s8 }
  0x16   : > { %p16418_p7 = pneg %p10215_p6  ;;  %s9966_s10 = scalar_lea.vmem %s255_s8, 4096 }
  0x17   : > { %p9967_p8 = scmp.ne.s32.totalorder %s255_s8, %s9966_s10  ;;  %s10123_s11 = smov [#allocation4]  }
  0x18   : > { %s9971_s12 = sshll.u32 %s10123_s11, 4  ;;  %s9972_s12 = int_to_ptr.vmem [resolvable:$false] %s9971_s12 }
  0x19   : > { %p9969_p9 = pnand %p9967_p8, %p16418_p7  ;;  %s9973_s13 = scalar_lea.vmem %s9972_s12, 8192 }
  0x1a   : > { %s253_s6 = scalar_lea.hbm %s16776_s1, %s10210_s25  ;;  %p9974_p11 = scmp.lt.s32.totalorder %s255_s8, %s9972_s12 }
  0x1b   : > { %p9970_p10 = pneg %p9969_p9  ;;  %p9975_p12 = scmp.lt.s32.totalorder %s9973_s13, %s9966_s10 }
  0x1d   : > { %p9976_p13 = por %p9975_p12, %p9974_p11 }
  0x1f   : > { %p9977_p0 = pnand %p9976_p13, %p9970_p10 }
  0x21   : > { %9980 = shalt.err (!%p9977_p0)
}
  0x22   : > { %s10124_s14 = smov 128   ;;  %s10125_s22 = smov 8  }
  0x23   : > { %9883 = dma.hbm_to_vmem [thread:$0]  (!%p10215_p6), %s253_s6, 4096, %s255_s8, %s10225_s9, %s10124_s14, %s10124_s14, %s10125_s22  }
  0x24   : > { %s16419_s23 = sadd.s32 4294967295, %s10121_s20   ;;  %p63_p1 = scmp.ne.s32.totalorder %s10105_s16, %s10101_s15 }
  0x25   : > { %p10243_p2 = scmp.eq.s32.totalorder %s16419_s23, 0  ;;  %p9420_p3 = scmp.ge.s32.totalorder %s10121_s20, 1 }
  0x26   : > { %p187_p4 = scmp.lt.s32.totalorder %s10121_s20, 3  ;;  %s10126_s15 = smov [#allocation7]  }
  0x27   : > { %p10251_p5 = por %p10243_p2, %p63_p1  ;;  %s199_s5 = sshll.u32 %s10126_s15, 4  ;;  %s200_s5 = int_to_ptr.vmem [resolvable:$true] %s199_s5 }
  0x28   : > { %p10255_p8 = pnand %p9420_p3, %p187_p4  ;;  %s16420_s6 = sshll.u32 %s10207_s24, 4 }
  0x29   : > { %s16780_s0 = sld [smem:[#allocation303_spill]]  ;;  %s217_s12 = scalar_lea.vmem [#allocation2], %s16420_s6 }
  0x2a   : > { %p9873_p9 = pneg %p10255_p8  ;;  %s230_s13 = sshll.u32 %s217_s12, 4  ;;  %s10274_s13 = int_to_ptr.vmem [resolvable:$true] %s230_s13 }
  0x2b   : > { %s9992_s15 = scalar_lea.vmem %s200_s5, 768  ;;  %p10000_p1 = scmp.lt.s32.totalorder %s200_s5, %s200_s5 }
  0x2c   : > { %p10268_p10 = pnand %p9873_p9, %p10243_p2  ;;  %p9993_p12 = scmp.ne.s32.totalorder %s200_s5, %s9992_s15 }
  0x2d   : > { %p10001_p3 = scmp.lt.s32.totalorder %s9992_s15, %s9992_s15 }
  0x2e   : > { %p9983_p11 = pneg %p10268_p10 }
  0x2f   : > { %s229_s10 = scalar_lea.hbm %s16780_s0, %s10210_s25  ;;  %p10002_p4 = por %p10001_p3, %p10000_p1 }
  0x30   : > { %p9995_p13 = pnand %p9993_p12, %p9983_p11 }
  0x32   : > { %p9996_p0 = pneg %p9995_p13 }
  0x34   : > { %p10003_p7 = pnand %p10002_p4, %p9996_p0 }
  0x36   : > { %10006 = shalt.err (!%p10003_p7)
}
  0x37   : > { %s16782_s3 = sld [smem:[#allocation305_spill]]  ;;  %s214_s12 = scalar_lea.sflag [#allocation3], %s10207_s24 }
  0x38   : > { %s10020_s23 = scalar_lea.vmem %s10274_s13, 256  ;;  %p16783_p11 = pneg %p10215_p6 }
  0x39   : > { %p10021_p9 = scmp.ne.s32.totalorder %s10274_s13, %s10020_s23  ;;  %s10127_s11 = smov [#allocation2]  }
  0x3a   : > { %s10025_s15 = sshll.u32 %s10127_s11, 4  ;;  %s10026_s15 = int_to_ptr.vmem [resolvable:$false] %s10025_s15 }
  0x3b   : > { %p10023_p7 = pnand %p10021_p9, %p16783_p11  ;;  %s10027_s6 = scalar_lea.vmem %s10026_s15, 512 }
  0x3c   : > { %p10028_p13 = scmp.lt.s32.totalorder %s10274_s13, %s10026_s15  ;;  %p10029_p0 = scmp.lt.s32.totalorder %s10027_s6, %s10020_s23 }
  0x3d   : > { %9876 = dma.hbm_to_vmem [thread:$0]  (!%p10268_p10), %s16782_s3, 768, %s200_s5, [#allocation8], %s10124_s14, %s10124_s14, %s10125_s22  }
  0x3e   : > { %p10024_p12 = pneg %p10023_p7  ;;  %p10030_p1 = por %p10029_p0, %p10028_p13 }
  0x40   : > { %p10031_p3 = pnand %p10030_p1, %p10024_p12 }
  0x42   : > { %10034 = shalt.err (!%p10031_p3)
}
  0x43   : > { %9880 = dma.hbm_to_vmem [thread:$0]  (!%p10215_p6), %s229_s10, 256, %s10274_s13, %s214_s12, %s10124_s14, %s10124_s14, %s10125_s22  }
  0x44   : > { %s16784_s8 = sshll.u32 %s10207_s24, 4  ;;  %s9568_s11 = sadd.s32 3840, %s10210_s25 }
  0x45   : > { %s268_s23 = scalar_lea.vmem [#allocation6], %s16784_s8  ;;  %s280_s3 = scalar_lea.hbm %s16415_s2, %s9568_s11 }
  0x46   : > { %s281_s6 = sshll.u32 %s268_s23, 4  ;;  %p16785_p4 = pmov %p16783_p11  ;;  %s282_s6 = int_to_ptr.vmem [resolvable:$true] %s281_s6 }
  0x47   : > { %s10048_s21 = scalar_lea.vmem %s282_s6, 256  ;;  %s10128_s5 = smov [#allocation6]  }
  0x48   : > { %p10049_p10 = scmp.ne.s32.totalorder %s282_s6, %s10048_s21  ;;  %s10053_s7 = sshll.u32 %s10128_s5, 4  ;;  %s10054_s7 = int_to_ptr.vmem [resolvable:$false] %s10053_s7 }
  0x49   : > { %s10055_s0 = scalar_lea.vmem %s10054_s7, 512  ;;  %p10056_p7 = scmp.lt.s32.totalorder %s282_s6, %s10054_s7 }
  0x4a   : > { %p10051_p9 = pnand %p10049_p10, %p16785_p4  ;;  %p10057_p12 = scmp.lt.s32.totalorder %s10055_s0, %s10048_s21 }
  0x4c   : > { %p10052_p11 = pneg %p10051_p9  ;;  %p10058_p13 = por %p10057_p12, %p10056_p7 }
  0x4e   : > { %p10059_p0 = pnand %p10058_p13, %p10052_p11 }
  0x50   : > { %10062 = shalt.err (!%p10059_p0)
}
  0x51   : > { %9886 = dma.hbm_to_vmem [thread:$0]  (!%p10215_p6), %s280_s3, 256, %s282_s6, %s10225_s9, %s10124_s14, %s10124_s14, %s10125_s22  }
  0x52   : > { %293 = sbr.rel (%p10255_p8) target bundleno = 1787 (0x6fb), region = 36 }
  0x57   : > { %s295_s1 = sand.u32 1, %s10105_s16  }
  0x58   : > { %s296_s24 = scalar_lea.sflag [#allocation3], %s295_s1 }
  0x59   : > { %10088 = dma.done.wait (%p10251_p5), %s296_s24, 256  }
  0x5a   : > { %10090 = vsyncadd (%p10251_p5), %s296_s24, 4294967040  ;;  %s16786_s0 = sadd.s32 4294967295, %s10121_s20   ;;  %s9434_s25 = sshll.u32 %s295_s1, 8 }
  0x5b   : > { %s304_s21 = sand.u32 1, %s16786_s0   ;;  %s10328_s10 = scalar_lea.vmem [#allocation4], %s9434_s25 }
  0x5c   : > { %s305_s27 = scalar_lea.sflag [#allocation5], %s304_s21 }
  0x5d   : > { %10092 = dma.done.wait (%p10251_p5), %s305_s27, 4352  }
  0x5e   : > { %10094 = vsyncadd (%p10251_p5), %s305_s27, 4294962944 }
  0x5f   : > { %10096 = dma.done.wait (%p10243_p2), [#allocation8], 768  }
  0x60   : > { %10098 = vsyncadd (%p10243_p2), [#allocation8], 4294966528  ;;  %v622_v0 = vlaneseq  ;;  %v10129_v1 = vmov 1983009808   ;;  %v10130_v4 = vmov 0.0   ;;  %vm459_vm0 = vcmask 1040384  }
  0x61   : > { %v620_v2 = vunpack.c.l.s4 %v10129_v1  ;;  %v460_v5 = vrot.slane %v10130_v4, 7  ;;  %v1321_v12 = vld [vmem:[#allocation7 + $0x18] sm:$0xff]  ;;  %v1320_v13 = vld [vmem:[#allocation7 + $0x10] sm:$0xff]  ;;  %v391_v14 = vld [vmem:[%s10328_s10] sm:$0xff]  ;;  %vm1934_vm1 = vcmask 130048   ;;  %s10131_s3 = smov 112  }
  0x62   : > { %v10338_v3 = vshrl.u32 %v622_v0, 7  ;;  %9859 = vmatprep.subr.mxu1 %v1321_v12  ;;  %9685 = vmatprep.subr.mxu0 %v1321_v12  ;;  %v10356_v18 = vld [vmem:[%s10328_s10 + $0x8] sm:$0xff]  ;;  %v463_v19 = vrot.slane %v391_v14, 7  ;;  %v407_v20 = vld [vmem:[%s10328_s10 + $0x80] sm:$0xff]  ;;  %v10373_v28 = vld [vmem:[%s10328_s10 + $0x10] sm:$0xff]  ;;  %vm4464_vm2 = vcmask 1042434  }
  0x63   : > { %v621_v6 = vunpack.c.0.s8 %v620_v2  ;;  %v550_v7 = vsel %vm459_vm0, 0.0, %v460_v5  ;;  %v635_v8 = vcombine.high %v460_v5, %v460_v5  ;;  %v568_v11 = vsel %vm459_vm0, %v460_v5, 0.0  ;;  %v10360_v21 = vld [vmem:[%s10328_s10 + $0x88] sm:$0xff]  ;;  %9861 = vmatpush3.msra.mxu1 %v1321_v12  ;;  %9686 = vmatpush3.msra.mxu0 %v1321_v12  ;;  %vm4465_vm3 = vmor %vm459_vm0, %vm4464_vm2  ;;  %s10132_s9 = smov 120   ;;  %s10134_s14 = smov 4  }
  0x64   : > { %16787 = vst [vmem:[#allocation13_spill] sm:$0xff] %v10338_v3  ;;  %v618_v10 = vcombine.high %v550_v7, %v550_v7  ;;  %v464_v24 = vrot.slane %v10356_v18, 7  ;;  %v487_v25 = vrot.slane %v407_v20, 7  ;;  %v488_v26 = vrot.slane %v10360_v21, 7  ;;  %v10370_v27 = vld [vmem:[#allocation7 + $0x8] sm:$0xff]  ;;  %9860 = vmatprep.subr.mxu1 %v1320_v13  ;;  %9687 = vmatprep.subr.mxu0 %v1320_v13  ;;  %s10135_s22 = smov 8  }
  0x65   : > { %v10342_v9 = vsub.s32 %v621_v6, %v10338_v3  ;;  %v551_v30 = vsel %vm459_vm0, 0.0, %v463_v19  ;;  %v10380_v31 = vld [vmem:[#allocation7 + $0x28] sm:$0xff]  ;;  %v466_v32 = vrot.slane %v10373_v28, 7  ;;  %9862 = vmatpush3.msra.mxu1 %v1320_v13  ;;  %9688 = vmatpush3.msra.mxu0 %v1320_v13  ;;  %v409_v13 = vld [vmem:[%s10328_s10 + $0x90] sm:$0xff]  ;;  %vm4466_vm4 = vcmask 1044484   ;;  %s10136_s28 = smov 12  }
  0x66   : > { %v465_v35 = vsel %vm459_vm0, %v463_v19, %v464_v24  ;;  %v659_v36 = vcombine.high %v551_v30, %v551_v30  ;;  %v559_v38 = vsel %vm459_vm0, 0.0, %v487_v25  ;;  %v489_v41 = vsel %vm459_vm0, %v487_v25, %v488_v26  ;;  %9743 = vmatprep.subr.mxu1 %v10370_v27  ;;  %9801 = vmatprep.subr.mxu0 %v10380_v31  ;;  %v10488_v25 = vld [vmem:[%s10328_s10 + $0x18] sm:$0xff]  ;;  %vm4467_vm5 = vmor %vm4465_vm3, %vm4466_vm4  ;;  %s10137_s29 = smov 16   ;;  %s10138_s30 = smov 20  }
  0x67   : > { %16788 = vst [vmem:[#allocation14_spill] sm:$0xff] %v10342_v9  ;;  %v10347_v15 = vrot.slane %v550_v7, %v10342_v9  ;;  %v10350_v16 = vrot.slane %v618_v10, %v10342_v9  ;;  %v10353_v17 = vrot.slane %v460_v5, %v10342_v9  ;;  %v10363_v22 = vrot.slane %v635_v8, %v10342_v9  ;;  %s10139_s13 = smov 24   ;;  %s10140_s12 = smov 28  }
  0x68   : > { %v10366_v23 = vrot.slane %v568_v11, %v10342_v9  ;;  %v10393_v37 = vrot.slane %v551_v30, %v10342_v9  ;;  %v676_v39 = vcombine.high %v465_v35, %v465_v35  ;;  %v10397_v40 = vrot.slane %v465_v35, %v10342_v9  ;;  %v10491_v30 = vld [vmem:[%s10328_s10 + $0x98] sm:$0xff]  ;;  %p370_p6 = scmp.lt.s32.totalorder %s10113_s18, 1 }
  0x69   : > { %v10377_v29 = vcombine.high %v10347_v15, %v10347_v15  ;;  %v10385_v33 = vcombine.high %v10350_v16, %v10350_v16  ;;  %v10389_v34 = vcombine.high %v10353_v17, %v10353_v17  ;;  %v987_v42 = vcombine.high %v559_v38, %v559_v38 }
  0x6a   : > { %v10404_v43 = vrot.slane %v659_v36, %v10342_v9  ;;  %v10408_v44 = vcombine.high %v10393_v37, %v10393_v37  ;;  %v10411_v45 = vrot.slane %v559_v38, %v10342_v9  ;;  %v1004_v46 = vcombine.high %v489_v41, %v489_v41  ;;  %s18188_s18 = smov (!%p370_p6, %s10113_s18), 1 }
  0x6b   : > { %16789 = vst [vmem:[#allocation15_spill] sm:$0xff] %v10377_v29  ;;  %16790 = vst [vmem:[#allocation16_spill] sm:$0xff] %v10385_v33  ;;  %v10415_v47 = vrot.slane %v987_v42, %v10342_v9  ;;  %v10418_v48 = vrot.slane %v489_v41, %v10342_v9  ;;  %v10421_v49 = vrot.slane %v676_v39, %v10342_v9  ;;  %v552_v12 = vsel %vm459_vm0, 0.0, %v466_v32  ;;  %s9569_s8 = sshll.u32 %s18188_s18, 6 }
  0x6c   : > { %16791 = vst [vmem:[#allocation17_spill] sm:$0xff] %v10389_v34  ;;  %16792 = vst [vmem:[#allocation18_spill] sm:$0xff] %v10411_v45  ;;  %v10425_v50 = vcombine.high %v10397_v40, %v10397_v40  ;;  %v10429_v51 = vcombine.high %v10404_v43, %v10404_v43  ;;  %v1322_v52 = vcombine.low %v10393_v37, %v10408_v44  ;;  %v569_v19 = vsel %vm459_vm0, %v464_v24, 0.0  ;;  %s16328_s11 = scalar_lea.vmem %s16417_s4, %s9569_s8 }
  0x6d   : > { %16793 = vst [vmem:[#allocation19_spill] sm:$0xff] %v10415_v47  ;;  %16794 = vst [vmem:[#allocation20_spill] sm:$0xff] %v10418_v48  ;;  %v10437_v54 = vcombine.high %v10411_v45, %v10411_v45  ;;  %v10441_v55 = vcombine.high %v10415_v47, %v10415_v47  ;;  %v10445_v56 = vcombine.high %v10421_v49, %v10421_v49  ;;  %vm4468_vm6 = vcmask 1046534  }
  0x6e   : > { %v1339_v57 = vcombine.low %v10397_v40, %v10425_v50  ;;  %v10450_v58 = vrot.slane %v1004_v46, %v10342_v9  ;;  %v1323_v59 = vcombine.low %v10404_v43, %v10429_v51  ;;  %v1330_v60 = vrot.slane %v1322_v52, %v10342_v9  ;;  %v3225_v52 = vld [vmem:[#allocation7 + $0x20] sm:$0xff]  ;;  %vm11892_vm7 = vmor %vm4467_vm5, %vm4468_vm6 }
  0x6f   : > { %16795 = vst [vmem:[#allocation21_spill] sm:$0xff] %v10437_v54  ;;  %16796 = vst [vmem:[#allocation22_spill] sm:$0xff] %v10441_v55  ;;  %v1628_v62 = vcombine.low %v10411_v45, %v10437_v54  ;;  %v1629_v63 = vcombine.low %v10415_v47, %v10441_v55  ;;  %v1340_v2 = vcombine.low %v10421_v49, %v10445_v56  ;;  %v490_v46 = vrot.slane %v409_v13, 7 }
  0x70   : > { %16797 = vst [vmem:[#allocation23_spill] sm:$0xff] %v10450_v58  ;;  %v1337_v4 = vrot.slane %v1323_v59, %v10342_v9  ;;  %v1347_v6 = vrot.slane %v1339_v57, %v10342_v9  ;;  %v10472_v7 = vcombine.high %v10418_v48, %v10418_v48  ;;  %v10478_v11 = vcombine.high %v10450_v58, %v10450_v58 }
  0x71   : > { %v1636_v5 = vrot.slane %v1628_v62, %v10342_v9  ;;  %v1643_v8 = vrot.slane %v1629_v63, %v10342_v9  ;;  %v1354_v10 = vrot.slane %v1340_v2, %v10342_v9  ;;  %v700_v20 = vcombine.high %v552_v12, %v552_v12 }
  0x72   : > { %16798 = vst [vmem:[#allocation24_spill] sm:$0xff] %v10472_v7  ;;  %16799 = vst [vmem:[#allocation25_spill] sm:$0xff] %v10478_v11  ;;  %v1338_v14 = vcombine.low %v1330_v60, %v1337_v4  ;;  %v1645_v18 = vcombine.low %v10418_v48, %v10472_v7  ;;  %v1646_v38 = vcombine.low %v10450_v58, %v10478_v11  ;;  %v577_v59 = vsel %vm459_vm0, %v488_v26, 0.0 }
  0x73   : > { %v1644_v35 = vcombine.low %v1636_v5, %v1643_v8  ;;  %v1355_v36 = vcombine.low %v1347_v6, %v1354_v10  ;;  %v10496_v39 = vrot.slane %v569_v19, %v10342_v9  ;;  %v10501_v42 = vrot.slane %v552_v12, %v10342_v9  ;;  %v10532_v8 = vld [vmem:[%s10328_s10 + $0x20] sm:$0xff] }
  0x74   : > { %9689 = vmatprep.mubr.msk.f32.mxu0 %vm1934_vm1, %v1338_v14  ;;  %v1653_v41 = vrot.slane %v1645_v18, %v10342_v9  ;;  %v10504_v24 = vrot.slane %v700_v20, %v10342_v9  ;;  %v1660_v57 = vrot.slane %v1646_v38, %v10342_v9  ;;  %v467_v60 = vrot.slane %v10488_v25, 7  ;;  %v1274_v18 = vld [vmem:[#allocation7] sm:$0xff] }
  0x75   : > { %9716 = vmatprep.mubr.msk.f32.mxu1 %vm1934_vm1, %v1644_v35  ;;  %9690 = vmatmul.mubr.msk.f32.vlgmr.msra.gmra.mxu0 %vm1934_vm1, %v1355_v36  ;;  %v491_v62 = vrot.slane %v10491_v30, 7  ;;  %v10517_v63 = vcombine.high %v10501_v42, %v10501_v42  ;;  %v1356_v2 = vcombine.low %v10496_v39, %v10501_v42  ;;  %v560_v4 = vsel %vm459_vm0, 0.0, %v490_v46 }
  0x76   : > { %9802 = vmatpush3.msra.mxu0 %v10380_v31  ;;  %v10523_v5 = vrot.slane %v577_v59, %v10342_v9  ;;  %v1661_v21 = vcombine.low %v1653_v41, %v1660_v57  ;;  %v1028_v26 = vcombine.high %v560_v4, %v560_v4  ;;  %v10526_v6 = vrot.slane %v560_v4, %v10342_v9 }
  0x77   : > { %v468_v31 = vsel %vm459_vm0, %v466_v32, %v467_v60  ;;  %9803 = vmatprep.subr.mxu0 %v3225_v52  ;;  %v1357_v10 = vcombine.low %v10517_v63, %v10504_v24  ;;  %v1364_v12 = vrot.slane %v1356_v2, %v10342_v9  ;;  %v10539_v13 = vcombine.high %v10504_v24, %v10504_v24 }
  0x78   : > { %16800 = vst [vmem:[#allocation26_spill] sm:$0xff] %v10523_v5  ;;  %16801 = vst [vmem:[#allocation27_spill] sm:$0xff] %v10526_v6  ;;  %v717_v14 = vcombine.high %v468_v31, %v468_v31  ;;  %9804 = vmatpush3.msra.mxu0 %v3225_v52  ;;  %9717 = vmatmul.mubr.msk.f32.vlgmr.msra.gmra.mxu1 %vm1934_vm1, %v1661_v21  ;;  %v10543_v28 = vrot.slane %v1028_v26, %v10342_v9  ;;  %v469_v36 = vrot.slane %v10532_v8, 7  ;;  %vm7686_vm8 = vcmask 7168  }
  0x79   : > { %v10547_v32 = vcombine.high %v10526_v6, %v10526_v6  ;;  %v1662_v19 = vcombine.low %v10523_v5, %v10526_v6  ;;  %v724_v20 = vrot.slane %v468_v31, %v10342_v9  ;;  %9744 = vmatpush3.msra.mxu1 %v10370_v27  ;;  %v1371_v25 = vrot.slane %v1357_v10, %v10342_v9 }
  0x7a   : > { %16802 = vst [vmem:[#allocation28_spill] sm:$0xff] %v10543_v28  ;;  %v731_v30 = vrot.slane %v717_v14, %v10342_v9  ;;  %v492_v35 = vsel %vm459_vm0, %v490_v46, %v491_v62  ;;  %9745 = vmatprep.subr.mxu1 %v1274_v18  ;;  %v10563_v27 = vcombine.high %v10543_v28, %v10543_v28  ;;  %v553_v14 = vsel %vm459_vm0, 0.0, %v469_v36 }
  0x7b   : > { %16803 = vst [vmem:[#allocation29_spill] sm:$0xff] %v10547_v32  ;;  %v1663_v38 = vcombine.low %v10547_v32, %v10543_v28  ;;  %v1670_v41 = vrot.slane %v1662_v19, %v10342_v9  ;;  %v732_v52 = vcombine.high %v724_v20, %v724_v20  ;;  %v1373_v57 = vcombine.low %v10539_v13, %v724_v20 }
  0x7c   : > { %v1372_v59 = vcombine.low %v1364_v12, %v1371_v25  ;;  %16804 = vst [vmem:[#allocation30_spill] sm:$0xff] %v10563_v27  ;;  %v1045_v2 = vcombine.high %v492_v35, %v492_v35  ;;  %v10566_v46 = vrot.slane %v492_v35, %v10342_v9  ;;  %9746 = vmatpush3.msra.mxu1 %v1274_v18  ;;  %v411_v18 = vld [vmem:[%s10328_s10 + $0xa0] sm:$0xff]  ;;  %v570_v35 = vsel %vm459_vm0, %v467_v60, 0.0 }
  0x7d   : > { %v1677_v4 = vrot.slane %v1663_v38, %v10342_v9  ;;  %v1374_v21 = vcombine.low %v732_v52, %v731_v30  ;;  %v1381_v26 = vrot.slane %v1373_v57, %v10342_v9  ;;  %v2338_v31 = vcombine.low %v724_v20, %v732_v52 }
  0x7e   : > { %16805 = vst [vmem:[#allocation31_spill] sm:$0xff] %v10566_v46  ;;  %9692 = vmatprep.mubr.msk.f32.mxu0 %vm1934_vm1, %v1372_v59  ;;  %v10572_v8 = vrot.slane %v1045_v2, %v10342_v9  ;;  %v10576_v10 = vcombine.high %v10566_v46, %v10566_v46  ;;  %v1679_v12 = vcombine.low %v10563_v27, %v10566_v46  ;;  %v396_v2 = vld [vmem:[%s10328_s10 + $0x28] sm:$0xff]  ;;  %v578_v60 = vsel %vm459_vm0, %v491_v62, 0.0 }
  0x7f   : > { %v1678_v19 = vcombine.low %v1670_v41, %v1677_v4  ;;  %v1388_v25 = vrot.slane %v1374_v21, %v10342_v9  ;;  %v10584_v20 = vrot.slane %v2338_v31, %v10342_v9  ;;  %v733_v57 = vcombine.high %v731_v30, %v731_v30 }
  0x80   : > { %16806 = vst [vmem:[#allocation32_spill] sm:$0xff] %v10572_v8  ;;  %16807 = vst [vmem:[#allocation33_spill] sm:$0xff] %v10576_v10  ;;  %v1680_v38 = vcombine.low %v10576_v10, %v10572_v8  ;;  %v1687_v52 = vrot.slane %v1679_v12, %v10342_v9  ;;  %v10591_v59 = vrot.slane %v570_v35, %v10342_v9  ;;  %v493_v21 = vrot.slane %v411_v18, 7 }
  0x81   : > { %9719 = vmatprep.mubr.msk.f32.mxu1 %vm1934_vm1, %v1678_v19  ;;  %v1389_v41 = vcombine.low %v1381_v26, %v1388_v25  ;;  %v10596_v4 = vrot.slane %v553_v14, %v10342_v9  ;;  %v2354_v1 = vcombine.low %v731_v30, %v733_v57  ;;  %v10603_v35 = vcombine.high %v10572_v8, %v10572_v8  ;;  %v412_v25 = vld [vmem:[%s10328_s10 + $0xa8] sm:$0xff] }
  0x82   : > { %v1694_v31 = vrot.slane %v1680_v38, %v10342_v9  ;;  %v1390_v12 = vcombine.low %v733_v57, %v10591_v59  ;;  %v561_v18 = vsel %vm459_vm0, 0.0, %v493_v21  ;;  %v10612_v19 = vrot.slane %v578_v60, %v10342_v9 }
  0x83   : > { %16808 = vst [vmem:[#allocation34_spill] sm:$0xff] %v10603_v35  ;;  %9693 = vmatmul.mubr.msk.f32.gmra.mxu0 %vm1934_vm1, %v1389_v41  ;;  %v10608_v26 = vcombine.high %v10596_v4, %v10596_v4  ;;  %v470_v62 = vrot.slane %v396_v2, 7  ;;  %v10617_v57 = vrot.slane %v2354_v1, %v10342_v9  ;;  %v10620_v0 = vrot.slane %v561_v18, %v10342_v9  ;;  %v10623_v41 = vld [vmem:[%s10328_s10 + $0x30] sm:$0xff] }
  0x84   : > { %16809 = vst [vmem:[#allocation35_spill] sm:$0xff] %v10612_v19  ;;  %v1695_v38 = vcombine.low %v1687_v52, %v1694_v31  ;;  %v1398_v30 = vrot.slane %v1390_v12, %v10342_v9  ;;  %v1696_v60 = vcombine.low %v10603_v35, %v10612_v19  ;;  %v741_v53 = vcombine.high %v553_v14, %v553_v14 }
  0x85   : > { %16810 = vst [vmem:[#allocation36_spill] sm:$0xff] %v10620_v0  ;;  %v1391_v61 = vcombine.low %v10596_v4, %v10608_v26  ;;  %v471_v2 = vsel %vm459_vm0, %v469_v36, %v470_v62  ;;  %v10633_v1 = vcombine.high %v10620_v0, %v10620_v0  ;;  %v494_v31 = vrot.slane %v412_v25, 7 }
  0x86   : > { %9720 = vmatmul.mubr.msk.f32.gmra.mxu1 %vm1934_vm1, %v1695_v38  ;;  %v10636_v52 = vrot.slane %v471_v2, %v10342_v9  ;;  %v1069_v12 = vcombine.high %v561_v18, %v561_v18  ;;  %v1704_v8 = vrot.slane %v1696_v60, %v10342_v9  ;;  %v10641_v19 = vrot.slane %v741_v53, %v10342_v9 }
  0x87   : > { %16811 = vst [vmem:[#allocation37_spill] sm:$0xff] %v10633_v1  ;;  %v1405_v3 = vrot.slane %v1391_v61, %v10342_v9  ;;  %v472_v36 = vrot.slane %v10623_v41, 7  ;;  %v1697_v14 = vcombine.low %v10620_v0, %v10633_v1  ;;  %v495_v25 = vsel %vm459_vm0, %v493_v21, %v494_v31 }
  0x88   : > { %v10648_v38 = vcombine.high %v10636_v52, %v10636_v52  ;;  %v10652_v18 = vrot.slane %v1069_v12, %v10342_v9  ;;  %v10656_v60 = vcombine.high %v10641_v19, %v10641_v19  ;;  %v10659_v53 = vrot.slane %v495_v25, %v10342_v9 }
  0x89   : > { %v1406_v61 = vcombine.low %v1398_v30, %v1405_v3  ;;  %v554_v41 = vsel %vm459_vm0, 0.0, %v472_v36  ;;  %v1711_v1 = vrot.slane %v1697_v14, %v10342_v9  ;;  %v571_v3 = vsel %vm459_vm0, %v470_v62, 0.0  ;;  %v413_v30 = vld [vmem:[%s10328_s10 + $0xb0] sm:$0xff] }
  0x8a   : > { %16812 = vst [vmem:[#allocation38_spill] sm:$0xff] %v10652_v18  ;;  %16813 = vst [vmem:[#allocation39_spill] sm:$0xff] %v10659_v53  ;;  %v1408_v0 = vcombine.low %v10636_v52, %v10648_v38  ;;  %v10667_v21 = vcombine.high %v10652_v18, %v10652_v18  ;;  %v1407_v12 = vcombine.low %v10641_v19, %v10656_v60  ;;  %vm7751_vm9 = vcmask 15360  }
  0x8b   : > { %9695 = vmatprep.mubr.msk.f32.mxu0 %vm1934_vm1, %v1406_v61  ;;  %v10676_v35 = vcombine.high %v10659_v53, %v10659_v53  ;;  %v758_v14 = vcombine.high %v471_v2, %v471_v2  ;;  %v10679_v46 = vrot.slane %v571_v3, %v10342_v9  ;;  %v1712_v10 = vcombine.low %v1704_v8, %v1711_v1 }
  0x8c   : > { %16814 = vst [vmem:[#allocation40_spill] sm:$0xff] %v10667_v21  ;;  %v1422_v28 = vrot.slane %v1408_v0, %v10342_v9  ;;  %v1713_v62 = vcombine.low %v10652_v18, %v10667_v21  ;;  %v10685_v61 = vrot.slane %v554_v41, %v10342_v9  ;;  %v1415_v27 = vrot.slane %v1407_v12, %v10342_v9  ;;  %v398_v18 = vld [vmem:[%s10328_s10 + $0x38] sm:$0xff] }
  0x8d   : > { %16815 = vst [vmem:[#allocation41_spill] sm:$0xff] %v10676_v35  ;;  %v1714_v6 = vcombine.low %v10659_v53, %v10676_v35  ;;  %v10691_v2 = vrot.slane %v758_v14, %v10342_v9  ;;  %v496_v3 = vrot.slane %v413_v30, 7  ;;  %9722 = vmatprep.mubr.msk.f32.mxu1 %vm1934_vm1, %v1712_v10  ;;  %v579_v1 = vsel %vm459_vm0, %v494_v31, 0.0  ;;  %v414_v14 = vld [vmem:[%s10328_s10 + $0xb8] sm:$0xff] }
  0x8e   : > { %v1721_v0 = vrot.slane %v1713_v62, %v10342_v9  ;;  %v1425_v8 = vcombine.low %v10679_v46, %v10685_v61  ;;  %v1086_v21 = vcombine.high %v495_v25, %v495_v25  ;;  %v1423_v32 = vcombine.low %v1415_v27, %v1422_v28 }
  0x8f   : > { %v1728_v12 = vrot.slane %v1714_v6, %v10342_v9  ;;  %v10702_v35 = vcombine.high %v10691_v2, %v10691_v2  ;;  %v562_v30 = vsel %vm459_vm0, 0.0, %v496_v3  ;;  %v10711_v53 = vrot.slane %v579_v1, %v10342_v9 }
  0x90   : > { %v1439_v10 = vrot.slane %v1425_v8, %v10342_v9  ;;  %v10708_v62 = vrot.slane %v1086_v21, %v10342_v9  ;;  %v10714_v31 = vrot.slane %v562_v30, %v10342_v9  ;;  %9696 = vmatmul.mubr.msk.f32.gmra.mxu0 %vm1934_vm1, %v1423_v32  ;;  %v473_v27 = vrot.slane %v398_v18, 7 }
  0x91   : > { %16817 = vst [vmem:[#allocation43_spill] sm:$0xff] %v10711_v53  ;;  %v1729_v6 = vcombine.low %v1721_v0, %v1728_v12  ;;  %v1424_v28 = vcombine.low %v10691_v2, %v10702_v35  ;;  %v782_v25 = vcombine.high %v554_v41, %v554_v41  ;;  %v10727_v1 = vcombine.high %v10685_v61, %v10685_v61 }
  0x92   : > { %16816 = vst [vmem:[#allocation42_spill] sm:$0xff] %v10708_v62  ;;  %16818 = vst [vmem:[#allocation44_spill] sm:$0xff] %v10714_v31  ;;  %v10721_v8 = vcombine.high %v10708_v62, %v10708_v62  ;;  %v1731_v21 = vcombine.low %v10711_v53, %v10714_v31  ;;  %v497_v11 = vrot.slane %v414_v14, 7  ;;  %v474_v0 = vsel %vm459_vm0, %v472_v36, %v473_v27 }
  0x93   : > { %9723 = vmatmul.mubr.msk.f32.gmra.mxu1 %vm1934_vm1, %v1729_v6  ;;  %v1432_v32 = vrot.slane %v1424_v28, %v10342_v9  ;;  %v10733_v18 = vrot.slane %v782_v25, %v10342_v9  ;;  %v1110_v41 = vcombine.high %v562_v30, %v562_v30  ;;  %v10739_v5 = vrot.slane %v474_v0, %v10342_v9 }
  0x94   : > { %16819 = vst [vmem:[#allocation45_spill] sm:$0xff] %v10721_v8  ;;  %v1730_v12 = vcombine.low %v10708_v62, %v10721_v8  ;;  %v1745_v53 = vrot.slane %v1731_v21, %v10342_v9  ;;  %v498_v14 = vsel %vm459_vm0, %v496_v3, %v497_v11  ;;  %v10754_v25 = vcombine.high %v10714_v31, %v10714_v31 }
  0x95   : > { %16820 = vst [vmem:[#allocation46_spill] sm:$0xff] %v10739_v5  ;;  %v1440_v7 = vcombine.low %v1432_v32, %v1439_v10  ;;  %v10744_v6 = vcombine.high %v10733_v18, %v10733_v18  ;;  %v1441_v36 = vcombine.low %v10727_v1, %v10733_v18  ;;  %v10749_v30 = vrot.slane %v1110_v41, %v10342_v9 }
  0x96   : > { %v1738_v28 = vrot.slane %v1730_v12, %v10342_v9  ;;  %16822 = vst [vmem:[#allocation48_spill] sm:$0xff] %v10754_v25  ;;  %v10757_v3 = vrot.slane %v498_v14, %v10342_v9  ;;  %v572_v10 = vsel %vm459_vm0, %v473_v27, 0.0  ;;  %v799_v12 = vcombine.high %v474_v0, %v474_v0  ;;  %v399_v0 = vld [vmem:[%s10328_s10 + $0x40] sm:$0xff] }
  0x97   : > { %16821 = vst [vmem:[#allocation47_spill] sm:$0xff] %v10749_v30  ;;  %9698 = vmatprep.mubr.msk.f32.mxu0 %vm1934_vm1, %v1440_v7  ;;  %v1442_v21 = vcombine.low %v10744_v6, %v10739_v5  ;;  %v1449_v32 = vrot.slane %v1441_v36, %v10342_v9  ;;  %v10766_v41 = vcombine.high %v10749_v30, %v10749_v30  ;;  %vm7816_vm10 = vcmask 23552  }
  0x98   : > { %16823 = vst [vmem:[#allocation49_spill] sm:$0xff] %v10757_v3  ;;  %v1746_v31 = vcombine.low %v1738_v28, %v1745_v53  ;;  %v1747_v8 = vcombine.low %v10754_v25, %v10749_v30  ;;  %v10772_v27 = vcombine.high %v10739_v5, %v10739_v5  ;;  %v10775_v7 = vrot.slane %v572_v10, %v10342_v9  ;;  %v415_v28 = vld [vmem:[%s10328_s10 + $0xc0] sm:$0xff]  ;;  %v10787_v30 = vld [vmem:[%s10328_s10 + $0x48] sm:$0xff] }
  0x99   : > { %16824 = vst [vmem:[#allocation50_spill] sm:$0xff] %v10766_v41  ;;  %v1456_v62 = vrot.slane %v1442_v21, %v10342_v9  ;;  %v1748_v36 = vcombine.low %v10766_v41, %v10757_v3  ;;  %v10781_v58 = vrot.slane %v799_v12, %v10342_v9  ;;  %v580_v53 = vsel %vm459_vm0, %v497_v11, 0.0  ;;  %v10799_v12 = vld [vmem:[%s10328_s10 + $0xc8] sm:$0xff] }
  0x9a   : > { %16825 = vst [vmem:[#allocation51_spill] sm:$0xff] %v10775_v7  ;;  %9725 = vmatprep.mubr.msk.f32.mxu1 %vm1934_vm1, %v1746_v31  ;;  %v1755_v25 = vrot.slane %v1747_v8, %v10342_v9  ;;  %v1127_v10 = vcombine.high %v498_v14, %v498_v14  ;;  %v10793_v21 = vcombine.high %v10757_v3, %v10757_v3  ;;  %v475_v14 = vrot.slane %v399_v0, 7 }
  0x9b   : > { %16826 = vst [vmem:[#allocation52_spill] sm:$0xff] %v10781_v58  ;;  %v10796_v41 = vrot.slane %v580_v53, %v10342_v9  ;;  %v1457_v48 = vcombine.low %v1449_v32, %v1456_v62  ;;  %v1762_v11 = vrot.slane %v1748_v36, %v10342_v9  ;;  %v10804_v55 = vcombine.high %v10781_v58, %v10781_v58 }
  0x9c   : > { %16827 = vst [vmem:[#allocation53_spill] sm:$0xff] %v10793_v21  ;;  %v1458_v31 = vcombine.low %v10772_v27, %v10781_v58  ;;  %v10809_v8 = vrot.slane %v1127_v10, %v10342_v9  ;;  %v499_v3 = vrot.slane %v415_v28, 7  ;;  %v476_v53 = vrot.slane %v10787_v30, 7 }
  0x9d   : > { %16828 = vst [vmem:[#allocation54_spill] sm:$0xff] %v10796_v41  ;;  %16829 = vst [vmem:[#allocation55_spill] sm:$0xff] %v10804_v55  ;;  %9699 = vmatmul.mubr.msk.f32.gmra.mxu0 %vm1934_vm1, %v1457_v48  ;;  %v1763_v47 = vcombine.low %v1755_v25, %v1762_v11  ;;  %v1459_v62 = vcombine.low %v10804_v55, %v10775_v7  ;;  %v555_v28 = vsel %vm459_vm0, 0.0, %v475_v14  ;;  %vm9193_vm11 = vcmask 31744  }
  0x9e   : > { %16830 = vst [vmem:[#allocation56_spill] sm:$0xff] %v10809_v8  ;;  %v1466_v32 = vrot.slane %v1458_v31, %v10342_v9  ;;  %v10819_v54 = vcombine.high %v10809_v8, %v10809_v8  ;;  %v1764_v0 = vcombine.low %v10793_v21, %v10809_v8  ;;  %v563_v30 = vsel %vm459_vm0, 0.0, %v499_v3 }
  0x9f   : > { %9726 = vmatmul.mubr.msk.f32.gmra.mxu1 %vm1934_vm1, %v1763_v47  ;;  %v1473_v48 = vrot.slane %v1459_v62, %v10342_v9  ;;  %v823_v25 = vcombine.high %v555_v28, %v555_v28  ;;  %v10828_v10 = vrot.slane %v555_v28, %v10342_v9  ;;  %v1151_v11 = vcombine.high %v563_v30, %v563_v30 }
  0xa0   : > { %16831 = vst [vmem:[#allocation57_spill] sm:$0xff] %v10819_v54  ;;  %v1765_v31 = vcombine.low %v10819_v54, %v10796_v41  ;;  %v1772_v36 = vrot.slane %v1764_v0, %v10342_v9  ;;  %v10834_v8 = vrot.slane %v563_v30, %v10342_v9  ;;  %v477_v21 = vsel %vm459_vm0, %v475_v14, %v476_v53 }
  0xa1   : > { %16832 = vst [vmem:[#allocation58_spill] sm:$0xff] %v10828_v10  ;;  %v1474_v45 = vcombine.low %v1466_v32, %v1473_v48  ;;  %v10838_v47 = vrot.slane %v823_v25, %v10342_v9  ;;  %v10842_v62 = vcombine.high %v10828_v10, %v10828_v10  ;;  %v10845_v28 = vrot.slane %v1151_v11, %v10342_v9 }
  0xa2   : > { %16833 = vst [vmem:[#allocation59_spill] sm:$0xff] %v10834_v8  ;;  %v1779_v41 = vrot.slane %v1765_v31, %v10342_v9  ;;  %v10850_v0 = vcombine.high %v10834_v8, %v10834_v8  ;;  %v840_v30 = vcombine.high %v477_v21, %v477_v21  ;;  %v10853_v14 = vrot.slane %v477_v21, %v10342_v9 }
  0xa3   : > { %16834 = vst [vmem:[#allocation60_spill] sm:$0xff] %v10838_v47  ;;  %16835 = vst [vmem:[#allocation61_spill] sm:$0xff] %v10842_v62  ;;  %9701 = vmatprep.mubr.msk.f32.mxu0 %vm1934_vm1, %v1474_v45  ;;  %v10858_v32 = vcombine.high %v10838_v47, %v10838_v47  ;;  %v1475_v48 = vcombine.low %v10828_v10, %v10842_v62  ;;  %v10864_v25 = vcombine.high %v10845_v28, %v10845_v28  ;;  %v401_v62 = vld [vmem:[%s10328_s10 + $0x50] sm:$0xff]  ;;  %vm9202_vm12 = vcmask 64512  }
  0xa4   : > { %16836 = vst [vmem:[#allocation62_spill] sm:$0xff] %v10845_v28  ;;  %16837 = vst [vmem:[#allocation63_spill] sm:$0xff] %v10850_v0  ;;  %v16841_v11 = vrot.slane %v10799_v12, 7  ;;  %v1780_v54 = vcombine.low %v1772_v36, %v1779_v41  ;;  %v1781_v21 = vcombine.low %v10834_v8, %v10850_v0  ;;  %v10872_v45 = vrot.slane %v840_v30, %v10342_v9 }
  0xa5   : > { %16838 = vst [vmem:[#allocation64_spill] sm:$0xff] %v10853_v14  ;;  %16839 = vst [vmem:[#allocation65_spill] sm:$0xff] %v10858_v32  ;;  %v10876_v7 = vcombine.high %v10853_v14, %v10853_v14  ;;  %v1476_v10 = vcombine.low %v10838_v47, %v10858_v32  ;;  %v1483_v58 = vrot.slane %v1475_v48, %v10342_v9  ;;  %vm9211_vm13 = vcmask 97280  }
  0xa6   : > { %16840 = vst [vmem:[#allocation66_spill] sm:$0xff] %v10864_v25  ;;  %v501_v31 = vsel %vm459_vm0, %v499_v3, %v16841_v11  ;;  %16842 = vst [vmem:[#allocation67_spill] sm:$0xff] %v10872_v45  ;;  %v1782_v3 = vcombine.low %v10845_v28, %v10864_v25  ;;  %9728 = vmatprep.mubr.msk.f32.mxu1 %vm1934_vm1, %v1780_v54  ;;  %v1789_v36 = vrot.slane %v1781_v21, %v10342_v9  ;;  %vm9228_vm14 = vcmask 162816  }
  0xa7   : > { %16843 = vst [vmem:[#allocation68_spill] sm:$0xff] %v10876_v7  ;;  %v1168_v41 = vcombine.high %v501_v31, %v501_v31  ;;  %v10888_v30 = vcombine.high %v10872_v45, %v10872_v45  ;;  %v1492_v11 = vcombine.low %v10853_v14, %v10876_v7  ;;  %v10893_v0 = vrot.slane %v501_v31, %v10342_v9  ;;  %v417_v7 = vld [vmem:[%s10328_s10 + $0xd0] sm:$0xff] }
  0xa8   : > { %v1490_v48 = vrot.slane %v1476_v10, %v10342_v9  ;;  %v1796_v8 = vrot.slane %v1782_v3, %v10342_v9  ;;  %v478_v54 = vrot.slane %v401_v62, 7  ;;  %v573_v31 = vsel %vm459_vm0, %v476_v53, 0.0 }
  0xa9   : > { %16844 = vst [vmem:[#allocation69_spill] sm:$0xff] %v10888_v30  ;;  %16845 = vst [vmem:[#allocation70_spill] sm:$0xff] %v10893_v0  ;;  %v10898_v25 = vrot.slane %v1168_v41, %v10342_v9  ;;  %v1493_v21 = vcombine.low %v10872_v45, %v10888_v30  ;;  %v1500_v28 = vrot.slane %v1492_v11, %v10342_v9  ;;  %vm9237_vm15 = vcmask 195584  }
  0xaa   : > { %v10905_v32 = vcombine.high %v10893_v0, %v10893_v0  ;;  %v1491_v10 = vcombine.low %v1483_v58, %v1490_v48  ;;  %v1797_v14 = vcombine.low %v1789_v36, %v1796_v8  ;;  %v556_v62 = vsel %vm459_vm0, 0.0, %v478_v54 }
  0xab   : > { %16846 = vst [vmem:[#allocation71_spill] sm:$0xff] %v10898_v25  ;;  %v10911_v3 = vcombine.high %v10898_v25, %v10898_v25  ;;  %v1507_v41 = vrot.slane %v1493_v21, %v10342_v9  ;;  %v10918_v30 = vrot.slane %v573_v31, %v10342_v9  ;;  %v864_v53 = vcombine.high %v556_v62, %v556_v62 }
  0xac   : > { %16847 = vst [vmem:[#allocation72_spill] sm:$0xff] %v10905_v32  ;;  %v1798_v11 = vcombine.low %v10893_v0, %v10905_v32  ;;  %9702 = vmatmul.mubr.msk.f32.gmra.mxu0 %vm1934_vm1, %v1491_v10  ;;  %9729 = vmatmul.mubr.msk.f32.gmra.mxu1 %vm1934_vm1, %v1797_v14  ;;  %v10925_v8 = vrot.slane %v556_v62, %v10342_v9  ;;  %v502_v36 = vrot.slane %v417_v7, 7  ;;  %v16851_v48 = vrot.slane %v10799_v12, 7  ;;  %v402_v32 = vld [vmem:[%s10328_s10 + $0x58] sm:$0xff] }
  0xad   : > { %16848 = vst [vmem:[#allocation73_spill] sm:$0xff] %v10911_v3  ;;  %16849 = vst [vmem:[#allocation74_spill] sm:$0xff] %v10918_v30  ;;  %v1799_v58 = vcombine.low %v10898_v25, %v10911_v3  ;;  %v1508_v0 = vcombine.low %v1500_v28, %v1507_v41  ;;  %v10933_v45 = vrot.slane %v864_v53, %v10342_v9  ;;  %v418_v10 = vld [vmem:[%s10328_s10 + $0xd8] sm:$0xff]  ;;  %vm9255_vm2 = vcmask 261120  }
  0xae   : > { %16850 = vst [vmem:[#allocation75_spill] sm:$0xff] %v10925_v8  ;;  %v581_v21 = vsel %vm459_vm0, %v16851_v48, 0.0  ;;  %v1806_v31 = vrot.slane %v1798_v11, %v10342_v9  ;;  %v10942_v7 = vcombine.high %v10925_v8, %v10925_v8  ;;  %v1509_v12 = vcombine.low %v10918_v30, %v10925_v8 }
  0xaf   : > { %16852 = vst [vmem:[#allocation76_spill] sm:$0xff] %v10933_v45  ;;  %v10936_v14 = vrot.slane %v581_v21, %v10342_v9  ;;  %v1813_v3 = vrot.slane %v1799_v58, %v10342_v9  ;;  %v564_v28 = vsel %vm459_vm0, 0.0, %v502_v36  ;;  %9704 = vmatprep.mubr.msk.f32.mxu0 %vm1934_vm1, %v1508_v0  ;;  %v479_v11 = vrot.slane %v402_v32, 7 }
  0xb0   : > { %16854 = vst [vmem:[#allocation78_spill] sm:$0xff] %v10942_v7  ;;  %v1192_v62 = vcombine.high %v564_v28, %v564_v28  ;;  %v10949_v41 = vrot.slane %v564_v28, %v10342_v9  ;;  %v10953_v53 = vcombine.high %v10933_v45, %v10933_v45  ;;  %v1510_v48 = vcombine.low %v10942_v7, %v10933_v45 }
  0xb1   : > { %16853 = vst [vmem:[#allocation77_spill] sm:$0xff] %v10936_v14  ;;  %v1814_v58 = vcombine.low %v1806_v31, %v1813_v3  ;;  %v1517_v21 = vrot.slane %v1509_v12, %v10342_v9  ;;  %v503_v25 = vrot.slane %v418_v10, 7  ;;  %v480_v28 = vsel %vm459_vm0, %v478_v54, %v479_v11 }
  0xb2   : > { %16855 = vst [vmem:[#allocation79_spill] sm:$0xff] %v10949_v41  ;;  %16856 = vst [vmem:[#allocation80_spill] sm:$0xff] %v10953_v53  ;;  %v10959_v8 = vrot.slane %v1192_v62, %v10342_v9  ;;  %v10963_v0 = vcombine.high %v10949_v41, %v10949_v41  ;;  %v1815_v32 = vcombine.low %v10936_v14, %v10949_v41  ;;  %v403_v62 = vld [vmem:[%s10328_s10 + $0x60] sm:$0xff] }
  0xb3   : > { %9731 = vmatprep.mubr.msk.f32.mxu1 %vm1934_vm1, %v1814_v58  ;;  %v1524_v3 = vrot.slane %v1510_v48, %v10342_v9  ;;  %v881_v31 = vcombine.high %v480_v28, %v480_v28  ;;  %v10971_v10 = vrot.slane %v480_v28, %v10342_v9  ;;  %v504_v12 = vsel %vm459_vm0, %v502_v36, %v503_v25 }
  0xb4   : > { %16857 = vst [vmem:[#allocation81_spill] sm:$0xff] %v10959_v8  ;;  %16858 = vst [vmem:[#allocation82_spill] sm:$0xff] %v10963_v0  ;;  %v1816_v45 = vcombine.low %v10963_v0, %v10959_v8  ;;  %v1823_v7 = vrot.slane %v1815_v32, %v10342_v9  ;;  %v10980_v54 = vcombine.high %v10959_v8, %v10959_v8 }
  0xb5   : > { %16859 = vst [vmem:[#allocation83_spill] sm:$0xff] %v10971_v10  ;;  %v1209_v58 = vcombine.high %v504_v12, %v504_v12  ;;  %v1525_v41 = vcombine.low %v1517_v21, %v1524_v3  ;;  %v10983_v48 = vrot.slane %v881_v31, %v10342_v9  ;;  %v10987_v28 = vcombine.high %v10971_v10, %v10971_v10  ;;  %v419_v3 = vld [vmem:[%s10328_s10 + $0xe0] sm:$0xff] }
  0xb6   : > { %16860 = vst [vmem:[#allocation84_spill] sm:$0xff] %v10980_v54  ;;  %v1526_v36 = vcombine.low %v10953_v53, %v10971_v10  ;;  %v1830_v0 = vrot.slane %v1816_v45, %v10342_v9  ;;  %v10993_v32 = vrot.slane %v504_v12, %v10342_v9  ;;  %v481_v21 = vrot.slane %v403_v62, 7  ;;  %v404_v53 = vld [vmem:[%s10328_s10 + $0x68] sm:$0xff] }
  0xb7   : > { %16861 = vst [vmem:[#allocation85_spill] sm:$0xff] %v10983_v48  ;;  %16862 = vst [vmem:[#allocation86_spill] sm:$0xff] %v10987_v28  ;;  %v10996_v8 = vrot.slane %v1209_v58, %v10342_v9  ;;  %9705 = vmatmul.mubr.msk.f32.gmra.mxu0 %vm1934_vm1, %v1525_v41  ;;  %v1527_v31 = vcombine.low %v10987_v28, %v10983_v48  ;;  %v574_v10 = vsel %vm459_vm0, %v479_v11, 0.0 }
  0xb8   : > { %16863 = vst [vmem:[#allocation87_spill] sm:$0xff] %v10993_v32  ;;  %v1534_v14 = vrot.slane %v1526_v36, %v10342_v9  ;;  %v11006_v45 = vcombine.high %v10983_v48, %v10983_v48  ;;  %v1831_v12 = vcombine.low %v1823_v7, %v1830_v0  ;;  %v11010_v58 = vcombine.high %v10993_v32, %v10993_v32 }
  0xb9   : > { %16864 = vst [vmem:[#allocation88_spill] sm:$0xff] %v10996_v8  ;;  %v1832_v41 = vcombine.low %v10980_v54, %v10993_v32  ;;  %v557_v62 = vsel %vm459_vm0, 0.0, %v481_v21  ;;  %v1541_v28 = vrot.slane %v1527_v31, %v10342_v9  ;;  %v11017_v36 = vrot.slane %v574_v10, %v10342_v9  ;;  %v420_v10 = vld [vmem:[%s10328_s10 + $0xe8] sm:$0xff] }
  0xba   : > { %16865 = vst [vmem:[#allocation89_spill] sm:$0xff] %v11006_v45  ;;  %16866 = vst [vmem:[#allocation90_spill] sm:$0xff] %v11010_v58  ;;  %v11020_v11 = vrot.slane %v557_v62, %v10342_v9  ;;  %v505_v48 = vrot.slane %v419_v3, 7  ;;  %9732 = vmatmul.mubr.msk.f32.gmra.mxu1 %vm1934_vm1, %v1831_v12  ;;  %v1833_v7 = vcombine.low %v11010_v58, %v10996_v8  ;;  %v582_v32 = vsel %vm459_vm0, %v503_v25, 0.0 }
  0xbb   : > { %16867 = vst [vmem:[#allocation91_spill] sm:$0xff] %v11017_v36  ;;  %v1840_v0 = vrot.slane %v1832_v41, %v10342_v9  ;;  %v11030_v31 = vcombine.high %v10996_v8, %v10996_v8  ;;  %v1542_v54 = vcombine.low %v1534_v14, %v1541_v28  ;;  %v1543_v3 = vcombine.low %v11006_v45, %v11017_v36 }
  0xbc   : > { %v11035_v30 = vcombine.high %v11020_v11, %v11020_v11  ;;  %v565_v12 = vsel %vm459_vm0, 0.0, %v505_v48  ;;  %v1847_v41 = vrot.slane %v1833_v7, %v10342_v9  ;;  %v11042_v25 = vrot.slane %v582_v32, %v10342_v9 }
  0xbd   : > { %16868 = vst [vmem:[#allocation92_spill] sm:$0xff] %v11030_v31  ;;  %v11045_v8 = vrot.slane %v565_v12, %v10342_v9  ;;  %v482_v58 = vrot.slane %v404_v53, 7  ;;  %9707 = vmatprep.mubr.msk.f32.mxu0 %vm1934_vm1, %v1542_v54  ;;  %v1551_v28 = vrot.slane %v1543_v3, %v10342_v9  ;;  %v905_v47 = vcombine.high %v557_v62, %v557_v62  ;;  %v405_v53 = vld [vmem:[%s10328_s10 + $0x70] sm:$0xff] }
  0xbe   : > { %16869 = vst [vmem:[#allocation93_spill] sm:$0xff] %v11035_v30  ;;  %16870 = vst [vmem:[#allocation94_spill] sm:$0xff] %v11042_v25  ;;  %v1544_v14 = vcombine.low %v11020_v11, %v11035_v30  ;;  %v506_v36 = vrot.slane %v420_v10, 7  ;;  %v1848_v45 = vcombine.low %v1840_v0, %v1847_v41  ;;  %v1849_v32 = vcombine.low %v11030_v31, %v11042_v25 }
  0xbf   : > { %16871 = vst [vmem:[#allocation95_spill] sm:$0xff] %v11045_v8  ;;  %v11053_v7 = vcombine.high %v11045_v8, %v11045_v8  ;;  %v483_v55 = vsel %vm459_vm0, %v481_v21, %v482_v58  ;;  %v11061_v5 = vrot.slane %v905_v47, %v10342_v9  ;;  %v1233_v21 = vcombine.high %v565_v12, %v565_v12 }
  0xc0   : > { %v1558_v54 = vrot.slane %v1544_v14, %v10342_v9  ;;  %v11064_v3 = vrot.slane %v483_v55, %v10342_v9  ;;  %v507_v62 = vsel %vm459_vm0, %v505_v48, %v506_v36  ;;  %9734 = vmatprep.mubr.msk.f32.mxu1 %vm1934_vm1, %v1848_v45  ;;  %v1857_v10 = vrot.slane %v1849_v32, %v10342_v9 }
  0xc1   : > { %16872 = vst [vmem:[#allocation96_spill] sm:$0xff] %v11053_v7  ;;  %16873 = vst [vmem:[#allocation97_spill] sm:$0xff] %v11061_v5  ;;  %v1850_v0 = vcombine.low %v11045_v8, %v11053_v7  ;;  %v11072_v41 = vrot.slane %v507_v62, %v10342_v9  ;;  %v11076_v47 = vcombine.high %v11061_v5, %v11061_v5  ;;  %v484_v45 = vrot.slane %v405_v53, 7 }
  0xc2   : > { %16874 = vst [vmem:[#allocation98_spill] sm:$0xff] %v11064_v3  ;;  %v1559_v14 = vcombine.low %v1551_v28, %v1558_v54  ;;  %v11080_v48 = vcombine.high %v11064_v3, %v11064_v3  ;;  %v11084_v7 = vrot.slane %v1233_v21, %v10342_v9  ;;  %v575_v28 = vsel %vm459_vm0, %v482_v58, 0.0  ;;  %v421_v21 = vld [vmem:[%s10328_s10 + $0xf0] sm:$0xff] }
  0xc3   : > { %16875 = vst [vmem:[#allocation99_spill] sm:$0xff] %v11072_v41  ;;  %16876 = vst [vmem:[#allocation100_spill] sm:$0xff] %v11076_v47  ;;  %v1864_v25 = vrot.slane %v1850_v0, %v10342_v9  ;;  %v11088_v12 = vcombine.high %v11072_v41, %v11072_v41  ;;  %v1560_v32 = vcombine.low %v11061_v5, %v11076_v47  ;;  %v558_v54 = vsel %vm459_vm0, 0.0, %v484_v45 }
  0xc4   : > { %16877 = vst [vmem:[#allocation101_spill] sm:$0xff] %v11080_v48  ;;  %16878 = vst [vmem:[#allocation102_spill] sm:$0xff] %v11084_v7  ;;  %9708 = vmatmul.mubr.msk.f32.gmra.mxu0 %vm1934_vm1, %v1559_v14  ;;  %v1561_v53 = vcombine.low %v11064_v3, %v11080_v48  ;;  %v922_v0 = vcombine.high %v483_v55, %v483_v55  ;;  %v11100_v31 = vcombine.high %v11084_v7, %v11084_v7 }
  0xc5   : > { %16879 = vst [vmem:[#allocation103_spill] sm:$0xff] %v11088_v12  ;;  %v1865_v8 = vcombine.low %v1857_v10, %v1864_v25  ;;  %v1867_v58 = vcombine.low %v11072_v41, %v11088_v12  ;;  %v11105_v14 = vrot.slane %v575_v28, %v10342_v9  ;;  %v1568_v47 = vrot.slane %v1560_v32, %v10342_v9  ;;  %v406_v25 = vld [vmem:[%s10328_s10 + $0x78] sm:$0xff] }
  0xc6   : > { %16880 = vst [vmem:[#allocation104_spill] sm:$0xff] %v11100_v31  ;;  %v1575_v30 = vrot.slane %v1561_v53, %v10342_v9  ;;  %v11110_v48 = vrot.slane %v922_v0, %v10342_v9  ;;  %v11113_v55 = vrot.slane %v558_v54, %v10342_v9  ;;  %v1866_v10 = vcombine.low %v11084_v7, %v11100_v31 }
  0xc7   : > { %16881 = vst [vmem:[#allocation105_spill] sm:$0xff] %v11105_v14  ;;  %9735 = vmatmul.mubr.msk.f32.gmra.mxu1 %vm1934_vm1, %v1865_v8  ;;  %v1881_v41 = vrot.slane %v1867_v58, %v10342_v9  ;;  %v508_v28 = vrot.slane %v421_v21, 7  ;;  %v583_v32 = vsel %vm459_vm0, %v506_v36, 0.0  ;;  %v1250_v3 = vcombine.high %v507_v62, %v507_v62  ;;  %v422_v21 = vld [vmem:[%s10328_s10 + $0xf8] sm:$0xff] }
  0xc8   : > { %16882 = vst [vmem:[#allocation106_spill] sm:$0xff] %v11113_v55  ;;  %v1576_v12 = vcombine.low %v1568_v47, %v1575_v30  ;;  %v11123_v53 = vcombine.high %v11110_v48, %v11110_v48  ;;  %v1578_v0 = vcombine.low %v11105_v14, %v11113_v55  ;;  %v1874_v8 = vrot.slane %v1866_v10, %v10342_v9 }
  0xc9   : > { %v566_v5 = vsel %vm459_vm0, 0.0, %v508_v28  ;;  %v11130_v31 = vrot.slane %v583_v32, %v10342_v9  ;;  %v485_v58 = vrot.slane %v406_v25, 7  ;;  %v11137_v47 = vrot.slane %v1250_v3, %v10342_v9 }
  0xca   : > { %16883 = vst [vmem:[#allocation107_spill] sm:$0xff] %v11123_v53  ;;  %9710 = vmatprep.mubr.msk.f32.mxu0 %vm1934_vm1, %v1576_v12  ;;  %v1577_v30 = vcombine.low %v11110_v48, %v11123_v53  ;;  %v1592_v36 = vrot.slane %v1578_v0, %v10342_v9  ;;  %v11140_v62 = vrot.slane %v566_v5, %v10342_v9 }
  0xcb   : > { %16884 = vst [vmem:[#allocation108_spill] sm:$0xff] %v11130_v31  ;;  %16885 = vst [vmem:[#allocation109_spill] sm:$0xff] %v11137_v47  ;;  %v1882_v10 = vcombine.low %v1874_v8, %v1881_v41  ;;  %v486_v7 = vsel %vm459_vm0, %v484_v45, %v485_v58  ;;  %v946_v32 = vcombine.high %v558_v54, %v558_v54  ;;  %v509_v45 = vrot.slane %v422_v21, 7 }
  0xcc   : > { %16886 = vst [vmem:[#allocation110_spill] sm:$0xff] %v11140_v62  ;;  %v11146_v25 = vcombine.high %v11113_v55, %v11113_v55  ;;  %v1585_v12 = vrot.slane %v1577_v30, %v10342_v9  ;;  %v11151_v0 = vcombine.high %v11137_v47, %v11137_v47  ;;  %v1884_v3 = vcombine.low %v11130_v31, %v11140_v62 }
  0xcd   : > { %v11156_v53 = vrot.slane %v486_v7, %v10342_v9  ;;  %9737 = vmatprep.mubr.msk.f32.mxu1 %vm1934_vm1, %v1882_v10  ;;  %v11160_v41 = vrot.slane %v946_v32, %v10342_v9  ;;  %v1278_v54 = vcombine.high %v566_v5, %v566_v5  ;;  %v11164_v8 = vcombine.high %v11140_v62, %v11140_v62 }
  0xce   : > { %16887 = vst [vmem:[#allocation111_spill] sm:$0xff] %v11151_v0  ;;  %v1593_v30 = vcombine.low %v1585_v12, %v1592_v36  ;;  %v1883_v55 = vcombine.low %v11137_v47, %v11151_v0  ;;  %v1898_v31 = vrot.slane %v1884_v3, %v10342_v9  ;;  %v576_v14 = vsel %vm459_vm0, %v485_v58, 0.0 }
  0xcf   : > { %16888 = vst [vmem:[#allocation112_spill] sm:$0xff] %v11156_v53  ;;  %16889 = vst [vmem:[#allocation113_spill] sm:$0xff] %v11160_v41  ;;  %v11172_v10 = vcombine.high %v11160_v41, %v11160_v41  ;;  %v1594_v21 = vcombine.low %v11146_v25, %v11160_v41  ;;  %v510_v5 = vsel %vm459_vm0, %v508_v28, %v509_v45  ;;  %v584_v47 = vsel %vm459_vm0, %v509_v45, 0.0 }
  0xd0   : > { %v11178_v32 = vrot.slane %v1278_v54, %v10342_v9  ;;  %9711 = vmatmul.mubr.msk.f32.gmra.mxu0 %vm1934_vm1, %v1593_v30  ;;  %v1891_v36 = vrot.slane %v1883_v55, %v10342_v9  ;;  %v11183_v12 = vrot.slane %v510_v5, %v10342_v9  ;;  %v963_v58 = vcombine.high %v486_v7, %v486_v7 }
  0xd1   : > { %16890 = vst [vmem:[#allocation114_spill] sm:$0xff] %v11172_v10  ;;  %v11187_v3 = vcombine.high %v11156_v53, %v11156_v53  ;;  %v1595_v62 = vcombine.low %v11172_v10, %v11156_v53  ;;  %v1602_v28 = vrot.slane %v1594_v21, %v10342_v9  ;;  %v11202_v7 = vrot.slane %v576_v14, %v10342_v9 }
  0xd2   : > { %16891 = vst [vmem:[#allocation115_spill] sm:$0xff] %v11178_v32  ;;  %16892 = vst [vmem:[#allocation116_spill] sm:$0xff] %v11183_v12  ;;  %v11194_v54 = vcombine.high %v11178_v32, %v11178_v32  ;;  %v1900_v55 = vcombine.low %v11164_v8, %v11178_v32  ;;  %v1899_v30 = vcombine.low %v1891_v36, %v1898_v31  ;;  %vm9246_vm0 = vcmask 228352  }
  0xd3   : > { %v11199_v0 = vrot.slane %v963_v58, %v10342_v9  ;;  %v1609_v53 = vrot.slane %v1595_v62, %v10342_v9  ;;  %v1295_v10 = vcombine.high %v510_v5, %v510_v5  ;;  %v11218_v45 = vcombine.high %v11183_v12, %v11183_v12 }
  0xd4   : > { %v1901_v21 = vcombine.low %v11194_v54, %v11183_v12  ;;  %v1908_v41 = vrot.slane %v1900_v55, %v10342_v9  ;;  %9738 = vmatmul.mubr.msk.f32.gmra.mxu1 %vm1934_vm1, %v1899_v30  ;;  %v11221_v62 = vrot.slane %v584_v47, %v10342_v9  ;;  %v2252_v55 = vcombine.low %v10347_v15, %v10377_v29 }
  0xd5   : > { %v11212_v31 = vcombine.high %v11199_v0, %v11199_v0  ;;  %v1611_v14 = vcombine.low %v11187_v3, %v11199_v0  ;;  %v1610_v36 = vcombine.low %v1602_v28, %v1609_v53  ;;  %v11225_v5 = vrot.slane %v1295_v10, %v10342_v9 }
  0xd6   : > { %v1915_v58 = vrot.slane %v1901_v21, %v10342_v9  ;;  %v2253_v12 = vcombine.low %v10350_v16, %v10385_v33  ;;  %v2321_v47 = vcombine.low %v10501_v42, %v10517_v63  ;;  %v2260_v21 = vrot.slane %v2252_v55, %v10342_v9 }
  0xd7   : > { %v1612_v30 = vcombine.low %v11212_v31, %v11202_v7  ;;  %v1619_v32 = vrot.slane %v1611_v14, %v10342_v9  ;;  %9713 = vmatprep.mubr.msk.f32.mxu0 %vm1934_vm1, %v1610_v36  ;;  %v11239_v10 = vcombine.high %v11225_v5, %v11225_v5  ;;  %v1917_v28 = vcombine.low %v11218_v45, %v11225_v5 }
  0xd8   : > { %v1916_v53 = vcombine.low %v1908_v41, %v1915_v58  ;;  %v2267_v29 = vrot.slane %v2253_v12, %v10342_v9  ;;  %v11247_v33 = vrot.slane %v2321_v47, %v10342_v9  ;;  %v2337_v42 = vcombine.low %v10504_v24, %v10539_v13 }
  0xd9   : > { %v1626_v14 = vrot.slane %v1612_v30, %v10342_v9  ;;  %v1918_v63 = vcombine.low %v11239_v10, %v11221_v62  ;;  %v1925_v41 = vrot.slane %v1917_v28, %v10342_v9  ;;  %v11257_v36 = vcombine.high %v10363_v22, %v10363_v22 }
  0xda   : > { %9740 = vmatprep.mubr.msk.f32.mxu1 %vm1934_vm1, %v1916_v53  ;;  %v2269_v12 = vcombine.low %v10353_v17, %v10389_v34  ;;  %v11262_v55 = vrot.slane %v2337_v42, %v10342_v9  ;;  %v3228_v24 = vcombine.low %v10584_v20, %v10617_v57  ;;  %v2286_v53 = vcombine.low %v10366_v23, %v10393_v37 }
  0xdb   : > { %16893 = vst [vmem:[#allocation117_spill] sm:$0xff] %v11257_v36  ;;  %v1627_v58 = vcombine.low %v1619_v32, %v1626_v14  ;;  %v1932_v13 = vrot.slane %v1918_v63, %v10342_v9  ;;  %v2270_v30 = vcombine.low %v10363_v22, %v11257_v36  ;;  %v2268_v28 = vcombine.low %v2260_v21, %v2267_v29 }
  0xdc   : > { %v2277_v47 = vrot.slane %v2269_v12, %v10342_v9  ;;  %v3227_v32 = vcombine.low %v11247_v33, %v11262_v55  ;;  %v16894_v14 = vcombine.low %v10408_v44, %v10404_v43  ;;  %v2304_v63 = vcombine.low %v10425_v50, %v10421_v49 }
  0xdd   : > { %9714 = vmatmul.mubr.msk.f32.gmra.mxu0 %vm1934_vm1, %v1627_v58  ;;  %v1933_v36 = vcombine.low %v1925_v41, %v1932_v13  ;;  %v2284_v12 = vrot.slane %v2270_v30, %v10342_v9  ;;  %v2294_v34 = vrot.slane %v2286_v53, %v10342_v9  ;;  %v2355_v37 = vcombine.low %v10591_v59, %v10596_v4  ;;  %v16899_v13 = vld [vmem:[#allocation58_spill] sm:$0xff]  ;;  %v16900_v30 = vld [vmem:[#allocation51_spill] sm:$0xff]  ;;  %v16901_v53 = vld [vmem:[#allocation60_spill] sm:$0xff] }
  0xde   : > { %v2301_v42 = vrot.slane %v16894_v14, %v10342_v9  ;;  %9805 = vmatprep.mubr.msk.f32.mxu0 %vm1934_vm1, %v3227_v32  ;;  %v16895_v29 = vcombine.low %v10429_v51, %v10397_v40  ;;  %v2371_v43 = vcombine.low %v10608_v26, %v10641_v19  ;;  %v2372_v44 = vcombine.low %v10656_v60, %v10636_v52 }
  0xdf   : > { %v2388_v49 = vcombine.low %v10648_v38, %v10691_v2  ;;  %9741 = vmatmul.mubr.msk.f32.gmra.mxu1 %vm1934_vm1, %v1933_v36  ;;  %v2285_v50 = vcombine.low %v2277_v47, %v2284_v12  ;;  %v2318_v59 = vrot.slane %v2304_v63, %v10342_v9  ;;  %v2369_v4 = vrot.slane %v2355_v37, %v10342_v9  ;;  %v16896_v2 = vld [vmem:[#allocation46_spill] sm:$0xff]  ;;  %v16903_v12 = vld [vmem:[#allocation64_spill] sm:$0xff]  ;;  %v16904_v37 = vld [vmem:[#allocation65_spill] sm:$0xff] }
  0xe0   : > { %v2311_v21 = vrot.slane %v16895_v29, %v10342_v9  ;;  %v2320_v40 = vcombine.low %v10445_v56, %v10496_v39  ;;  %9747 = vmatprep.mubr.msk.f32.mxu1 %vm1934_vm1, %v2268_v28  ;;  %v2302_v51 = vcombine.low %v2294_v34, %v2301_v42  ;;  %v11304_v26 = vrot.slane %v2371_v43, %v10342_v9  ;;  %v16902_v28 = vld [vmem:[#allocation61_spill] sm:$0xff] }
  0xe1   : > { %9806 = vmatmul.mubr.msk.f32.vlgmr.msra.gmra.mxu0 %vm1934_vm1, %v3228_v24  ;;  %v11307_v19 = vrot.slane %v2372_v44, %v10342_v9  ;;  %v11310_v52 = vrot.slane %v2388_v49, %v10342_v9  ;;  %v2389_v60 = vcombine.low %v10702_v35, %v10679_v46  ;;  %v2405_v39 = vcombine.low %v10685_v61, %v10727_v1  ;;  %v16905_v44 = vld [vmem:[#allocation67_spill] sm:$0xff]  ;;  %v16906_v49 = vld [vmem:[#allocation68_spill] sm:$0xff] }
  0xe2   : > { %v2328_v38 = vrot.slane %v2320_v40, %v10342_v9  ;;  %v3229_v56 = vcombine.low %v2369_v4, %v11304_v26  ;;  %v2406_v34 = vcombine.low %v10733_v18, %v10744_v6  ;;  %v2422_v41 = vcombine.low %v16896_v2, %v10772_v27  ;;  %v16897_v18 = vld [vmem:[#allocation55_spill] sm:$0xff]  ;;  %v16898_v6 = vld [vmem:[#allocation52_spill] sm:$0xff] }
  0xe3   : > { %9748 = vmatmul.mubr.msk.f32.vlgmr.msra.gmra.mxu1 %vm1934_vm1, %v2285_v50  ;;  %v2319_v36 = vcombine.low %v2311_v21, %v2318_v59  ;;  %v3230_v58 = vcombine.low %v11307_v19, %v11310_v52  ;;  %v2403_v46 = vrot.slane %v2389_v60, %v10342_v9  ;;  %v11330_v35 = vrot.slane %v2405_v39, %v10342_v9  ;;  %v16907_v59 = vld [vmem:[#allocation74_spill] sm:$0xff]  ;;  %v16912_v39 = vld [vmem:[#allocation76_spill] sm:$0xff] }
  0xe4   : > { %v2336_v24 = vcombine.low %v2328_v38, %v11247_v33  ;;  %9750 = vmatprep.mubr.msk.f32.mxu1 %vm1934_vm1, %v2302_v51  ;;  %9808 = vmatprep.mubr.msk.f32.mxu0 %vm1934_vm1, %v3229_v56  ;;  %v11333_v61 = vrot.slane %v2406_v34, %v10342_v9  ;;  %v11336_v1 = vrot.slane %v2422_v41, %v10342_v9  ;;  %v16910_v38 = vld [vmem:[#allocation75_spill] sm:$0xff]  ;;  %v16911_v56 = vld [vmem:[#allocation80_spill] sm:$0xff] }
  0xe5   : > { %9809 = vmatmul.mubr.msk.f32.gmra.mxu0 %vm1934_vm1, %v3230_v58  ;;  %v2353_v33 = vcombine.low %v11262_v55, %v10584_v20  ;;  %v2423_v27 = vcombine.low %v16898_v6, %v16897_v18  ;;  %v2439_v47 = vcombine.low %v16900_v30, %v16899_v13  ;;  %v2440_v32 = vcombine.low %v16902_v28, %v16901_v53  ;;  %v16914_v18 = vld [vmem:[#allocation83_spill] sm:$0xff]  ;;  %v16915_v13 = vld [vmem:[#allocation89_spill] sm:$0xff] }
  0xe6   : > { %v3231_v14 = vcombine.low %v2403_v46, %v11330_v35  ;;  %v3232_v42 = vcombine.low %v11333_v61, %v11336_v1  ;;  %v2370_v63 = vcombine.low %v10617_v57, %v2369_v4  ;;  %v2456_v29 = vcombine.low %v16904_v37, %v16903_v12  ;;  %v16908_v4 = vld [vmem:[#allocation69_spill] sm:$0xff] }
  0xe7   : > { %9751 = vmatmul.mubr.msk.f32.gmra.mxu1 %vm1934_vm1, %v2319_v36  ;;  %v2387_v20 = vcombine.low %v11304_v26, %v11307_v19  ;;  %v2437_v55 = vrot.slane %v2423_v27, %v10342_v9  ;;  %v11358_v21 = vrot.slane %v2439_v47, %v10342_v9  ;;  %v11361_v43 = vrot.slane %v2440_v32, %v10342_v9  ;;  %v16909_v19 = vld [vmem:[#allocation78_spill] sm:$0xff]  ;;  %v16916_v30 = vld [vmem:[#allocation85_spill] sm:$0xff] }
  0xe8   : > { %9753 = vmatprep.mubr.msk.f32.mxu1 %vm1934_vm1, %v2336_v24  ;;  %9811 = vmatprep.mubr.msk.f32.mxu0 %vm1934_vm1, %v3231_v14  ;;  %v11366_v57 = vrot.slane %v2456_v29, %v10342_v9  ;;  %v2457_v50 = vcombine.low %v16906_v49, %v16905_v44  ;;  %v2473_v40 = vcombine.low %v16908_v4, %v16907_v59  ;;  %v16918_v28 = vld [vmem:[#allocation97_spill] sm:$0xff]  ;;  %v16924_v4 = vld [vmem:[#allocation107_spill] sm:$0xff] }
  0xe9   : > { %9812 = vmatmul.mubr.msk.f32.gmra.mxu0 %vm1934_vm1, %v3232_v42  ;;  %v3233_v51 = vcombine.low %v2437_v55, %v11358_v21  ;;  %v2404_v26 = vcombine.low %v11310_v52, %v2403_v46  ;;  %v2474_v60 = vcombine.low %v16910_v38, %v16909_v19  ;;  %v2490_v34 = vcombine.low %v16912_v39, %v16911_v56  ;;  %v16913_v46 = vld [vmem:[#allocation86_spill] sm:$0xff]  ;;  %v16919_v32 = vld [vmem:[#allocation93_spill] sm:$0xff]  ;;  %v16928_v56 = vld [vmem:[#allocation112_spill] sm:$0xff] }
  0xea   : > { %v3234_v2 = vcombine.low %v11361_v43, %v11366_v57  ;;  %v2471_v41 = vrot.slane %v2457_v50, %v10342_v9  ;;  %v11383_v36 = vrot.slane %v2473_v40, %v10342_v9  ;;  %v2455_v58 = vcombine.low %v11358_v21, %v11361_v43  ;;  %v16920_v21 = vld [vmem:[#allocation98_spill] sm:$0xff]  ;;  %v16921_v43 = vld [vmem:[#allocation100_spill] sm:$0xff]  ;;  %v16923_v59 = vld [vmem:[#allocation105_spill] sm:$0xff] }
  0xeb   : > { %9754 = vmatmul.mubr.msk.f32.gmra.mxu1 %vm1934_vm1, %v2353_v33  ;;  %9814 = vmatprep.mubr.msk.f32.mxu0 %vm1934_vm1, %v3233_v51  ;;  %v11390_v52 = vrot.slane %v2474_v60, %v10342_v9  ;;  %v11393_v24 = vrot.slane %v2490_v34, %v10342_v9  ;;  %v2491_v6 = vcombine.low %v16914_v18, %v16913_v46  ;;  %v16917_v33 = vld [vmem:[#allocation91_spill] sm:$0xff]  ;;  %v16925_v51 = vld [vmem:[#allocation106_spill] sm:$0xff] }
  0xec   : > { %9756 = vmatprep.mubr.msk.f32.mxu1 %vm1934_vm1, %v2370_v63  ;;  %v3235_v27 = vcombine.low %v2471_v41, %v11383_v36  ;;  %v2507_v47 = vcombine.low %v16916_v30, %v16915_v13  ;;  %v2508_v53 = vcombine.low %v16917_v33, %v11020_v11  ;;  %v2524_v14 = vcombine.low %v16919_v32, %v16918_v28  ;;  %v16934_v33 = vld [vmem:[#allocation20_spill] sm:$0xff]  ;;  %v16936_v32 = vld [vmem:[#allocation23_spill] sm:$0xff] }
  0xed   : > { %9815 = vmatmul.mubr.msk.f32.gmra.mxu0 %vm1934_vm1, %v3234_v2  ;;  %v3236_v42 = vcombine.low %v11390_v52, %v11393_v24  ;;  %v2505_v12 = vrot.slane %v2491_v6, %v10342_v9  ;;  %v2472_v63 = vcombine.low %v11366_v57, %v2471_v41  ;;  %v2525_v44 = vcombine.low %v16921_v43, %v16920_v21  ;;  %v16922_v57 = vld [vmem:[#allocation101_spill] sm:$0xff]  ;;  %v16929_v2 = vld [vmem:[#allocation18_spill] sm:$0xff] }
  0xee   : > { %9817 = vmatprep.mubr.msk.f32.mxu0 %vm1934_vm1, %v3235_v27  ;;  %v11412_v37 = vrot.slane %v2507_v47, %v10342_v9  ;;  %v11415_v29 = vrot.slane %v2508_v53, %v10342_v9  ;;  %v11418_v11 = vrot.slane %v2524_v14, %v10342_v9  ;;  %v2421_v49 = vcombine.low %v11330_v35, %v11333_v61  ;;  %v16933_v47 = vld [vmem:[#allocation22_spill] sm:$0xff]  ;;  %v16937_v14 = vld [vmem:[#allocation24_spill] sm:$0xff]  ;;  %v16939_v43 = vld [vmem:[#allocation25_spill] sm:$0xff] }
  0xef   : > { %9757 = vmatmul.mubr.msk.f32.gmra.mxu1 %vm1934_vm1, %v2387_v20  ;;  %v2541_v50 = vcombine.low %v16922_v57, %v11110_v48  ;;  %v2542_v40 = vcombine.low %v16924_v4, %v16923_v59  ;;  %v2558_v19 = vcombine.low %v16925_v51, %v11146_v25  ;;  %v2438_v38 = vcombine.low %v11336_v1, %v2437_v55  ;;  %v16926_v1 = vld [vmem:[#allocation114_spill] sm:$0xff]  ;;  %v16927_v55 = vld [vmem:[#allocation113_spill] sm:$0xff] }
  0xf0   : > { %9759 = vmatprep.mubr.msk.f32.mxu1 %vm1934_vm1, %v2404_v26  ;;  %v3237_v60 = vcombine.low %v2505_v12, %v11412_v37  ;;  %v3238_v20 = vcombine.low %v11415_v29, %v11418_v11  ;;  %v11437_v35 = vrot.slane %v2525_v44, %v10342_v9  ;;  %v2559_v26 = vcombine.low %v16927_v55, %v16926_v1  ;;  %v16938_v21 = vld [vmem:[#allocation26_spill] sm:$0xff]  ;;  %v16940_v57 = vld [vmem:[#allocation29_spill] sm:$0xff]  ;;  %v16945_v55 = vld [vmem:[#allocation31_spill] sm:$0xff] }
  0xf1   : > { %9818 = vmatmul.mubr.msk.f32.gmra.mxu0 %vm1934_vm1, %v3236_v42  ;;  %v11441_v48 = vrot.slane %v2541_v50, %v10342_v9  ;;  %v11444_v61 = vrot.slane %v2542_v40, %v10342_v9  ;;  %v11447_v25 = vrot.slane %v2558_v19, %v10342_v9  ;;  %v2575_v39 = vcombine.low %v16928_v56, %v11187_v3  ;;  %v16941_v50 = vld [vmem:[#allocation27_spill] sm:$0xff]  ;;  %v16942_v51 = vld [vmem:[#allocation30_spill] sm:$0xff]  ;;  %v16943_v19 = vld [vmem:[#allocation28_spill] sm:$0xff] }
  0xf2   : > { %9820 = vmatprep.mubr.msk.f32.mxu0 %vm1934_vm1, %v3237_v60  ;;  %v2576_v34 = vcombine.low %v11199_v0, %v11212_v31  ;;  %v2592_v41 = vcombine.low %v11202_v7, %v16929_v2  ;;  %v11462_v18 = vrot.slane %v2559_v26, %v10342_v9  ;;  %v16930_v7 = vld [vmem:[#allocation21_spill] sm:$0xff]  ;;  %v16931_v31 = vld [vmem:[#allocation19_spill] sm:$0xff]  ;;  %v16935_v53 = vcombine.low %v16933_v47, %v16934_v33  ;;  %v16947_v56 = vld [vmem:[#allocation32_spill] sm:$0xff] }
  0xf3   : > { %9760 = vmatmul.mubr.msk.f32.gmra.mxu1 %vm1934_vm1, %v2421_v49  ;;  %v3239_v46 = vcombine.low %v11437_v35, %v11441_v48  ;;  %v11466_v6 = vrot.slane %v2575_v39, %v10342_v9  ;;  %v16932_v27 = vcombine.low %v16930_v7, %v16931_v31  ;;  %v3240_v30 = vcombine.low %v11444_v61, %v11447_v25  ;;  %v16944_v1 = vld [vmem:[#allocation33_spill] sm:$0xff] }
  0xf4   : > { %9762 = vmatprep.mubr.msk.f32.mxu1 %vm1934_vm1, %v2438_v38  ;;  %v11469_v3 = vrot.slane %v2576_v34, %v10342_v9  ;;  %v11472_v0 = vrot.slane %v2592_v41, %v10342_v9  ;;  %v11487_v28 = vrot.slane %v16935_v53, %v10342_v9  ;;  %v2610_v42 = vcombine.low %v16937_v14, %v16936_v32  ;;  %v16949_v34 = vld [vmem:[#allocation35_spill] sm:$0xff]  ;;  %v16950_v41 = vld [vmem:[#allocation38_spill] sm:$0xff]  ;;  %v16953_v32 = vld [vmem:[#allocation40_spill] sm:$0xff] }
  0xf5   : > { %v11478_v13 = vrot.slane %v16932_v27, %v10342_v9  ;;  %9821 = vmatmul.mubr.msk.f32.gmra.mxu0 %vm1934_vm1, %v3238_v20  ;;  %v2626_v44 = vcombine.low %v16939_v43, %v16938_v21  ;;  %v3241_v49 = vcombine.low %v11462_v18, %v11466_v6  ;;  %v2627_v59 = vcombine.low %v16941_v50, %v16940_v57  ;;  %v16955_v14 = vld [vmem:[#allocation41_spill] sm:$0xff]  ;;  %v16956_v21 = vld [vmem:[#allocation43_spill] sm:$0xff]  ;;  %v16959_v57 = vld [vmem:[#allocation44_spill] sm:$0xff] }
  0xf6   : > { %9823 = vmatprep.mubr.msk.f32.mxu0 %vm1934_vm1, %v3239_v46  ;;  %v2489_v4 = vcombine.low %v11383_v36, %v11390_v52  ;;  %v2643_v38 = vcombine.low %v16943_v19, %v16942_v51  ;;  %v2506_v60 = vcombine.low %v11393_v24, %v2505_v12  ;;  %v3242_v20 = vcombine.low %v11469_v3, %v11472_v0  ;;  %v16948_v12 = vld [vmem:[#allocation36_spill] sm:$0xff]  ;;  %v16951_v46 = vld [vmem:[#allocation37_spill] sm:$0xff]  ;;  %v16960_v51 = vld [vmem:[#allocation50_spill] sm:$0xff] }
  0xf7   : > { %9763 = vmatmul.mubr.msk.f32.gmra.mxu1 %vm1934_vm1, %v2455_v58  ;;  %v3243_v40 = vcombine.low %v11478_v13, %v11487_v28  ;;  %v2644_v26 = vcombine.low %v16945_v55, %v16944_v1  ;;  %v16946_v58 = vld [vmem:[#allocation34_spill] sm:$0xff]  ;;  %v11515_v36 = vrot.slane %v2610_v42, %v10342_v9  ;;  %v11518_v52 = vrot.slane %v2626_v44, %v10342_v9  ;;  %v16957_v43 = vld [vmem:[#allocation45_spill] sm:$0xff]  ;;  %v16961_v19 = vld [vmem:[#allocation47_spill] sm:$0xff] }
  0xf8   : > { %9765 = vmatprep.mubr.msk.f32.mxu1 %vm1934_vm1, %v2472_v63  ;;  %v2660_v39 = vcombine.low %v16947_v56, %v16946_v58  ;;  %v11521_v63 = vrot.slane %v2627_v59, %v10342_v9  ;;  %v11524_v24 = vrot.slane %v2643_v38, %v10342_v9  ;;  %v2661_v2 = vcombine.low %v16949_v34, %v16948_v12  ;;  %v16963_v1 = vld [vmem:[#allocation49_spill] sm:$0xff]  ;;  %v16965_v58 = vld [vmem:[#allocation56_spill] sm:$0xff]  ;;  %v16967_v56 = vld [vmem:[#allocation54_spill] sm:$0xff] }
  0xf9   : > { %9824 = vmatmul.mubr.msk.f32.gmra.mxu0 %vm1934_vm1, %v3240_v30  ;;  %v2677_v7 = vcombine.low %v16951_v46, %v16950_v41  ;;  %v2523_v31 = vcombine.low %v11412_v37, %v11415_v29  ;;  %v2540_v27 = vcombine.low %v11418_v11, %v11437_v35  ;;  %v2557_v30 = vcombine.low %v11441_v48, %v11444_v61  ;;  %v16952_v29 = vld [vmem:[#allocation39_spill] sm:$0xff]  ;;  %v16954_v35 = vld [vmem:[#allocation42_spill] sm:$0xff] }
  0xfa   : > { %9826 = vmatprep.mubr.msk.f32.mxu0 %vm1934_vm1, %v3241_v49  ;;  %v11540_v47 = vrot.slane %v2644_v26, %v10342_v9  ;;  %v11543_v33 = vrot.slane %v2660_v39, %v10342_v9  ;;  %v3244_v53 = vcombine.low %v11515_v36, %v11518_v52  ;;  %v3245_v37 = vcombine.low %v11521_v63, %v11524_v24  ;;  %v16958_v49 = vld [vmem:[#allocation48_spill] sm:$0xff]  ;;  %v16964_v26 = vld [vmem:[#allocation57_spill] sm:$0xff]  ;;  %v16969_v39 = vld [vmem:[#allocation63_spill] sm:$0xff] }
  0xfb   : > { %9766 = vmatmul.mubr.msk.f32.gmra.mxu1 %vm1934_vm1, %v2489_v4  ;;  %v2678_v11 = vcombine.low %v16953_v32, %v16952_v29  ;;  %v2694_v48 = vcombine.low %v16955_v14, %v16954_v35  ;;  %v11556_v61 = vrot.slane %v2661_v2, %v10342_v9  ;;  %v11559_v42 = vrot.slane %v2677_v7, %v10342_v9  ;;  %v16970_v34 = vld [vmem:[#allocation70_spill] sm:$0xff]  ;;  %v16972_v29 = vld [vmem:[#allocation71_spill] sm:$0xff]  ;;  %v16973_v32 = vld [vmem:[#allocation72_spill] sm:$0xff] }
  0xfc   : > { %9768 = vmatprep.mubr.msk.f32.mxu1 %vm1934_vm1, %v2506_v60  ;;  %v2695_v44 = vcombine.low %v16957_v43, %v16956_v21  ;;  %v2711_v50 = vcombine.low %v16959_v57, %v16958_v49  ;;  %v2574_v59 = vcombine.low %v11447_v25, %v11462_v18  ;;  %v2591_v4 = vcombine.low %v11466_v6, %v11469_v3  ;;  %v16966_v18 = vld [vmem:[#allocation59_spill] sm:$0xff]  ;;  %v16971_v2 = vld [vmem:[#allocation66_spill] sm:$0xff]  ;;  %v16975_v35 = vld [vmem:[#allocation73_spill] sm:$0xff] }
  0xfd   : > { %9827 = vmatmul.mubr.msk.f32.gmra.mxu0 %vm1934_vm1, %v3242_v20  ;;  %v2712_v38 = vcombine.low %v16961_v19, %v16960_v51  ;;  %v3246_v60 = vcombine.low %v11540_v47, %v11543_v33  ;;  %v16962_v20 = vld [vmem:[#allocation53_spill] sm:$0xff]  ;;  %v2729_v25 = vcombine.low %v16965_v58, %v16964_v26  ;;  %v2745_v6 = vcombine.low %v16967_v56, %v16966_v18  ;;  %v16977_v14 = vld [vmem:[#allocation79_spill] sm:$0xff]  ;;  %v16982_v18 = vld [vmem:[#allocation92_spill] sm:$0xff] }
  0xfe   : > { %9829 = vmatprep.mubr.msk.f32.mxu0 %vm1934_vm1, %v3243_v40  ;;  %v2608_v40 = vcombine.low %v11472_v0, %v11478_v13  ;;  %v2728_v55 = vcombine.low %v16963_v1, %v16962_v20  ;;  %v11585_v3 = vrot.slane %v2678_v11, %v10342_v9  ;;  %v11588_v0 = vrot.slane %v2694_v48, %v10342_v9  ;;  %v16968_v13 = vld [vmem:[#allocation62_spill] sm:$0xff]  ;;  %v16974_v11 = vld [vmem:[#allocation77_spill] sm:$0xff]  ;;  %v16983_v56 = vld [vmem:[#allocation88_spill] sm:$0xff] }
  0xff   : > { %9769 = vmatmul.mubr.msk.f32.gmra.mxu1 %vm1934_vm1, %v2523_v31  ;;  %v2746_v12 = vcombine.low %v16969_v39, %v16968_v13  ;;  %v2762_v41 = vcombine.low %v16971_v2, %v16970_v34  ;;  %v2625_v46 = vcombine.low %v11487_v28, %v11515_v36  ;;  %v3247_v7 = vcombine.low %v11556_v61, %v11559_v42  ;;  %v16976_v36 = vld [vmem:[#allocation82_spill] sm:$0xff]  ;;  %v16979_v49 = vld [vmem:[#allocation81_spill] sm:$0xff]  ;;  %v16985_v13 = vld [vmem:[#allocation103_spill] sm:$0xff] }
 0x100   : > { %9771 = vmatprep.mubr.msk.f32.mxu1 %vm1934_vm1, %v2540_v27  ;;  %v11600_v31 = vrot.slane %v2695_v44, %v10342_v9  ;;  %v11603_v27 = vrot.slane %v2711_v50, %v10342_v9  ;;  %v2779_v28 = vcombine.low %v16975_v35, %v16974_v11  ;;  %v2780_v48 = vcombine.low %v16977_v14, %v16976_v36  ;;  %v16978_v44 = vld [vmem:[#allocation84_spill] sm:$0xff]  ;;  %v16987_v34 = vld [vmem:[#allocation111_spill] sm:$0xff]  ;;  %v16989_v2 = vld [vmem:[#allocation94_spill] sm:$0xff] }
 0x101   : > { %9830 = vmatmul.mubr.msk.f32.gmra.mxu0 %vm1934_vm1, %v3244_v53  ;;  %v11607_v53 = vrot.slane %v2712_v38, %v10342_v9  ;;  %v11617_v21 = vrot.slane %v2728_v55, %v10342_v9  ;;  %v11620_v43 = vrot.slane %v2729_v25, %v10342_v9  ;;  %v2796_v57 = vcombine.low %v16979_v49, %v16978_v44 }
 0x102   : > { %9832 = vmatprep.mubr.msk.f32.mxu0 %vm1934_vm1, %v3245_v37  ;;  %v2763_v37 = vcombine.low %v16973_v32, %v16972_v29  ;;  %v3248_v50 = vcombine.low %v11585_v3, %v11588_v0  ;;  %v11633_v51 = vrot.slane %v2746_v12, %v10342_v9  ;;  %v11636_v19 = vrot.slane %v2762_v41, %v10342_v9  ;;  %v16986_v12 = vld [vmem:[#allocation108_spill] sm:$0xff]  ;;  %v16992_v32 = vld [vmem:[#allocation110_spill] sm:$0xff] }
 0x103   : > { %9772 = vmatmul.mubr.msk.f32.gmra.mxu1 %vm1934_vm1, %v2557_v30  ;;  %v11623_v30 = vrot.slane %v2745_v6, %v10342_v9  ;;  %v2659_v38 = vcombine.low %v11524_v24, %v11540_v47  ;;  %v11647_v1 = vrot.slane %v2779_v28, %v10342_v9  ;;  %v11656_v55 = vrot.slane %v2796_v57, %v10342_v9  ;;  %v16980_v24 = vld [vmem:[#allocation90_spill] sm:$0xff]  ;;  %v16981_v47 = vld [vmem:[#allocation87_spill] sm:$0xff]  ;;  %v16984_v6 = vld [vmem:[#allocation109_spill] sm:$0xff] }
 0x104   : > { %9774 = vmatprep.mubr.msk.f32.mxu1 %vm1934_vm1, %v2574_v59  ;;  %v2642_v59 = vcombine.low %v11518_v52, %v11521_v63  ;;  %v11644_v20 = vrot.slane %v2763_v37, %v10342_v9  ;;  %v2676_v52 = vcombine.low %v11543_v33, %v11556_v61  ;;  %v11653_v63 = vrot.slane %v2780_v48, %v10342_v9  ;;  %v16993_v48 = vld [vmem:[#allocation115_spill] sm:$0xff] }
 0x105   : > { %9833 = vmatmul.mubr.msk.f32.gmra.mxu0 %vm1934_vm1, %v3246_v60  ;;  %v3249_v60 = vcombine.low %v11600_v31, %v11603_v27  ;;  %v2797_v26 = vcombine.low %v16981_v47, %v16980_v24  ;;  %v3250_v58 = vcombine.low %v11607_v53, %v11617_v21  ;;  %v3251_v33 = vcombine.low %v11620_v43, %v11623_v30 }
 0x106   : > { %9835 = vmatprep.mubr.msk.f32.mxu0 %vm1934_vm1, %v3247_v7  ;;  %v2710_v61 = vcombine.low %v11588_v0, %v11600_v31  ;;  %v3252_v25 = vcombine.low %v11633_v51, %v11636_v19  ;;  %v2847_v39 = vcombine.low %v16985_v13, %v16984_v6  ;;  %v16988_v0 = vld [vmem:[#allocation95_spill] sm:$0xff]  ;;  %v16990_v7 = vld [vmem:[#allocation102_spill] sm:$0xff]  ;;  %v16991_v31 = vld [vmem:[#allocation96_spill] sm:$0xff]  ;;  %v3258_v37 = vcombine.low %v16992_v32, %v11164_v8 }
 0x107   : > { %9775 = vmatmul.mubr.msk.f32.gmra.mxu1 %vm1934_vm1, %v2591_v4  ;;  %v2693_v4 = vcombine.low %v11559_v42, %v11585_v3  ;;  %v2848_v42 = vcombine.low %v16987_v34, %v16986_v12  ;;  %v3253_v3 = vcombine.low %v11644_v20, %v11647_v1  ;;  %v2814_v41 = vcombine.low %v16989_v2, %v16988_v0 }
 0x108   : > { %9777 = vmatprep.mubr.msk.f32.mxu1 %vm1934_vm1, %v2608_v40  ;;  %v2813_v40 = vcombine.low %v16983_v56, %v16982_v18  ;;  %v2830_v29 = vcombine.low %v16991_v31, %v16990_v7  ;;  %v3254_v11 = vcombine.low %v11653_v63, %v11656_v55  ;;  %v2811_v35 = vrot.slane %v2797_v26, %v10342_v9 }
 0x109   : > { %9836 = vmatmul.mubr.msk.f32.gmra.mxu0 %vm1934_vm1, %v3248_v50  ;;  %v11692_v28 = vrot.slane %v2847_v39, %v10342_v9  ;;  %v11695_v36 = vrot.slane %v2848_v42, %v10342_v9  ;;  %v3265_v14 = vrot.slane %v3258_v37, %v10342_v9  ;;  %v3267_v8 = vcombine.low %v16993_v48, %v11194_v54  ;;  %v16995_v50 = vld [vmem:[#allocation99_spill] sm:$0xff] }
 0x10a   : > { %9838 = vmatprep.mubr.msk.f32.mxu0 %vm1934_vm1, %v3249_v60  ;;  %v3284_v49 = vcombine.low %v11225_v5, %v11239_v10  ;;  %v2821_v57 = vrot.slane %v2813_v40, %v10342_v9  ;;  %v16996_v60 = vld [vmem:[#allocation104_spill] sm:$0xff]  ;;  %v2828_v40 = vrot.slane %v2814_v41, %v10342_v9  ;;  %v2838_v6 = vrot.slane %v2830_v29, %v10342_v9 }
 0x10b   : > { %9778 = vmatmul.mubr.msk.f32.gmra.mxu1 %vm1934_vm1, %v2625_v46  ;;  %v16994_v46 = vld [vmem:[#allocation116_spill] sm:$0xff]  ;;  %v2831_v24 = vcombine.low %v16996_v60, %v16995_v50  ;;  %v2863_v47 = vcombine.low %v11692_v28, %v11695_v36  ;;  %v3266_v54 = vcombine.low %v11695_v36, %v3265_v14  ;;  %v2744_v0 = vcombine.low %v11617_v21, %v11620_v43 }
 0x10c   : > { %9780 = vmatprep.mubr.msk.f32.mxu1 %vm1934_vm1, %v2642_v59  ;;  %v3268_v44 = vcombine.low %v16994_v46, %v11218_v45  ;;  %v3285_v59 = vcombine.low %v11221_v62, %v10347_v15  ;;  %v3275_v45 = vrot.slane %v3267_v8, %v10342_v9  ;;  %v3292_v10 = vrot.slane %v3284_v49, %v10342_v9  ;;  %v16998_v62 = vld [vmem:[#allocation16_spill] sm:$0xff] }
 0x10d   : > { %9839 = vmatmul.mubr.msk.f32.gmra.mxu0 %vm1934_vm1, %v3250_v58  ;;  %v16997_v58 = vld [vmem:[#allocation15_spill] sm:$0xff]  ;;  %v3302_v18 = vcombine.low %v16998_v62, %v10353_v17  ;;  %v2812_v21 = vcombine.low %v11656_v55, %v2811_v35  ;;  %v2829_v43 = vcombine.low %v2821_v57, %v2828_v40 }
 0x10e   : > { %9841 = vmatprep.mubr.msk.f32.mxu0 %vm1934_vm1, %v3251_v33  ;;  %v3282_v5 = vrot.slane %v3268_v44, %v10342_v9  ;;  %v3299_v26 = vrot.slane %v3285_v59, %v10342_v9  ;;  %v3301_v15 = vcombine.low %v16997_v58, %v10350_v16  ;;  %v16999_v33 = vld [vmem:[#allocation17_spill] sm:$0xff] }
 0x10f   : > { %9781 = vmatmul.mubr.msk.f32.gmra.mxu1 %vm1934_vm1, %v2659_v38  ;;  %v3318_v56 = vcombine.low %v16999_v33, %v10363_v22  ;;  %v17000_v38 = vld [vmem:[#allocation117_spill] sm:$0xff]  ;;  %v3316_v17 = vrot.slane %v3302_v18, %v10342_v9  ;;  %v3255_v22 = vcombine.low %v2811_v35, %v2821_v57 }
 0x110   : > { %9783 = vmatprep.mubr.msk.f32.mxu1 %vm1934_vm1, %v2676_v52  ;;  %v3283_v13 = vcombine.low %v3275_v45, %v3282_v5  ;;  %v3319_v39 = vcombine.low %v17000_v38, %v10366_v23  ;;  %v3300_v12 = vcombine.low %v3292_v10, %v3299_v26  ;;  %v3309_v16 = vrot.slane %v3301_v15, %v10342_v9 }
 0x111   : > { %9842 = vmatmul.mubr.msk.f32.gmra.mxu0 %vm1934_vm1, %v3252_v25  ;;  %v3326_v34 = vrot.slane %v3318_v56, %v10342_v9  ;;  %v2845_v52 = vrot.slane %v2831_v24, %v10342_v9  ;;  %v2727_v23 = vcombine.low %v11603_v27, %v11607_v53  ;;  %v2778_v27 = vcombine.low %v11636_v19, %v11644_v20 }
 0x112   : > { %9844 = vmatprep.mubr.msk.f32.mxu0 %vm1934_vm1, %v3253_v3  ;;  %v3333_v42 = vrot.slane %v3319_v39, %v10342_v9  ;;  %v3317_v25 = vcombine.low %v3309_v16, %v3316_v17  ;;  %v3256_v3 = vcombine.low %v2828_v40, %v2838_v6  ;;  %v2795_v53 = vcombine.low %v11647_v1, %v11653_v63 }
 0x113   : > { %9784 = vmatmul.mubr.msk.f32.gmra.mxu1 %vm1934_vm1, %v2693_v4  ;;  %v3257_v41 = vcombine.low %v2845_v52, %v11692_v28  ;;  %v2761_v4 = vcombine.low %v11623_v30, %v11633_v51  ;;  %v2846_v30 = vcombine.low %v2838_v6, %v2845_v52 }
 0x114   : > { %9786 = vmatprep.mubr.msk.f32.mxu1 %vm1934_vm1, %v2710_v61  ;;  %v3334_v2 = vcombine.low %v3326_v34, %v3333_v42 }
 0x115   : > { %9845 = vmatmul.mubr.msk.f32.gmra.mxu0 %vm1934_vm1, %v3254_v11 }
 0x116   : > { %9847 = vmatprep.mubr.msk.f32.mxu0 %vm1934_vm1, %v3255_v22 }
 0x117   : > { %9787 = vmatmul.mubr.msk.f32.gmra.mxu1 %vm1934_vm1, %v2727_v23 }
 0x118   : > { %9789 = vmatprep.mubr.msk.f32.mxu1 %vm1934_vm1, %v2744_v0 }
 0x119   : > { %9848 = vmatmul.mubr.msk.f32.gmra.mxu0 %vm1934_vm1, %v3256_v3 }
 0x11a   : > { %9850 = vmatprep.mubr.msk.f32.mxu0 %vm1934_vm1, %v3257_v41 }
 0x11b   : > { %9790 = vmatmul.mubr.msk.f32.gmra.mxu1 %vm1934_vm1, %v2761_v4 }
 0x11c   : > { %9792 = vmatprep.mubr.msk.f32.mxu1 %vm1934_vm1, %v2778_v27 }
 0x11d   : > { %9851 = vmatmul.mubr.msk.f32.gmra.mxu0 %vm1934_vm1, %v3266_v54 }
 0x11e   : > { %9853 = vmatprep.mubr.msk.f32.mxu0 %vm1934_vm1, %v3283_v13 }
 0x11f   : > { %9793 = vmatmul.mubr.msk.f32.gmra.mxu1 %vm1934_vm1, %v2795_v53 }
 0x120   : > { %9795 = vmatprep.mubr.msk.f32.mxu1 %vm1934_vm1, %v2812_v21 }
 0x121   : > { %9854 = vmatmul.mubr.msk.f32.gmra.mxu0 %vm1934_vm1, %v3300_v12 }
 0x122   : > { %9856 = vmatprep.mubr.msk.f32.mxu0 %vm1934_vm1, %v3317_v25 }
 0x123   : > { %9796 = vmatmul.mubr.msk.f32.gmra.mxu1 %vm1934_vm1, %v2829_v43 }
 0x124   : > { %9798 = vmatprep.mubr.msk.f32.mxu1 %vm1934_vm1, %v2846_v30 }
 0x125   : > { %9857 = vmatmul.mubr.msk.f32.gmra.mxu0 %vm1934_vm1, %v3334_v2 }
 0x127   : > { %9799 = vmatmul.mubr.msk.f32.gmra.mxu1 %vm1934_vm1, %v2863_v47 }
 0x135   : > { %v9691_v51 = vpop.f32.mrf.mxu0 }
 0x137   : > { %v2073_v20 = vpop.f32.mrf.mxu0 }
 0x138   : > { %v11770_v19 = vpop.f32.mrf.mxu1 }
 0x13a   : > { %v11772_v1 = vpop.f32.mrf.mxu1 }
 0x143   : > { %v9694_v63 = vpop.f32.mrf.mxu0 }
 0x145   : > { %v2083_v61 = vpop.f32.mrf.mxu0 }
 0x146   : > { %v11774_v55 = vpop.f32.mrf.mxu1 }
 0x148   : > { %v11776_v7 = vpop.f32.mrf.mxu1 }
 0x150   : > { %v11778_v31 = vpop.f32.mrf.mxu0 }
 0x152   : > { %v11782_v32 = vpop.f32.mrf.mxu0 }
 0x153   : > { %v11780_v29 = vpop.f32.mrf.mxu1 }
 0x155   : > { %v11784_v37 = vpop.f32.mrf.mxu1 }
 0x15d   : > { %v11786_v11 = vpop.f32.mrf.mxu0 }
 0x15f   : > { %v11788_v35 = vpop.f32.mrf.mxu1  ;;  %v11790_v28 = vpop.f32.mrf.mxu0 }
 0x161   : > { %v11792_v36 = vpop.f32.mrf.mxu1 }
 0x16c   : > { %v11794_v14 = vpop.f32.mrf.mxu0  ;;  %v11796_v48 = vpop.f32.mrf.mxu1 }
 0x16e   : > { %v11798_v8 = vpop.f32.mrf.mxu0  ;;  %v11800_v46 = vpop.f32.mrf.mxu1 }
 0x177   : > { %v11802_v44 = vpop.f32.mrf.mxu0 }
 0x179   : > { %v11806_v57 = vpop.f32.mrf.mxu0 }
 0x17a   : > { %v11804_v49 = vpop.f32.mrf.mxu1 }
 0x17c   : > { %v11808_v50 = vpop.f32.mrf.mxu1 }
 0x184   : > { %v11810_v60 = vpop.f32.mrf.mxu0 }
 0x186   : > { %v11814_v59 = vpop.f32.mrf.mxu0 }
 0x187   : > { %v11812_v24 = vpop.f32.mrf.mxu1 }
 0x189   : > { %v11816_v47 = vpop.f32.mrf.mxu1 }
 0x190   : > { %v11818_v54 = vpop.f32.mrf.mxu0 }
 0x192   : > { %v11822_v5 = vpop.f32.mrf.mxu0 }
 0x194   : > { %v11820_v45 = vpop.f32.mrf.mxu1 }
 0x196   : > { %v11824_v10 = vpop.f32.mrf.mxu1 }
 0x19d   : > { %v11826_v26 = vpop.f32.mrf.mxu0 }
 0x19f   : > { %v11828_v58 = vpop.f32.mrf.mxu1  ;;  %v11830_v15 = vpop.f32.mrf.mxu0 }
 0x1a1   : > { %v11832_v62 = vpop.f32.mrf.mxu1  ;;  %v9807_v33 = vpop.f32.mrf.mxu0 }
 0x1a3   : > { %v9749_v18 = vpop.f32.mrf.mxu1  ;;  %v3473_v38 = vpop.f32.mrf.mxu0 }
 0x1a4   : > { %v3008_v56 = vadd.f32 %v9749_v18, %v9691_v51 }
 0x1a5   : > { %v3002_v40 = vpop.f32.mrf.mxu1  ;;  %v9810_v22 = vpop.f32.mrf.mxu0 }
 0x1a6   : > { %v3653_v6 = vadd.f32 %v9807_v33, %v3008_v56  ;;  %v3003_v13 = vadd.f32 %v3002_v40, %v2073_v20 }
 0x1a7   : > { %v9752_v39 = vpop.f32.mrf.mxu1  ;;  %v3483_v3 = vpop.f32.mrf.mxu0 }
 0x1a8   : > { %v3741_v12 = vcombine.high %v3653_v6, %v3653_v6  ;;  %v11835_v16 = vrot.slane %v3653_v6, %v10342_v9  ;;  %v3652_v17 = vadd.f32 %v3473_v38, %v3003_v13  ;;  %v3018_v0 = vadd.f32 %v9752_v39, %v9694_v63 }
 0x1a9   : > { %v3012_v34 = vpop.f32.mrf.mxu1 }
 0x1aa   : > { %17001 = vst [vmem:[#allocation46_spill] sm:$0xff] %v11835_v16  ;;  %5388 = vrot.lane.b32.xlu1 %v11835_v16, %s10131_s3  ;;  %v11840_v52 = vrot.slane %v3652_v17, %v10342_v9  ;;  %v11844_v42 = vcombine.high %v11835_v16, %v11835_v16  ;;  %v11847_v23 = vrot.slane %v3741_v12, %v10342_v9  ;;  %v16527_v51 = vrot.slane %v11835_v16, 7  ;;  %v9813_v12 = vpop.f32.mrf.mxu0 }
 0x1ab   : > { %v3724_v25 = vcombine.high %v3652_v17, %v3652_v17  ;;  %v3013_v2 = vadd.f32 %v3012_v34, %v2083_v61  ;;  %v3655_v27 = vadd.f32 %v9810_v22, %v3018_v0  ;;  %v9755_v33 = vpop.f32.mrf.mxu1 }
 0x1ac   : > { %17002 = vst [vmem:[#allocation55_spill] sm:$0xff] %v11840_v52  ;;  %17003 = vst [vmem:[#allocation52_spill] sm:$0xff] %v11844_v42  ;;  %5390 = vrot.lane.b32.xlu0 %v11844_v42, %s10131_s3  ;;  %v11855_v41 = vcombine.high %v11840_v52, %v11840_v52  ;;  %v11868_v21 = vcombine.high %v11847_v23, %v11847_v23  ;;  %v4484_v20 = vrot.slane %v11844_v42, 7  ;;  %v4483_v18 = vrot.slane %v16527_v51, 2 }
 0x1ad   : > { %17004 = vst [vmem:[#allocation58_spill] sm:$0xff] %v11847_v23  ;;  %v11858_v4 = vrot.slane %v3724_v25, %v10342_v9  ;;  %v11860_v53 = vadd.f32 %v3483_v3, %v3013_v2  ;;  %v11872_v43 = vrot.slane %v3655_v27, %v10342_v9  ;;  %v3775_v63 = vcombine.high %v3655_v27, %v3655_v27  ;;  %v3022_v51 = vpop.f32.mrf.mxu1 }
 0x1ae   : > { %5392 = vrot.lane.b32.xlu1 %v11847_v23, %s10131_s3  ;;  %17005 = vst [vmem:[#allocation51_spill] sm:$0xff] %v11855_v41  ;;  %17007 = vst [vmem:[#allocation61_spill] sm:$0xff] %v11868_v21  ;;  %v4486_v40 = vrot.slane %v4484_v20, 2  ;;  %v4487_v6 = vrot.slane %v11847_v23, 7  ;;  %v3028_v38 = vadd.f32 %v9755_v33, %v11778_v31  ;;  %v4485_v39 = vsel %vm11892_vm7, %v4483_v18, %v4484_v20  ;;  %v3493_v23 = vpop.f32.mrf.mxu0 }
 0x1af   : > { %17006 = vst [vmem:[#allocation60_spill] sm:$0xff] %v11858_v4  ;;  %17008 = vst [vmem:[#allocation64_spill] sm:$0xff] %v11872_v43  ;;  %v11876_v30 = vrot.slane %v11860_v53, %v10342_v9  ;;  %v11886_v61 = vcombine.high %v11872_v43, %v11872_v43  ;;  %v11900_v13 = vrot.slane %v3775_v63, %v10342_v9  ;;  %v4475_v25 = vrot.slane %v11858_v4, 7 }
 0x1b0   : > { %5382 = vrot.lane.b32.xlu0 %v11855_v41, %s10131_s3  ;;  %v4488_v17 = vsel %vm11892_vm7, %v4486_v40, %v4487_v6  ;;  %v11911_v34 = vcombine.high %v11858_v4, %v11858_v4  ;;  %v3657_v22 = vadd.f32 %v9813_v12, %v3028_v38  ;;  %v4472_v2 = vrot.slane %v11855_v41, 7 }
 0x1b1   : > { %17009 = vst [vmem:[#allocation65_spill] sm:$0xff] %v11886_v61  ;;  %17012 = vst [vmem:[#allocation67_spill] sm:$0xff] %v11900_v13  ;;  %v11915_v31 = vcombine.high %v11900_v13, %v11900_v13  ;;  %v4477_v3 = vrot.slane %v4475_v25, 2  ;;  %v4490_v20 = vrot.slane %v11868_v21, 7  ;;  %v9547_v63 = vrot.slane %v11840_v52, 9 }
 0x1b2   : > { %5384 = vrot.lane.b32.xlu1 %v11858_v4, %s10131_s3  ;;  %17013 = vst [vmem:[#allocation68_spill] sm:$0xff] %v11911_v34  ;;  %v11923_v0 = vrot.slane %v3657_v22, %v10342_v9  ;;  %v4478_v27 = vrot.slane %v11911_v34, 7  ;;  %v4489_v33 = vrot.slane %v4487_v6, 2  ;;  %v16530_v12 = vrot.slane %v11872_v43, 7 }
 0x1b3   : > { %17014 = vst [vmem:[#allocation74_spill] sm:$0xff] %v11915_v31  ;;  %v4473_v18 = vsel %vm11892_vm7, %v9547_v63, %v4472_v2  ;;  %v4492_v38 = vrot.slane %v4490_v20, 2 }
 0x1b4   : > { %5394 = vrot.lane.b32.xlu0 %v11868_v21, %s10131_s3  ;;  %17015 = vst [vmem:[#allocation69_spill] sm:$0xff] %v11923_v0  ;;  %v4479_v40 = vsel %vm11892_vm7, %v4477_v3, %v4478_v27  ;;  %v4491_v63 = vsel %vm11892_vm7, %v4489_v33, %v4490_v20  ;;  %v4505_v3 = vrot.slane %v16530_v12, 2  ;;  %v4474_v21 = vrot.slane %v4472_v2, 2  ;;  %v9816_v12 = vpop.f32.mrf.mxu0 }
 0x1b6   : > { %5396 = vrot.lane.b32.xlu1 %v11876_v30, %s10131_s3 }
 0x1b8   : > { %5402 = vrot.lane.b32.xlu0 %v11872_v43, %s10131_s3 }
 0x1ba   : > { %5404 = vrot.lane.b32.xlu1 %v11886_v61, %s10131_s3 }
 0x1bc   : > { %4878 = vrot.lane.b32.xlu0 %v4485_v39, %s10132_s9  ;;  %v4493_v39 = vrot.slane %v11876_v30, 7 }
 0x1be   : > { %4880 = vrot.lane.b32.xlu1 %v4488_v17, %s10132_s9  ;;  %v3758_v17 = vcombine.high %v11860_v53, %v11860_v53  ;;  %v4494_v6 = vsel %vm11892_vm7, %v4492_v38, %v4493_v39  ;;  %v3023_v53 = vadd.f32 %v3022_v51, %v11782_v32  ;;  %v3809_v38 = vcombine.high %v3657_v22, %v3657_v22 }
 0x1bf   : > { %v4476_v39 = vsel %vm11892_vm7, %v4474_v21, %v4475_v25  ;;  %v11975_v51 = vcombine.high %v11876_v30, %v11876_v30  ;;  %v4480_v21 = vrot.slane %v4478_v27, 2  ;;  %v4509_v22 = vrot.slane %v11900_v13, 7 }
 0x1c0   : > { %5386 = vrot.lane.b32.xlu0 %v11911_v34, %s10131_s3  ;;  %v3656_v33 = vadd.f32 %v3493_v23, %v3023_v53  ;;  %v11978_v23 = vrot.slane %v3809_v38, %v10342_v9  ;;  %v11987_v25 = vcombine.high %v11923_v0, %v11923_v0  ;;  %v4512_v53 = vrot.slane %v11915_v31, 7 }
 0x1c1   : > { %17019 = vst [vmem:[#allocation76_spill] sm:$0xff] %v11975_v51  ;;  %v9548_v2 = vrot.slane %v11975_v51, 9 }
 0x1c2   : > { %5408 = vrot.lane.b32.xlu1 %v11915_v31, %s10131_s3  ;;  %v11971_v32 = vrot.slane %v3656_v33, %v10342_v9  ;;  %17020 = vst [vmem:[#allocation86_spill] sm:$0xff] %v11978_v23  ;;  %17021 = vst [vmem:[#allocation83_spill] sm:$0xff] %v11987_v25 }
 0x1c4   : > { %5406 = vrot.lane.b32.xlu0 %v11900_v13, %s10131_s3  ;;  %17018 = vst [vmem:[#allocation80_spill] sm:$0xff] %v11971_v32 }
 0x1c6   : > { %5416 = vrot.lane.b32.xlu1 %v11923_v0, %s10131_s3 }
 0x1c8   : > { %4870 = vrot.lane.b32.xlu0 %v4473_v18, %s10132_s9  ;;  %v4506_v18 = vrot.slane %v11886_v61, 7 }
 0x1ca   : > { %4874 = vrot.lane.b32.xlu1 %v4479_v40, %s10132_s9  ;;  %v11953_v40 = vrot.slane %v3758_v17, %v10342_v9  ;;  %v4507_v20 = vsel %vm11892_vm7, %v4505_v3, %v4506_v18  ;;  %v4511_v3 = vrot.slane %v4509_v22, 2  ;;  %v4508_v38 = vrot.slane %v4506_v18, 2  ;;  %v3503_v18 = vpop.f32.mrf.mxu0 }
 0x1cc   : > { %4882 = vrot.lane.b32.xlu0 %v4491_v63, %s10132_s9  ;;  %17016 = vst [vmem:[#allocation78_spill] sm:$0xff] %v11953_v40  ;;  %v11965_v17 = vcombine.high %v11953_v40, %v11953_v40  ;;  %v4497_v30 = vrot.slane %v11953_v40, 7  ;;  %v9758_v63 = vpop.f32.mrf.mxu1  ;;  %v4513_v61 = vsel %vm11892_vm7, %v4511_v3, %v4512_v53 }
 0x1ce   : > { %4884 = vrot.lane.b32.xlu1 %v4494_v6, %s10132_s9  ;;  %17017 = vst [vmem:[#allocation75_spill] sm:$0xff] %v11965_v17  ;;  %v17022_v6 = vrot.slane %v11835_v16, 7  ;;  %v4499_v31 = vrot.slane %v4497_v30, 2 }
 0x1d0   : > { %5398 = vrot.lane.b32.xlu0 %v11953_v40, %s10131_s3  ;;  %v4482_v27 = vsel %vm11892_vm7, %v4480_v21, %v17022_v6  ;;  %v3038_v21 = vadd.f32 %v9758_v63, %v11786_v11  ;;  %v12016_v11 = vcombine.high %v11978_v23, %v11978_v23  ;;  %v4515_v63 = vrot.slane %v11971_v32, 7 }
 0x1d2   : > { %4892 = vrot.lane.b32.xlu1 %v4507_v20, %s10132_s9  ;;  %v4498_v20 = vsel %vm11892_vm7, %v9548_v2, %v4497_v30  ;;  %v3807_v2 = vcombine.high %v11971_v32, %v11971_v32  ;;  %v3659_v3 = vadd.f32 %v9816_v12, %v3038_v21  ;;  %17023 = vst [vmem:[#allocation89_spill] sm:$0xff] %v12016_v11  ;;  %v4514_v12 = vrot.slane %v4512_v53, 2 }
 0x1d4   : > { %4872 = vrot.lane.b32.xlu0 %v4476_v39, %s10132_s9  ;;  %v3032_v39 = vpop.f32.mrf.mxu1 }
 0x1d5   : > { %v3033_v6 = vadd.f32 %v3032_v39, %v11790_v28  ;;  %v4516_v39 = vsel %vm11892_vm7, %v4514_v12, %v4515_v63 }
 0x1d6   : > { %5400 = vrot.lane.b32.xlu1 %v11965_v17, %s10131_s3 }
 0x1d7   : > { %v3658_v28 = vadd.f32 %v3503_v18, %v3033_v6  ;;  %v4528_v6 = vrot.slane %v11987_v25, 7  ;;  %v4517_v18 = vrot.slane %v4515_v63, 2 }
 0x1d8   : > { %5410 = vrot.lane.b32.xlu0 %v11971_v32, %s10131_s3 }
 0x1d9   : > { %v12027_v30 = vrot.slane %v3658_v28, %v10342_v9 }
 0x1da   : > { %5420 = vrot.lane.b32.xlu1 %v11978_v23, %s10131_s3 }
 0x1db   : > { %17025 = vst [vmem:[#allocation91_spill] sm:$0xff] %v12027_v30  ;;  %v4537_v32 = vrot.slane %v12027_v30, 7 }
 0x1dc   : > { %5418 = vrot.lane.b32.xlu0 %v11987_v25, %s10131_s3 }
 0x1de   : > { %4876 = vrot.lane.b32.xlu1 %v4482_v27, %s10132_s9  ;;  %v4510_v27 = vsel %vm11892_vm7, %v4508_v38, %v4509_v22  ;;  %v12024_v22 = vrot.slane %v3659_v3, %v10342_v9  ;;  %v16533_v38 = vrot.slane %v11923_v0, 7 }
 0x1e0   : > { %4886 = vrot.lane.b32.xlu0 %v4498_v20, %s10132_s9  ;;  %v4500_v20 = vrot.slane %v11965_v17, 7  ;;  %17024 = vst [vmem:[#allocation85_spill] sm:$0xff] %v12024_v22  ;;  %v12039_v21 = vcombine.high %v12024_v22, %v12024_v22  ;;  %v4527_v53 = vrot.slane %v16533_v38, 2  ;;  %v4530_v38 = vrot.slane %v4528_v6, 2 }
 0x1e1   : > { %v16537_v13 = vrot.slane %v12024_v22, 7 }
 0x1e2   : > { %4896 = vrot.lane.b32.xlu1 %v4513_v61, %s10132_s9  ;;  %v4501_v61 = vsel %vm11892_vm7, %v4499_v31, %v4500_v20  ;;  %v3792_v31 = vcombine.high %v3656_v33, %v3656_v33  ;;  %17026 = vst [vmem:[#allocation97_spill] sm:$0xff] %v12039_v21 }
 0x1e4   : > { %4894 = vrot.lane.b32.xlu0 %v4510_v27, %s10132_s9  ;;  %v4518_v27 = vrot.slane %v3807_v2, 7  ;;  %v12048_v33 = vrot.slane %v3792_v31, %v10342_v9  ;;  %v3826_v31 = vcombine.high %v3658_v28, %v3658_v28  ;;  %v4534_v28 = vrot.slane %v12016_v11, 7 }
 0x1e6   : > { %5412 = vrot.lane.b32.xlu1 %v3807_v2, %s10131_s3  ;;  %17027 = vst [vmem:[#allocation93_spill] sm:$0xff] %v12048_v33  ;;  %v4519_v12 = vsel %vm11892_vm7, %v4517_v18, %v4518_v27  ;;  %v3843_v2 = vcombine.high %v3659_v3, %v3659_v3  ;;  %v12058_v63 = vcombine.high %v12048_v33, %v12048_v33  ;;  %v4502_v27 = vrot.slane %v4500_v20, 2  ;;  %v9761_v18 = vpop.f32.mrf.mxu1 }
 0x1e7   : > { %v12070_v3 = vrot.slane %v3826_v31, %v10342_v9  ;;  %v9819_v31 = vpop.f32.mrf.mxu0 }
 0x1e8   : > { %5422 = vrot.lane.b32.xlu0 %v12016_v11, %s10131_s3  ;;  %17028 = vst [vmem:[#allocation98_spill] sm:$0xff] %v12058_v63 }
 0x1ea   : > { %4888 = vrot.lane.b32.xlu1 %v4501_v61, %s10132_s9  ;;  %v4529_v61 = vsel %vm11892_vm7, %v4527_v53, %v4528_v6  ;;  %v12067_v6 = vrot.slane %v3843_v2, %v10342_v9 }
 0x1ec   : > { %5430 = vrot.lane.b32.xlu0 %v12024_v22, %s10131_s3  ;;  %17029 = vst [vmem:[#allocation100_spill] sm:$0xff] %v12067_v6  ;;  %v12084_v2 = vcombine.high %v12067_v6, %v12067_v6 }
 0x1ee   : > { %5424 = vrot.lane.b32.xlu1 %v12027_v30, %s10131_s3  ;;  %17031 = vst [vmem:[#allocation101_spill] sm:$0xff] %v12084_v2 }
 0x1f0   : > { %4898 = vrot.lane.b32.xlu0 %v4516_v39, %s10132_s9  ;;  %v4531_v39 = vrot.slane %v11978_v23, 7 }
 0x1f2   : > { %5432 = vrot.lane.b32.xlu1 %v12039_v21, %s10131_s3  ;;  %v4532_v53 = vsel %vm11892_vm7, %v4530_v38, %v4531_v39  ;;  %v3048_v38 = vadd.f32 %v9761_v18, %v11794_v14  ;;  %v4533_v20 = vrot.slane %v4531_v39, 2  ;;  %v3042_v14 = vpop.f32.mrf.mxu1 }
 0x1f3   : > { %v3043_v17 = vadd.f32 %v3042_v14, %v11798_v8 }
 0x1f4   : > { %4906 = vrot.lane.b32.xlu0 %v4529_v61, %s10132_s9  ;;  %v17030_v61 = vrot.slane %v11872_v43, 7  ;;  %v3661_v18 = vadd.f32 %v9819_v31, %v3048_v38  ;;  %v12103_v38 = vcombine.high %v12027_v30, %v12027_v30 }
 0x1f6   : > { %4900 = vrot.lane.b32.xlu1 %v4519_v12, %s10132_s9  ;;  %v4504_v12 = vsel %vm11892_vm7, %v4502_v27, %v17030_v61  ;;  %v4535_v27 = vsel %vm11892_vm7, %v4533_v20, %v4534_v28  ;;  %v4549_v61 = vrot.slane %v16537_v13, 2  ;;  %17032 = vst [vmem:[#allocation105_spill] sm:$0xff] %v12103_v38  ;;  %v3877_v31 = vcombine.high %v3661_v18, %v3661_v18 }
 0x1f7   : > { %v4522_v20 = vrot.slane %v12058_v63, 7  ;;  %v4540_v43 = vrot.slane %v12103_v38, 7 }
 0x1f8   : > { %5414 = vrot.lane.b32.xlu0 %v12058_v63, %s10131_s3  ;;  %v12113_v8 = vrot.slane %v3877_v31, %v10342_v9  ;;  %v17036_v31 = vrot.slane %v11923_v0, 7 }
 0x1f9   : > { %v4524_v13 = vrot.slane %v4522_v20, 2 }
 0x1fa   : > { %4908 = vrot.lane.b32.xlu1 %v4532_v53, %s10132_s9  ;;  %v4536_v53 = vrot.slane %v4534_v28, 2  ;;  %v3513_v28 = vpop.f32.mrf.mxu0  ;;  %17033 = vst [vmem:[#allocation107_spill] sm:$0xff] %v12113_v8 }
 0x1fc   : > { %5434 = vrot.lane.b32.xlu0 %v12067_v6, %s10131_s3  ;;  %v4538_v39 = vsel %vm11892_vm7, %v4536_v53, %v4537_v32  ;;  %v9822_v51 = vpop.f32.mrf.mxu0 }
 0x1fe   : > { %5428 = vrot.lane.b32.xlu1 %v12070_v3, %s10131_s3 }
 0x200   : > { %4890 = vrot.lane.b32.xlu0 %v4504_v12, %s10132_s9  ;;  %v4550_v12 = vrot.slane %v12039_v21, 7  ;;  %v4553_v21 = vrot.slane %v12067_v6, 7  ;;  %v4539_v6 = vrot.slane %v4537_v32, 2 }
 0x202   : > { %5436 = vrot.lane.b32.xlu1 %v12084_v2, %s10131_s3  ;;  %v4551_v53 = vsel %vm11892_vm7, %v4549_v61, %v4550_v12  ;;  %v12122_v61 = vrot.slane %v3661_v18, %v10342_v9 }
 0x204   : > { %4910 = vrot.lane.b32.xlu0 %v4535_v27, %s10132_s9  ;;  %v9549_v27 = vrot.slane %v12048_v33, 9  ;;  %17034 = vst [vmem:[#allocation106_spill] sm:$0xff] %v12122_v61  ;;  %v12137_v18 = vcombine.high %v12122_v61, %v12122_v61 }
 0x206   : > { %4912 = vrot.lane.b32.xlu1 %v4538_v39, %s10132_s9  ;;  %v3660_v39 = vadd.f32 %v3513_v28, %v3043_v17  ;;  %v4523_v14 = vsel %vm11892_vm7, %v9549_v27, %v4522_v20  ;;  %v9764_v17 = vpop.f32.mrf.mxu1  ;;  %v4526_v28 = vsel %vm11892_vm7, %v4524_v13, %v17036_v31  ;;  %v4555_v20 = vrot.slane %v4553_v21, 2  ;;  %17037 = vst [vmem:[#allocation113_spill] sm:$0xff] %v12137_v18 }
 0x207   : > { %v4556_v27 = vrot.slane %v12084_v2, 7  ;;  %v4572_v11 = vrot.slane %v12137_v18, 7 }
 0x208   : > { %5426 = vrot.lane.b32.xlu0 %v12103_v38, %s10131_s3  ;;  %v3860_v32 = vcombine.high %v3660_v39, %v3660_v39 }
 0x209   : > { %v4557_v13 = vsel %vm11892_vm7, %v4555_v20, %v4556_v27 }
 0x20a   : > { %4920 = vrot.lane.b32.xlu1 %v4551_v53, %s10132_s9  ;;  %v12125_v53 = vrot.slane %v3660_v39, %v10342_v9  ;;  %v4543_v39 = vrot.slane %v12070_v3, 7 }
 0x20c   : > { %4902 = vrot.lane.b32.xlu0 %v4523_v14, %s10132_s9  ;;  %17035 = vst [vmem:[#allocation114_spill] sm:$0xff] %v12125_v53  ;;  %v3058_v14 = vadd.f32 %v9764_v17, %v11802_v44  ;;  %v12150_v2 = vcombine.high %v12125_v53, %v12125_v53  ;;  %v4552_v44 = vrot.slane %v4550_v12, 2  ;;  %v12166_v12 = vrot.slane %v3860_v32, %v10342_v9 }
 0x20e   : > { %5448 = vrot.lane.b32.xlu1 %v12113_v8, %s10131_s3  ;;  %v3663_v31 = vadd.f32 %v9822_v51, %v3058_v14  ;;  %17038 = vst [vmem:[#allocation112_spill] sm:$0xff] %v12150_v2  ;;  %v4554_v51 = vsel %vm11892_vm7, %v4552_v44, %v4553_v21  ;;  %v4542_v14 = vrot.slane %v4540_v43, 2  ;;  %17040 = vst [vmem:[#allocation21_spill] sm:$0xff] %v12166_v12  ;;  %v3523_v44 = vpop.f32.mrf.mxu0 }
 0x20f   : > { %v12176_v21 = vcombine.high %v12070_v3, %v12070_v3  ;;  %v3876_v3 = vcombine.high %v12166_v12, %v12166_v12 }
 0x210   : > { %5438 = vrot.lane.b32.xlu0 %v12125_v53, %s10131_s3  ;;  %v12156_v17 = vrot.slane %v3663_v31, %v10342_v9 }
 0x211   : > { %17043 = vst [vmem:[#allocation20_spill] sm:$0xff] %v12176_v21  ;;  %v9550_v30 = vrot.slane %v12176_v21, 9  ;;  %v4558_v21 = vrot.slane %v4556_v27, 2  ;;  %v9551_v27 = vrot.slane %v12122_v61, 9 }
 0x212   : > { %4904 = vrot.lane.b32.xlu1 %v4526_v28, %s10132_s9  ;;  %v4541_v28 = vsel %vm11892_vm7, %v4539_v6, %v4540_v43  ;;  %v3052_v6 = vpop.f32.mrf.mxu1  ;;  %v4544_v43 = vsel %vm11892_vm7, %v4542_v14, %v4543_v39  ;;  %v4559_v14 = vrot.slane %v12125_v53, 7  ;;  %v4562_v53 = vrot.slane %v12150_v2, 7 }
 0x214   : > { %5446 = vrot.lane.b32.xlu0 %v12137_v18, %s10131_s3  ;;  %v4561_v23 = vrot.slane %v4559_v14, 2 }
 0x216   : > { %4924 = vrot.lane.b32.xlu1 %v4557_v13, %s10132_s9 }
 0x218   : > { %4914 = vrot.lane.b32.xlu0 %v4541_v28, %s10132_s9  ;;  %v3053_v28 = vadd.f32 %v3052_v6, %v11806_v57  ;;  %v12187_v57 = vcombine.high %v12113_v8, %v12113_v8 }
 0x21a   : > { %5440 = vrot.lane.b32.xlu1 %v12150_v2, %s10131_s3  ;;  %17045 = vst [vmem:[#allocation24_spill] sm:$0xff] %v12187_v57 }
 0x21c   : > { %v12158_v20 = vpop.permute.xlu1 %5388  ;;  %4922 = vrot.lane.b32.xlu0 %v4554_v51, %s10132_s9  ;;  %v3662_v51 = vadd.f32 %v3523_v44, %v3053_v28  ;;  %v17050_v44 = vrot.slane %v12024_v22, 7  ;;  %v4560_v22 = vsel %vm11892_vm7, %v4558_v21, %v4559_v14  ;;  %v4573_v21 = vsel %vm11892_vm7, %v9551_v27, %v4572_v11  ;;  %v9767_v27 = vpop.f32.mrf.mxu1 }
 0x21d   : > { %17039 = vst [vmem:[#allocation18_spill] sm:$0xff] %v12158_v20 }
 0x21e   : > { %5460 = vrot.lane.b32.xlu1 %v12156_v17, %s10131_s3  ;;  %v12168_v13 = vpop.permute.xlu0 %5390  ;;  %v4548_v38 = vsel %vm11892_vm7, %v9550_v30, %v17050_v44  ;;  %v4563_v30 = vsel %vm11892_vm7, %v4561_v23, %v4562_v53  ;;  %v3911_v44 = vcombine.high %v3663_v31, %v3663_v31  ;;  %v3894_v18 = vcombine.high %v3662_v51, %v3662_v51  ;;  %v3062_v61 = vpop.f32.mrf.mxu1 }
 0x21f   : > { %17041 = vst [vmem:[#allocation19_spill] sm:$0xff] %v12168_v13 }
 0x220   : > { %v12172_v40 = vpop.permute.xlu1 %5392  ;;  %5442 = vrot.lane.b32.xlu0 %v12166_v12, %s10131_s3  ;;  %v12242_v14 = vrot.slane %v3894_v18, %v10342_v9 }
 0x221   : > { %17042 = vst [vmem:[#allocation22_spill] sm:$0xff] %v12172_v40 }
 0x222   : > { %4916 = vrot.lane.b32.xlu1 %v4544_v43, %s10132_s9  ;;  %v12183_v32 = vpop.permute.xlu0 %5382  ;;  %v12201_v43 = vrot.slane %v3662_v51, %v10342_v9  ;;  %17057 = vst [vmem:[#allocation36_spill] sm:$0xff] %v12242_v14 }
 0x223   : > { %17044 = vst [vmem:[#allocation23_spill] sm:$0xff] %v12183_v32 }
 0x224   : > { %v12189_v6 = vpop.permute.xlu1 %5384  ;;  %5450 = vrot.lane.b32.xlu0 %v12187_v57, %s10131_s3  ;;  %17048 = vst [vmem:[#allocation29_spill] sm:$0xff] %v12201_v43  ;;  %v4581_v33 = vrot.slane %v12201_v43, 7 }
 0x225   : > { %17046 = vst [vmem:[#allocation26_spill] sm:$0xff] %v12189_v6 }
 0x226   : > { %5444 = vrot.lane.b32.xlu1 %v3876_v3, %s10131_s3  ;;  %v12198_v39 = vpop.permute.xlu0 %5394 }
 0x227   : > { %17047 = vst [vmem:[#allocation25_spill] sm:$0xff] %v12198_v39 }
 0x228   : > { %v12203_v28 = vpop.permute.xlu1 %5396  ;;  %4918 = vrot.lane.b32.xlu0 %v4548_v38, %s10132_s9  ;;  %v4574_v38 = vrot.slane %v4572_v11, 2  ;;  %v4578_v11 = vrot.slane %v12187_v57, 7 }
 0x229   : > { %17049 = vst [vmem:[#allocation27_spill] sm:$0xff] %v12203_v28 }
 0x22a   : > { %5452 = vrot.lane.b32.xlu1 %v12201_v43, %s10131_s3  ;;  %v12214_v0 = vpop.permute.xlu0 %5402 }
 0x22b   : > { %17051 = vst [vmem:[#allocation30_spill] sm:$0xff] %v12214_v0  ;;  %v4575_v0 = vrot.slane %v12113_v8, 7  ;;  %v4568_v8 = vrot.slane %v3876_v3, 7  ;;  %v4564_v3 = vrot.slane %v4562_v53, 2 }
 0x22c   : > { %v12216_v25 = vpop.permute.xlu1 %5404  ;;  %4926 = vrot.lane.b32.xlu0 %v4560_v22, %s10132_s9  ;;  %v12237_v22 = vrot.slane %v3911_v44, %v10342_v9 }
 0x22d   : > { %17052 = vst [vmem:[#allocation28_spill] sm:$0xff] %v12216_v25  ;;  %v4576_v23 = vsel %vm11892_vm7, %v4574_v38, %v4575_v0  ;;  %v4565_v38 = vrot.slane %v12166_v12, 7 }
 0x22e   : > { %4928 = vrot.lane.b32.xlu1 %v4563_v30, %s10132_s9  ;;  %v12225_v2 = vpop.permute.xlu0 %4878  ;;  %17055 = vst [vmem:[#allocation34_spill] sm:$0xff] %v12237_v22  ;;  %v4577_v30 = vrot.slane %v4575_v0, 2  ;;  %v4597_v39 = vrot.slane %v12237_v22, 7 }
 0x22f   : > { %17053 = vst [vmem:[#allocation33_spill] sm:$0xff] %v12225_v2  ;;  %v4567_v12 = vrot.slane %v4565_v38, 2  ;;  %v4566_v28 = vsel %vm11892_vm7, %v4564_v3, %v4565_v38 }
 0x230   : > { %v12228_v25 = vpop.permute.xlu1 %4880  ;;  %4934 = vrot.lane.b32.xlu0 %v4573_v21, %s10132_s9  ;;  %v3068_v21 = vadd.f32 %v9767_v27, %v11810_v60  ;;  %v4579_v0 = vsel %vm11892_vm7, %v4577_v30, %v4578_v11  ;;  %v12270_v60 = vcombine.high %v12201_v43, %v12201_v43  ;;  %v12274_v30 = vcombine.high %v12156_v17, %v12156_v17  ;;  %v9770_v43 = vpop.f32.mrf.mxu1 }
 0x231   : > { %17054 = vst [vmem:[#allocation31_spill] sm:$0xff] %v12228_v25 }
 0x232   : > { %4936 = vrot.lane.b32.xlu1 %v4576_v23, %s10132_s9  ;;  %v12239_v31 = vpop.permute.xlu0 %5386  ;;  %v12261_v23 = vcombine.high %v12237_v22, %v12237_v22  ;;  %17063 = vst [vmem:[#allocation42_spill] sm:$0xff] %v12270_v60  ;;  %17064 = vst [vmem:[#allocation41_spill] sm:$0xff] %v12274_v30  ;;  %v3072_v13 = vpop.f32.mrf.mxu1 }
 0x233   : > { %17056 = vst [vmem:[#allocation32_spill] sm:$0xff] %v12239_v31 }
 0x234   : > { %v12244_v51 = vpop.permute.xlu1 %5408  ;;  %5462 = vrot.lane.b32.xlu0 %v12237_v22, %s10131_s3  ;;  %17061 = vst [vmem:[#allocation39_spill] sm:$0xff] %v12261_v23  ;;  %v4600_v22 = vrot.slane %v12261_v23, 7 }
 0x235   : > { %17058 = vst [vmem:[#allocation35_spill] sm:$0xff] %v12244_v51  ;;  %v9825_v51 = vpop.f32.mrf.mxu0 }
 0x236   : > { %5456 = vrot.lane.b32.xlu1 %v12242_v14, %s10131_s3  ;;  %v12252_v44 = vpop.permute.xlu0 %5406  ;;  %v3665_v27 = vadd.f32 %v9825_v51, %v3068_v21  ;;  %v3063_v51 = vadd.f32 %v3062_v61, %v11814_v59  ;;  %v4584_v59 = vrot.slane %v12270_v60, 7 }
 0x237   : > { %17059 = vst [vmem:[#allocation38_spill] sm:$0xff] %v12252_v44 }
 0x238   : > { %v12255_v18 = vpop.permute.xlu1 %5416  ;;  %4938 = vrot.lane.b32.xlu0 %v4579_v0, %s10132_s9  ;;  %v4569_v0 = vsel %vm11892_vm7, %v4567_v12, %v4568_v8  ;;  %v12289_v53 = vrot.slane %v3665_v27, %v10342_v9  ;;  %v9552_v8 = vrot.slane %v12274_v30, 9  ;;  %v3533_v12 = vpop.f32.mrf.mxu0  ;;  %v4587_v30 = vrot.slane %v12242_v14, 7 }
 0x239   : > { %17060 = vst [vmem:[#allocation37_spill] sm:$0xff] %v12255_v18  ;;  %v4580_v18 = vrot.slane %v4578_v11, 2 }
 0x23a   : > { %5464 = vrot.lane.b32.xlu1 %v12261_v23, %s10131_s3  ;;  %v12266_v44 = vpop.permute.xlu0 %4870  ;;  %17067 = vst [vmem:[#allocation48_spill] sm:$0xff] %v12289_v53  ;;  %v4598_v3 = vsel %vm11892_vm7, %v9552_v8, %v4597_v39  ;;  %v4586_v23 = vrot.slane %v4584_v59, 2 }
 0x23b   : > { %17062 = vst [vmem:[#allocation40_spill] sm:$0xff] %v12266_v44  ;;  %v4582_v11 = vsel %vm11892_vm7, %v4580_v18, %v4581_v33 }
 0x23c   : > { %v12276_v57 = vpop.permute.xlu1 %4874  ;;  %5454 = vrot.lane.b32.xlu0 %v12270_v60, %s10131_s3  ;;  %v4583_v60 = vrot.slane %v4581_v33, 2 }
 0x23d   : > { %17065 = vst [vmem:[#allocation43_spill] sm:$0xff] %v12276_v57 }
 0x23e   : > { %4932 = vrot.lane.b32.xlu1 %v4569_v0, %s10132_s9  ;;  %v12285_v63 = vpop.permute.xlu0 %4882  ;;  %v4599_v0 = vrot.slane %v4597_v39, 2  ;;  %v3078_v39 = vadd.f32 %v9770_v43, %v11818_v54 }
 0x23f   : > { %17066 = vst [vmem:[#allocation45_spill] sm:$0xff] %v12285_v63  ;;  %v3664_v63 = vadd.f32 %v3533_v12, %v3063_v51  ;;  %v16567_v51 = vrot.slane %v12289_v53, 7  ;;  %v3945_v12 = vcombine.high %v3665_v27, %v3665_v27  ;;  %v4588_v27 = vsel %vm11892_vm7, %v4586_v23, %v4587_v30 }
 0x240   : > { %v12291_v21 = vpop.permute.xlu1 %4884  ;;  %4930 = vrot.lane.b32.xlu0 %v4566_v28, %s10132_s9  ;;  %v12310_v28 = vcombine.high %v12242_v14, %v12242_v14  ;;  %v4601_v18 = vsel %vm11892_vm7, %v4599_v0, %v4600_v22  ;;  %v9828_v0 = vpop.f32.mrf.mxu0  ;;  %v3073_v23 = vadd.f32 %v3072_v13, %v11822_v5 }
 0x241   : > { %17068 = vst [vmem:[#allocation44_spill] sm:$0xff] %v12291_v21  ;;  %v4617_v54 = vrot.slane %v16567_v51, 2  ;;  %v3667_v33 = vadd.f32 %v9828_v0, %v3078_v39  ;;  %v4585_v51 = vsel %vm11892_vm7, %v4583_v60, %v4584_v59  ;;  %v9773_v59 = vpop.f32.mrf.mxu1 }
 0x242   : > { %4940 = vrot.lane.b32.xlu1 %v4582_v11, %s10132_s9  ;;  %v12302_v61 = vpop.permute.xlu0 %5398  ;;  %17071 = vst [vmem:[#allocation53_spill] sm:$0xff] %v12310_v28  ;;  %v12317_v11 = vcombine.high %v12289_v53, %v12289_v53 }
 0x243   : > { %17069 = vst [vmem:[#allocation50_spill] sm:$0xff] %v12302_v61  ;;  %v12326_v61 = vrot.slane %v3664_v63, %v10342_v9  ;;  %v12366_v13 = vrot.slane %v3667_v33, %v10342_v9 }
 0x244   : > { %v12304_v38 = vpop.permute.xlu1 %4892  ;;  %4950 = vrot.lane.b32.xlu0 %v4598_v3, %s10132_s9  ;;  %v3928_v3 = vcombine.high %v3664_v63, %v3664_v63  ;;  %v4618_v43 = vrot.slane %v12317_v11, 7  ;;  %v12340_v63 = vrot.slane %v3945_v12, %v10342_v9  ;;  %v3543_v12 = vpop.f32.mrf.mxu0 }
 0x245   : > { %17070 = vst [vmem:[#allocation47_spill] sm:$0xff] %v12304_v38  ;;  %17073 = vst [vmem:[#allocation57_spill] sm:$0xff] %v12326_v61  ;;  %v12346_v14 = vcombine.high %v12326_v61, %v12326_v61 }
 0x246   : > { %4952 = vrot.lane.b32.xlu1 %v4601_v18, %s10132_s9  ;;  %v12322_v8 = vpop.permute.xlu0 %4872  ;;  %v4590_v18 = vrot.slane %v12310_v28, 7  ;;  %17075 = vst [vmem:[#allocation59_spill] sm:$0xff] %v12340_v63  ;;  %v4619_v39 = vsel %vm11892_vm7, %v4617_v54, %v4618_v43  ;;  %v12363_v5 = vcombine.high %v12340_v63, %v12340_v63  ;;  %v4602_v43 = vrot.slane %v4600_v22, 2 }
 0x247   : > { %17072 = vst [vmem:[#allocation49_spill] sm:$0xff] %v12322_v8  ;;  %17077 = vst [vmem:[#allocation62_spill] sm:$0xff] %v12346_v14 }
 0x248   : > { %v12328_v38 = vpop.permute.xlu1 %5400  ;;  %5458 = vrot.lane.b32.xlu0 %v12310_v28, %s10131_s3  ;;  %v4589_v28 = vrot.slane %v4587_v30, 2  ;;  %v4592_v0 = vrot.slane %v4590_v18, 2  ;;  %v4593_v30 = vrot.slane %v12156_v17, 7 }
 0x249   : > { %17074 = vst [vmem:[#allocation56_spill] sm:$0xff] %v12328_v38 }
 0x24a   : > { %4944 = vrot.lane.b32.xlu1 %v4588_v27, %s10132_s9  ;;  %v12342_v38 = vpop.permute.xlu0 %5410  ;;  %v12354_v27 = vrot.slane %v3928_v3, %v10342_v9  ;;  %v4591_v54 = vsel %vm11892_vm7, %v4589_v28, %v4590_v18  ;;  %v9831_v18 = vpop.f32.mrf.mxu0 }
 0x24b   : > { %17076 = vst [vmem:[#allocation54_spill] sm:$0xff] %v12342_v38  ;;  %v4603_v38 = vrot.slane %v12326_v61, 7 }
 0x24c   : > { %v12349_v21 = vpop.permute.xlu1 %5420  ;;  %17079 = vst [vmem:[#allocation70_spill] sm:$0xff] %v12354_v27  ;;  %4942 = vrot.lane.b32.xlu0 %v4585_v51, %s10132_s9  ;;  %v3666_v51 = vadd.f32 %v3543_v12, %v3073_v23  ;;  %v4609_v17 = vrot.slane %v12354_v27, 7  ;;  %v3088_v23 = vadd.f32 %v9773_v59, %v11826_v26 }
 0x24d   : > { %17078 = vst [vmem:[#allocation63_spill] sm:$0xff] %v12349_v21  ;;  %v4594_v21 = vsel %vm11892_vm7, %v4592_v0, %v4593_v30  ;;  %v4605_v40 = vrot.slane %v4603_v38, 2  ;;  %v4604_v0 = vsel %vm11892_vm7, %v4602_v43, %v4603_v38  ;;  %v4622_v30 = vrot.slane %v12363_v5, 7 }
 0x24e   : > { %4964 = vrot.lane.b32.xlu1 %v4619_v39, %s10132_s9  ;;  %v12368_v60 = vpop.permute.xlu0 %5418  ;;  %v4606_v39 = vrot.slane %v12346_v14, 7  ;;  %v12389_v22 = vrot.slane %v3666_v51, %v10342_v9  ;;  %v3962_v38 = vcombine.high %v3666_v51, %v3666_v51  ;;  %v3669_v43 = vadd.f32 %v9831_v18, %v3088_v23 }
 0x24f   : > { %17080 = vst [vmem:[#allocation66_spill] sm:$0xff] %v12368_v60  ;;  %v12381_v60 = vcombine.high %v12354_v27, %v12354_v27  ;;  %v4624_v51 = vrot.slane %v4622_v30, 2 }
 0x250   : > { %v12371_v3 = vpop.permute.xlu1 %4876  ;;  %4946 = vrot.lane.b32.xlu0 %v4591_v54, %s10132_s9  ;;  %v12398_v54 = vcombine.high %v12366_v13, %v12366_v13  ;;  %v4607_v26 = vsel %vm11892_vm7, %v4605_v40, %v4606_v39  ;;  %v12410_v2 = vcombine.high %v12389_v22, %v12389_v22  ;;  %v4608_v16 = vrot.slane %v4606_v39, 2 }
 0x251   : > { %17081 = vst [vmem:[#allocation71_spill] sm:$0xff] %v12371_v3  ;;  %17082 = vst [vmem:[#allocation72_spill] sm:$0xff] %v12381_v60  ;;  %v4612_v59 = vrot.slane %v12381_v60, 7  ;;  %v4625_v23 = vrot.slane %v12389_v22, 7  ;;  %v12430_v20 = vrot.slane %v3669_v43, %v10342_v9 }
 0x252   : > { %4948 = vrot.lane.b32.xlu1 %v4594_v21, %s10132_s9  ;;  %v12386_v28 = vpop.permute.xlu0 %4886  ;;  %v4611_v21 = vrot.slane %v4609_v17, 2  ;;  %v4640_v18 = vrot.slane %v12398_v54, 7 }
 0x253   : > { %17083 = vst [vmem:[#allocation77_spill] sm:$0xff] %v12386_v28  ;;  %v3979_v28 = vcombine.high %v3667_v33, %v3667_v33  ;;  %17088 = vst [vmem:[#allocation81_spill] sm:$0xff] %v12430_v20  ;;  %v4627_v25 = vrot.slane %v4625_v23, 2 }
 0x254   : > { %v12391_v12 = vpop.permute.xlu1 %4896  ;;  %4954 = vrot.lane.b32.xlu0 %v4604_v0, %s10132_s9  ;;  %v4613_v33 = vsel %vm11892_vm7, %v4611_v21, %v4612_v59  ;;  %v17090_v21 = vrot.slane %v12366_v13, 7 }
 0x255   : > { %17084 = vst [vmem:[#allocation73_spill] sm:$0xff] %v12391_v12  ;;  %v9553_v12 = vrot.slane %v12340_v63, 9  ;;  %v4628_v63 = vrot.slane %v12410_v2, 7 }
 0x256   : > { %4956 = vrot.lane.b32.xlu1 %v4607_v26, %s10132_s9  ;;  %v12406_v31 = vpop.permute.xlu0 %4894  ;;  %v3082_v26 = vpop.f32.mrf.mxu1 }
 0x257   : > { %17085 = vst [vmem:[#allocation82_spill] sm:$0xff] %v12406_v31  ;;  %v4623_v40 = vsel %vm11892_vm7, %v9553_v12, %v4622_v30  ;;  %v3083_v39 = vadd.f32 %v3082_v26, %v11830_v15  ;;  %v4610_v30 = vsel %vm11892_vm7, %v4608_v16, %v4609_v17  ;;  %v4639_v31 = vrot.slane %v17090_v21, 2 }
 0x258   : > { %v12412_v0 = vpop.permute.xlu1 %5412  ;;  %4966 = vrot.lane.b32.xlu0 %v4623_v40, %s10132_s9  ;;  %v4626_v15 = vsel %vm11892_vm7, %v4624_v51, %v4625_v23  ;;  %v4642_v26 = vrot.slane %v4640_v18, 2  ;;  %v12451_v17 = vcombine.high %v12430_v20, %v12430_v20 }
 0x259   : > { %17086 = vst [vmem:[#allocation79_spill] sm:$0xff] %v12412_v0  ;;  %v12424_v0 = vrot.slane %v3979_v28, %v10342_v9  ;;  %v3553_v28 = vpop.f32.mrf.mxu0  ;;  %v4641_v51 = vsel %vm11892_vm7, %v4639_v31, %v4640_v18 }
 0x25a   : > { %4960 = vrot.lane.b32.xlu1 %v4613_v33, %s10132_s9  ;;  %v12426_v12 = vpop.permute.xlu0 %5422  ;;  %v12439_v33 = vrot.slane %v3962_v38, %v10342_v9  ;;  %17092 = vst [vmem:[#allocation92_spill] sm:$0xff] %v12451_v17  ;;  %v9776_v38 = vpop.f32.mrf.mxu1  ;;  %v3668_v21 = vadd.f32 %v3553_v28, %v3083_v39  ;;  %v4013_v39 = vcombine.high %v3669_v43, %v3669_v43  ;;  %v17098_v43 = vrot.slane %v12430_v20, 7 }
 0x25b   : > { %17087 = vst [vmem:[#allocation84_spill] sm:$0xff] %v12426_v12  ;;  %v4643_v16 = vrot.slane %v12424_v0, 7  ;;  %v3098_v28 = vadd.f32 %v9776_v38, %v11770_v19  ;;  %v9834_v18 = vpop.f32.mrf.mxu0 }
 0x25c   : > { %v12432_v40 = vpop.permute.xlu1 %4888  ;;  %4958 = vrot.lane.b32.xlu0 %v4610_v30, %s10132_s9  ;;  %v4614_v30 = vrot.slane %v4612_v59, 2  ;;  %v12463_v42 = vcombine.high %v12439_v33, %v12439_v33  ;;  %v4631_v31 = vrot.slane %v12439_v33, 7  ;;  %v12471_v59 = vrot.slane %v3668_v21, %v10342_v9 }
 0x25d   : > { %17089 = vst [vmem:[#allocation90_spill] sm:$0xff] %v12432_v40  ;;  %v4661_v38 = vrot.slane %v17098_v43, 2 }
 0x25e   : > { %4968 = vrot.lane.b32.xlu1 %v4626_v15, %s10132_s9  ;;  %v12446_v40 = vpop.permute.xlu0 %5430  ;;  %v4644_v15 = vsel %vm11892_vm7, %v4642_v26, %v4643_v16  ;;  %17095 = vst [vmem:[#allocation103_spill] sm:$0xff] %v12471_v59  ;;  %v17097_v16 = vrot.slane %v12289_v53, 7  ;;  %v4634_v57 = vrot.slane %v12463_v42, 7  ;;  %v4633_v43 = vrot.slane %v4631_v31, 2 }
 0x25f   : > { %17091 = vst [vmem:[#allocation87_spill] sm:$0xff] %v12446_v40  ;;  %v4630_v40 = vrot.slane %v4628_v63, 2  ;;  %v12499_v32 = vcombine.high %v12471_v59, %v12471_v59 }
 0x260   : > { %v12453_v12 = vpop.permute.xlu1 %5424  ;;  %4978 = vrot.lane.b32.xlu0 %v4641_v51, %s10132_s9  ;;  %v4616_v51 = vsel %vm11892_vm7, %v4614_v30, %v17097_v16  ;;  %v3671_v30 = vadd.f32 %v9834_v18, %v3098_v28  ;;  %v3996_v16 = vcombine.high %v3668_v21, %v3668_v21  ;;  %v4636_v28 = vrot.slane %v4634_v57, 2 }
 0x261   : > { %17093 = vst [vmem:[#allocation88_spill] sm:$0xff] %v12453_v12  ;;  %v4632_v19 = vsel %vm11892_vm7, %v4630_v40, %v4631_v31  ;;  %v4629_v40 = vsel %vm11892_vm7, %v4627_v25, %v4628_v63  ;;  %17102 = vst [vmem:[#allocation102_spill] sm:$0xff] %v12499_v32  ;;  %v4647_v21 = vrot.slane %v12471_v59, 7 }
 0x262   : > { %4980 = vrot.lane.b32.xlu1 %v4644_v15, %s10132_s9  ;;  %v12467_v12 = vpop.permute.xlu0 %4898  ;;  %v3092_v15 = vpop.f32.mrf.mxu1  ;;  %v12511_v25 = vrot.slane %v3671_v30, %v10342_v9  ;;  %v12516_v31 = vrot.slane %v3996_v16, %v10342_v9  ;;  %v4650_v16 = vrot.slane %v12499_v32, 7 }
 0x263   : > { %17094 = vst [vmem:[#allocation109_spill] sm:$0xff] %v12467_v12  ;;  %v4662_v12 = vrot.slane %v12451_v17, 7 }
 0x264   : > { %v12473_v26 = vpop.permute.xlu1 %5432  ;;  %4962 = vrot.lane.b32.xlu0 %v4616_v51, %s10132_s9  ;;  %v3093_v51 = vadd.f32 %v3092_v15, %v11772_v1  ;;  %v12507_v1 = vcombine.high %v12424_v0, %v12424_v0  ;;  %17105 = vst [vmem:[#allocation115_spill] sm:$0xff] %v12516_v31  ;;  %v9779_v18 = vpop.f32.mrf.mxu1  ;;  %v12555_v44 = vcombine.high %v12516_v31, %v12516_v31  ;;  %v4652_v8 = vrot.slane %v4650_v16, 2 }
 0x265   : > { %17096 = vst [vmem:[#allocation108_spill] sm:$0xff] %v12473_v26  ;;  %v12488_v26 = vrot.slane %v4013_v39, %v10342_v9  ;;  %v4663_v39 = vsel %vm11892_vm7, %v4661_v38, %v4662_v12  ;;  %v4664_v34 = vrot.slane %v4662_v12, 2  ;;  %v3108_v12 = vadd.f32 %v9779_v18, %v11774_v55 }
 0x266   : > { %4972 = vrot.lane.b32.xlu1 %v4632_v19, %s10132_s9  ;;  %v12490_v23 = vpop.permute.xlu0 %4906  ;;  %v3563_v19 = vpop.f32.mrf.mxu0  ;;  %17103 = vst [vmem:[#allocation96_spill] sm:$0xff] %v12507_v1  ;;  %17113 = vst [vmem:[#allocation117_spill] sm:$0xff] %v12555_v44  ;;  %v4656_v18 = vrot.slane %v12555_v44, 7 }
 0x267   : > { %17099 = vst [vmem:[#allocation111_spill] sm:$0xff] %v12488_v26  ;;  %17100 = vst [vmem:[#allocation95_spill] sm:$0xff] %v12490_v23  ;;  %v3670_v15 = vadd.f32 %v3563_v19, %v3093_v51  ;;  %v12531_v51 = vcombine.high %v12488_v26, %v12488_v26  ;;  %v12537_v19 = vcombine.high %v12511_v25, %v12511_v25 }
 0x268   : > { %v12493_v4 = vpop.permute.xlu1 %4900  ;;  %4970 = vrot.lane.b32.xlu0 %v4629_v40, %s10132_s9  ;;  %v4635_v40 = vsel %vm11892_vm7, %v4633_v43, %v4634_v57  ;;  %v9554_v57 = vrot.slane %v12507_v1, 9  ;;  %v4047_v43 = vcombine.high %v3671_v30, %v3671_v30  ;;  %v9837_v6 = vpop.f32.mrf.mxu0 }
 0x269   : > { %17101 = vst [vmem:[#allocation94_spill] sm:$0xff] %v12493_v4  ;;  %v4665_v4 = vrot.slane %v12488_v26, 7  ;;  %17108 = vst [vmem:[#allocation99_spill] sm:$0xff] %v12531_v51  ;;  %v4668_v1 = vrot.slane %v12531_v51, 7 }
 0x26a   : > { %4992 = vrot.lane.b32.xlu1 %v4663_v39, %s10132_s9  ;;  %v12513_v63 = vpop.permute.xlu0 %5414  ;;  %v17107_v39 = vrot.slane %v12366_v13, 7  ;;  %17109 = vst [vmem:[#allocation104_spill] sm:$0xff] %v12537_v19  ;;  %v4648_v3 = vsel %vm11892_vm7, %v9554_v57, %v4647_v21 }
 0x26b   : > { %17104 = vst [vmem:[#allocation110_spill] sm:$0xff] %v12513_v63  ;;  %v4649_v63 = vrot.slane %v4647_v21, 2  ;;  %v12559_v21 = vrot.slane %v4047_v43, %v10342_v9  ;;  %v4666_v52 = vsel %vm11892_vm7, %v4664_v34, %v4665_v4  ;;  %v3573_v43 = vpop.f32.mrf.mxu0 }
 0x26c   : > { %v12518_v38 = vpop.permute.xlu1 %4908  ;;  %4974 = vrot.lane.b32.xlu0 %v4635_v40, %s10132_s9  ;;  %v4638_v23 = vsel %vm11892_vm7, %v4636_v28, %v17107_v39  ;;  %v12542_v28 = vrot.slane %v3670_v15, %v10342_v9  ;;  %v3102_v39 = vpop.f32.mrf.mxu1 }
 0x26d   : > { %17106 = vst [vmem:[#allocation116_spill] sm:$0xff] %v12518_v38  ;;  %v4651_v30 = vsel %vm11892_vm7, %v4649_v63, %v4650_v16  ;;  %17114 = vst [vmem:[#allocation118_spill] sm:$0xff] %v12559_v21 }
 0x26e   : > { %4976 = vrot.lane.b32.xlu1 %v4638_v23, %s10132_s9  ;;  %v12539_v40 = vpop.permute.xlu0 %5434  ;;  %17111 = vst [vmem:[#allocation16_spill] sm:$0xff] %v12542_v28  ;;  %v4667_v23 = vrot.slane %v4665_v4, 2  ;;  %v12567_v63 = vcombine.high %v12542_v28, %v12542_v28  ;;  %v3673_v4 = vadd.f32 %v9837_v6, %v3108_v12 }
 0x26f   : > { %17110 = vst [vmem:[#allocation15_spill] sm:$0xff] %v12539_v40  ;;  %v4653_v40 = vrot.slane %v12516_v31, 7 }
 0x270   : > { %v12544_v38 = vpop.permute.xlu1 %5428  ;;  %4982 = vrot.lane.b32.xlu0 %v4648_v3, %s10132_s9  ;;  %v3103_v3 = vadd.f32 %v3102_v39, %v11776_v7  ;;  %17116 = vst [vmem:[#allocation120_spill] sm:$0xff] %v12567_v63  ;;  %v4669_v55 = vsel %vm11892_vm7, %v4667_v23, %v4668_v1  ;;  %v4684_v39 = vrot.slane %v12537_v19, 7  ;;  %v12590_v23 = vcombine.high %v12559_v21, %v12559_v21 }
 0x271   : > { %17112 = vst [vmem:[#allocation17_spill] sm:$0xff] %v12544_v38  ;;  %v4655_v7 = vrot.slane %v4653_v40, 2  ;;  %v4672_v6 = vrot.slane %v12567_v63, 7  ;;  %v9555_v63 = vrot.slane %v12542_v28, 9 }
 0x272   : > { %4984 = vrot.lane.b32.xlu1 %v4651_v30, %s10132_s9  ;;  %v12563_v57 = vpop.permute.xlu0 %4890  ;;  %v16576_v30 = vrot.slane %v12511_v25, 7  ;;  %v3672_v34 = vadd.f32 %v3573_v43, %v3103_v3  ;;  %17120 = vst [vmem:[#allocation124_spill] sm:$0xff] %v12590_v23  ;;  %v12604_v3 = vrot.slane %v3673_v4, %v10342_v9  ;;  %v9782_v43 = vpop.f32.mrf.mxu1 }
 0x273   : > { %17115 = vst [vmem:[#allocation119_spill] sm:$0xff] %v12563_v57 }
 0x274   : > { %v12569_v38 = vpop.permute.xlu1 %5436  ;;  %4994 = vrot.lane.b32.xlu0 %v4666_v52, %s10132_s9  ;;  %v4654_v52 = vsel %vm11892_vm7, %v4652_v8, %v4653_v40  ;;  %v4683_v1 = vrot.slane %v16576_v30, 2  ;;  %v4687_v40 = vrot.slane %v12559_v21, 7  ;;  %17123 = vst [vmem:[#allocation127_spill] sm:$0xff] %v12604_v3 }
 0x275   : > { %17117 = vst [vmem:[#allocation121_spill] sm:$0xff] %v12569_v38  ;;  %v4030_v38 = vcombine.high %v3670_v15, %v3670_v15  ;;  %v4657_v15 = vsel %vm11892_vm7, %v4655_v7, %v4656_v18 }
 0x276   : > { %4996 = vrot.lane.b32.xlu1 %v4669_v55, %s10132_s9  ;;  %v12580_v57 = vpop.permute.xlu0 %4910  ;;  %v4686_v55 = vrot.slane %v4684_v39, 2  ;;  %v4685_v30 = vsel %vm11892_vm7, %v4683_v1, %v4684_v39  ;;  %v12623_v39 = vcombine.high %v12604_v3, %v12604_v3  ;;  %v4689_v51 = vrot.slane %v4687_v40, 2 }
 0x277   : > { %17118 = vst [vmem:[#allocation122_spill] sm:$0xff] %v12580_v57  ;;  %v12598_v12 = vrot.slane %v4030_v38, %v10342_v9  ;;  %v4690_v57 = vrot.slane %v12590_v23, 7 }
 0x278   : > { %v12582_v16 = vpop.permute.xlu1 %4912  ;;  %4986 = vrot.lane.b32.xlu0 %v4654_v52, %s10132_s9  ;;  %v12607_v52 = vrot.slane %v3672_v34, %v10342_v9  ;;  %v4688_v38 = vsel %vm11892_vm7, %v4686_v55, %v4687_v40  ;;  %17126 = vst [vmem:[#allocation130_spill] sm:$0xff] %v12623_v39  ;;  %v17128_v55 = vrot.slane %v12430_v20, 7 }
 0x279   : > { %17119 = vst [vmem:[#allocation123_spill] sm:$0xff] %v12582_v16  ;;  %17121 = vst [vmem:[#allocation125_spill] sm:$0xff] %v12598_v12  ;;  %v9840_v16 = vpop.f32.mrf.mxu0  ;;  %v4675_v19 = vrot.slane %v12598_v12, 7  ;;  %v12638_v21 = vcombine.high %v12598_v12, %v12598_v12  ;;  %v4673_v12 = vsel %vm11892_vm7, %v9555_v63, %v4672_v6 }
 0x27a   : > { %4988 = vrot.lane.b32.xlu1 %v4657_v15, %s10132_s9  ;;  %v12600_v8 = vpop.permute.xlu0 %5426  ;;  %v4658_v15 = vrot.slane %v4656_v18, 2  ;;  %v3112_v18 = vpop.f32.mrf.mxu1 }
 0x27b   : > { %17122 = vst [vmem:[#allocation126_spill] sm:$0xff] %v12600_v8  ;;  %v4674_v8 = vrot.slane %v4672_v6, 2  ;;  %v3583_v26 = vpop.f32.mrf.mxu0  ;;  %v12670_v6 = vcombine.high %v12607_v52, %v12607_v52 }
 0x27c   : > { %v12609_v7 = vpop.permute.xlu1 %4920  ;;  %5006 = vrot.lane.b32.xlu0 %v4685_v30, %s10132_s9  ;;  %v4693_v30 = vrot.slane %v12607_v52, 7 }
 0x27d   : > { %17124 = vst [vmem:[#allocation128_spill] sm:$0xff] %v12609_v7  ;;  %v4081_v7 = vcombine.high %v3673_v4, %v3673_v4  ;;  %v4692_v4 = vrot.slane %v4690_v57, 2  ;;  %17135 = vst [vmem:[#allocation137_spill] sm:$0xff] %v12670_v6 }
 0x27e   : > { %5008 = vrot.lane.b32.xlu1 %v4688_v38, %s10132_s9  ;;  %v12618_v41 = vpop.permute.xlu0 %4902  ;;  %v4660_v38 = vsel %vm11892_vm7, %v4658_v15, %v17128_v55  ;;  %v3113_v15 = vadd.f32 %v3112_v18, %v11784_v37  ;;  %v17132_v37 = vrot.slane %v12604_v3, 7 }
 0x27f   : > { %17125 = vst [vmem:[#allocation129_spill] sm:$0xff] %v12618_v41  ;;  %v4676_v41 = vsel %vm11892_vm7, %v4674_v8, %v4675_v19  ;;  %v4064_v8 = vcombine.high %v3672_v34, %v3672_v34 }
 0x280   : > { %v12626_v1 = vpop.permute.xlu1 %5448  ;;  %4990 = vrot.lane.b32.xlu0 %v4660_v38, %s10132_s9  ;;  %v12647_v38 = vrot.slane %v4081_v7, %v10342_v9  ;;  %v4678_v7 = vrot.slane %v12638_v21, 7  ;;  %v12661_v18 = vadd.f32 %v3583_v26, %v3113_v15 }
 0x281   : > { %17127 = vst [vmem:[#allocation131_spill] sm:$0xff] %v12626_v1  ;;  %v3118_v1 = vadd.f32 %v9782_v43, %v11780_v29  ;;  %v4694_v29 = vsel %vm11892_vm7, %v4692_v4, %v4693_v30  ;;  %v4706_v43 = vrot.slane %v12623_v39, 7  ;;  %v12666_v63 = vrot.slane %v4064_v8, %v10342_v9 }
 0x282   : > { %5000 = vrot.lane.b32.xlu1 %v4676_v41, %s10132_s9  ;;  %v12644_v55 = vpop.permute.xlu0 %5438  ;;  %17130 = vst [vmem:[#allocation133_spill] sm:$0xff] %v12647_v38  ;;  %v4705_v41 = vrot.slane %v17132_v37, 2  ;;  %v4691_v30 = vsel %vm11892_vm7, %v4689_v51, %v4690_v57  ;;  %v4677_v4 = vrot.slane %v4675_v19, 2  ;;  %v4709_v15 = vrot.slane %v12647_v38, 7  ;;  %v9843_v51 = vpop.f32.mrf.mxu0 }
 0x283   : > { %17129 = vst [vmem:[#allocation132_spill] sm:$0xff] %v12644_v55  ;;  %v3675_v34 = vadd.f32 %v9840_v16, %v3118_v1  ;;  %17134 = vst [vmem:[#allocation136_spill] sm:$0xff] %v12666_v63  ;;  %v4680_v16 = vrot.slane %v4678_v7, 2  ;;  %v12681_v1 = vcombine.high %v12647_v38, %v12647_v38  ;;  %v12692_v57 = vrot.slane %v12661_v18, %v10342_v9 }
 0x284   : > { %v12649_v23 = vpop.permute.xlu1 %4904  ;;  %4998 = vrot.lane.b32.xlu0 %v4673_v12, %s10132_s9  ;;  %v9785_v12 = vpop.f32.mrf.mxu1  ;;  %v4707_v26 = vsel %vm11892_vm7, %v4705_v41, %v4706_v43 }
 0x285   : > { %17131 = vst [vmem:[#allocation134_spill] sm:$0xff] %v12649_v23  ;;  %17137 = vst [vmem:[#allocation139_spill] sm:$0xff] %v12681_v1  ;;  %v4115_v8 = vcombine.high %v3675_v34, %v3675_v34 }
 0x286   : > { %5012 = vrot.lane.b32.xlu1 %v4694_v29, %s10132_s9  ;;  %v12663_v55 = vpop.permute.xlu0 %5446  ;;  %v12686_v29 = vrot.slane %v3675_v34, %v10342_v9  ;;  %17140 = vst [vmem:[#allocation142_spill] sm:$0xff] %v12692_v57  ;;  %v3122_v37 = vpop.f32.mrf.mxu1  ;;  %v17142_v34 = vrot.slane %v12511_v25, 7 }
 0x287   : > { %17133 = vst [vmem:[#allocation135_spill] sm:$0xff] %v12663_v55  ;;  %v4711_v55 = vrot.slane %v4709_v15, 2 }
 0x288   : > { %v12672_v40 = vpop.permute.xlu1 %4924  ;;  %5010 = vrot.lane.b32.xlu0 %v4691_v30, %s10132_s9  ;;  %17138 = vst [vmem:[#allocation140_spill] sm:$0xff] %v12686_v29  ;;  %v4679_v30 = vsel %vm11892_vm7, %v4677_v4, %v4678_v7  ;;  %v4682_v28 = vsel %vm11892_vm7, %v4680_v16, %v17142_v34  ;;  %v12712_v7 = vrot.slane %v4115_v8, %v10342_v9  ;;  %v3593_v34 = vpop.f32.mrf.mxu0 }
 0x289   : > { %17136 = vst [vmem:[#allocation138_spill] sm:$0xff] %v12672_v40  ;;  %v9556_v40 = vrot.slane %v12670_v6, 9  ;;  %v3128_v4 = vadd.f32 %v9785_v12, %v11788_v35  ;;  %v12720_v16 = vcombine.high %v12686_v29, %v12686_v29  ;;  %v4715_v12 = vrot.slane %v12692_v57, 7 }
 0x28a   : > { %5020 = vrot.lane.b32.xlu1 %v4707_v26, %s10132_s9  ;;  %v12688_v19 = vpop.permute.xlu0 %4914  ;;  %v4697_v26 = vrot.slane %v12666_v63, 7  ;;  %17144 = vst [vmem:[#allocation145_spill] sm:$0xff] %v12712_v7  ;;  %v12733_v8 = vcombine.high %v12692_v57, %v12692_v57 }
 0x28b   : > { %17139 = vst [vmem:[#allocation141_spill] sm:$0xff] %v12688_v19  ;;  %v4712_v19 = vrot.slane %v12681_v1, 7  ;;  %17146 = vst [vmem:[#allocation147_spill] sm:$0xff] %v12720_v16 }
 0x28c   : > { %v12694_v41 = vpop.permute.xlu1 %5440  ;;  %5002 = vrot.lane.b32.xlu0 %v4679_v30, %s10132_s9  ;;  %v3123_v30 = vadd.f32 %v3122_v37, %v11792_v36  ;;  %v4698_v38 = vsel %vm11892_vm7, %v9556_v40, %v4697_v26  ;;  %v4699_v1 = vrot.slane %v4697_v26, 2  ;;  %17148 = vst [vmem:[#allocation149_spill] sm:$0xff] %v12733_v8  ;;  %v4098_v40 = vcombine.high %v12661_v18, %v12661_v18 }
 0x28d   : > { %17141 = vst [vmem:[#allocation143_spill] sm:$0xff] %v12694_v41  ;;  %v12708_v41 = vcombine.high %v12666_v63, %v12666_v63  ;;  %v4713_v35 = vsel %vm11892_vm7, %v4711_v55, %v4712_v19  ;;  %v12744_v55 = vcombine.high %v12712_v7, %v12712_v7 }
 0x28e   : > { %5004 = vrot.lane.b32.xlu1 %v4682_v28, %s10132_s9  ;;  %v12716_v6 = vpop.permute.xlu0 %4922  ;;  %v4708_v28 = vrot.slane %v4706_v43, 2  ;;  %v3677_v43 = vadd.f32 %v9843_v51, %v3128_v4  ;;  %v12738_v37 = vadd.f32 %v3593_v34, %v3123_v30  ;;  %v4717_v51 = vrot.slane %v4715_v12, 2 }
 0x28f   : > { %17143 = vst [vmem:[#allocation144_spill] sm:$0xff] %v12708_v41  ;;  %17145 = vst [vmem:[#allocation146_spill] sm:$0xff] %v12716_v6  ;;  %v4700_v36 = vrot.slane %v12708_v41, 7  ;;  %v4718_v4 = vrot.slane %v12733_v8, 7  ;;  %v4728_v30 = vrot.slane %v12720_v16, 7 }
 0x290   : > { %v12722_v23 = vpop.permute.xlu1 %5460  ;;  %5014 = vrot.lane.b32.xlu0 %v4698_v38, %s10132_s9  ;;  %17150 = vst [vmem:[#allocation151_spill] sm:$0xff] %v12744_v55  ;;  %v4710_v6 = vsel %vm11892_vm7, %v4708_v28, %v4709_v15  ;;  %v12763_v15 = vrot.slane %v3677_v43, %v10342_v9  ;;  %v9788_v28 = vpop.f32.mrf.mxu1 }
 0x291   : > { %17147 = vst [vmem:[#allocation148_spill] sm:$0xff] %v12722_v23  ;;  %v4714_v23 = vrot.slane %v4712_v19, 2  ;;  %v4701_v18 = vsel %vm11892_vm7, %v4699_v1, %v4700_v36 }
 0x292   : > { %5024 = vrot.lane.b32.xlu1 %v4713_v35, %s10132_s9  ;;  %v12740_v38 = vpop.permute.xlu0 %5442  ;;  %v16597_v35 = vrot.slane %v12686_v29, 7  ;;  %17154 = vst [vmem:[#allocation155_spill] sm:$0xff] %v12763_v15 }
 0x293   : > { %17149 = vst [vmem:[#allocation150_spill] sm:$0xff] %v12740_v38  ;;  %v12760_v38 = vrot.slane %v4098_v40, %v10342_v9  ;;  %v4719_v40 = vsel %vm11892_vm7, %v4717_v51, %v4718_v4  ;;  %v4702_v4 = vrot.slane %v4700_v36, 2 }
 0x294   : > { %v12746_v26 = vpop.permute.xlu1 %4916  ;;  %5022 = vrot.lane.b32.xlu0 %v4710_v6, %s10132_s9  ;;  %v4716_v6 = vsel %vm11892_vm7, %v4714_v23, %v4715_v12  ;;  %v4727_v1 = vrot.slane %v16597_v35, 2  ;;  %v4731_v12 = vrot.slane %v12712_v7, 7 }
 0x295   : > { %17151 = vst [vmem:[#allocation152_spill] sm:$0xff] %v12746_v26  ;;  %17153 = vst [vmem:[#allocation154_spill] sm:$0xff] %v12760_v38  ;;  %v4734_v26 = vrot.slane %v12744_v55, 7  ;;  %v12785_v35 = vcombine.high %v12760_v38, %v12760_v38 }
 0x296   : > { %5016 = vrot.lane.b32.xlu1 %v4701_v18, %s10132_s9  ;;  %v12757_v34 = vpop.permute.xlu0 %5450  ;;  %v12773_v18 = vrot.slane %v12738_v37, %v10342_v9  ;;  %v4729_v51 = vsel %vm11892_vm7, %v4727_v1, %v4728_v30  ;;  %v4733_v39 = vrot.slane %v4731_v12, 2 }
 0x297   : > { %17152 = vst [vmem:[#allocation153_spill] sm:$0xff] %v12757_v34  ;;  %v4730_v34 = vrot.slane %v4728_v30, 2  ;;  %v4736_v55 = vrot.slane %v4734_v26, 2 }
 0x298   : > { %v12765_v19 = vpop.permute.xlu1 %5444  ;;  %17156 = vst [vmem:[#allocation157_spill] sm:$0xff] %v12773_v18  ;;  %5026 = vrot.lane.b32.xlu0 %v4716_v6, %s10132_s9  ;;  %v12789_v6 = vcombine.high %v12763_v15, %v12763_v15  ;;  %v4737_v7 = vrot.slane %v12773_v18, 7 }
 0x299   : > { %17155 = vst [vmem:[#allocation156_spill] sm:$0xff] %v12765_v19  ;;  %v4149_v19 = vcombine.high %v3677_v43, %v3677_v43  ;;  %v9846_v43 = vpop.f32.mrf.mxu0 }
 0x29a   : > { %5028 = vrot.lane.b32.xlu1 %v4719_v40, %s10132_s9  ;;  %v12780_v23 = vpop.permute.xlu0 %4918  ;;  %17158 = vst [vmem:[#allocation159_spill] sm:$0xff] %v12789_v6  ;;  %v3132_v40 = vpop.f32.mrf.mxu1 }
 0x29b   : > { %17157 = vst [vmem:[#allocation158_spill] sm:$0xff] %v12780_v23  ;;  %v4732_v23 = vsel %vm11892_vm7, %v4730_v34, %v4731_v12  ;;  %v12805_v36 = vrot.slane %v4149_v19, %v10342_v9  ;;  %v3133_v30 = vadd.f32 %v3132_v40, %v11800_v46  ;;  %v17163_v34 = vrot.slane %v12604_v3, 7  ;;  %v3603_v57 = vpop.f32.mrf.mxu0 }
 0x29c   : > { %v12791_v16 = vpop.permute.xlu1 %5452  ;;  %5034 = vrot.lane.b32.xlu0 %v4729_v51, %s10132_s9  ;;  %v4722_v46 = vrot.slane %v12785_v35, 7  ;;  %v4132_v12 = vcombine.high %v12738_v37, %v12738_v37 }
 0x29d   : > { %17159 = vst [vmem:[#allocation160_spill] sm:$0xff] %v12791_v16  ;;  %v3138_v16 = vadd.f32 %v9788_v28, %v11796_v48  ;;  %17161 = vst [vmem:[#allocation162_spill] sm:$0xff] %v12805_v36  ;;  %v4704_v51 = vsel %vm11892_vm7, %v4702_v4, %v17163_v34  ;;  %v4738_v48 = vsel %vm11892_vm7, %v4736_v55, %v4737_v7  ;;  %v17164_v28 = vrot.slane %v12763_v15, 7 }
 0x29e   : > { %5036 = vrot.lane.b32.xlu1 %v4732_v23, %s10132_s9  ;;  %v12802_v8 = vpop.permute.xlu0 %4926  ;;  %v4750_v23 = vrot.slane %v12789_v6, 7  ;;  %v12828_v4 = vcombine.high %v12773_v18, %v12773_v18  ;;  %v3678_v55 = vadd.f32 %v3603_v57, %v3133_v30  ;;  %v4753_v37 = vrot.slane %v12805_v36, 7 }
 0x29f   : > { %17160 = vst [vmem:[#allocation161_spill] sm:$0xff] %v12802_v8  ;;  %v4749_v19 = vrot.slane %v17164_v28, 2  ;;  %v3679_v40 = vadd.f32 %v9846_v43, %v3138_v16  ;;  %v4724_v43 = vrot.slane %v4722_v46, 2  ;;  %v9557_v57 = vrot.slane %v12760_v38, 9  ;;  %v9791_v28 = vpop.f32.mrf.mxu1 }
 0x2a0   : > { %v12808_v1 = vpop.permute.xlu1 %4928  ;;  %5018 = vrot.lane.b32.xlu0 %v4704_v51, %s10132_s9  ;;  %17166 = vst [vmem:[#allocation165_spill] sm:$0xff] %v12828_v4  ;;  %v4735_v51 = vsel %vm11892_vm7, %v4733_v39, %v4734_v26  ;;  %v12850_v26 = vrot.slane %v4132_v12, %v10342_v9  ;;  %v17173_v38 = vrot.slane %v12686_v29, 7 }
 0x2a1   : > { %17162 = vst [vmem:[#allocation163_spill] sm:$0xff] %v12808_v1  ;;  %v4751_v16 = vsel %vm11892_vm7, %v4749_v19, %v4750_v23  ;;  %v12845_v30 = vrot.slane %v3679_v40, %v10342_v9  ;;  %v4739_v1 = vrot.slane %v4737_v7, 2  ;;  %v3142_v6 = vpop.f32.mrf.mxu1 }
 0x2a2   : > { %5040 = vrot.lane.b32.xlu1 %v4738_v48, %s10132_s9  ;;  %v12822_v8 = vpop.permute.xlu0 %4934  ;;  %v12839_v48 = vcombine.high %v12805_v36, %v12805_v36  ;;  %v4726_v12 = vsel %vm11892_vm7, %v4724_v43, %v17173_v38  ;;  %v4166_v36 = vcombine.high %v3678_v55, %v3678_v55  ;;  %v9849_v38 = vpop.f32.mrf.mxu0 }
 0x2a3   : > { %17165 = vst [vmem:[#allocation164_spill] sm:$0xff] %v12822_v8  ;;  %17169 = vst [vmem:[#allocation168_spill] sm:$0xff] %v12845_v30  ;;  %v4740_v8 = vrot.slane %v12828_v4, 7  ;;  %v12869_v7 = vcombine.high %v12845_v30, %v12845_v30 }
 0x2a4   : > { %v12830_v34 = vpop.permute.xlu1 %4936  ;;  %5038 = vrot.lane.b32.xlu0 %v4735_v51, %s10132_s9  ;;  %17168 = vst [vmem:[#allocation167_spill] sm:$0xff] %v12839_v48  ;;  %v4723_v51 = vsel %vm11892_vm7, %v9557_v57, %v4722_v46  ;;  %v3148_v46 = vadd.f32 %v9791_v28, %v11804_v49  ;;  %v12898_v4 = vrot.slane %v4166_v36, %v10342_v9 }
 0x2a5   : > { %17167 = vst [vmem:[#allocation166_spill] sm:$0xff] %v12830_v34  ;;  %v4756_v34 = vrot.slane %v12839_v48, 7  ;;  %17174 = vst [vmem:[#allocation172_spill] sm:$0xff] %v12869_v7  ;;  %v4742_v28 = vrot.slane %v4740_v8, 2  ;;  %v4772_v36 = vrot.slane %v12869_v7, 7 }
 0x2a6   : > { %5048 = vrot.lane.b32.xlu1 %v4751_v16, %s10132_s9  ;;  %v12847_v39 = vpop.permute.xlu0 %5462  ;;  %v12858_v16 = vrot.slane %v3678_v55, %v10342_v9  ;;  %17181 = vst [vmem:[#allocation179_spill] sm:$0xff] %v12898_v4 }
 0x2a7   : > { %17170 = vst [vmem:[#allocation169_spill] sm:$0xff] %v12847_v39  ;;  %v4755_v39 = vrot.slane %v4753_v37, 2 }
 0x2a8   : > { %v12852_v19 = vpop.permute.xlu1 %5456  ;;  %17172 = vst [vmem:[#allocation171_spill] sm:$0xff] %v12858_v16  ;;  %5030 = vrot.lane.b32.xlu0 %v4723_v51, %s10132_s9  ;;  %v12876_v51 = vcombine.high %v12850_v26, %v12850_v26  ;;  %v12884_v48 = vcombine.high %v12858_v16, %v12858_v16  ;;  %v4759_v55 = vrot.slane %v12858_v16, 7 }
 0x2a9   : > { %17171 = vst [vmem:[#allocation170_spill] sm:$0xff] %v12852_v19  ;;  %v4183_v19 = vcombine.high %v3679_v40, %v3679_v40  ;;  %v4752_v40 = vrot.slane %v4750_v23, 2  ;;  %v4757_v49 = vsel %vm11892_vm7, %v4755_v39, %v4756_v34 }
 0x2aa   : > { %5032 = vrot.lane.b32.xlu1 %v4726_v12, %s10132_s9  ;;  %v12872_v57 = vpop.permute.xlu0 %4938  ;;  %17176 = vst [vmem:[#allocation174_spill] sm:$0xff] %v12876_v51  ;;  %v4741_v12 = vsel %vm11892_vm7, %v4739_v1, %v4740_v8  ;;  %17178 = vst [vmem:[#allocation176_spill] sm:$0xff] %v12884_v48  ;;  %v3681_v1 = vadd.f32 %v9849_v38, %v3148_v46  ;;  %v9558_v39 = vrot.slane %v12876_v51, 9  ;;  %v4761_v46 = vrot.slane %v4759_v55, 2 }
 0x2ab   : > { %17175 = vst [vmem:[#allocation173_spill] sm:$0xff] %v12872_v57  ;;  %v4743_v57 = vrot.slane %v12850_v26, 7  ;;  %v4754_v8 = vsel %vm11892_vm7, %v4752_v40, %v4753_v37  ;;  %v4762_v38 = vrot.slane %v12884_v48, 7  ;;  %v17185_v51 = vrot.slane %v12763_v15, 7 }
 0x2ac   : > { %v12878_v43 = vpop.permute.xlu1 %5464  ;;  %5042 = vrot.lane.b32.xlu0 %v4741_v12, %s10132_s9  ;;  %v3143_v12 = vadd.f32 %v3142_v6, %v11808_v50  ;;  %v4217_v50 = vcombine.high %v3681_v1, %v3681_v1 }
 0x2ad   : > { %17177 = vst [vmem:[#allocation175_spill] sm:$0xff] %v12878_v43  ;;  %v12892_v43 = vrot.slane %v4183_v19, %v10342_v9  ;;  %v4744_v19 = vsel %vm11892_vm7, %v4742_v28, %v4743_v57  ;;  %v4758_v57 = vrot.slane %v4756_v34, 2  ;;  %v12922_v28 = vcombine.high %v12898_v4, %v12898_v4 }
 0x2ae   : > { %5052 = vrot.lane.b32.xlu1 %v4757_v49, %s10132_s9  ;;  %v12894_v23 = vpop.permute.xlu0 %5454  ;;  %v3613_v49 = vpop.f32.mrf.mxu0 }
 0x2af   : > { %17179 = vst [vmem:[#allocation177_spill] sm:$0xff] %v12892_v43  ;;  %17180 = vst [vmem:[#allocation178_spill] sm:$0xff] %v12894_v23  ;;  %v3680_v37 = vadd.f32 %v3613_v49, %v3143_v12  ;;  %v4765_v12 = vrot.slane %v12898_v4, 7  ;;  %v12930_v49 = vcombine.high %v12892_v43, %v12892_v43  ;;  %v4760_v7 = vsel %vm11892_vm7, %v4758_v57, %v4759_v55 }
 0x2b0   : > { %v12901_v18 = vpop.permute.xlu1 %4932  ;;  %5050 = vrot.lane.b32.xlu0 %v4754_v8, %s10132_s9  ;;  %v4748_v8 = vsel %vm11892_vm7, %v9558_v39, %v17185_v51  ;;  %17186 = vst [vmem:[#allocation183_spill] sm:$0xff] %v12922_v28  ;;  %v4775_v39 = vrot.slane %v12892_v43, 7  ;;  %v9852_v23 = vpop.f32.mrf.mxu0  ;;  %v12955_v43 = vrot.slane %v3681_v1, %v10342_v9 }
 0x2b1   : > { %17182 = vst [vmem:[#allocation180_spill] sm:$0xff] %v12901_v18  ;;  %v9794_v18 = vpop.f32.mrf.mxu1  ;;  %17187 = vst [vmem:[#allocation184_spill] sm:$0xff] %v12930_v49 }
 0x2b2   : > { %5044 = vrot.lane.b32.xlu1 %v4744_v19, %s10132_s9  ;;  %v12912_v6 = vpop.permute.xlu0 %4930  ;;  %v4763_v19 = vsel %vm11892_vm7, %v4761_v46, %v4762_v38  ;;  %v3158_v34 = vadd.f32 %v9794_v18, %v11812_v24  ;;  %v12941_v46 = vrot.slane %v3680_v37, %v10342_v9  ;;  %v4767_v18 = vrot.slane %v4765_v12, 2 }
 0x2b3   : > { %17183 = vst [vmem:[#allocation181_spill] sm:$0xff] %v12912_v6  ;;  %v4774_v6 = vrot.slane %v4772_v36, 2 }
 0x2b4   : > { %v12914_v40 = vpop.permute.xlu1 %4940  ;;  %5046 = vrot.lane.b32.xlu0 %v4748_v8, %s10132_s9  ;;  %v12938_v8 = vrot.slane %v4217_v50, %v10342_v9  ;;  %17190 = vst [vmem:[#allocation187_spill] sm:$0xff] %v12941_v46  ;;  %v4778_v50 = vrot.slane %v12930_v49, 7  ;;  %v3683_v4 = vadd.f32 %v9852_v23, %v3158_v34  ;;  %v12970_v1 = vcombine.high %v12941_v46, %v12941_v46 }
 0x2b5   : > { %17184 = vst [vmem:[#allocation182_spill] sm:$0xff] %v12914_v40  ;;  %v4776_v24 = vsel %vm11892_vm7, %v4774_v6, %v4775_v39  ;;  %v4781_v34 = vrot.slane %v12941_v46, 7 }
 0x2b6   : > { %5056 = vrot.lane.b32.xlu1 %v4763_v19, %s10132_s9  ;;  %v12934_v51 = vpop.permute.xlu0 %4950  ;;  %17189 = vst [vmem:[#allocation186_spill] sm:$0xff] %v12938_v8  ;;  %v4768_v19 = vrot.slane %v12922_v28, 7  ;;  %v4777_v28 = vrot.slane %v4775_v39, 2  ;;  %v12965_v49 = vcombine.high %v12938_v8, %v12938_v8  ;;  %17195 = vst [vmem:[#allocation192_spill] sm:$0xff] %v12970_v1 }
 0x2b7   : > { %17188 = vst [vmem:[#allocation185_spill] sm:$0xff] %v12934_v51  ;;  %v9559_v51 = vrot.slane %v12845_v30, 9 }
 0x2b8   : > { %v12943_v40 = vpop.permute.xlu1 %4952  ;;  %5054 = vrot.lane.b32.xlu0 %v4760_v7, %s10132_s9  ;;  %v3152_v7 = vpop.f32.mrf.mxu1  ;;  %17194 = vst [vmem:[#allocation191_spill] sm:$0xff] %v12965_v49  ;;  %v4769_v23 = vsel %vm11892_vm7, %v4767_v18, %v4768_v19  ;;  %v4800_v19 = vrot.slane %v12965_v49, 7 }
 0x2b9   : > { %17191 = vst [vmem:[#allocation188_spill] sm:$0xff] %v12943_v40  ;;  %v4200_v40 = vcombine.high %v3680_v37, %v3680_v37  ;;  %v4773_v6 = vsel %vm11892_vm7, %v9559_v51, %v4772_v36  ;;  %v4780_v37 = vrot.slane %v4778_v50, 2  ;;  %v12979_v36 = vcombine.high %v12955_v43, %v12955_v43 }
 0x2ba   : > { %5064 = vrot.lane.b32.xlu1 %v4776_v24, %s10132_s9  ;;  %v12957_v55 = vpop.permute.xlu0 %5458  ;;  %v4797_v24 = vrot.slane %v12938_v8, 7  ;;  %v3153_v51 = vadd.f32 %v3152_v7, %v11816_v47  ;;  %v3623_v8 = vpop.f32.mrf.mxu0  ;;  %v4784_v7 = vrot.slane %v12970_v1, 7  ;;  %v4783_v1 = vrot.slane %v4781_v34, 2 }
 0x2bb   : > { %17192 = vst [vmem:[#allocation189_spill] sm:$0xff] %v12957_v55  ;;  %17196 = vst [vmem:[#allocation193_spill] sm:$0xff] %v12979_v36  ;;  %v4764_v55 = vrot.slane %v4762_v38, 2  ;;  %v4782_v47 = vsel %vm11892_vm7, %v4780_v37, %v4781_v34 }
 0x2bc   : > { %v12959_v57 = vpop.permute.xlu1 %4944  ;;  %5062 = vrot.lane.b32.xlu0 %v4773_v6, %s10132_s9  ;;  %v4779_v6 = vsel %vm11892_vm7, %v4777_v28, %v4778_v50  ;;  %v4799_v18 = vrot.slane %v4797_v24, 2  ;;  %v9797_v28 = vpop.f32.mrf.mxu1  ;;  %v3682_v50 = vadd.f32 %v3623_v8, %v3153_v51  ;;  %v4786_v37 = vrot.slane %v4784_v7, 2 }
 0x2bd   : > { %17193 = vst [vmem:[#allocation190_spill] sm:$0xff] %v12959_v57  ;;  %v12990_v57 = vrot.slane %v4200_v40, %v10342_v9  ;;  %v4766_v40 = vsel %vm11892_vm7, %v4764_v55, %v4765_v12  ;;  %v4251_v12 = vcombine.high %v3683_v4, %v3683_v4  ;;  %v3168_v55 = vadd.f32 %v9797_v28, %v11820_v45 }
 0x2be   : > { %5060 = vrot.lane.b32.xlu1 %v4769_v23, %s10132_s9  ;;  %v12982_v39 = vpop.permute.xlu0 %4942  ;;  %v12993_v23 = vrot.slane %v3683_v4, %v10342_v9  ;;  %v3162_v46 = vpop.f32.mrf.mxu1 }
 0x2bf   : > { %17197 = vst [vmem:[#allocation194_spill] sm:$0xff] %v12982_v39  ;;  %17199 = vst [vmem:[#allocation196_spill] sm:$0xff] %v12990_v57  ;;  %v4801_v39 = vsel %vm11892_vm7, %v4799_v18, %v4800_v19  ;;  %v13017_v8 = vcombine.high %v12990_v57, %v12990_v57  ;;  %v4787_v18 = vrot.slane %v12990_v57, 7 }
 0x2c0   : > { %v12984_v30 = vpop.permute.xlu1 %4964  ;;  %17200 = vst [vmem:[#allocation197_spill] sm:$0xff] %v12993_v23  ;;  %5066 = vrot.lane.b32.xlu0 %v4779_v6, %s10132_s9  ;;  %v9560_v6 = vrot.slane %v12979_v36, 9  ;;  %v13025_v36 = vrot.slane %v3682_v50, %v10342_v9  ;;  %v17208_v4 = vrot.slane %v12993_v23, 7 }
 0x2c1   : > { %17198 = vst [vmem:[#allocation195_spill] sm:$0xff] %v12984_v30  ;;  %17204 = vst [vmem:[#allocation201_spill] sm:$0xff] %v13017_v8  ;;  %v4788_v45 = vsel %vm11892_vm7, %v4786_v37, %v4787_v18 }
 0x2c2   : > { %5068 = vrot.lane.b32.xlu1 %v4782_v47, %s10132_s9  ;;  %v13000_v38 = vpop.permute.xlu0 %4946  ;;  %v13012_v47 = vcombine.high %v12993_v23, %v12993_v23  ;;  %17206 = vst [vmem:[#allocation203_spill] sm:$0xff] %v13025_v36 }
 0x2c3   : > { %17201 = vst [vmem:[#allocation198_spill] sm:$0xff] %v13000_v38  ;;  %v4798_v38 = vsel %vm11892_vm7, %v9560_v6, %v4797_v24  ;;  %v3163_v6 = vadd.f32 %v3162_v46, %v11824_v10  ;;  %v4793_v10 = vrot.slane %v12955_v43, 7 }
 0x2c4   : > { %v13002_v30 = vpop.permute.xlu1 %4948  ;;  %5058 = vrot.lane.b32.xlu0 %v4766_v40, %s10132_s9  ;;  %17203 = vst [vmem:[#allocation200_spill] sm:$0xff] %v13012_v47  ;;  %v4234_v40 = vcombine.high %v3682_v50, %v3682_v50  ;;  %v4818_v28 = vrot.slane %v13012_v47, 7  ;;  %v4790_v50 = vrot.slane %v13017_v8, 7 }
 0x2c5   : > { %17202 = vst [vmem:[#allocation199_spill] sm:$0xff] %v13002_v30  ;;  %v9855_v30 = vpop.f32.mrf.mxu0 }
 0x2c6   : > { %5080 = vrot.lane.b32.xlu1 %v4801_v39, %s10132_s9  ;;  %v13021_v51 = vpop.permute.xlu0 %4954  ;;  %v4817_v39 = vrot.slane %v17208_v4, 2  ;;  %v3685_v24 = vadd.f32 %v9855_v30, %v3168_v55  ;;  %v4785_v4 = vsel %vm11892_vm7, %v4783_v1, %v4784_v7  ;;  %v4792_v55 = vrot.slane %v4790_v50, 2 }
 0x2c7   : > { %17205 = vst [vmem:[#allocation202_spill] sm:$0xff] %v13021_v51  ;;  %v13040_v51 = vrot.slane %v4251_v12, %v10342_v9  ;;  %v3633_v12 = vpop.f32.mrf.mxu0 }
 0x2c8   : > { %v13027_v49 = vpop.permute.xlu1 %4956  ;;  %5078 = vrot.lane.b32.xlu0 %v4798_v38, %s10132_s9  ;;  %v13046_v38 = vcombine.high %v13025_v36, %v13025_v36  ;;  %v4819_v30 = vsel %vm11892_vm7, %v4817_v39, %v4818_v28  ;;  %v13067_v1 = vrot.slane %v3685_v24, %v10342_v9  ;;  %v4802_v28 = vrot.slane %v4800_v19, 2 }
 0x2c9   : > { %17207 = vst [vmem:[#allocation204_spill] sm:$0xff] %v13027_v49  ;;  %17209 = vst [vmem:[#allocation205_spill] sm:$0xff] %v13040_v51  ;;  %v4789_v49 = vrot.slane %v4787_v18, 2  ;;  %v13064_v46 = vcombine.high %v13040_v51, %v13040_v51  ;;  %v9800_v18 = vpop.f32.mrf.mxu1 }
 0x2ca   : > { %5072 = vrot.lane.b32.xlu1 %v4788_v45, %s10132_s9  ;;  %v13042_v34 = vpop.permute.xlu0 %4966  ;;  %17211 = vst [vmem:[#allocation207_spill] sm:$0xff] %v13046_v38  ;;  %v13054_v45 = vrot.slane %v4234_v40, %v10342_v9  ;;  %17215 = vst [vmem:[#allocation211_spill] sm:$0xff] %v13067_v1  ;;  %v3684_v40 = vadd.f32 %v3633_v12, %v3163_v6  ;;  %v3178_v12 = vadd.f32 %v9800_v18, %v11828_v58 }
 0x2cb   : > { %17210 = vst [vmem:[#allocation206_spill] sm:$0xff] %v13042_v34  ;;  %v4803_v34 = vrot.slane %v13025_v36, 7  ;;  %17214 = vst [vmem:[#allocation210_spill] sm:$0xff] %v13064_v46  ;;  %v4791_v39 = vsel %vm11892_vm7, %v4789_v49, %v4790_v50  ;;  %v9858_v50 = vpop.f32.mrf.mxu0 }
 0x2cc   : > { %v13049_v37 = vpop.permute.xlu1 %4960  ;;  %17213 = vst [vmem:[#allocation209_spill] sm:$0xff] %v13054_v45  ;;  %5070 = vrot.lane.b32.xlu0 %v4785_v4, %s10132_s9  ;;  %v13081_v36 = vcombine.high %v13054_v45, %v13054_v45  ;;  %v4809_v6 = vrot.slane %v13054_v45, 7  ;;  %v13089_v19 = vrot.slane %v3684_v40, %v10342_v9 }
 0x2cd   : > { %17212 = vst [vmem:[#allocation208_spill] sm:$0xff] %v13049_v37  ;;  %v4794_v37 = vsel %vm11892_vm7, %v4792_v55, %v4793_v10  ;;  %v4805_v47 = vrot.slane %v4803_v34, 2  ;;  %v4804_v55 = vsel %vm11892_vm7, %v4802_v28, %v4803_v34  ;;  %v4822_v10 = vrot.slane %v13064_v46, 7 }
 0x2ce   : > { %5092 = vrot.lane.b32.xlu1 %v4819_v30, %s10132_s9  ;;  %v13069_v7 = vpop.permute.xlu0 %4958  ;;  %v4806_v30 = vrot.slane %v13046_v38, 7  ;;  %17218 = vst [vmem:[#allocation214_spill] sm:$0xff] %v13081_v36  ;;  %17220 = vst [vmem:[#allocation216_spill] sm:$0xff] %v13089_v19  ;;  %v4812_v18 = vrot.slane %v13081_v36, 7  ;;  %v4268_v34 = vcombine.high %v3684_v40, %v3684_v40  ;;  %v3687_v28 = vadd.f32 %v9858_v50, %v3178_v12 }
 0x2cf   : > { %17216 = vst [vmem:[#allocation212_spill] sm:$0xff] %v13069_v7  ;;  %v13098_v7 = vcombine.high %v13067_v1, %v13067_v1  ;;  %v13110_v46 = vcombine.high %v13089_v19, %v13089_v19  ;;  %v4824_v40 = vrot.slane %v4822_v10, 2  ;;  %v4825_v12 = vrot.slane %v13089_v19, 7 }
 0x2d0   : > { %v13071_v4 = vpop.permute.xlu1 %4968  ;;  %5074 = vrot.lane.b32.xlu0 %v4791_v39, %s10132_s9  ;;  %v4807_v58 = vsel %vm11892_vm7, %v4805_v47, %v4806_v30  ;;  %v4808_v45 = vrot.slane %v4806_v30, 2  ;;  %v13130_v36 = vrot.slane %v3687_v28, %v10342_v9 }
 0x2d1   : > { %17217 = vst [vmem:[#allocation213_spill] sm:$0xff] %v13071_v4  ;;  %17222 = vst [vmem:[#allocation218_spill] sm:$0xff] %v13098_v7  ;;  %v4840_v50 = vrot.slane %v13098_v7, 7 }
 0x2d2   : > { %5076 = vrot.lane.b32.xlu1 %v4794_v37, %s10132_s9  ;;  %v13086_v49 = vpop.permute.xlu0 %4978  ;;  %v4811_v37 = vrot.slane %v4809_v6, 2  ;;  %17224 = vst [vmem:[#allocation220_spill] sm:$0xff] %v13110_v46  ;;  %17227 = vst [vmem:[#allocation223_spill] sm:$0xff] %v13130_v36 }
 0x2d3   : > { %17219 = vst [vmem:[#allocation215_spill] sm:$0xff] %v13086_v49  ;;  %v9561_v49 = vrot.slane %v13040_v51, 9 }
 0x2d4   : > { %v13091_v39 = vpop.permute.xlu1 %4980  ;;  %5082 = vrot.lane.b32.xlu0 %v4804_v55, %s10132_s9 }
 0x2d5   : > { %17221 = vst [vmem:[#allocation217_spill] sm:$0xff] %v13091_v39  ;;  %v4285_v39 = vcombine.high %v3685_v24, %v3685_v24  ;;  %v4823_v47 = vsel %vm11892_vm7, %v9561_v49, %v4822_v10  ;;  %v4813_v24 = vsel %vm11892_vm7, %v4811_v37, %v4812_v18  ;;  %v4810_v10 = vsel %vm11892_vm7, %v4808_v45, %v4809_v6 }
 0x2d6   : > { %5084 = vrot.lane.b32.xlu1 %v4807_v58, %s10132_s9  ;;  %v13106_v4 = vpop.permute.xlu0 %4962  ;;  %v3172_v58 = vpop.f32.mrf.mxu1  ;;  %v17229_v37 = vrot.slane %v13067_v1, 7  ;;  %v13151_v6 = vcombine.high %v13130_v36, %v13130_v36 }
 0x2d7   : > { %17223 = vst [vmem:[#allocation219_spill] sm:$0xff] %v13106_v4  ;;  %v13124_v4 = vrot.slane %v4285_v39, %v10342_v9  ;;  %v3173_v30 = vadd.f32 %v3172_v58, %v11832_v62  ;;  %v3643_v39 = vpop.f32.mrf.mxu0  ;;  %v4826_v62 = vsel %vm11892_vm7, %v4824_v40, %v4825_v12  ;;  %v4842_v58 = vrot.slane %v4840_v50, 2 }
 0x2d8   : > { %v13112_v55 = vpop.permute.xlu1 %4972  ;;  %5094 = vrot.lane.b32.xlu0 %v4823_v47, %s10132_s9  ;;  %v4839_v51 = vrot.slane %v17229_v37, 2  ;;  %17232 = vst [vmem:[#allocation227_spill] sm:$0xff] %v13151_v6  ;;  %v4814_v40 = vrot.slane %v4812_v18, 2 }
 0x2d9   : > { %17225 = vst [vmem:[#allocation221_spill] sm:$0xff] %v13112_v55  ;;  %v4843_v45 = vrot.slane %v13124_v4, 7 }
 0x2da   : > { %5088 = vrot.lane.b32.xlu1 %v4813_v24, %s10132_s9  ;;  %v13126_v49 = vpop.permute.xlu0 %4970  ;;  %v13139_v24 = vrot.slane %v4268_v34, %v10342_v9  ;;  %v3686_v34 = vadd.f32 %v3643_v39, %v3173_v30 }
 0x2db   : > { %17226 = vst [vmem:[#allocation222_spill] sm:$0xff] %v13126_v49  ;;  %v4828_v49 = vrot.slane %v13110_v46, 7 }
 0x2dc   : > { %v13132_v47 = vpop.permute.xlu1 %4992  ;;  %17230 = vst [vmem:[#allocation225_spill] sm:$0xff] %v13139_v24  ;;  %5086 = vrot.lane.b32.xlu0 %v4810_v10, %s10132_s9  ;;  %v4841_v10 = vsel %vm11892_vm7, %v4839_v51, %v4840_v50  ;;  %v13163_v7 = vcombine.high %v13139_v24, %v13139_v24  ;;  %v4831_v39 = vrot.slane %v13139_v24, 7  ;;  %v4319_v51 = vcombine.high %v3687_v28, %v3687_v28 }
 0x2dd   : > { %17228 = vst [vmem:[#allocation224_spill] sm:$0xff] %v13132_v47  ;;  %v4830_v55 = vrot.slane %v4828_v49, 2  ;;  %v13170_v18 = vrot.slane %v3686_v34, %v10342_v9  ;;  %v4862_v28 = vrot.slane %v13151_v6, 7  ;;  %v4302_v46 = vcombine.high %v3686_v34, %v3686_v34 }
 0x2de   : > { %5096 = vrot.lane.b32.xlu1 %v4826_v62, %s10132_s9  ;;  %v13146_v47 = vpop.permute.xlu0 %4974  ;;  %v4844_v62 = vsel %vm11892_vm7, %v4842_v58, %v4843_v45  ;;  %17234 = vst [vmem:[#allocation229_spill] sm:$0xff] %v13163_v7  ;;  %v17238_v58 = vrot.slane %v12993_v23, 7 }
 0x2df   : > { %17231 = vst [vmem:[#allocation226_spill] sm:$0xff] %v13146_v47  ;;  %v16654_v47 = vrot.slane %v13130_v36, 7  ;;  %17236 = vst [vmem:[#allocation231_spill] sm:$0xff] %v13170_v18  ;;  %v4847_v34 = vrot.slane %v13170_v18, 7 }
 0x2e0   : > { %v13153_v37 = vpop.permute.xlu1 %4976  ;;  %5106 = vrot.lane.b32.xlu0 %v4841_v10, %s10132_s9  ;;  %v4816_v45 = vsel %vm11892_vm7, %v4814_v40, %v17238_v58  ;;  %v4827_v10 = vrot.slane %v4825_v12, 2  ;;  %v13190_v12 = vcombine.high %v13170_v18, %v13170_v18  ;;  %v4833_v58 = vrot.slane %v4831_v39, 2 }
 0x2e1   : > { %17233 = vst [vmem:[#allocation228_spill] sm:$0xff] %v13153_v37  ;;  %v4834_v37 = vrot.slane %v13163_v7, 7 }
 0x2e2   : > { %5108 = vrot.lane.b32.xlu1 %v4844_v62, %s10132_s9  ;;  %v13166_v30 = vpop.permute.xlu0 %4982  ;;  %v4832_v62 = vsel %vm11892_vm7, %v4830_v55, %v4831_v39  ;;  %17240 = vst [vmem:[#allocation234_spill] sm:$0xff] %v13190_v12  ;;  %v4829_v55 = vsel %vm11892_vm7, %v4827_v10, %v4828_v49  ;;  %v13211_v49 = vrot.slane %v4302_v46, %v10342_v9  ;;  %v17247_v10 = vrot.slane %v13067_v1, 7 }
 0x2e3   : > { %17235 = vst [vmem:[#allocation230_spill] sm:$0xff] %v13166_v30  ;;  %v4861_v30 = vrot.slane %v16654_v47, 2  ;;  %v4836_v47 = vrot.slane %v4834_v37, 2  ;;  %v4835_v39 = vsel %vm11892_vm7, %v4833_v58, %v4834_v37 }
 0x2e4   : > { %v13172_v50 = vpop.permute.xlu1 %4984  ;;  %5090 = vrot.lane.b32.xlu0 %v4816_v45, %s10132_s9  ;;  %v13197_v45 = vrot.slane %v4319_v51, %v10342_v9  ;;  %17245 = vst [vmem:[#allocation239_spill] sm:$0xff] %v13211_v49 }
 0x2e5   : > { %17237 = vst [vmem:[#allocation232_spill] sm:$0xff] %v13172_v50 }
 0x2e6   : > { %5100 = vrot.lane.b32.xlu1 %v4832_v62, %s10132_s9  ;;  %v13186_v50 = vpop.permute.xlu0 %4994  ;;  %17242 = vst [vmem:[#allocation236_spill] sm:$0xff] %v13197_v45  ;;  %v4863_v62 = vsel %vm11892_vm7, %v4861_v30, %v4862_v28  ;;  %v4850_v30 = vrot.slane %v13190_v12, 7  ;;  %v13226_v46 = vcombine.high %v13197_v45, %v13197_v45 }
 0x2e7   : > { %17239 = vst [vmem:[#allocation233_spill] sm:$0xff] %v13186_v50  ;;  %v13205_v50 = vcombine.high %v13124_v4, %v13124_v4 }
 0x2e8   : > { %v13192_v40 = vpop.permute.xlu1 %4996  ;;  %5098 = vrot.lane.b32.xlu0 %v4829_v55, %s10132_s9  ;;  %v4838_v55 = vsel %vm11892_vm7, %v4836_v47, %v17247_v10  ;;  %17248 = vst [vmem:[#allocation241_spill] sm:$0xff] %v13226_v46  ;;  %v13238_v47 = vcombine.high %v13211_v49, %v13211_v49 }
 0x2e9   : > { %17241 = vst [vmem:[#allocation235_spill] sm:$0xff] %v13192_v40  ;;  %17243 = vst [vmem:[#allocation237_spill] sm:$0xff] %v13205_v50  ;;  %v9562_v37 = vrot.slane %v13205_v50, 9  ;;  %v4868_v50 = vrot.slane %v13226_v46, 7 }
 0x2ea   : > { %5120 = vrot.lane.b32.xlu1 %v4863_v62, %s10132_s9  ;;  %v13208_v40 = vpop.permute.xlu0 %4986  ;;  %v4849_v62 = vrot.slane %v4847_v34, 2  ;;  %17251 = vst [vmem:[#allocation244_spill] sm:$0xff] %v13238_v47 }
 0x2eb   : > { %17244 = vst [vmem:[#allocation238_spill] sm:$0xff] %v13208_v40  ;;  %v4865_v40 = vrot.slane %v13197_v45, 7 }
 0x2ec   : > { %v13215_v51 = vpop.permute.xlu1 %4988  ;;  %5102 = vrot.lane.b32.xlu0 %v4835_v39, %s10132_s9  ;;  %v4848_v39 = vsel %vm11892_vm7, %v9562_v37, %v4847_v34  ;;  %v4851_v10 = vsel %vm11892_vm7, %v4849_v62, %v4850_v30 }
 0x2ed   : > { %17246 = vst [vmem:[#allocation240_spill] sm:$0xff] %v13215_v51  ;;  %v4864_v51 = vrot.slane %v4862_v28, 2 }
 0x2ee   : > { %5104 = vrot.lane.b32.xlu1 %v4838_v55, %s10132_s9  ;;  %v13230_v58 = vpop.permute.xlu0 %5006  ;;  %v4867_v55 = vrot.slane %v4865_v40, 2 }
 0x2ef   : > { %17249 = vst [vmem:[#allocation242_spill] sm:$0xff] %v13230_v58  ;;  %v4853_v58 = vrot.slane %v13211_v49, 7  ;;  %v4866_v28 = vsel %vm11892_vm7, %v4864_v51, %v4865_v40 }
 0x2f0   : > { %v13234_v9 = vpop.permute.xlu1 %5008  ;;  %5110 = vrot.lane.b32.xlu0 %v4848_v39, %s10132_s9  ;;  %v4856_v39 = vrot.slane %v13238_v47, 7  ;;  %v4869_v62 = vsel %vm11892_vm7, %v4867_v55, %v4868_v50  ;;  %v17253_v50 = vrot.slane %v13130_v36, 7 }
 0x2f1   : > { %17250 = vst [vmem:[#allocation243_spill] sm:$0xff] %v13234_v9  ;;  %v4852_v9 = vrot.slane %v4850_v30, 2  ;;  %v4855_v45 = vrot.slane %v4853_v58, 2 }
 0x2f2   : > { %5112 = vrot.lane.b32.xlu1 %v4851_v10, %s10132_s9  ;;  %v13246_v34 = vpop.permute.xlu0 %4990  ;;  %v4858_v40 = vrot.slane %v4856_v39, 2 }
 0x2f3   : > { %17252 = vst [vmem:[#allocation245_spill] sm:$0xff] %v13246_v34  ;;  %v4854_v10 = vsel %vm11892_vm7, %v4852_v9, %v4853_v58  ;;  %v4857_v51 = vsel %vm11892_vm7, %v4855_v45, %v4856_v39 }
 0x2f4   : > { %v13250_v37 = vpop.permute.xlu1 %5000  ;;  %5122 = vrot.lane.b32.xlu0 %v4866_v28, %s10132_s9  ;;  %v4860_v55 = vsel %vm11892_vm7, %v4858_v40, %v17253_v50 }
 0x2f6   : > { %5124 = vrot.lane.b32.xlu1 %v4869_v62, %s10132_s9  ;;  %v13257_v46 = vpop.permute.xlu0 %4998 }
 0x2f8   : > { %v13261_v34 = vpop.permute.xlu1 %5012  ;;  %5114 = vrot.lane.b32.xlu0 %v4854_v10, %s10132_s9 }
 0x2fa   : > { %5116 = vrot.lane.b32.xlu1 %v4857_v51, %s10132_s9  ;;  %v13267_v30 = vpop.permute.xlu0 %5010 }
 0x2fc   : > { %v13273_v28 = vpop.permute.xlu1 %5020  ;;  %5118 = vrot.lane.b32.xlu0 %v4860_v55, %s10132_s9 }
 0x2fd   : > { %17254 = vst [vmem:[#allocation246_spill] sm:$0xff] %v13273_v28 }
 0x2fe   : > { %5468 = vrot.lane.b32.xlu1 %v12346_v14, %s10131_s3  ;;  %v13278_v9 = vpop.permute.xlu0 %5002 }
 0x300   : > { %v13280_v58 = vpop.permute.xlu1 %5004  ;;  %5466 = vrot.lane.b32.xlu0 %v12326_v61, %s10131_s3  ;;  %v17295_v61 = vld [vmem:[#allocation133_spill] sm:$0xff] }
 0x302   : > { %5472 = vrot.lane.b32.xlu1 %v12381_v60, %s10131_s3  ;;  %v13286_v45 = vpop.permute.xlu0 %5014 }
 0x303   : > { %17255 = vst [vmem:[#allocation247_spill] sm:$0xff] %v13286_v45  ;;  %v17270_v45 = vld [vmem:[#allocation99_spill] sm:$0xff] }
 0x304   : > { %v13288_v56 = vpop.permute.xlu1 %5024  ;;  %5470 = vrot.lane.b32.xlu0 %v12354_v27, %s10131_s3  ;;  %v17289_v27 = vld [vmem:[#allocation130_spill] sm:$0xff] }
 0x305   : > { %17256 = vst [vmem:[#allocation248_spill] sm:$0xff] %v13288_v56 }
 0x306   : > { %5476 = vrot.lane.b32.xlu1 %v12317_v11, %s10131_s3  ;;  %v13294_v39 = vpop.permute.xlu0 %5022 }
 0x307   : > { %17257 = vst [vmem:[#allocation249_spill] sm:$0xff] %v13294_v39 }
 0x308   : > { %v13296_v62 = vpop.permute.xlu1 %5016  ;;  %5474 = vrot.lane.b32.xlu0 %v12289_v53, %s10131_s3 }
 0x309   : > { %17258 = vst [vmem:[#allocation250_spill] sm:$0xff] %v13296_v62 }
 0x30a   : > { %5480 = vrot.lane.b32.xlu1 %v12389_v22, %s10131_s3  ;;  %v13302_v10 = vpop.permute.xlu0 %5026 }
 0x30b   : > { %17259 = vst [vmem:[#allocation251_spill] sm:$0xff] %v13302_v10 }
 0x30c   : > { %v13304_v40 = vpop.permute.xlu1 %5028  ;;  %5478 = vrot.lane.b32.xlu0 %v12363_v5, %s10131_s3 }
 0x30d   : > { %17260 = vst [vmem:[#allocation252_spill] sm:$0xff] %v13304_v40 }
 0x30e   : > { %5484 = vrot.lane.b32.xlu1 %v12439_v33, %s10131_s3  ;;  %v13310_v11 = vpop.permute.xlu0 %5034 }
 0x30f   : > { %17261 = vst [vmem:[#allocation253_spill] sm:$0xff] %v13310_v11  ;;  %v17440_v11 = vld [vmem:[#allocation182_spill] sm:$0xff] }
 0x310   : > { %v13312_v51 = vpop.permute.xlu1 %5036  ;;  %5482 = vrot.lane.b32.xlu0 %v12410_v2, %s10131_s3 }
 0x312   : > { %5488 = vrot.lane.b32.xlu1 %v12366_v13, %s10131_s3  ;;  %v13318_v50 = vpop.permute.xlu0 %5018 }
 0x313   : > { %17262 = vst [vmem:[#allocation254_spill] sm:$0xff] %v13318_v50 }
 0x314   : > { %v13320_v55 = vpop.permute.xlu1 %5040  ;;  %5486 = vrot.lane.b32.xlu0 %v12463_v42, %s10131_s3 }
 0x315   : > { %17263 = vst [vmem:[#allocation255_spill] sm:$0xff] %v13320_v55 }
 0x316   : > { %5492 = vrot.lane.b32.xlu1 %v12424_v0, %s10131_s3  ;;  %v13326_v10 = vpop.permute.xlu0 %5038 }
 0x317   : > { %17264 = vst [vmem:[#allocation256_spill] sm:$0xff] %v13326_v10 }
 0x318   : > { %v13328_v40 = vpop.permute.xlu1 %5048  ;;  %5490 = vrot.lane.b32.xlu0 %v12398_v54, %s10131_s3 }
 0x319   : > { %17265 = vst [vmem:[#allocation257_spill] sm:$0xff] %v13328_v40 }
 0x31a   : > { %5496 = vrot.lane.b32.xlu1 %v12499_v32, %s10131_s3  ;;  %v13334_v39 = vpop.permute.xlu0 %5030  ;;  %v17274_v32 = vld [vmem:[#allocation125_spill] sm:$0xff] }
 0x31c   : > { %v13336_v56 = vpop.permute.xlu1 %5032  ;;  %5494 = vrot.lane.b32.xlu0 %v12471_v59, %s10131_s3 }
 0x31e   : > { %5500 = vrot.lane.b32.xlu1 %v12555_v44, %s10131_s3  ;;  %v13342_v0 = vpop.permute.xlu0 %5042 }
 0x31f   : > { %17266 = vst [vmem:[#allocation258_spill] sm:$0xff] %v13342_v0  ;;  %v17373_v0 = vld [vmem:[#allocation18_spill] sm:$0xff] }
 0x320   : > { %v13344_v50 = vpop.permute.xlu1 %5052  ;;  %5498 = vrot.lane.b32.xlu0 %v12516_v31, %s10131_s3  ;;  %v17277_v31 = vld [vmem:[#allocation120_spill] sm:$0xff] }
 0x321   : > { %17267 = vst [vmem:[#allocation259_spill] sm:$0xff] %v13344_v50  ;;  %v17273_v50 = vld [vmem:[#allocation111_spill] sm:$0xff] }
 0x322   : > { %5504 = vrot.lane.b32.xlu1 %v12451_v17, %s10131_s3  ;;  %v13350_v40 = vpop.permute.xlu0 %5050 }
 0x323   : > { %17268 = vst [vmem:[#allocation260_spill] sm:$0xff] %v13350_v40 }
 0x324   : > { %v13352_v28 = vpop.permute.xlu1 %5044  ;;  %5502 = vrot.lane.b32.xlu0 %v12430_v20, %s10131_s3  ;;  %v17283_v20 = vld [vmem:[#allocation104_spill] sm:$0xff] }
 0x325   : > { %17269 = vst [vmem:[#allocation261_spill] sm:$0xff] %v13352_v28 }
 0x326   : > { %5508 = vrot.lane.b32.xlu1 %v17270_v45, %s10131_s3  ;;  %v13358_v62 = vpop.permute.xlu0 %5046 }
 0x327   : > { %17271 = vst [vmem:[#allocation99_spill] sm:$0xff] %v13358_v62 }
 0x328   : > { %v13360_v44 = vpop.permute.xlu1 %5056  ;;  %5506 = vrot.lane.b32.xlu0 %v17273_v50, %s10131_s3 }
 0x329   : > { %17272 = vst [vmem:[#allocation262_spill] sm:$0xff] %v13360_v44  ;;  %v17280_v44 = vld [vmem:[#allocation118_spill] sm:$0xff] }
 0x32a   : > { %5512 = vrot.lane.b32.xlu1 %v17274_v32, %s10131_s3  ;;  %v13366_v17 = vpop.permute.xlu0 %5054 }
 0x32b   : > { %17275 = vst [vmem:[#allocation125_spill] sm:$0xff] %v13366_v17 }
 0x32c   : > { %v13368_v40 = vpop.permute.xlu1 %5064  ;;  %5510 = vrot.lane.b32.xlu0 %v17277_v31, %s10131_s3 }
 0x32d   : > { %17276 = vst [vmem:[#allocation263_spill] sm:$0xff] %v13368_v40 }
 0x32e   : > { %5516 = vrot.lane.b32.xlu1 %v12511_v25, %s10131_s3  ;;  %v13374_v45 = vpop.permute.xlu0 %5062 }
 0x32f   : > { %17278 = vst [vmem:[#allocation120_spill] sm:$0xff] %v13374_v45  ;;  %v17369_v45 = vld [vmem:[#allocation60_spill] sm:$0xff] }
 0x330   : > { %v13376_v62 = vpop.permute.xlu1 %5060  ;;  %5514 = vrot.lane.b32.xlu0 %v12638_v21, %s10131_s3 }
 0x331   : > { %17279 = vst [vmem:[#allocation264_spill] sm:$0xff] %v13376_v62  ;;  %v17286_v62 = vld [vmem:[#allocation124_spill] sm:$0xff] }
 0x332   : > { %5520 = vrot.lane.b32.xlu1 %v17280_v44, %s10131_s3  ;;  %v13382_v50 = vpop.permute.xlu0 %5066 }
 0x333   : > { %17281 = vst [vmem:[#allocation118_spill] sm:$0xff] %v13382_v50 }
 0x334   : > { %v13384_v17 = vpop.permute.xlu1 %5068  ;;  %5518 = vrot.lane.b32.xlu0 %v17283_v20, %s10131_s3 }
 0x335   : > { %17282 = vst [vmem:[#allocation265_spill] sm:$0xff] %v13384_v17  ;;  %v17350_v17 = vld [vmem:[#allocation220_spill] sm:$0xff] }
 0x336   : > { %5524 = vrot.lane.b32.xlu1 %v12607_v52, %s10131_s3  ;;  %v13390_v59 = vpop.permute.xlu0 %5058 }
 0x337   : > { %17284 = vst [vmem:[#allocation104_spill] sm:$0xff] %v13390_v59 }
 0x338   : > { %v13392_v60 = vpop.permute.xlu1 %5080  ;;  %5522 = vrot.lane.b32.xlu0 %v17286_v62, %s10131_s3 }
 0x339   : > { %17285 = vst [vmem:[#allocation266_spill] sm:$0xff] %v13392_v60  ;;  %v17292_v60 = vld [vmem:[#allocation139_spill] sm:$0xff] }
 0x33a   : > { %5528 = vrot.lane.b32.xlu1 %v12708_v41, %s10131_s3  ;;  %v13398_v53 = vpop.permute.xlu0 %5078 }
 0x33b   : > { %17287 = vst [vmem:[#allocation124_spill] sm:$0xff] %v13398_v53 }
 0x33c   : > { %v13400_v14 = vpop.permute.xlu1 %5072  ;;  %5526 = vrot.lane.b32.xlu0 %v12666_v63, %s10131_s3  ;;  %v17296_v63 = vld [vmem:[#allocation149_spill] sm:$0xff] }
 0x33d   : > { %17288 = vst [vmem:[#allocation267_spill] sm:$0xff] %v13400_v14  ;;  %v17313_v14 = vld [vmem:[#allocation159_spill] sm:$0xff] }
 0x33e   : > { %5532 = vrot.lane.b32.xlu1 %v17289_v27, %s10131_s3  ;;  %v13406_v52 = vpop.permute.xlu0 %5070 }
 0x33f   : > { %17290 = vst [vmem:[#allocation268_spill] sm:$0xff] %v13406_v52 }
 0x340   : > { %v13408_v59 = vpop.permute.xlu1 %5092  ;;  %5530 = vrot.lane.b32.xlu0 %v12604_v3, %s10131_s3 }
 0x341   : > { %17291 = vst [vmem:[#allocation269_spill] sm:$0xff] %v13408_v59  ;;  %v17299_v59 = vld [vmem:[#allocation142_spill] sm:$0xff] }
 0x342   : > { %5536 = vrot.lane.b32.xlu1 %v17292_v60, %s10131_s3  ;;  %v13414_v41 = vpop.permute.xlu0 %5074 }
 0x343   : > { %17293 = vst [vmem:[#allocation270_spill] sm:$0xff] %v13414_v41 }
 0x344   : > { %v13416_v53 = vpop.permute.xlu1 %5076  ;;  %5534 = vrot.lane.b32.xlu0 %v17295_v61, %s10131_s3  ;;  %v17302_v61 = vld [vmem:[#allocation145_spill] sm:$0xff] }
 0x345   : > { %17294 = vst [vmem:[#allocation271_spill] sm:$0xff] %v13416_v53 }
 0x346   : > { %5540 = vrot.lane.b32.xlu1 %v17296_v63, %s10131_s3  ;;  %v13422_v27 = vpop.permute.xlu0 %5082 }
 0x347   : > { %17297 = vst [vmem:[#allocation149_spill] sm:$0xff] %v13422_v27 }
 0x348   : > { %v13424_v52 = vpop.permute.xlu1 %5084  ;;  %5538 = vrot.lane.b32.xlu0 %v17299_v59, %s10131_s3  ;;  %v17306_v59 = vld [vmem:[#allocation157_spill] sm:$0xff] }
 0x349   : > { %17298 = vst [vmem:[#allocation272_spill] sm:$0xff] %v13424_v52  ;;  %v17305_v52 = vld [vmem:[#allocation147_spill] sm:$0xff] }
 0x34a   : > { %5544 = vrot.lane.b32.xlu1 %v12686_v29, %s10131_s3  ;;  %v13430_v60 = vpop.permute.xlu0 %5094 }
 0x34b   : > { %17300 = vst [vmem:[#allocation273_spill] sm:$0xff] %v13430_v60 }
 0x34c   : > { %v13432_v3 = vpop.permute.xlu1 %5088  ;;  %5542 = vrot.lane.b32.xlu0 %v12785_v35, %s10131_s3 }
 0x34d   : > { %17301 = vst [vmem:[#allocation274_spill] sm:$0xff] %v13432_v3  ;;  %v17309_v3 = vld [vmem:[#allocation151_spill] sm:$0xff] }
 0x34e   : > { %5548 = vrot.lane.b32.xlu1 %v17302_v61, %s10131_s3  ;;  %v13438_v63 = vpop.permute.xlu0 %5086 }
 0x34f   : > { %17303 = vst [vmem:[#allocation275_spill] sm:$0xff] %v13438_v63 }
 0x350   : > { %v13440_v27 = vpop.permute.xlu1 %5096  ;;  %5546 = vrot.lane.b32.xlu0 %v17305_v52, %s10131_s3 }
 0x351   : > { %17304 = vst [vmem:[#allocation276_spill] sm:$0xff] %v13440_v27  ;;  %v17312_v27 = vld [vmem:[#allocation165_spill] sm:$0xff] }
 0x352   : > { %5552 = vrot.lane.b32.xlu1 %v17306_v59, %s10131_s3  ;;  %v13446_v41 = vpop.permute.xlu0 %5106 }
 0x353   : > { %17307 = vst [vmem:[#allocation147_spill] sm:$0xff] %v13446_v41 }
 0x354   : > { %v13448_v60 = vpop.permute.xlu1 %5108  ;;  %5550 = vrot.lane.b32.xlu0 %v17309_v3, %s10131_s3 }
 0x355   : > { %17308 = vst [vmem:[#allocation277_spill] sm:$0xff] %v13448_v60  ;;  %v17316_v60 = vld [vmem:[#allocation167_spill] sm:$0xff] }
 0x356   : > { %5556 = vrot.lane.b32.xlu1 %v12850_v26, %s10131_s3  ;;  %v13454_v53 = vpop.permute.xlu0 %5090 }
 0x357   : > { %17310 = vst [vmem:[#allocation278_spill] sm:$0xff] %v13454_v53 }
 0x358   : > { %v13456_v63 = vpop.permute.xlu1 %5100  ;;  %5554 = vrot.lane.b32.xlu0 %v17312_v27, %s10131_s3 }
 0x359   : > { %17311 = vst [vmem:[#allocation279_spill] sm:$0xff] %v13456_v63  ;;  %v17319_v63 = vld [vmem:[#allocation162_spill] sm:$0xff] }
 0x35a   : > { %5560 = vrot.lane.b32.xlu1 %v17313_v14, %s10131_s3  ;;  %v13462_v50 = vpop.permute.xlu0 %5098 }
 0x35b   : > { %17314 = vst [vmem:[#allocation280_spill] sm:$0xff] %v13462_v50 }
 0x35c   : > { %v13464_v41 = vpop.permute.xlu1 %5120  ;;  %5558 = vrot.lane.b32.xlu0 %v12763_v15, %s10131_s3 }
 0x35d   : > { %17315 = vst [vmem:[#allocation281_spill] sm:$0xff] %v13464_v41  ;;  %v17322_v41 = vld [vmem:[#allocation183_spill] sm:$0xff] }
 0x35e   : > { %5564 = vrot.lane.b32.xlu1 %v17316_v60, %s10131_s3  ;;  %v13470_v26 = vpop.permute.xlu0 %5102 }
 0x35f   : > { %17317 = vst [vmem:[#allocation282_spill] sm:$0xff] %v13470_v26  ;;  %v17325_v26 = vld [vmem:[#allocation179_spill] sm:$0xff] }
 0x360   : > { %v13472_v53 = vpop.permute.xlu1 %5104  ;;  %5562 = vrot.lane.b32.xlu0 %v17319_v63, %s10131_s3  ;;  %v17326_v63 = vld [vmem:[#allocation177_spill] sm:$0xff] }
 0x361   : > { %17318 = vst [vmem:[#allocation283_spill] sm:$0xff] %v13472_v53 }
 0x362   : > { %5568 = vrot.lane.b32.xlu1 %v12884_v48, %s10131_s3  ;;  %v13478_v14 = vpop.permute.xlu0 %5110 }
 0x363   : > { %17320 = vst [vmem:[#allocation284_spill] sm:$0xff] %v13478_v14 }
 0x364   : > { %v13480_v50 = vpop.permute.xlu1 %5112  ;;  %5566 = vrot.lane.b32.xlu0 %v12858_v16, %s10131_s3  ;;  %v17330_v16 = vld [vmem:[#allocation187_spill] sm:$0xff] }
 0x365   : > { %17321 = vst [vmem:[#allocation285_spill] sm:$0xff] %v13480_v50  ;;  %v17329_v50 = vld [vmem:[#allocation172_spill] sm:$0xff] }
 0x366   : > { %5572 = vrot.lane.b32.xlu1 %v17322_v41, %s10131_s3  ;;  %v13486_v60 = vpop.permute.xlu0 %5122 }
 0x367   : > { %17323 = vst [vmem:[#allocation183_spill] sm:$0xff] %v13486_v60 }
 0x368   : > { %v13488_v15 = vpop.permute.xlu1 %5124  ;;  %5570 = vrot.lane.b32.xlu0 %v17325_v26, %s10131_s3 }
 0x369   : > { %17324 = vst [vmem:[#allocation286_spill] sm:$0xff] %v13488_v15  ;;  %v17333_v15 = vld [vmem:[#allocation184_spill] sm:$0xff] }
 0x36a   : > { %5576 = vrot.lane.b32.xlu1 %v17326_v63, %s10131_s3  ;;  %v13494_v48 = vpop.permute.xlu0 %5114  ;;  %v17347_v63 = vld [vmem:[#allocation210_spill] sm:$0xff] }
 0x36b   : > { %17327 = vst [vmem:[#allocation287_spill] sm:$0xff] %v13494_v48 }
 0x36c   : > { %v13496_v14 = vpop.permute.xlu1 %5116  ;;  %5574 = vrot.lane.b32.xlu0 %v17329_v50, %s10131_s3 }
 0x36d   : > { %17328 = vst [vmem:[#allocation288_spill] sm:$0xff] %v13496_v14  ;;  %v17336_v14 = vld [vmem:[#allocation192_spill] sm:$0xff] }
 0x36e   : > { %5580 = vrot.lane.b32.xlu1 %v17330_v16, %s10131_s3  ;;  %v13502_v41 = vpop.permute.xlu0 %5118  ;;  %v17344_v16 = vld [vmem:[#allocation209_spill] sm:$0xff] }
 0x36f   : > { %17331 = vst [vmem:[#allocation289_spill] sm:$0xff] %v13502_v41 }
 0x370   : > { %v13504_v60 = vpop.permute.xlu1 %5468  ;;  %5578 = vrot.lane.b32.xlu0 %v17333_v15, %s10131_s3 }
 0x371   : > { %17332 = vst [vmem:[#allocation290_spill] sm:$0xff] %v13504_v60  ;;  %v17339_v60 = vld [vmem:[#allocation191_spill] sm:$0xff] }
 0x372   : > { %5584 = vrot.lane.b32.xlu1 %v12990_v57, %s10131_s3  ;;  %v13510_v26 = vpop.permute.xlu0 %5466 }
 0x373   : > { %17334 = vst [vmem:[#allocation291_spill] sm:$0xff] %v13510_v26 }
 0x374   : > { %v13512_v48 = vpop.permute.xlu1 %5472  ;;  %5582 = vrot.lane.b32.xlu0 %v17336_v14, %s10131_s3 }
 0x375   : > { %17335 = vst [vmem:[#allocation292_spill] sm:$0xff] %v13512_v48  ;;  %v17341_v48 = vld [vmem:[#allocation186_spill] sm:$0xff] }
 0x376   : > { %5588 = vrot.lane.b32.xlu1 %v12955_v43, %s10131_s3  ;;  %v13518_v53 = vpop.permute.xlu0 %5470 }
 0x377   : > { %17337 = vst [vmem:[#allocation293_spill] sm:$0xff] %v13518_v53 }
 0x378   : > { %v13520_v41 = vpop.permute.xlu1 %5476  ;;  %5586 = vrot.lane.b32.xlu0 %v13017_v8, %s10131_s3  ;;  %v17343_v8 = vld [vmem:[#allocation214_spill] sm:$0xff] }
 0x379   : > { %17338 = vst [vmem:[#allocation294_spill] sm:$0xff] %v13520_v41  ;;  %v17342_v41 = vld [vmem:[#allocation203_spill] sm:$0xff] }
 0x37a   : > { %5592 = vrot.lane.b32.xlu1 %v17339_v60, %s10131_s3  ;;  %v13526_v57 = vpop.permute.xlu0 %5474 }
 0x37b   : > { %17340 = vst [vmem:[#allocation295_spill] sm:$0xff] %v13526_v57 }
 0x37c   : > { %v13528_v26 = vpop.permute.xlu1 %5480  ;;  %5590 = vrot.lane.b32.xlu0 %v17341_v48, %s10131_s3  ;;  %v17345_v48 = vld [vmem:[#allocation200_spill] sm:$0xff] }
 0x37e   : > { %5596 = vrot.lane.b32.xlu1 %v13046_v38, %s10131_s3  ;;  %v13534_v43 = vpop.permute.xlu0 %5478 }
 0x380   : > { %v13536_v53 = vpop.permute.xlu1 %5484  ;;  %5594 = vrot.lane.b32.xlu0 %v17342_v41, %s10131_s3 }
 0x382   : > { %5600 = vrot.lane.b32.xlu1 %v17343_v8, %s10131_s3  ;;  %v13542_v60 = vpop.permute.xlu0 %5482 }
 0x384   : > { %v13544_v57 = vpop.permute.xlu1 %5488  ;;  %5598 = vrot.lane.b32.xlu0 %v17344_v16, %s10131_s3 }
 0x386   : > { %5604 = vrot.lane.b32.xlu1 %v17345_v48, %s10131_s3  ;;  %v13550_v38 = vpop.permute.xlu0 %5486 }
 0x388   : > { %v13552_v14 = vpop.permute.xlu1 %5492  ;;  %5602 = vrot.lane.b32.xlu0 %v12993_v23, %s10131_s3 }
 0x38a   : > { %5608 = vrot.lane.b32.xlu1 %v13089_v19, %s10131_s3  ;;  %v13558_v8 = vpop.permute.xlu0 %5490 }
 0x38c   : > { %v13560_v41 = vpop.permute.xlu1 %5496  ;;  %5606 = vrot.lane.b32.xlu0 %v17347_v63, %s10131_s3  ;;  %v17364_v63 = vld [vmem:[#allocation71_spill] sm:$0xff] }
 0x38d   : > { %17346 = vst [vmem:[#allocation200_spill] sm:$0xff] %v13560_v41 }
 0x38e   : > { %5612 = vrot.lane.b32.xlu1 %v13139_v24, %s10131_s3  ;;  %v13566_v48 = vpop.permute.xlu0 %5494 }
 0x38f   : > { %17348 = vst [vmem:[#allocation296_spill] sm:$0xff] %v13566_v48 }
 0x390   : > { %v13568_v16 = vpop.permute.xlu1 %5500  ;;  %5610 = vrot.lane.b32.xlu0 %v17350_v17, %s10131_s3  ;;  %v17363_v17 = vld [vmem:[#allocation68_spill] sm:$0xff] }
 0x391   : > { %17349 = vst [vmem:[#allocation297_spill] sm:$0xff] %v13568_v16  ;;  %v17355_v16 = vld [vmem:[#allocation218_spill] sm:$0xff]  ;;  %v5257_v15 = vadd.f32 %v17364_v63, %v17363_v17  ;;  %v17371_v17 = vld [vmem:[#allocation52_spill] sm:$0xff]  ;;  %v17372_v63 = vld [vmem:[#allocation31_spill] sm:$0xff] }
 0x392   : > { %5616 = vrot.lane.b32.xlu1 %v13067_v1, %s10131_s3  ;;  %v13574_v23 = vpop.permute.xlu0 %5498  ;;  %v5259_v50 = vadd.f32 %v17372_v63, %v17371_v17  ;;  %v17382_v63 = vld [vmem:[#allocation61_spill] sm:$0xff] }
 0x393   : > { %17351 = vst [vmem:[#allocation298_spill] sm:$0xff] %v13574_v23  ;;  %v13636_v59 = vadd.f32 %v17373_v0, %v5257_v15  ;;  %v17380_v0 = vld [vmem:[#allocation22_spill] sm:$0xff] }
 0x394   : > { %v13576_v19 = vpop.permute.xlu1 %5504  ;;  %5614 = vrot.lane.b32.xlu0 %v13163_v7, %s10131_s3  ;;  %v17361_v7 = vld [vmem:[#allocation26_spill] sm:$0xff]  ;;  %v13654_v17 = vadd.f32 %v17380_v0, %v5259_v50  ;;  %v17390_v0 = vld [vmem:[#allocation27_spill] sm:$0xff] }
 0x395   : > { %17352 = vst [vmem:[#allocation299_spill] sm:$0xff] %v13576_v19 }
 0x396   : > { %5620 = vrot.lane.b32.xlu1 %v13124_v4, %s10131_s3  ;;  %v13582_v41 = vpop.permute.xlu0 %5502  ;;  %17381 = vst [vmem:[#allocation26_spill] sm:$0xff] %v13654_v17 }
 0x397   : > { %17353 = vst [vmem:[#allocation300_spill] sm:$0xff] %v13582_v41  ;;  %v17357_v41 = vld [vmem:[#allocation51_spill] sm:$0xff] }
 0x398   : > { %v13584_v48 = vpop.permute.xlu1 %5508  ;;  %5618 = vrot.lane.b32.xlu0 %v17355_v16, %s10131_s3 }
 0x399   : > { %17354 = vst [vmem:[#allocation301_spill] sm:$0xff] %v13584_v48  ;;  %v17358_v48 = vld [vmem:[#allocation49_spill] sm:$0xff] }
 0x39a   : > { %5624 = vrot.lane.b32.xlu1 %v13190_v12, %s10131_s3  ;;  %v13590_v1 = vpop.permute.xlu0 %5506  ;;  %v5255_v19 = vadd.f32 %v17358_v48, %v17357_v41  ;;  %v17359_v12 = vld [vmem:[#allocation55_spill] sm:$0xff]  ;;  %v17365_v48 = vld [vmem:[#allocation13_spill] sm:$0xff] }
 0x39b   : > { %17356 = vst [vmem:[#allocation302_spill] sm:$0xff] %v13590_v1  ;;  %v17360_v1 = vld [vmem:[#allocation40_spill] sm:$0xff]  ;;  %17374 = vst [vmem:[#allocation55_spill] sm:$0xff] %v13636_v59 }
 0x39c   : > { %v13592_v23 = vpop.permute.xlu1 %5512  ;;  %5622 = vrot.lane.b32.xlu0 %v13170_v18, %s10131_s3  ;;  %v5254_v16 = vadd.f32 %v17360_v1, %v17359_v12  ;;  %v17367_v1 = vld [vmem:[#allocation23_spill] sm:$0xff] }
 0x39e   : > { %5628 = vrot.lane.b32.xlu1 %v13238_v47, %s10131_s3  ;;  %v13598_v4 = vpop.permute.xlu0 %5510  ;;  %v13613_v47 = vadd.f32 %v17361_v7, %v5255_v19  ;;  %v13627_v12 = vadd.f32 %v17367_v1, %v5254_v16  ;;  %v17370_v7 = vld [vmem:[#allocation43_spill] sm:$0xff]  ;;  %v17376_v16 = vld [vmem:[#allocation46_spill] sm:$0xff]  ;;  %v17377_v1 = vld [vmem:[#allocation33_spill] sm:$0xff] }
 0x39f   : > { %v5256_v19 = vadd.f32 %v17370_v7, %v17369_v45  ;;  %v5258_v45 = vadd.f32 %v17377_v1, %v17376_v16  ;;  %v17378_v7 = vld [vmem:[#allocation32_spill] sm:$0xff]  ;;  %v17387_v1 = vld [vmem:[#allocation58_spill] sm:$0xff] }
 0x3a0   : > { %v13602_v24 = vpop.permute.xlu1 %5516  ;;  %5626 = vrot.lane.b32.xlu0 %v13211_v49, %s10131_s3  ;;  %17362 = vst [vmem:[#allocation51_spill] sm:$0xff] %v13613_v47  ;;  %v13622_v49 = vsub.s32 0, %v17365_v48  ;;  %17368 = vst [vmem:[#allocation49_spill] sm:$0xff] %v13627_v12 }
 0x3a1   : > { %v13647_v28 = vadd.f32 %v17378_v7, %v5256_v19  ;;  %v17385_v19 = vld [vmem:[#allocation19_spill] sm:$0xff]  ;;  %v17388_v7 = vld [vmem:[#allocation45_spill] sm:$0xff] }
 0x3a2   : > { %5632 = vrot.lane.b32.xlu1 %v13151_v6, %s10131_s3  ;;  %v13610_v18 = vpop.permute.xlu0 %5514  ;;  %v17366_v6 = vld [vmem:[#allocation241_spill] sm:$0xff]  ;;  %v5904_v48 = vrot.slane %v13613_v47, %v13622_v49  ;;  %v5897_v15 = vrot.slane %v13627_v12, %v13622_v49  ;;  %v17383_v47 = vld [vmem:[#allocation44_spill] sm:$0xff]  ;;  %v13663_v16 = vadd.f32 %v17385_v19, %v5258_v45  ;;  %v5932_v45 = vrot.slane %v13654_v17, %v13622_v49 }
 0x3a3   : > { %17379 = vst [vmem:[#allocation40_spill] sm:$0xff] %v13647_v28  ;;  %v5261_v10 = vadd.f32 %v17383_v47, %v17382_v63  ;;  %v5911_v50 = vrot.slane %v13647_v28, %v13622_v49  ;;  %v17392_v63 = vld [vmem:[#allocation98_spill] sm:$0xff]  ;;  %v17397_v19 = vld [vmem:[#allocation93_spill] sm:$0xff] }
 0x3a4   : > { %v13617_v41 = vpop.permute.xlu1 %5520  ;;  %5630 = vrot.lane.b32.xlu0 %v13130_v36, %s10131_s3  ;;  %17386 = vst [vmem:[#allocation71_spill] sm:$0xff] %v13663_v16 }
 0x3a5   : > { %v13672_v47 = vadd.f32 %v17390_v0, %v5261_v10  ;;  %v5925_v10 = vrot.slane %v13663_v16, %v13622_v49  ;;  %v17400_v0 = vld [vmem:[#allocation83_spill] sm:$0xff] }
 0x3a6   : > { %5636 = vrot.lane.b32.xlu1 %v17366_v6, %s10131_s3  ;;  %v13631_v40 = vpop.permute.xlu0 %5518  ;;  %v17375_v6 = vld [vmem:[#allocation236_spill] sm:$0xff] }
 0x3a7   : > { %17391 = vst [vmem:[#allocation23_spill] sm:$0xff] %v13672_v47 }
 0x3a8   : > { %v13638_v36 = vpop.permute.xlu1 %5524  ;;  %5634 = vrot.lane.b32.xlu0 %v17375_v6, %s10131_s3  ;;  %v5260_v6 = vadd.f32 %v17388_v7, %v17387_v1  ;;  %v17398_v1 = vld [vmem:[#allocation129_spill] sm:$0xff] }
 0x3a9   : > { %v5270_v7 = vadd.f32 %v17398_v1, %v17397_v19  ;;  %v17407_v19 = vld [vmem:[#allocation110_spill] sm:$0xff] }
 0x3aa   : > { %5906 = vbcast.lane.b32.xlu1 %v5904_v48, 256  ;;  %v13649_v27 = vpop.permute.xlu0 %5522  ;;  %v5918_v48 = vrot.slane %v13636_v59, %v13622_v49 }
 0x3ab   : > { %v13701_v1 = vadd.f32 %v17407_v19, %v5270_v7  ;;  %v17415_v7 = vld [vmem:[#allocation66_spill] sm:$0xff] }
 0x3ac   : > { %v13658_v61 = vpop.permute.xlu1 %5528  ;;  %5899 = vbcast.lane.b32.xlu0 %v5897_v15, 256  ;;  %v17395_v15 = vld [vmem:[#allocation25_spill] sm:$0xff] }
 0x3ad   : > { %17384 = vst [vmem:[#allocation68_spill] sm:$0xff] %v13658_v61  ;;  %v17393_v61 = vld [vmem:[#allocation134_spill] sm:$0xff]  ;;  %17408 = vst [vmem:[#allocation46_spill] sm:$0xff] %v13701_v1 }
 0x3ae   : > { %5920 = vbcast.lane.b32.xlu1 %v5918_v48, 256  ;;  %v13667_v12 = vpop.permute.xlu0 %5526  ;;  %v5271_v55 = vadd.f32 %v17393_v61, %v17392_v63  ;;  %v13681_v48 = vadd.f32 %v17395_v15, %v5260_v6  ;;  %v17401_v61 = vld [vmem:[#allocation116_spill] sm:$0xff]  ;;  %v5946_v6 = vrot.slane %v13672_v47, %v13622_v49 }
 0x3af   : > { %17389 = vst [vmem:[#allocation241_spill] sm:$0xff] %v13667_v12  ;;  %v5273_v63 = vadd.f32 %v17401_v61, %v17400_v0  ;;  %v17412_v61 = vld [vmem:[#allocation89_spill] sm:$0xff] }
 0x3b0   : > { %v13676_v59 = vpop.permute.xlu1 %5532  ;;  %5913 = vbcast.lane.b32.xlu0 %v5911_v50, 256  ;;  %17396 = vst [vmem:[#allocation43_spill] sm:$0xff] %v13681_v48  ;;  %v17405_v50 = vld [vmem:[#allocation69_spill] sm:$0xff]  ;;  %v5939_v0 = vrot.slane %v13681_v48, %v13622_v49 }
 0x3b1   : > { %17394 = vst [vmem:[#allocation60_spill] sm:$0xff] %v13676_v59  ;;  %v17402_v59 = vld [vmem:[#allocation37_spill] sm:$0xff] }
 0x3b2   : > { %5934 = vbcast.lane.b32.xlu1 %v5932_v45, 256  ;;  %v13685_v12 = vpop.permute.xlu0 %5530  ;;  %v13692_v28 = vadd.f32 %v17402_v59, %v5271_v55  ;;  %v17406_v45 = vld [vmem:[#allocation95_spill] sm:$0xff] }
 0x3b3   : > { %17399 = vst [vmem:[#allocation52_spill] sm:$0xff] %v13685_v12  ;;  %v5272_v15 = vadd.f32 %v17406_v45, %v17405_v50  ;;  %v17410_v59 = vld [vmem:[#allocation63_spill] sm:$0xff]  ;;  %v17417_v50 = vld [vmem:[#allocation86_spill] sm:$0xff] }
 0x3b4   : > { %17403 = vst [vmem:[#allocation31_spill] sm:$0xff] %v13692_v28  ;;  %v13694_v17 = vpop.permute.xlu1 %5536  ;;  %5927 = vbcast.lane.b32.xlu0 %v5925_v10, 256  ;;  %v13708_v55 = vadd.f32 %v17410_v59, %v5273_v63  ;;  %v5960_v10 = vrot.slane %v13692_v28, %v13622_v49  ;;  %v17418_v45 = vld [vmem:[#allocation122_spill] sm:$0xff]  ;;  %v5953_v63 = vrot.slane %v13701_v1, %v13622_v49  ;;  %v17420_v59 = vld [vmem:[#allocation88_spill] sm:$0xff] }
 0x3b5   : > { %17404 = vst [vmem:[#allocation18_spill] sm:$0xff] %v13694_v17  ;;  %v17413_v17 = vld [vmem:[#allocation123_spill] sm:$0xff]  ;;  %v5274_v19 = vadd.f32 %v17418_v45, %v17417_v50  ;;  %v17427_v50 = vld [vmem:[#allocation141_spill] sm:$0xff]  ;;  %v17431_v1 = vld [vmem:[#allocation166_spill] sm:$0xff] }
 0x3b6   : > { %5948 = vbcast.lane.b32.xlu1 %v5946_v6, 256  ;;  %v13703_v12 = vpop.permute.xlu0 %5534  ;;  %17411 = vst [vmem:[#allocation32_spill] sm:$0xff] %v13708_v55  ;;  %v5275_v16 = vadd.f32 %v17413_v17, %v17412_v61  ;;  %v13717_v6 = vadd.f32 %v17415_v7, %v5272_v15  ;;  %v17422_v61 = vld [vmem:[#allocation105_spill] sm:$0xff]  ;;  %v5974_v15 = vrot.slane %v13708_v55, %v13622_v49  ;;  %v17426_v7 = vld [vmem:[#allocation91_spill] sm:$0xff] }
 0x3b7   : > { %17409 = vst [vmem:[#allocation33_spill] sm:$0xff] %v13703_v12  ;;  %v5276_v45 = vadd.f32 %v17427_v50, %v17426_v7  ;;  %v17435_v7 = vld [vmem:[#allocation164_spill] sm:$0xff] }
 0x3b8   : > { %v13712_v47 = vpop.permute.xlu1 %5540  ;;  %5941 = vbcast.lane.b32.xlu0 %v5939_v0, 256  ;;  %17416 = vst [vmem:[#allocation61_spill] sm:$0xff] %v13717_v6  ;;  %v13726_v17 = vadd.f32 %v17420_v59, %v5275_v16  ;;  %v17424_v0 = vld [vmem:[#allocation84_spill] sm:$0xff]  ;;  %v5967_v16 = vrot.slane %v13717_v6, %v13622_v49  ;;  %v17428_v59 = vld [vmem:[#allocation17_spill] sm:$0xff] }
 0x3b9   : > { %17414 = vst [vmem:[#allocation22_spill] sm:$0xff] %v13712_v47  ;;  %v17423_v47 = vld [vmem:[#allocation152_spill] sm:$0xff] }
 0x3ba   : > { %5962 = vbcast.lane.b32.xlu1 %v5960_v10, 256  ;;  %v13721_v12 = vpop.permute.xlu0 %5538  ;;  %17421 = vst [vmem:[#allocation19_spill] sm:$0xff] %v13726_v17  ;;  %v5277_v48 = vadd.f32 %v17423_v47, %v17422_v61  ;;  %v13735_v10 = vadd.f32 %v17424_v0, %v5274_v19  ;;  %v17430_v61 = vld [vmem:[#allocation113_spill] sm:$0xff]  ;;  %v5988_v19 = vrot.slane %v13726_v17, %v13622_v49  ;;  %v17434_v0 = vld [vmem:[#allocation106_spill] sm:$0xff] }
 0x3bb   : > { %17419 = vst [vmem:[#allocation44_spill] sm:$0xff] %v13721_v12  ;;  %v5287_v3 = vadd.f32 %v17431_v1, %v17430_v61  ;;  %v5286_v50 = vadd.f32 %v17435_v7, %v17434_v0  ;;  %v17439_v61 = vld [vmem:[#allocation24_spill] sm:$0xff]  ;;  %v17445_v0 = vld [vmem:[#allocation173_spill] sm:$0xff] }
 0x3bc   : > { %v13730_v28 = vpop.permute.xlu1 %5544  ;;  %5955 = vbcast.lane.b32.xlu0 %v5953_v63, 256  ;;  %17425 = vst [vmem:[#allocation58_spill] sm:$0xff] %v13735_v10  ;;  %v13744_v47 = vadd.f32 %v17428_v59, %v5277_v48  ;;  %v17432_v63 = vld [vmem:[#allocation126_spill] sm:$0xff]  ;;  %v5981_v48 = vrot.slane %v13735_v10, %v13622_v49  ;;  %v17437_v59 = vld [vmem:[#allocation131_spill] sm:$0xff]  ;;  %v5289_v29 = vadd.f32 %v17440_v11, %v17439_v61 }
 0x3bd   : > { %v13762_v1 = vadd.f32 %v17437_v59, %v5287_v3  ;;  %v17447_v59 = vld [vmem:[#allocation160_spill] sm:$0xff]  ;;  %v17448_v61 = vld [vmem:[#allocation42_spill] sm:$0xff] }
 0x3be   : > { %5976 = vbcast.lane.b32.xlu1 %v5974_v15, 256  ;;  %v13739_v12 = vpop.permute.xlu0 %5542  ;;  %17429 = vst [vmem:[#allocation45_spill] sm:$0xff] %v13744_v47  ;;  %v13753_v15 = vadd.f32 %v17432_v63, %v5276_v45  ;;  %v6002_v45 = vrot.slane %v13744_v47, %v13622_v49  ;;  %v17444_v63 = vld [vmem:[#allocation107_spill] sm:$0xff]  ;;  %v13780_v11 = vadd.f32 %v17447_v59, %v5289_v29  ;;  %v17454_v59 = vld [vmem:[#allocation170_spill] sm:$0xff] }
 0x3bf   : > { %17438 = vst [vmem:[#allocation134_spill] sm:$0xff] %v13762_v1  ;;  %v5288_v7 = vadd.f32 %v17445_v0, %v17444_v63  ;;  %v17453_v63 = vld [vmem:[#allocation194_spill] sm:$0xff] }
 0x3c0   : > { %v13748_v55 = vpop.permute.xlu1 %5548  ;;  %5969 = vbcast.lane.b32.xlu0 %v5967_v16, 256  ;;  %17433 = vst [vmem:[#allocation27_spill] sm:$0xff] %v13753_v15  ;;  %v17442_v16 = vld [vmem:[#allocation135_spill] sm:$0xff]  ;;  %v5995_v3 = vrot.slane %v13753_v15, %v13622_v49 }
 0x3c2   : > { %5990 = vbcast.lane.b32.xlu1 %v5988_v19, 256  ;;  %v13757_v6 = vpop.permute.xlu0 %5546  ;;  %v13771_v19 = vadd.f32 %v17442_v16, %v5286_v50  ;;  %v6016_v50 = vrot.slane %v13762_v1, %v13622_v49  ;;  %v17452_v16 = vld [vmem:[#allocation29_spill] sm:$0xff] }
 0x3c3   : > { %17436 = vst [vmem:[#allocation98_spill] sm:$0xff] %v13757_v6  ;;  %v5290_v0 = vadd.f32 %v17453_v63, %v17452_v16  ;;  %v17460_v16 = vld [vmem:[#allocation198_spill] sm:$0xff] }
 0x3c4   : > { %v13766_v17 = vpop.permute.xlu1 %5552  ;;  %5983 = vbcast.lane.b32.xlu0 %v5981_v48, 256  ;;  %17443 = vst [vmem:[#allocation93_spill] sm:$0xff] %v13771_v19  ;;  %v17451_v48 = vld [vmem:[#allocation153_spill] sm:$0xff]  ;;  %v6009_v29 = vrot.slane %v13771_v19, %v13622_v49 }
 0x3c5   : > { %17441 = vst [vmem:[#allocation25_spill] sm:$0xff] %v13766_v17  ;;  %v17449_v17 = vld [vmem:[#allocation190_spill] sm:$0xff] }
 0x3c6   : > { %6004 = vbcast.lane.b32.xlu1 %v6002_v45, 256  ;;  %v13775_v10 = vpop.permute.xlu0 %5550  ;;  %v5291_v6 = vadd.f32 %v17449_v17, %v17448_v61  ;;  %v13789_v45 = vadd.f32 %v17451_v48, %v5288_v7  ;;  %v17455_v61 = vld [vmem:[#allocation53_spill] sm:$0xff]  ;;  %v6030_v7 = vrot.slane %v13780_v11, %v13622_v49  ;;  %v17459_v48 = vld [vmem:[#allocation36_spill] sm:$0xff] }
 0x3c7   : > { %17446 = vst [vmem:[#allocation129_spill] sm:$0xff] %v13775_v10  ;;  %v5292_v63 = vadd.f32 %v17460_v16, %v17459_v48 }
 0x3c8   : > { %v13784_v47 = vpop.permute.xlu1 %5556  ;;  %5997 = vbcast.lane.b32.xlu0 %v5995_v3, 256  ;;  %v13798_v17 = vadd.f32 %v17454_v59, %v5291_v6  ;;  %v17458_v3 = vld [vmem:[#allocation178_spill] sm:$0xff]  ;;  %v6023_v6 = vrot.slane %v13789_v45, %v13622_v49  ;;  %v17462_v59 = vld [vmem:[#allocation148_spill] sm:$0xff] }
 0x3c9   : > { %17450 = vst [vmem:[#allocation83_spill] sm:$0xff] %v13784_v47  ;;  %v17456_v47 = vld [vmem:[#allocation199_spill] sm:$0xff] }
 0x3ca   : > { %6018 = vbcast.lane.b32.xlu1 %v6016_v50, 256  ;;  %v13793_v15 = vpop.permute.xlu0 %5554  ;;  %v5293_v10 = vadd.f32 %v17456_v47, %v17455_v61  ;;  %v13807_v50 = vadd.f32 %v17458_v3, %v5290_v0  ;;  %v17464_v0 = vld [vmem:[#allocation213_spill] sm:$0xff] }
 0x3cb   : > { %v17465_v3 = vld [vmem:[#allocation189_spill] sm:$0xff] }
 0x3cc   : > { %v13802_v1 = vpop.permute.xlu1 %5560  ;;  %6011 = vbcast.lane.b32.xlu0 %v6009_v29, 256  ;;  %v13816_v47 = vadd.f32 %v17462_v59, %v5293_v10  ;;  %v6044_v29 = vrot.slane %v13798_v17, %v13622_v49  ;;  %v13825_v48 = vadd.f32 %v17465_v3, %v5292_v63  ;;  %v17469_v63 = vld [vmem:[#allocation221_spill] sm:$0xff] }
 0x3cd   : > { %17457 = vst [vmem:[#allocation116_spill] sm:$0xff] %v13802_v1  ;;  %v17468_v1 = vld [vmem:[#allocation206_spill] sm:$0xff] }
 0x3ce   : > { %6032 = vbcast.lane.b32.xlu1 %v6030_v7, 256  ;;  %v13811_v19 = vpop.permute.xlu0 %5558  ;;  %v5303_v7 = vadd.f32 %v17464_v0, %v12363_v5 }
 0x3cf   : > { %17461 = vst [vmem:[#allocation37_spill] sm:$0xff] %v13811_v19  ;;  %v6037_v19 = vrot.slane %v13807_v50, %v13622_v49 }
 0x3d0   : > { %v13818_v61 = vpop.permute.xlu1 %5564  ;;  %6025 = vbcast.lane.b32.xlu0 %v6023_v6, 256  ;;  %v13832_v10 = vadd.f32 %v13528_v26, %v5303_v7  ;;  %v6058_v6 = vrot.slane %v13816_v47, %v13622_v49  ;;  %v6051_v26 = vrot.slane %v13825_v48, %v13622_v49 }
 0x3d1   : > { %17463 = vst [vmem:[#allocation69_spill] sm:$0xff] %v13818_v61  ;;  %v17467_v61 = vld [vmem:[#allocation59_spill] sm:$0xff] }
 0x3d2   : > { %6046 = vbcast.lane.b32.xlu1 %v6044_v29, 256  ;;  %v13827_v16 = vpop.permute.xlu0 %5562  ;;  %v5302_v5 = vadd.f32 %v17468_v1, %v17467_v61  ;;  %v5305_v29 = vadd.f32 %v17469_v63, %v12410_v2  ;;  %v6072_v7 = vrot.slane %v13832_v10, %v13622_v49 }
 0x3d4   : > { %v13834_v59 = vpop.permute.xlu1 %5568  ;;  %6039 = vbcast.lane.b32.xlu0 %v6037_v19, 256  ;;  %v13843_v0 = vadd.f32 %v13534_v43, %v5302_v5  ;;  %v17470_v19 = vld [vmem:[#allocation222_spill] sm:$0xff]  ;;  %v17471_v43 = vld [vmem:[#allocation228_spill] sm:$0xff] }
 0x3d5   : > { %17466 = vst [vmem:[#allocation95_spill] sm:$0xff] %v13834_v59  ;;  %v13852_v59 = vadd.f32 %v13536_v53, %v5305_v29  ;;  %v5304_v2 = vadd.f32 %v17470_v19, %v12389_v22  ;;  %v5307_v61 = vadd.f32 %v17471_v43, %v12463_v42 }
 0x3d6   : > { %6060 = vbcast.lane.b32.xlu1 %v6058_v6, 256  ;;  %v13845_v3 = vpop.permute.xlu0 %5566  ;;  %v6065_v6 = vrot.slane %v13843_v0, %v13622_v49 }
 0x3d7   : > { %v13863_v5 = vadd.f32 %v13542_v60, %v5304_v2  ;;  %v6086_v53 = vrot.slane %v13852_v59, %v13622_v49  ;;  %v13870_v29 = vadd.f32 %v13544_v57, %v5307_v61 }
 0x3d8   : > { %v13854_v1 = vpop.permute.xlu1 %5572  ;;  %6053 = vbcast.lane.b32.xlu0 %v6051_v26, 256  ;;  %v17473_v26 = vld [vmem:[#allocation226_spill] sm:$0xff] }
 0x3d9   : > { %v5306_v42 = vadd.f32 %v17473_v26, %v12439_v33  ;;  %v6079_v60 = vrot.slane %v13863_v5, %v13622_v49  ;;  %v6100_v57 = vrot.slane %v13870_v29, %v13622_v49 }
 0x3da   : > { %6074 = vbcast.lane.b32.xlu1 %v6072_v7, 256  ;;  %v13865_v63 = vpop.permute.xlu0 %5570  ;;  %v17474_v7 = vld [vmem:[#allocation217_spill] sm:$0xff] }
 0x3db   : > { %17472 = vst [vmem:[#allocation110_spill] sm:$0xff] %v13865_v63  ;;  %v5309_v19 = vadd.f32 %v17474_v7, %v12398_v54  ;;  %v13881_v2 = vadd.f32 %v13550_v38, %v5306_v42 }
 0x3dc   : > { %v13872_v22 = vpop.permute.xlu1 %5576  ;;  %6067 = vbcast.lane.b32.xlu0 %v6065_v6, 256  ;;  %v17475_v6 = vld [vmem:[#allocation215_spill] sm:$0xff] }
 0x3dd   : > { %v13888_v61 = vadd.f32 %v13552_v14, %v5309_v19  ;;  %v5308_v54 = vadd.f32 %v17475_v6, %v12366_v13  ;;  %v6093_v38 = vrot.slane %v13881_v2, %v13622_v49  ;;  %v17476_v19 = vld [vmem:[#allocation16_spill] sm:$0xff] }
 0x3de   : > { %6088 = vbcast.lane.b32.xlu1 %v6086_v53, 256  ;;  %v13883_v43 = vpop.permute.xlu0 %5574  ;;  %v5319_v53 = vadd.f32 %v13250_v37, %v17277_v31  ;;  %v5318_v31 = vadd.f32 %v13257_v46, %v17476_v19  ;;  %v5321_v37 = vadd.f32 %v13280_v58, %v12638_v21  ;;  %v5320_v21 = vadd.f32 %v13278_v9, %v17274_v32  ;;  %v17477_v58 = vld [vmem:[#allocation243_spill] sm:$0xff]  ;;  %v17479_v9 = vld [vmem:[#allocation242_spill] sm:$0xff] }
 0x3df   : > { %v13899_v26 = vadd.f32 %v13558_v8, %v5308_v54  ;;  %v6114_v14 = vrot.slane %v13888_v61, %v13622_v49  ;;  %v5323_v54 = vadd.f32 %v17477_v58, %v17283_v20  ;;  %v5322_v20 = vadd.f32 %v17479_v9, %v12511_v25  ;;  %v17487_v9 = vld [vmem:[#allocation140_spill] sm:$0xff] }
 0x3e0   : > { %v13890_v33 = vpop.permute.xlu1 %5580  ;;  %6081 = vbcast.lane.b32.xlu0 %v6079_v60, 256  ;;  %v13906_v7 = vadd.f32 %v13592_v23, %v5319_v53  ;;  %v13917_v60 = vadd.f32 %v13598_v4, %v5318_v31  ;;  %v13924_v6 = vadd.f32 %v13602_v24, %v5321_v37  ;;  %v13935_v53 = vadd.f32 %v13610_v18, %v5320_v21 }
 0x3e1   : > { %v6107_v8 = vrot.slane %v13899_v26, %v13622_v49  ;;  %v5325_v19 = vadd.f32 %v13261_v34, %v17286_v62  ;;  %v13953_v31 = vadd.f32 %v13631_v40, %v5322_v20  ;;  %v5324_v34 = vadd.f32 %v13267_v30, %v17280_v44  ;;  %v17484_v30 = vld [vmem:[#allocation154_spill] sm:$0xff]  ;;  %v17488_v20 = vld [vmem:[#allocation253_spill] sm:$0xff] }
 0x3e2   : > { %6102 = vbcast.lane.b32.xlu1 %v6100_v57, 256  ;;  %v13901_v42 = vpop.permute.xlu0 %5578  ;;  %v6128_v23 = vrot.slane %v13906_v7, %v13622_v49  ;;  %v6121_v4 = vrot.slane %v13917_v60, %v13622_v49  ;;  %v6142_v24 = vrot.slane %v13924_v6, %v13622_v49  ;;  %v6135_v18 = vrot.slane %v13935_v53, %v13622_v49 }
 0x3e3   : > { %v5335_v62 = vadd.f32 %v13336_v56, %v12785_v35  ;;  %v6149_v40 = vrot.slane %v13953_v31, %v13622_v49  ;;  %v5334_v35 = vadd.f32 %v13334_v39, %v17484_v30  ;;  %v5337_v56 = vadd.f32 %v13312_v51, %v17305_v52  ;;  %v17489_v52 = vld [vmem:[#allocation151_spill] sm:$0xff] }
 0x3e4   : > { %v13908_v13 = vpop.permute.xlu1 %5584  ;;  %6095 = vbcast.lane.b32.xlu0 %v6093_v38, 256  ;;  %v5336_v51 = vadd.f32 %v17488_v20, %v17487_v9  ;;  %v17497_v9 = vld [vmem:[#allocation261_spill] sm:$0xff] }
 0x3e5   : > { %v13978_v58 = vadd.f32 %v13730_v28, %v5335_v62 }
 0x3e6   : > { %6116 = vbcast.lane.b32.xlu1 %v6114_v14, 256  ;;  %v13919_v57 = vpop.permute.xlu0 %5582  ;;  %v13942_v14 = vadd.f32 %v13617_v41, %v5323_v54  ;;  %v13989_v54 = vadd.f32 %v13739_v12, %v5334_v35  ;;  %v17494_v35 = vld [vmem:[#allocation145_spill] sm:$0xff] }
 0x3e7   : > { %v6184_v28 = vrot.slane %v13978_v58, %v13622_v49 }
 0x3e8   : > { %v13926_v46 = vpop.permute.xlu1 %5588  ;;  %6109 = vbcast.lane.b32.xlu0 %v6107_v8, 256  ;;  %v6156_v41 = vrot.slane %v13942_v14, %v13622_v49  ;;  %v13960_v8 = vadd.f32 %v13638_v36, %v5325_v19  ;;  %v17490_v19 = vld [vmem:[#allocation255_spill] sm:$0xff]  ;;  %v6177_v12 = vrot.slane %v13989_v54, %v13622_v49 }
 0x3ea   : > { %6130 = vbcast.lane.b32.xlu1 %v6128_v23, 256  ;;  %v13937_v38 = vpop.permute.xlu0 %5586  ;;  %v13971_v23 = vadd.f32 %v13649_v27, %v5324_v34  ;;  %v6170_v36 = vrot.slane %v13960_v8, %v13622_v49 }
 0x3ec   : > { %v13944_v32 = vpop.permute.xlu1 %5592  ;;  %6123 = vbcast.lane.b32.xlu0 %v6121_v4, 256  ;;  %v6163_v27 = vrot.slane %v13971_v23, %v13622_v49 }
 0x3ed   : > { %17478 = vst [vmem:[#allocation63_spill] sm:$0xff] %v13944_v32 }
 0x3ee   : > { %6144 = vbcast.lane.b32.xlu1 %v6142_v24, 256  ;;  %v13955_v37 = vpop.permute.xlu0 %5590  ;;  %v13996_v24 = vadd.f32 %v13748_v55, %v5337_v56  ;;  %v17495_v56 = vld [vmem:[#allocation256_spill] sm:$0xff] }
 0x3ef   : > { %17480 = vst [vmem:[#allocation89_spill] sm:$0xff] %v13955_v37 }
 0x3f0   : > { %v13962_v25 = vpop.permute.xlu1 %5596  ;;  %6137 = vbcast.lane.b32.xlu0 %v6135_v18, 256  ;;  %v5339_v18 = vadd.f32 %v17490_v19, %v17489_v52  ;;  %v6198_v55 = vrot.slane %v13996_v24, %v13622_v49  ;;  %v17498_v52 = vld [vmem:[#allocation129_spill] sm:$0xff] }
 0x3f1   : > { %17481 = vst [vmem:[#allocation123_spill] sm:$0xff] %v13962_v25 }
 0x3f2   : > { %6158 = vbcast.lane.b32.xlu1 %v6156_v41, 256  ;;  %v13973_v21 = vpop.permute.xlu0 %5594  ;;  %v17491_v41 = vld [vmem:[#allocation98_spill] sm:$0xff] }
 0x3f3   : > { %17482 = vst [vmem:[#allocation66_spill] sm:$0xff] %v13973_v21  ;;  %v14007_v34 = vadd.f32 %v17491_v41, %v5336_v51 }
 0x3f4   : > { %v13980_v44 = vpop.permute.xlu1 %5600  ;;  %6151 = vbcast.lane.b32.xlu0 %v6149_v40, 256  ;;  %v17493_v40 = vld [vmem:[#allocation25_spill] sm:$0xff] }
 0x3f5   : > { %17483 = vst [vmem:[#allocation86_spill] sm:$0xff] %v13980_v44  ;;  %v6191_v51 = vrot.slane %v14007_v34, %v13622_v49 }
 0x3f6   : > { %6172 = vbcast.lane.b32.xlu1 %v6170_v36, 256  ;;  %v13991_v4 = vpop.permute.xlu0 %5598  ;;  %v14014_v36 = vadd.f32 %v17493_v40, %v5339_v18  ;;  %v17499_v40 = vld [vmem:[#allocation83_spill] sm:$0xff] }
 0x3f7   : > { %17485 = vst [vmem:[#allocation122_spill] sm:$0xff] %v13991_v4 }
 0x3f8   : > { %v13998_v39 = vpop.permute.xlu1 %5604  ;;  %6165 = vbcast.lane.b32.xlu0 %v6163_v27, 256  ;;  %v5338_v27 = vadd.f32 %v17495_v56, %v17494_v35  ;;  %v6212_v18 = vrot.slane %v14014_v36, %v13622_v49  ;;  %v17500_v35 = vld [vmem:[#allocation157_spill] sm:$0xff] }
 0x3f9   : > { %17486 = vst [vmem:[#allocation88_spill] sm:$0xff] %v13998_v39 }
 0x3fa   : > { %6186 = vbcast.lane.b32.xlu1 %v6184_v28, 256  ;;  %v14009_v62 = vpop.permute.xlu0 %5602  ;;  %v17496_v28 = vld [vmem:[#allocation165_spill] sm:$0xff]  ;;  %v14023_v19 = vadd.f32 %v17498_v52, %v5338_v27 }
 0x3fb   : > { %17492 = vst [vmem:[#allocation105_spill] sm:$0xff] %v14009_v62  ;;  %v5341_v20 = vadd.f32 %v17497_v9, %v17496_v28  ;;  %v17502_v28 = vld [vmem:[#allocation172_spill] sm:$0xff] }
 0x3fc   : > { %v5609_v30 = vpop.permute.xlu1 %5608  ;;  %6179 = vbcast.lane.b32.xlu0 %v6177_v12, 256  ;;  %v17501_v12 = vld [vmem:[#allocation258_spill] sm:$0xff]  ;;  %v6205_v27 = vrot.slane %v14023_v19, %v13622_v49 }
 0x3fd   : > { %v14028_v62 = vadd.f32 %v17499_v40, %v5341_v20  ;;  %v5340_v56 = vadd.f32 %v17501_v12, %v17500_v35  ;;  %v17504_v35 = vld [vmem:[#allocation168_spill] sm:$0xff] }
 0x3fe   : > { %6200 = vbcast.lane.b32.xlu1 %v6198_v55, 256  ;;  %v5607_v41 = vpop.permute.xlu0 %5606  ;;  %v17503_v55 = vld [vmem:[#allocation263_spill] sm:$0xff] }
 0x3ff   : > { %v5351_v9 = vadd.f32 %v17503_v55, %v17502_v28  ;;  %v14037_v52 = vadd.f32 %v13793_v15, %v5340_v56  ;;  %v6226_v20 = vrot.slane %v14028_v62, %v13622_v49  ;;  %v17506_v28 = vld [vmem:[#allocation184_spill] sm:$0xff] }
 0x400   : > { %v5613_v39 = vpop.permute.xlu1 %5612  ;;  %6193 = vbcast.lane.b32.xlu0 %v6191_v51, 256  ;;  %v17505_v51 = vld [vmem:[#allocation120_spill] sm:$0xff] }
 0x401   : > { %v14042_v40 = vadd.f32 %v13872_v22, %v5351_v9  ;;  %v5350_v12 = vadd.f32 %v17505_v51, %v17504_v35  ;;  %v6219_v15 = vrot.slane %v14037_v52, %v13622_v49  ;;  %v17508_v35 = vld [vmem:[#allocation177_spill] sm:$0xff] }
 0x402   : > { %6214 = vbcast.lane.b32.xlu1 %v6212_v18, 256  ;;  %v5611_v4 = vpop.permute.xlu0 %5610  ;;  %v17507_v18 = vld [vmem:[#allocation265_spill] sm:$0xff] }
 0x403   : > { %v5353_v55 = vadd.f32 %v17507_v18, %v17506_v28  ;;  %v14051_v56 = vadd.f32 %v13883_v43, %v5350_v12  ;;  %v6240_v22 = vrot.slane %v14042_v40, %v13622_v49  ;;  %v17510_v28 = vld [vmem:[#allocation192_spill] sm:$0xff] }
 0x404   : > { %v5617_v44 = vpop.permute.xlu1 %5616  ;;  %6207 = vbcast.lane.b32.xlu0 %v6205_v27, 256  ;;  %v17509_v27 = vld [vmem:[#allocation118_spill] sm:$0xff] }
 0x405   : > { %v14056_v9 = vadd.f32 %v13890_v33, %v5353_v55  ;;  %v5352_v51 = vadd.f32 %v17509_v27, %v17508_v35  ;;  %v6233_v43 = vrot.slane %v14051_v56, %v13622_v49  ;;  %v17514_v35 = vld [vmem:[#allocation268_spill] sm:$0xff] }
 0x406   : > { %6228 = vbcast.lane.b32.xlu1 %v6226_v20, 256  ;;  %v5615_v21 = vpop.permute.xlu0 %5614  ;;  %v17511_v20 = vld [vmem:[#allocation267_spill] sm:$0xff] }
 0x407   : > { %v5355_v18 = vadd.f32 %v17511_v20, %v17510_v28  ;;  %v14065_v12 = vadd.f32 %v13901_v42, %v5352_v51  ;;  %v6254_v33 = vrot.slane %v14056_v9, %v13622_v49  ;;  %v17516_v28 = vld [vmem:[#allocation271_spill] sm:$0xff] }
 0x408   : > { %v5621_v25 = vpop.permute.xlu1 %5620  ;;  %6221 = vbcast.lane.b32.xlu0 %v6219_v15, 256  ;;  %v17513_v15 = vld [vmem:[#allocation187_spill] sm:$0xff] }
 0x409   : > { %v14070_v55 = vadd.f32 %v13908_v13, %v5355_v18  ;;  %v5354_v27 = vadd.f32 %v17514_v35, %v17513_v15  ;;  %v6247_v42 = vrot.slane %v14065_v12, %v13622_v49  ;;  %v17520_v35 = vld [vmem:[#allocation270_spill] sm:$0xff] }
 0x40a   : > { %6242 = vbcast.lane.b32.xlu1 %v6240_v22, 256  ;;  %v5619_v37 = vpop.permute.xlu0 %5618  ;;  %v17515_v22 = vld [vmem:[#allocation201_spill] sm:$0xff] }
 0x40b   : > { %v5357_v20 = vadd.f32 %v17516_v28, %v17515_v22  ;;  %v14081_v51 = vadd.f32 %v13919_v57, %v5354_v27  ;;  %v6268_v13 = vrot.slane %v14070_v55, %v13622_v49  ;;  %v17522_v28 = vld [vmem:[#allocation276_spill] sm:$0xff] }
 0x40c   : > { %v14072_v32 = vpop.permute.xlu1 %5624  ;;  %6235 = vbcast.lane.b32.xlu0 %v6233_v43, 256  ;;  %v17519_v43 = vld [vmem:[#allocation196_spill] sm:$0xff] }
 0x40d   : > { %17512 = vst [vmem:[#allocation152_spill] sm:$0xff] %v14072_v32  ;;  %v14088_v18 = vadd.f32 %v13926_v46, %v5357_v20  ;;  %v5356_v22 = vadd.f32 %v17520_v35, %v17519_v43  ;;  %v6261_v57 = vrot.slane %v14081_v51, %v13622_v49  ;;  %v17526_v43 = vld [vmem:[#allocation273_spill] sm:$0xff] }
 0x40e   : > { %6256 = vbcast.lane.b32.xlu1 %v6254_v33, 256  ;;  %v14083_v63 = vpop.permute.xlu0 %5622  ;;  %v17521_v33 = vld [vmem:[#allocation210_spill] sm:$0xff] }
 0x40f   : > { %17517 = vst [vmem:[#allocation84_spill] sm:$0xff] %v14083_v63  ;;  %v5367_v32 = vadd.f32 %v17522_v28, %v17521_v33  ;;  %v14099_v27 = vadd.f32 %v13937_v38, %v5356_v22  ;;  %v6282_v46 = vrot.slane %v14088_v18, %v13622_v49  ;;  %v17528_v33 = vld [vmem:[#allocation279_spill] sm:$0xff] }
 0x410   : > { %v14090_v15 = vpop.permute.xlu1 %5628  ;;  %6249 = vbcast.lane.b32.xlu0 %v6247_v42, 256  ;;  %v17525_v42 = vld [vmem:[#allocation205_spill] sm:$0xff] }
 0x411   : > { %17518 = vst [vmem:[#allocation91_spill] sm:$0xff] %v14090_v15  ;;  %v14105_v20 = vadd.f32 %v5609_v30, %v5367_v32  ;;  %v5366_v35 = vadd.f32 %v17526_v43, %v17525_v42  ;;  %v6275_v38 = vrot.slane %v14099_v27, %v13622_v49  ;;  %v17531_v42 = vld [vmem:[#allocation216_spill] sm:$0xff] }
 0x412   : > { %6270 = vbcast.lane.b32.xlu1 %v6268_v13, 256  ;;  %v14101_v63 = vpop.permute.xlu0 %5626  ;;  %v17527_v13 = vld [vmem:[#allocation220_spill] sm:$0xff] }
 0x413   : > { %17523 = vst [vmem:[#allocation141_spill] sm:$0xff] %v14101_v63  ;;  %v5369_v28 = vadd.f32 %v17528_v33, %v17527_v13  ;;  %v14115_v22 = vadd.f32 %v5607_v41, %v5366_v35  ;;  %v6296_v32 = vrot.slane %v14105_v20, %v13622_v49  ;;  %v17533_v13 = vld [vmem:[#allocation229_spill] sm:$0xff] }
 0x414   : > { %v14107_v15 = vpop.permute.xlu1 %5632  ;;  %6263 = vbcast.lane.b32.xlu0 %v6261_v57, 256  ;;  %v17532_v57 = vld [vmem:[#allocation280_spill] sm:$0xff] }
 0x415   : > { %17524 = vst [vmem:[#allocation17_spill] sm:$0xff] %v14107_v15  ;;  %v14121_v30 = vadd.f32 %v5613_v39, %v5369_v28  ;;  %v5368_v43 = vadd.f32 %v17532_v57, %v17531_v42  ;;  %v6289_v41 = vrot.slane %v14115_v22, %v13622_v49  ;;  %v17537_v42 = vld [vmem:[#allocation225_spill] sm:$0xff] }
 0x416   : > { %6284 = vbcast.lane.b32.xlu1 %v6282_v46, 256  ;;  %v14117_v63 = vpop.permute.xlu0 %5630  ;;  %v17534_v46 = vld [vmem:[#allocation283_spill] sm:$0xff] }
 0x417   : > { %17529 = vst [vmem:[#allocation113_spill] sm:$0xff] %v14117_v63  ;;  %v5371_v33 = vadd.f32 %v17534_v46, %v17533_v13  ;;  %v14131_v35 = vadd.f32 %v5611_v4, %v5368_v43  ;;  %v6310_v39 = vrot.slane %v14121_v30, %v13622_v49  ;;  %v17539_v13 = vld [vmem:[#allocation218_spill] sm:$0xff] }
 0x418   : > { %v14123_v15 = vpop.permute.xlu1 %5636  ;;  %6277 = vbcast.lane.b32.xlu0 %v6275_v38, 256  ;;  %v17538_v38 = vld [vmem:[#allocation282_spill] sm:$0xff] }
 0x419   : > { %17530 = vst [vmem:[#allocation166_spill] sm:$0xff] %v14123_v15  ;;  %v14137_v28 = vadd.f32 %v5617_v44, %v5371_v33  ;;  %v5370_v57 = vadd.f32 %v17538_v38, %v17537_v42  ;;  %v6303_v4 = vrot.slane %v14131_v35, %v13622_v49  ;;  %v17543_v42 = vld [vmem:[#allocation211_spill] sm:$0xff] }
 0x41a   : > { %6298 = vbcast.lane.b32.xlu1 %v6296_v32, 256  ;;  %v14133_v63 = vpop.permute.xlu0 %5634  ;;  %v17540_v32 = vld [vmem:[#allocation277_spill] sm:$0xff] }
 0x41b   : > { %17535 = vst [vmem:[#allocation126_spill] sm:$0xff] %v14133_v63  ;;  %v5373_v46 = vadd.f32 %v17540_v32, %v17539_v13  ;;  %v14147_v43 = vadd.f32 %v5615_v21, %v5370_v57  ;;  %v6324_v44 = vrot.slane %v14137_v28, %v13622_v49 }
 0x41c   : > { %v14139_v15 = vpop.permute.xlu1 %5906  ;;  %6291 = vbcast.lane.b32.xlu0 %v6289_v41, 256  ;;  %v17544_v41 = vld [vmem:[#allocation147_spill] sm:$0xff] }
 0x41d   : > { %17536 = vst [vmem:[#allocation106_spill] sm:$0xff] %v14139_v15  ;;  %v14153_v33 = vadd.f32 %v5621_v25, %v5373_v46  ;;  %v5372_v38 = vadd.f32 %v17544_v41, %v17543_v42  ;;  %v17547_v25 = vld [vmem:[#allocation13_spill] sm:$0xff] }
 0x41e   : > { %6312 = vbcast.lane.b32.xlu1 %v6310_v39, 256  ;;  %v14149_v63 = vpop.permute.xlu0 %5899  ;;  %v6317_v39 = vrot.slane %v14147_v43, %v13622_v49  ;;  %v14170_v46 = vsub.s32 1, %v17547_v25 }
 0x41f   : > { %17541 = vst [vmem:[#allocation164_spill] sm:$0xff] %v14149_v63  ;;  %v14161_v13 = vadd.f32 %v5619_v37, %v5372_v38  ;;  %v6338_v57 = vrot.slane %v14153_v33, %v13622_v49  ;;  %v17550_v37 = vld [vmem:[#allocation51_spill] sm:$0xff] }
 0x420   : > { %v14155_v15 = vpop.permute.xlu1 %5920  ;;  %6305 = vbcast.lane.b32.xlu0 %v6303_v4, 256  ;;  %v6352_v41 = vrot.slane %v17550_v37, %v14170_v46 }
 0x421   : > { %17542 = vst [vmem:[#allocation131_spill] sm:$0xff] %v14155_v15  ;;  %v6331_v4 = vrot.slane %v14161_v13, %v13622_v49 }
 0x422   : > { %6326 = vbcast.lane.b32.xlu1 %v6324_v44, 256  ;;  %v14163_v21 = vpop.permute.xlu0 %5913 }
 0x423   : > { %17545 = vst [vmem:[#allocation24_spill] sm:$0xff] %v14163_v21 }
 0x424   : > { %v14167_v32 = vpop.permute.xlu1 %5934  ;;  %6319 = vbcast.lane.b32.xlu0 %v6317_v39, 256  ;;  %v17552_v39 = vld [vmem:[#allocation49_spill] sm:$0xff] }
 0x425   : > { %17546 = vst [vmem:[#allocation182_spill] sm:$0xff] %v14167_v32  ;;  %v6345_v32 = vrot.slane %v17552_v39, %v14170_v46 }
 0x426   : > { %6340 = vbcast.lane.b32.xlu1 %v6338_v57, 256  ;;  %v14174_v44 = vpop.permute.xlu0 %5927  ;;  %v17554_v57 = vld [vmem:[#allocation55_spill] sm:$0xff] }
 0x427   : > { %17548 = vst [vmem:[#allocation135_spill] sm:$0xff] %v14174_v44  ;;  %v6366_v21 = vrot.slane %v17554_v57, %v14170_v46 }
 0x428   : > { %v14176_v42 = vpop.permute.xlu1 %5948  ;;  %6333 = vbcast.lane.b32.xlu0 %v6331_v4, 256  ;;  %v17558_v4 = vld [vmem:[#allocation26_spill] sm:$0xff] }
 0x429   : > { %17549 = vst [vmem:[#allocation107_spill] sm:$0xff] %v14176_v42  ;;  %v17556_v42 = vld [vmem:[#allocation40_spill] sm:$0xff] }
 0x42a   : > { %6354 = vbcast.lane.b32.xlu1 %v6352_v41, 256  ;;  %v14180_v38 = vpop.permute.xlu0 %5941  ;;  %v6359_v63 = vrot.slane %v17556_v42, %v14170_v46  ;;  %v6380_v41 = vrot.slane %v17558_v4, %v14170_v46 }
 0x42b   : > { %17551 = vst [vmem:[#allocation173_spill] sm:$0xff] %v14180_v38 }
 0x42c   : > { %v14184_v25 = vpop.permute.xlu1 %5962  ;;  %6347 = vbcast.lane.b32.xlu0 %v6345_v32, 256 }
 0x42d   : > { %17553 = vst [vmem:[#allocation160_spill] sm:$0xff] %v14184_v25  ;;  %v17560_v25 = vld [vmem:[#allocation71_spill] sm:$0xff] }
 0x42e   : > { %6368 = vbcast.lane.b32.xlu1 %v6366_v21, 256  ;;  %v14188_v44 = vpop.permute.xlu0 %5955  ;;  %v6373_v38 = vrot.slane %v17560_v25, %v14170_v46  ;;  %v17562_v21 = vld [vmem:[#allocation23_spill] sm:$0xff] }
 0x42f   : > { %17555 = vst [vmem:[#allocation42_spill] sm:$0xff] %v14188_v44  ;;  %v6394_v32 = vrot.slane %v17562_v21, %v14170_v46 }
 0x430   : > { %v14192_v37 = vpop.permute.xlu1 %5976  ;;  %6361 = vbcast.lane.b32.xlu0 %v6359_v63, 256  ;;  %v17566_v63 = vld [vmem:[#allocation31_spill] sm:$0xff] }
 0x431   : > { %17557 = vst [vmem:[#allocation190_spill] sm:$0xff] %v14192_v37  ;;  %v17564_v37 = vld [vmem:[#allocation43_spill] sm:$0xff] }
 0x432   : > { %6382 = vbcast.lane.b32.xlu1 %v6380_v41, 256  ;;  %v14196_v39 = vpop.permute.xlu0 %5969  ;;  %v6387_v44 = vrot.slane %v17564_v37, %v14170_v46  ;;  %v6408_v41 = vrot.slane %v17566_v63, %v14170_v46 }
 0x433   : > { %17559 = vst [vmem:[#allocation153_spill] sm:$0xff] %v14196_v39 }
 0x434   : > { %v14200_v57 = vpop.permute.xlu1 %5990  ;;  %6375 = vbcast.lane.b32.xlu0 %v6373_v38, 256  ;;  %v17570_v38 = vld [vmem:[#allocation32_spill] sm:$0xff] }
 0x435   : > { %17561 = vst [vmem:[#allocation29_spill] sm:$0xff] %v14200_v57  ;;  %v17568_v57 = vld [vmem:[#allocation46_spill] sm:$0xff] }
 0x436   : > { %6396 = vbcast.lane.b32.xlu1 %v6394_v32, 256  ;;  %v14204_v42 = vpop.permute.xlu0 %5983  ;;  %v6401_v39 = vrot.slane %v17568_v57, %v14170_v46  ;;  %v6422_v32 = vrot.slane %v17570_v38, %v14170_v46 }
 0x437   : > { %17563 = vst [vmem:[#allocation194_spill] sm:$0xff] %v14204_v42 }
 0x438   : > { %v14208_v4 = vpop.permute.xlu1 %6004  ;;  %6389 = vbcast.lane.b32.xlu0 %v6387_v44, 256  ;;  %v17574_v44 = vld [vmem:[#allocation19_spill] sm:$0xff] }
 0x439   : > { %17565 = vst [vmem:[#allocation170_spill] sm:$0xff] %v14208_v4  ;;  %v17572_v4 = vld [vmem:[#allocation61_spill] sm:$0xff] }
 0x43a   : > { %6410 = vbcast.lane.b32.xlu1 %v6408_v41, 256  ;;  %v14212_v25 = vpop.permute.xlu0 %5997  ;;  %v6415_v42 = vrot.slane %v17572_v4, %v14170_v46  ;;  %v6436_v41 = vrot.slane %v17574_v44, %v14170_v46 }
 0x43b   : > { %17567 = vst [vmem:[#allocation53_spill] sm:$0xff] %v14212_v25 }
 0x43c   : > { %v14216_v21 = vpop.permute.xlu1 %6018  ;;  %6403 = vbcast.lane.b32.xlu0 %v6401_v39, 256  ;;  %v17578_v39 = vld [vmem:[#allocation45_spill] sm:$0xff] }
 0x43d   : > { %17569 = vst [vmem:[#allocation199_spill] sm:$0xff] %v14216_v21  ;;  %v17576_v21 = vld [vmem:[#allocation58_spill] sm:$0xff] }
 0x43e   : > { %6424 = vbcast.lane.b32.xlu1 %v6422_v32, 256  ;;  %v14220_v37 = vpop.permute.xlu0 %6011  ;;  %v6429_v25 = vrot.slane %v17576_v21, %v14170_v46  ;;  %v6450_v32 = vrot.slane %v17578_v39, %v14170_v46 }
 0x43f   : > { %17571 = vst [vmem:[#allocation178_spill] sm:$0xff] %v14220_v37 }
 0x440   : > { %v14224_v63 = vpop.permute.xlu1 %6032  ;;  %6417 = vbcast.lane.b32.xlu0 %v6415_v42, 256  ;;  %v17582_v42 = vld [vmem:[#allocation134_spill] sm:$0xff] }
 0x441   : > { %17573 = vst [vmem:[#allocation36_spill] sm:$0xff] %v14224_v63  ;;  %v17580_v63 = vld [vmem:[#allocation27_spill] sm:$0xff] }
 0x442   : > { %6438 = vbcast.lane.b32.xlu1 %v6436_v41, 256  ;;  %v14228_v57 = vpop.permute.xlu0 %6025  ;;  %v6443_v37 = vrot.slane %v17580_v63, %v14170_v46  ;;  %v6464_v41 = vrot.slane %v17582_v42, %v14170_v46 }
 0x443   : > { %17575 = vst [vmem:[#allocation198_spill] sm:$0xff] %v14228_v57 }
 0x444   : > { %v14232_v38 = vpop.permute.xlu1 %6046  ;;  %6431 = vbcast.lane.b32.xlu0 %v6429_v25, 256  ;;  %v6478_v25 = vrot.slane %v13780_v11, %v14170_v46 }
 0x445   : > { %17577 = vst [vmem:[#allocation148_spill] sm:$0xff] %v14232_v38  ;;  %v17584_v38 = vld [vmem:[#allocation93_spill] sm:$0xff] }
 0x446   : > { %6452 = vbcast.lane.b32.xlu1 %v6450_v32, 256  ;;  %v14236_v4 = vpop.permute.xlu0 %6039  ;;  %v6457_v57 = vrot.slane %v17584_v38, %v14170_v46  ;;  %v6471_v32 = vrot.slane %v13789_v45, %v14170_v46 }
 0x447   : > { %17579 = vst [vmem:[#allocation213_spill] sm:$0xff] %v14236_v4 }
 0x448   : > { %v14240_v44 = vpop.permute.xlu1 %6060  ;;  %6445 = vbcast.lane.b32.xlu0 %v6443_v37, 256  ;;  %v6492_v37 = vrot.slane %v13798_v17, %v14170_v46  ;;  %v6520_v17 = vrot.slane %v13832_v10, %v14170_v46 }
 0x449   : > { %17581 = vst [vmem:[#allocation189_spill] sm:$0xff] %v14240_v44 }
 0x44a   : > { %6466 = vbcast.lane.b32.xlu1 %v6464_v41, 256  ;;  %v14244_v21 = vpop.permute.xlu0 %6053  ;;  %v6485_v41 = vrot.slane %v13807_v50, %v14170_v46  ;;  %v6513_v50 = vrot.slane %v13843_v0, %v14170_v46  ;;  %v6541_v0 = vrot.slane %v13881_v2, %v14170_v46  ;;  %v6569_v2 = vrot.slane %v13917_v60, %v14170_v46 }
 0x44b   : > { %17583 = vst [vmem:[#allocation59_spill] sm:$0xff] %v14244_v21  ;;  %v6597_v60 = vrot.slane %v13953_v31, %v14170_v46  ;;  %v6625_v31 = vrot.slane %v13989_v54, %v14170_v46  ;;  %v6653_v54 = vrot.slane %v14023_v19, %v14170_v46  ;;  %v6681_v19 = vrot.slane %v14051_v56, %v14170_v46  ;;  %v17711_v21 = vld [vmem:[#allocation292_spill] sm:$0xff] }
 0x44c   : > { %v14248_v39 = vpop.permute.xlu1 %6074  ;;  %6459 = vbcast.lane.b32.xlu0 %v6457_v57, 256  ;;  %v6506_v57 = vrot.slane %v13816_v47, %v14170_v46  ;;  %v6534_v47 = vrot.slane %v13852_v59, %v14170_v46  ;;  %v6709_v56 = vrot.slane %v14081_v51, %v14170_v46  ;;  %v6737_v51 = vrot.slane %v14115_v22, %v14170_v46 }
 0x44d   : > { %17585 = vst [vmem:[#allocation206_spill] sm:$0xff] %v14248_v39  ;;  %v6772_v22 = vrot.slane %v14137_v28, %v14170_v46  ;;  %v6786_v28 = vrot.slane %v14153_v33, %v14170_v46  ;;  %v17643_v33 = vld [vmem:[#allocation73_spill] sm:$0xff] }
 0x44e   : > { %6480 = vbcast.lane.b32.xlu1 %v6478_v25, 256  ;;  %v14252_v63 = vpop.permute.xlu0 %6067  ;;  %v6499_v25 = vrot.slane %v13825_v48, %v14170_v46  ;;  %v6527_v48 = vrot.slane %v13863_v5, %v14170_v46  ;;  %v6555_v5 = vrot.slane %v13899_v26, %v14170_v46  ;;  %v6583_v26 = vrot.slane %v13935_v53, %v14170_v46 }
 0x44f   : > { %17586 = vst [vmem:[#allocation221_spill] sm:$0xff] %v14252_v63  ;;  %v6611_v53 = vrot.slane %v13971_v23, %v14170_v46  ;;  %v6639_v23 = vrot.slane %v14007_v34, %v14170_v46  ;;  %v6667_v34 = vrot.slane %v14037_v52, %v14170_v46  ;;  %v6695_v52 = vrot.slane %v14065_v12, %v14170_v46 }
 0x450   : > { %v14256_v42 = vpop.permute.xlu1 %6088  ;;  %6473 = vbcast.lane.b32.xlu0 %v6471_v32, 256  ;;  %v6723_v12 = vrot.slane %v14099_v27, %v14170_v46  ;;  %v6751_v27 = vrot.slane %v14131_v35, %v14170_v46  ;;  %v17633_v35 = vld [vmem:[#allocation64_spill] sm:$0xff] }
 0x451   : > { %17587 = vst [vmem:[#allocation222_spill] sm:$0xff] %v14256_v42  ;;  %v17706_v42 = vld [vmem:[#allocation202_spill] sm:$0xff] }
 0x452   : > { %6494 = vbcast.lane.b32.xlu1 %v6492_v37, 256  ;;  %v14260_v38 = vpop.permute.xlu0 %6081 }
 0x453   : > { %17588 = vst [vmem:[#allocation228_spill] sm:$0xff] %v14260_v38  ;;  %v17705_v38 = vld [vmem:[#allocation39_spill] sm:$0xff] }
 0x454   : > { %v14264_v11 = vpop.permute.xlu1 %6102  ;;  %6487 = vbcast.lane.b32.xlu0 %v6485_v41, 256 }
 0x455   : > { %17589 = vst [vmem:[#allocation226_spill] sm:$0xff] %v14264_v11 }
 0x456   : > { %6508 = vbcast.lane.b32.xlu1 %v6506_v57, 256  ;;  %v14268_v45 = vpop.permute.xlu0 %6095  ;;  %v6548_v57 = vrot.slane %v13870_v29, %v14170_v46 }
 0x457   : > { %17590 = vst [vmem:[#allocation217_spill] sm:$0xff] %v14268_v45  ;;  %v17701_v45 = vld [vmem:[#allocation169_spill] sm:$0xff] }
 0x458   : > { %v14274_v32 = vpop.permute.xlu1 %6116  ;;  %6501 = vbcast.lane.b32.xlu0 %v6499_v25, 256 }
 0x459   : > { %17591 = vst [vmem:[#allocation215_spill] sm:$0xff] %v14274_v32 }
 0x45a   : > { %6522 = vbcast.lane.b32.xlu1 %v6520_v17, 256  ;;  %v14278_v37 = vpop.permute.xlu0 %6109  ;;  %v6562_v17 = vrot.slane %v13888_v61, %v14170_v46 }
 0x45b   : > { %17592 = vst [vmem:[#allocation16_spill] sm:$0xff] %v14278_v37 }
 0x45c   : > { %v14282_v41 = vpop.permute.xlu1 %6130  ;;  %6515 = vbcast.lane.b32.xlu0 %v6513_v50, 256 }
 0x45d   : > { %17593 = vst [vmem:[#allocation243_spill] sm:$0xff] %v14282_v41 }
 0x45e   : > { %6536 = vbcast.lane.b32.xlu1 %v6534_v47, 256  ;;  %v14286_v10 = vpop.permute.xlu0 %6123  ;;  %v6576_v47 = vrot.slane %v13906_v7, %v14170_v46 }
 0x45f   : > { %17594 = vst [vmem:[#allocation242_spill] sm:$0xff] %v14286_v10 }
 0x460   : > { %v14290_v25 = vpop.permute.xlu1 %6144  ;;  %6529 = vbcast.lane.b32.xlu0 %v6527_v48, 256 }
 0x461   : > { %17595 = vst [vmem:[#allocation154_spill] sm:$0xff] %v14290_v25  ;;  %v17691_v25 = vld [vmem:[#allocation188_spill] sm:$0xff] }
 0x462   : > { %6550 = vbcast.lane.b32.xlu1 %v6548_v57, 256  ;;  %v14294_v59 = vpop.permute.xlu0 %6137  ;;  %v6590_v57 = vrot.slane %v13924_v6, %v14170_v46 }
 0x463   : > { %17596 = vst [vmem:[#allocation140_spill] sm:$0xff] %v14294_v59 }
 0x464   : > { %v14298_v50 = vpop.permute.xlu1 %6158  ;;  %6543 = vbcast.lane.b32.xlu0 %v6541_v0, 256 }
 0x465   : > { %17597 = vst [vmem:[#allocation253_spill] sm:$0xff] %v14298_v50 }
 0x466   : > { %6564 = vbcast.lane.b32.xlu1 %v6562_v17, 256  ;;  %v14302_v29 = vpop.permute.xlu0 %6151  ;;  %v6604_v17 = vrot.slane %v13942_v14, %v14170_v46 }
 0x467   : > { %17598 = vst [vmem:[#allocation151_spill] sm:$0xff] %v14302_v29  ;;  %v17683_v29 = vld [vmem:[#allocation180_spill] sm:$0xff] }
 0x468   : > { %v14306_v48 = vpop.permute.xlu1 %6172  ;;  %6557 = vbcast.lane.b32.xlu0 %v6555_v5, 256 }
 0x469   : > { %17599 = vst [vmem:[#allocation255_spill] sm:$0xff] %v14306_v48 }
 0x46a   : > { %6578 = vbcast.lane.b32.xlu1 %v6576_v47, 256  ;;  %v14310_v61 = vpop.permute.xlu0 %6165  ;;  %v6618_v47 = vrot.slane %v13960_v8, %v14170_v46 }
 0x46b   : > { %17600 = vst [vmem:[#allocation98_spill] sm:$0xff] %v14310_v61 }
 0x46c   : > { %v14314_v0 = vpop.permute.xlu1 %6186  ;;  %6571 = vbcast.lane.b32.xlu0 %v6569_v2, 256 }
 0x46d   : > { %17601 = vst [vmem:[#allocation25_spill] sm:$0xff] %v14314_v0 }
 0x46e   : > { %6592 = vbcast.lane.b32.xlu1 %v6590_v57, 256  ;;  %v14318_v7 = vpop.permute.xlu0 %6179  ;;  %v6632_v57 = vrot.slane %v13978_v58, %v14170_v46 }
 0x46f   : > { %17602 = vst [vmem:[#allocation145_spill] sm:$0xff] %v14318_v7 }
 0x470   : > { %v14322_v5 = vpop.permute.xlu1 %6200  ;;  %6585 = vbcast.lane.b32.xlu0 %v6583_v26, 256 }
 0x471   : > { %17603 = vst [vmem:[#allocation256_spill] sm:$0xff] %v14322_v5  ;;  %v17675_v5 = vld [vmem:[#allocation163_spill] sm:$0xff] }
 0x472   : > { %6606 = vbcast.lane.b32.xlu1 %v6604_v17, 256  ;;  %v14326_v6 = vpop.permute.xlu0 %6193  ;;  %v6646_v17 = vrot.slane %v13996_v24, %v14170_v46 }
 0x473   : > { %17604 = vst [vmem:[#allocation165_spill] sm:$0xff] %v14326_v6 }
 0x474   : > { %v14330_v2 = vpop.permute.xlu1 %6214  ;;  %6599 = vbcast.lane.b32.xlu0 %v6597_v60, 256 }
 0x475   : > { %17605 = vst [vmem:[#allocation261_spill] sm:$0xff] %v14330_v2 }
 0x476   : > { %6620 = vbcast.lane.b32.xlu1 %v6618_v47, 256  ;;  %v14334_v14 = vpop.permute.xlu0 %6207  ;;  %v6660_v47 = vrot.slane %v14014_v36, %v14170_v46 }
 0x477   : > { %17606 = vst [vmem:[#allocation129_spill] sm:$0xff] %v14334_v14  ;;  %v17667_v14 = vld [vmem:[#allocation138_spill] sm:$0xff] }
 0x478   : > { %v14338_v26 = vpop.permute.xlu1 %6228  ;;  %6613 = vbcast.lane.b32.xlu0 %v6611_v53, 256 }
 0x479   : > { %17607 = vst [vmem:[#allocation83_spill] sm:$0xff] %v14338_v26 }
 0x47a   : > { %6634 = vbcast.lane.b32.xlu1 %v6632_v57, 256  ;;  %v14342_v8 = vpop.permute.xlu0 %6221  ;;  %v6674_v57 = vrot.slane %v14028_v62, %v14170_v46 }
 0x47b   : > { %17608 = vst [vmem:[#allocation157_spill] sm:$0xff] %v14342_v8 }
 0x47c   : > { %v14346_v60 = vpop.permute.xlu1 %6242  ;;  %6627 = vbcast.lane.b32.xlu0 %v6625_v31, 256 }
 0x47d   : > { %17609 = vst [vmem:[#allocation258_spill] sm:$0xff] %v14346_v60 }
 0x47e   : > { %6648 = vbcast.lane.b32.xlu1 %v6646_v17, 256  ;;  %v14350_v58 = vpop.permute.xlu0 %6235  ;;  %v6688_v17 = vrot.slane %v14042_v40, %v14170_v46 }
 0x47f   : > { %17610 = vst [vmem:[#allocation172_spill] sm:$0xff] %v14350_v58  ;;  %v17659_v58 = vld [vmem:[#allocation128_spill] sm:$0xff] }
 0x480   : > { %v14354_v53 = vpop.permute.xlu1 %6256  ;;  %6641 = vbcast.lane.b32.xlu0 %v6639_v23, 256 }
 0x481   : > { %17611 = vst [vmem:[#allocation263_spill] sm:$0xff] %v14354_v53 }
 0x482   : > { %6662 = vbcast.lane.b32.xlu1 %v6660_v47, 256  ;;  %v14358_v24 = vpop.permute.xlu0 %6249  ;;  %v6702_v47 = vrot.slane %v14056_v9, %v14170_v46 }
 0x483   : > { %17612 = vst [vmem:[#allocation168_spill] sm:$0xff] %v14358_v24 }
 0x484   : > { %v14362_v31 = vpop.permute.xlu1 %6270  ;;  %6655 = vbcast.lane.b32.xlu0 %v6653_v54, 256 }
 0x485   : > { %17613 = vst [vmem:[#allocation120_spill] sm:$0xff] %v14362_v31 }
 0x486   : > { %6676 = vbcast.lane.b32.xlu1 %v6674_v57, 256  ;;  %v14366_v36 = vpop.permute.xlu0 %6263  ;;  %v6716_v57 = vrot.slane %v14070_v55, %v14170_v46 }
 0x487   : > { %17614 = vst [vmem:[#allocation184_spill] sm:$0xff] %v14366_v36  ;;  %v17651_v36 = vld [vmem:[#allocation94_spill] sm:$0xff] }
 0x488   : > { %v14370_v23 = vpop.permute.xlu1 %6284  ;;  %6669 = vbcast.lane.b32.xlu0 %v6667_v34, 256 }
 0x489   : > { %17615 = vst [vmem:[#allocation265_spill] sm:$0xff] %v14370_v23 }
 0x48a   : > { %6690 = vbcast.lane.b32.xlu1 %v6688_v17, 256  ;;  %v14374_v62 = vpop.permute.xlu0 %6277  ;;  %v6730_v17 = vrot.slane %v14088_v18, %v14170_v46 }
 0x48b   : > { %17616 = vst [vmem:[#allocation177_spill] sm:$0xff] %v14374_v62 }
 0x48c   : > { %v14378_v54 = vpop.permute.xlu1 %6298  ;;  %6683 = vbcast.lane.b32.xlu0 %v6681_v19, 256 }
 0x48d   : > { %17617 = vst [vmem:[#allocation118_spill] sm:$0xff] %v14378_v54 }
 0x48e   : > { %6704 = vbcast.lane.b32.xlu1 %v6702_v47, 256  ;;  %v14382_v40 = vpop.permute.xlu0 %6291  ;;  %v6744_v47 = vrot.slane %v14105_v20, %v14170_v46 }
 0x48f   : > { %17618 = vst [vmem:[#allocation192_spill] sm:$0xff] %v14382_v40  ;;  %v6779_v40 = vrot.slane %v14161_v13, %v14170_v46 }
 0x490   : > { %v14386_v34 = vpop.permute.xlu1 %6312  ;;  %6697 = vbcast.lane.b32.xlu0 %v6695_v52, 256 }
 0x491   : > { %17619 = vst [vmem:[#allocation267_spill] sm:$0xff] %v14386_v34  ;;  %v17635_v34 = vld [vmem:[#allocation56_spill] sm:$0xff] }
 0x492   : > { %6718 = vbcast.lane.b32.xlu1 %v6716_v57, 256  ;;  %v14390_v9 = vpop.permute.xlu0 %6305  ;;  %v6758_v57 = vrot.slane %v14121_v30, %v14170_v46  ;;  %v17630_v30 = vld [vmem:[#allocation76_spill] sm:$0xff] }
 0x493   : > { %17620 = vst [vmem:[#allocation187_spill] sm:$0xff] %v14390_v9 }
 0x494   : > { %v14394_v19 = vpop.permute.xlu1 %6326  ;;  %6711 = vbcast.lane.b32.xlu0 %v6709_v56, 256 }
 0x495   : > { %17621 = vst [vmem:[#allocation268_spill] sm:$0xff] %v14394_v19  ;;  %v17634_v19 = vld [vmem:[#allocation47_spill] sm:$0xff] }
 0x496   : > { %6732 = vbcast.lane.b32.xlu1 %v6730_v17, 256  ;;  %v14398_v55 = vpop.permute.xlu0 %6319  ;;  %v17627_v17 = vld [vmem:[#allocation78_spill] sm:$0xff]  ;;  %v5265_v54 = vadd.f32 %v17634_v19, %v17633_v35  ;;  %v17642_v35 = vld [vmem:[#allocation67_spill] sm:$0xff] }
 0x497   : > { %17622 = vst [vmem:[#allocation201_spill] sm:$0xff] %v14398_v55  ;;  %v5267_v9 = vadd.f32 %v17643_v33, %v17642_v35  ;;  %v17650_v33 = vld [vmem:[#allocation80_spill] sm:$0xff] }
 0x498   : > { %v14402_v52 = vpop.permute.xlu1 %6340  ;;  %6725 = vbcast.lane.b32.xlu0 %v6723_v12, 256  ;;  %v17628_v12 = vld [vmem:[#allocation90_spill] sm:$0xff]  ;;  %v5269_v31 = vadd.f32 %v17651_v36, %v17650_v33  ;;  %v17658_v33 = vld [vmem:[#allocation85_spill] sm:$0xff] }
 0x499   : > { %17623 = vst [vmem:[#allocation271_spill] sm:$0xff] %v14402_v52  ;;  %v5279_v24 = vadd.f32 %v17659_v58, %v17658_v33  ;;  %v17666_v33 = vld [vmem:[#allocation100_spill] sm:$0xff] }
 0x49a   : > { %6746 = vbcast.lane.b32.xlu1 %v6744_v47, 256  ;;  %v14406_v18 = vpop.permute.xlu0 %6333  ;;  %v5263_v47 = vadd.f32 %v17628_v12, %v17627_v17  ;;  %v5281_v26 = vadd.f32 %v17667_v14, %v17666_v33  ;;  %v17674_v33 = vld [vmem:[#allocation114_spill] sm:$0xff] }
 0x49b   : > { %17624 = vst [vmem:[#allocation196_spill] sm:$0xff] %v14406_v18  ;;  %v17631_v18 = vld [vmem:[#allocation77_spill] sm:$0xff]  ;;  %v5283_v7 = vadd.f32 %v17675_v5, %v17674_v33 }
 0x49c   : > { %v14410_v56 = vpop.permute.xlu1 %6354  ;;  %6739 = vbcast.lane.b32.xlu0 %v6737_v51, 256  ;;  %v5262_v52 = vadd.f32 %v17631_v18, %v17630_v30  ;;  %v6765_v51 = vrot.slane %v14147_v43, %v14170_v46  ;;  %v14431_v17 = vadd.f32 %v17635_v34, %v5263_v47  ;;  %v17639_v43 = vld [vmem:[#allocation119_spill] sm:$0xff]  ;;  %v17641_v34 = vld [vmem:[#allocation28_spill] sm:$0xff]  ;;  %v17682_v33 = vld [vmem:[#allocation21_spill] sm:$0xff] }
 0x49d   : > { %17625 = vst [vmem:[#allocation270_spill] sm:$0xff] %v14410_v56  ;;  %v14447_v47 = vadd.f32 %v17641_v34, %v5265_v54  ;;  %v17649_v34 = vld [vmem:[#allocation35_spill] sm:$0xff]  ;;  %v5285_v48 = vadd.f32 %v17683_v29, %v17682_v33  ;;  %v17690_v33 = vld [vmem:[#allocation34_spill] sm:$0xff] }
 0x49e   : > { %6760 = vbcast.lane.b32.xlu1 %v6758_v57, 256  ;;  %v14414_v20 = vpop.permute.xlu0 %6347  ;;  %v14465_v35 = vadd.f32 %v17649_v34, %v5267_v9  ;;  %v17657_v34 = vld [vmem:[#allocation79_spill] sm:$0xff]  ;;  %v5295_v10 = vadd.f32 %v17691_v25, %v17690_v33 }
 0x49f   : > { %17626 = vst [vmem:[#allocation210_spill] sm:$0xff] %v14414_v20  ;;  %v14483_v36 = vadd.f32 %v17657_v34, %v5269_v31  ;;  %v17665_v34 = vld [vmem:[#allocation108_spill] sm:$0xff] }
 0x4a0   : > { %v14420_v55 = vpop.permute.xlu1 %6368  ;;  %6753 = vbcast.lane.b32.xlu0 %v6751_v27, 256  ;;  %v17637_v27 = vld [vmem:[#allocation50_spill] sm:$0xff]  ;;  %v14501_v58 = vadd.f32 %v17665_v34, %v5279_v24  ;;  %v17673_v34 = vld [vmem:[#allocation121_spill] sm:$0xff] }
 0x4a1   : > { %17629 = vst [vmem:[#allocation276_spill] sm:$0xff] %v14420_v55  ;;  %v14438_v18 = vadd.f32 %v17637_v27, %v5262_v52  ;;  %v6800_v52 = vrot.slane %v14431_v17, %v13622_v49  ;;  %v14519_v14 = vadd.f32 %v17673_v34, %v5281_v26  ;;  %v17681_v34 = vld [vmem:[#allocation143_spill] sm:$0xff] }
 0x4a2   : > { %6774 = vbcast.lane.b32.xlu1 %v6772_v22, 256  ;;  %v14426_v57 = vpop.permute.xlu0 %6361  ;;  %v17638_v22 = vld [vmem:[#allocation75_spill] sm:$0xff]  ;;  %v14537_v5 = vadd.f32 %v17681_v34, %v5283_v7  ;;  %v17689_v34 = vld [vmem:[#allocation156_spill] sm:$0xff] }
 0x4a3   : > { %17632 = vst [vmem:[#allocation205_spill] sm:$0xff] %v14426_v57  ;;  %v5264_v30 = vadd.f32 %v17639_v43, %v17638_v22  ;;  %v17647_v22 = vld [vmem:[#allocation30_spill] sm:$0xff]  ;;  %v6793_v54 = vrot.slane %v14438_v18, %v13622_v49  ;;  %v14555_v29 = vadd.f32 %v17689_v34, %v5285_v48  ;;  %v17697_v34 = vld [vmem:[#allocation175_spill] sm:$0xff] }
 0x4a4   : > { %v14435_v12 = vpop.permute.xlu1 %6382  ;;  %6767 = vbcast.lane.b32.xlu0 %v6765_v51, 256  ;;  %v17645_v51 = vld [vmem:[#allocation65_spill] sm:$0xff]  ;;  %v14573_v25 = vadd.f32 %v17697_v34, %v5295_v10  ;;  %v17703_v10 = vld [vmem:[#allocation290_spill] sm:$0xff] }
 0x4a5   : > { %17636 = vst [vmem:[#allocation273_spill] sm:$0xff] %v14435_v12  ;;  %v14458_v13 = vadd.f32 %v17647_v22, %v5264_v30  ;;  %v17653_v30 = vld [vmem:[#allocation38_spill] sm:$0xff] }
 0x4a6   : > { %6788 = vbcast.lane.b32.xlu1 %v6786_v28, 256  ;;  %v14444_v19 = vpop.permute.xlu0 %6375  ;;  %v17646_v28 = vld [vmem:[#allocation82_spill] sm:$0xff] }
 0x4a7   : > { %17640 = vst [vmem:[#allocation220_spill] sm:$0xff] %v14444_v19  ;;  %v5266_v27 = vadd.f32 %v17646_v28, %v17645_v51  ;;  %v17654_v51 = vld [vmem:[#allocation74_spill] sm:$0xff]  ;;  %v17655_v28 = vld [vmem:[#allocation109_spill] sm:$0xff]  ;;  %v6807_v9 = vrot.slane %v14458_v13, %v13622_v49 }
 0x4a8   : > { %v14451_v62 = vpop.permute.xlu1 %6396  ;;  %6781 = vbcast.lane.b32.xlu0 %v6779_v40, 256  ;;  %v6814_v40 = vrot.slane %v14447_v47, %v13622_v49  ;;  %v5268_v22 = vadd.f32 %v17655_v28, %v17654_v51  ;;  %v17663_v51 = vld [vmem:[#allocation158_spill] sm:$0xff] }
 0x4a9   : > { %17644 = vst [vmem:[#allocation279_spill] sm:$0xff] %v14451_v62 }
 0x4aa   : > { %6802 = vbcast.lane.b32.xlu1 %v6800_v52, 256  ;;  %v14460_v43 = vpop.permute.xlu0 %6389  ;;  %v14474_v52 = vadd.f32 %v17653_v30, %v5266_v27  ;;  %v6828_v27 = vrot.slane %v14465_v35, %v13622_v49  ;;  %v17662_v30 = vld [vmem:[#allocation20_spill] sm:$0xff] }
 0x4ab   : > { %17648 = vst [vmem:[#allocation216_spill] sm:$0xff] %v14460_v43  ;;  %v5278_v28 = vadd.f32 %v17663_v51, %v17662_v30  ;;  %v17671_v30 = vld [vmem:[#allocation87_spill] sm:$0xff] }
 0x4ac   : > { %v14469_v23 = vpop.permute.xlu1 %6410  ;;  %6795 = vbcast.lane.b32.xlu0 %v6793_v54, 256  ;;  %v17661_v54 = vld [vmem:[#allocation54_spill] sm:$0xff]  ;;  %v6821_v31 = vrot.slane %v14474_v52, %v13622_v49 }
 0x4ad   : > { %17652 = vst [vmem:[#allocation280_spill] sm:$0xff] %v14469_v23  ;;  %v14512_v51 = vadd.f32 %v17671_v30, %v5278_v28  ;;  %v17677_v28 = vld [vmem:[#allocation15_spill] sm:$0xff] }
 0x4ae   : > { %6816 = vbcast.lane.b32.xlu1 %v6814_v40, 256  ;;  %v14478_v53 = vpop.permute.xlu0 %6403  ;;  %v14492_v40 = vadd.f32 %v17661_v54, %v5268_v22  ;;  %v6842_v22 = vrot.slane %v14483_v36, %v13622_v49 }
 0x4af   : > { %17656 = vst [vmem:[#allocation229_spill] sm:$0xff] %v14478_v53  ;;  %v6849_v26 = vrot.slane %v14512_v51, %v13622_v49 }
 0x4b0   : > { %v14487_v60 = vpop.permute.xlu1 %6424  ;;  %6809 = vbcast.lane.b32.xlu0 %v6807_v9, 256  ;;  %v17669_v9 = vld [vmem:[#allocation97_spill] sm:$0xff]  ;;  %v6835_v24 = vrot.slane %v14492_v40, %v13622_v49 }
 0x4b1   : > { %17660 = vst [vmem:[#allocation283_spill] sm:$0xff] %v14487_v60 }
 0x4b2   : > { %6830 = vbcast.lane.b32.xlu1 %v6828_v27, 256  ;;  %v14496_v8 = vpop.permute.xlu0 %6417  ;;  %v17670_v27 = vld [vmem:[#allocation146_spill] sm:$0xff] }
 0x4b3   : > { %17664 = vst [vmem:[#allocation225_spill] sm:$0xff] %v14496_v8  ;;  %v5280_v54 = vadd.f32 %v17670_v27, %v17669_v9  ;;  %v17678_v9 = vld [vmem:[#allocation101_spill] sm:$0xff] }
 0x4b4   : > { %v14505_v2 = vpop.permute.xlu1 %6438  ;;  %6823 = vbcast.lane.b32.xlu0 %v6821_v31, 256  ;;  %v6856_v31 = vrot.slane %v14501_v58, %v13622_v49  ;;  %v17679_v27 = vld [vmem:[#allocation161_spill] sm:$0xff] }
 0x4b5   : > { %17668 = vst [vmem:[#allocation282_spill] sm:$0xff] %v14505_v2  ;;  %v5282_v30 = vadd.f32 %v17679_v27, %v17678_v9  ;;  %v17687_v9 = vld [vmem:[#allocation181_spill] sm:$0xff] }
 0x4b6   : > { %6844 = vbcast.lane.b32.xlu1 %v6842_v22, 256  ;;  %v14514_v6 = vpop.permute.xlu0 %6431  ;;  %v14528_v22 = vadd.f32 %v17677_v28, %v5280_v54  ;;  %v6870_v54 = vrot.slane %v14519_v14, %v13622_v49  ;;  %v17686_v28 = vld [vmem:[#allocation112_spill] sm:$0xff] }
 0x4b7   : > { %17672 = vst [vmem:[#allocation218_spill] sm:$0xff] %v14514_v6  ;;  %v5284_v27 = vadd.f32 %v17687_v9, %v17686_v28  ;;  %v17695_v28 = vld [vmem:[#allocation185_spill] sm:$0xff] }
 0x4b8   : > { %v14523_v0 = vpop.permute.xlu1 %6452  ;;  %6837 = vbcast.lane.b32.xlu0 %v6835_v24, 256  ;;  %v17685_v24 = vld [vmem:[#allocation132_spill] sm:$0xff]  ;;  %v6863_v7 = vrot.slane %v14528_v22, %v13622_v49 }
 0x4b9   : > { %17676 = vst [vmem:[#allocation277_spill] sm:$0xff] %v14523_v0 }
 0x4ba   : > { %6858 = vbcast.lane.b32.xlu1 %v6856_v31, 256  ;;  %v14532_v61 = vpop.permute.xlu0 %6445  ;;  %v14546_v31 = vadd.f32 %v17685_v24, %v5282_v30  ;;  %v6884_v30 = vrot.slane %v14537_v5, %v13622_v49  ;;  %v17694_v24 = vld [vmem:[#allocation41_spill] sm:$0xff] }
 0x4bb   : > { %17680 = vst [vmem:[#allocation211_spill] sm:$0xff] %v14532_v61  ;;  %v5294_v9 = vadd.f32 %v17695_v28, %v17694_v24 }
 0x4bc   : > { %v14541_v50 = vpop.permute.xlu1 %6466  ;;  %6851 = vbcast.lane.b32.xlu0 %v6849_v26, 256  ;;  %v17693_v26 = vld [vmem:[#allocation150_spill] sm:$0xff]  ;;  %v6877_v48 = vrot.slane %v14546_v31, %v13622_v49 }
 0x4bd   : > { %17684 = vst [vmem:[#allocation147_spill] sm:$0xff] %v14541_v50  ;;  %v14582_v24 = vadd.f32 %v17701_v45, %v5294_v9  ;;  %v17708_v45 = vld [vmem:[#allocation208_spill] sm:$0xff] }
 0x4be   : > { %6872 = vbcast.lane.b32.xlu1 %v6870_v54, 256  ;;  %v14550_v59 = vpop.permute.xlu0 %6459  ;;  %v14564_v54 = vadd.f32 %v17693_v26, %v5284_v27  ;;  %v17700_v27 = vld [vmem:[#allocation204_spill] sm:$0xff] }
 0x4bf   : > { %17688 = vst [vmem:[#allocation51_spill] sm:$0xff] %v14550_v59 }
 0x4c0   : > { %v14559_v41 = vpop.permute.xlu1 %6480  ;;  %6865 = vbcast.lane.b32.xlu0 %v6863_v7, 256  ;;  %v6898_v7 = vrot.slane %v14555_v29, %v13622_v49  ;;  %v6891_v32 = vrot.slane %v14564_v54, %v13622_v49 }
 0x4c1   : > { %17692 = vst [vmem:[#allocation49_spill] sm:$0xff] %v14559_v41 }
 0x4c2   : > { %6886 = vbcast.lane.b32.xlu1 %v6884_v30, 256  ;;  %v14568_v37 = vpop.permute.xlu0 %6473  ;;  %v17699_v30 = vld [vmem:[#allocation57_spill] sm:$0xff] }
 0x4c3   : > { %17696 = vst [vmem:[#allocation55_spill] sm:$0xff] %v14568_v37  ;;  %v5297_v26 = vadd.f32 %v17700_v27, %v17699_v30  ;;  %v5296_v30 = vadd.f32 %v17706_v42, %v17705_v38  ;;  %v17709_v27 = vld [vmem:[#allocation291_spill] sm:$0xff]  ;;  %v17713_v38 = vld [vmem:[#allocation62_spill] sm:$0xff] }
 0x4c4   : > { %v14575_v33 = vpop.permute.xlu1 %6494  ;;  %6879 = vbcast.lane.b32.xlu0 %v6877_v48, 256  ;;  %v6912_v48 = vrot.slane %v14573_v25, %v13622_v49 }
 0x4c5   : > { %17698 = vst [vmem:[#allocation40_spill] sm:$0xff] %v14575_v33  ;;  %v14589_v34 = vadd.f32 %v17703_v10, %v5297_v26  ;;  %v14600_v63 = vadd.f32 %v17709_v27, %v5296_v30  ;;  %v6905_v26 = vrot.slane %v14582_v24, %v13622_v49  ;;  %v17716_v30 = vld [vmem:[#allocation195_spill] sm:$0xff] }
 0x4c6   : > { %6900 = vbcast.lane.b32.xlu1 %v6898_v7, 256  ;;  %v14584_v28 = vpop.permute.xlu0 %6487  ;;  %v17707_v7 = vld [vmem:[#allocation70_spill] sm:$0xff] }
 0x4c7   : > { %17702 = vst [vmem:[#allocation26_spill] sm:$0xff] %v14584_v28  ;;  %v5299_v9 = vadd.f32 %v17708_v45, %v17707_v7  ;;  %v6926_v10 = vrot.slane %v14589_v34, %v13622_v49  ;;  %v6919_v27 = vrot.slane %v14600_v63, %v13622_v49 }
 0x4c8   : > { %v14591_v11 = vpop.permute.xlu1 %6508  ;;  %6893 = vbcast.lane.b32.xlu0 %v6891_v32, 256  ;;  %v17714_v32 = vld [vmem:[#allocation212_spill] sm:$0xff] }
 0x4c9   : > { %17704 = vst [vmem:[#allocation71_spill] sm:$0xff] %v14591_v11  ;;  %v14609_v44 = vadd.f32 %v17711_v21, %v5299_v9  ;;  %v5298_v7 = vadd.f32 %v17714_v32, %v17713_v38  ;;  %v17719_v9 = vld [vmem:[#allocation294_spill] sm:$0xff]  ;;  %v17722_v32 = vld [vmem:[#allocation219_spill] sm:$0xff] }
 0x4ca   : > { %6914 = vbcast.lane.b32.xlu1 %v6912_v48, 256  ;;  %v14602_v39 = vpop.permute.xlu0 %6501  ;;  %v17715_v48 = vld [vmem:[#allocation48_spill] sm:$0xff] }
 0x4cb   : > { %17710 = vst [vmem:[#allocation23_spill] sm:$0xff] %v14602_v39  ;;  %v5301_v45 = vadd.f32 %v17716_v30, %v17715_v48  ;;  %v17717_v39 = vld [vmem:[#allocation293_spill] sm:$0xff]  ;;  %v6940_v21 = vrot.slane %v14609_v44, %v13622_v49  ;;  %v17724_v30 = vld [vmem:[#allocation232_spill] sm:$0xff] }
 0x4cc   : > { %v14611_v42 = vpop.permute.xlu1 %6522  ;;  %6907 = vbcast.lane.b32.xlu0 %v6905_v26, 256  ;;  %v14620_v11 = vadd.f32 %v17717_v39, %v5298_v7  ;;  %v17721_v26 = vld [vmem:[#allocation72_spill] sm:$0xff]  ;;  %v17725_v7 = vld [vmem:[#allocation295_spill] sm:$0xff] }
 0x4cd   : > { %17712 = vst [vmem:[#allocation43_spill] sm:$0xff] %v14611_v42  ;;  %v14627_v42 = vadd.f32 %v17719_v9, %v5301_v45  ;;  %v5300_v48 = vadd.f32 %v17722_v32, %v17721_v26  ;;  %v17727_v9 = vld [vmem:[#allocation200_spill] sm:$0xff]  ;;  %v17730_v32 = vld [vmem:[#allocation230_spill] sm:$0xff] }
 0x4ce   : > { %6928 = vbcast.lane.b32.xlu1 %v6926_v10, 256  ;;  %v14622_v4 = vpop.permute.xlu0 %6515  ;;  %v17723_v10 = vld [vmem:[#allocation103_spill] sm:$0xff]  ;;  %v6933_v39 = vrot.slane %v14620_v11, %v13622_v49 }
 0x4cf   : > { %17718 = vst [vmem:[#allocation31_spill] sm:$0xff] %v14622_v4  ;;  %v5311_v28 = vadd.f32 %v17724_v30, %v17723_v10  ;;  %v14638_v4 = vadd.f32 %v17725_v7, %v5300_v48  ;;  %v6954_v45 = vrot.slane %v14627_v42, %v13622_v49  ;;  %v17732_v30 = vld [vmem:[#allocation240_spill] sm:$0xff] }
 0x4d0   : > { %v14629_v38 = vpop.permute.xlu1 %6536  ;;  %6921 = vbcast.lane.b32.xlu0 %v6919_v27, 256  ;;  %v17729_v27 = vld [vmem:[#allocation96_spill] sm:$0xff] }
 0x4d1   : > { %17720 = vst [vmem:[#allocation46_spill] sm:$0xff] %v14629_v38  ;;  %v14645_v38 = vadd.f32 %v17727_v9, %v5311_v28  ;;  %v5310_v10 = vadd.f32 %v17730_v32, %v17729_v27  ;;  %v6947_v48 = vrot.slane %v14638_v4, %v13622_v49  ;;  %v17733_v7 = vld [vmem:[#allocation296_spill] sm:$0xff]  ;;  %v17735_v9 = vld [vmem:[#allocation297_spill] sm:$0xff]  ;;  %v17738_v32 = vld [vmem:[#allocation238_spill] sm:$0xff] }
 0x4d2   : > { %6942 = vbcast.lane.b32.xlu1 %v6940_v21, 256  ;;  %v14640_v33 = vpop.permute.xlu0 %6529  ;;  %v17731_v21 = vld [vmem:[#allocation115_spill] sm:$0xff] }
 0x4d3   : > { %17726 = vst [vmem:[#allocation32_spill] sm:$0xff] %v14640_v33  ;;  %v5313_v37 = vadd.f32 %v17732_v30, %v17731_v21  ;;  %v14656_v33 = vadd.f32 %v17733_v7, %v5310_v10  ;;  %v6968_v28 = vrot.slane %v14645_v38, %v13622_v49  ;;  %v17740_v30 = vld [vmem:[#allocation224_spill] sm:$0xff]  ;;  %v17741_v7 = vld [vmem:[#allocation298_spill] sm:$0xff] }
 0x4d4   : > { %v14647_v26 = vpop.permute.xlu1 %6550  ;;  %6935 = vbcast.lane.b32.xlu0 %v6933_v39, 256  ;;  %v17737_v39 = vld [vmem:[#allocation102_spill] sm:$0xff] }
 0x4d5   : > { %17728 = vst [vmem:[#allocation61_spill] sm:$0xff] %v14647_v26  ;;  %v14663_v26 = vadd.f32 %v17735_v9, %v5313_v37  ;;  %v5312_v21 = vadd.f32 %v17738_v32, %v17737_v39  ;;  %v6961_v10 = vrot.slane %v14656_v33, %v13622_v49  ;;  %v17743_v9 = vld [vmem:[#allocation299_spill] sm:$0xff]  ;;  %v17746_v32 = vld [vmem:[#allocation245_spill] sm:$0xff] }
 0x4d6   : > { %6956 = vbcast.lane.b32.xlu1 %v6954_v45, 256  ;;  %v14658_v41 = vpop.permute.xlu0 %6543  ;;  %v17739_v45 = vld [vmem:[#allocation81_spill] sm:$0xff] }
 0x4d7   : > { %17734 = vst [vmem:[#allocation19_spill] sm:$0xff] %v14658_v41  ;;  %v5315_v59 = vadd.f32 %v17740_v30, %v17739_v45  ;;  %v14674_v41 = vadd.f32 %v17741_v7, %v5312_v21  ;;  %v6982_v37 = vrot.slane %v14663_v26, %v13622_v49  ;;  %v17748_v30 = vld [vmem:[#allocation235_spill] sm:$0xff]  ;;  %v17749_v7 = vld [vmem:[#allocation300_spill] sm:$0xff] }
 0x4d8   : > { %v14665_v27 = vpop.permute.xlu1 %6564  ;;  %6949 = vbcast.lane.b32.xlu0 %v6947_v48, 256  ;;  %v17745_v48 = vld [vmem:[#allocation117_spill] sm:$0xff] }
 0x4d9   : > { %17736 = vst [vmem:[#allocation58_spill] sm:$0xff] %v14665_v27  ;;  %v14681_v27 = vadd.f32 %v17743_v9, %v5315_v59  ;;  %v5314_v45 = vadd.f32 %v17746_v32, %v17745_v48  ;;  %v6975_v21 = vrot.slane %v14674_v41, %v13622_v49  ;;  %v17751_v9 = vld [vmem:[#allocation301_spill] sm:$0xff] }
 0x4da   : > { %6970 = vbcast.lane.b32.xlu1 %v6968_v28, 256  ;;  %v14676_v50 = vpop.permute.xlu0 %6557  ;;  %v17747_v28 = vld [vmem:[#allocation111_spill] sm:$0xff]  ;;  %v17754_v32 = vld [vmem:[#allocation233_spill] sm:$0xff] }
 0x4db   : > { %17742 = vst [vmem:[#allocation45_spill] sm:$0xff] %v14676_v50  ;;  %v5317_v61 = vadd.f32 %v17748_v30, %v17747_v28  ;;  %v14692_v50 = vadd.f32 %v17749_v7, %v5314_v45  ;;  %v6996_v59 = vrot.slane %v14681_v27, %v13622_v49  ;;  %v17756_v30 = vld [vmem:[#allocation250_spill] sm:$0xff] }
 0x4dc   : > { %v14683_v39 = vpop.permute.xlu1 %6578  ;;  %6963 = vbcast.lane.b32.xlu0 %v6961_v10, 256  ;;  %v17753_v10 = vld [vmem:[#allocation92_spill] sm:$0xff]  ;;  %v17757_v7 = vld [vmem:[#allocation302_spill] sm:$0xff] }
 0x4dd   : > { %17744 = vst [vmem:[#allocation27_spill] sm:$0xff] %v14683_v39  ;;  %v14699_v39 = vadd.f32 %v17751_v9, %v5317_v61  ;;  %v5316_v28 = vadd.f32 %v17754_v32, %v17753_v10  ;;  %v6989_v45 = vrot.slane %v14692_v50, %v13622_v49  ;;  %v17759_v9 = vld [vmem:[#allocation68_spill] sm:$0xff]  ;;  %v17762_v32 = vld [vmem:[#allocation247_spill] sm:$0xff] }
 0x4de   : > { %6984 = vbcast.lane.b32.xlu1 %v6982_v37, 256  ;;  %v14694_v0 = vpop.permute.xlu0 %6571  ;;  %v17755_v37 = vld [vmem:[#allocation136_spill] sm:$0xff] }
 0x4df   : > { %17750 = vst [vmem:[#allocation134_spill] sm:$0xff] %v14694_v0  ;;  %v5327_v6 = vadd.f32 %v17756_v30, %v17755_v37  ;;  %v14710_v0 = vadd.f32 %v17757_v7, %v5316_v28  ;;  %v7010_v61 = vrot.slane %v14699_v39, %v13622_v49  ;;  %v17764_v30 = vld [vmem:[#allocation246_spill] sm:$0xff]  ;;  %v17765_v7 = vld [vmem:[#allocation241_spill] sm:$0xff] }
 0x4e0   : > { %v14701_v48 = vpop.permute.xlu1 %6592  ;;  %6977 = vbcast.lane.b32.xlu0 %v6975_v21, 256  ;;  %v17761_v21 = vld [vmem:[#allocation137_spill] sm:$0xff] }
 0x4e1   : > { %17752 = vst [vmem:[#allocation93_spill] sm:$0xff] %v14701_v48  ;;  %v14717_v48 = vadd.f32 %v17759_v9, %v5327_v6  ;;  %v5326_v37 = vadd.f32 %v17762_v32, %v17761_v21  ;;  %v7003_v28 = vrot.slane %v14710_v0, %v13622_v49  ;;  %v17767_v9 = vld [vmem:[#allocation60_spill] sm:$0xff]  ;;  %v17770_v32 = vld [vmem:[#allocation254_spill] sm:$0xff] }
 0x4e2   : > { %6998 = vbcast.lane.b32.xlu1 %v6996_v59, 256  ;;  %v14712_v2 = vpop.permute.xlu0 %6585  ;;  %v17763_v59 = vld [vmem:[#allocation127_spill] sm:$0xff] }
 0x4e3   : > { %17758 = vst [vmem:[#allocation78_spill] sm:$0xff] %v14712_v2  ;;  %v5329_v8 = vadd.f32 %v17764_v30, %v17763_v59  ;;  %v14728_v2 = vadd.f32 %v17765_v7, %v5326_v37  ;;  %v7024_v6 = vrot.slane %v14717_v48, %v13622_v49  ;;  %v17772_v30 = vld [vmem:[#allocation248_spill] sm:$0xff] }
 0x4e4   : > { %v14719_v10 = vpop.permute.xlu1 %6606  ;;  %6991 = vbcast.lane.b32.xlu0 %v6989_v45, 256  ;;  %v17769_v45 = vld [vmem:[#allocation144_spill] sm:$0xff] }
 0x4e5   : > { %17760 = vst [vmem:[#allocation90_spill] sm:$0xff] %v14719_v10  ;;  %v14735_v10 = vadd.f32 %v17767_v9, %v5329_v8  ;;  %v5328_v59 = vadd.f32 %v17770_v32, %v17769_v45  ;;  %v7017_v37 = vrot.slane %v14728_v2, %v13622_v49  ;;  %v17773_v7 = vld [vmem:[#allocation52_spill] sm:$0xff]  ;;  %v17775_v9 = vld [vmem:[#allocation18_spill] sm:$0xff]  ;;  %v17778_v32 = vld [vmem:[#allocation249_spill] sm:$0xff] }
 0x4e6   : > { %7012 = vbcast.lane.b32.xlu1 %v7010_v61, 256  ;;  %v14730_v60 = vpop.permute.xlu0 %6599  ;;  %v17771_v61 = vld [vmem:[#allocation133_spill] sm:$0xff] }
 0x4e7   : > { %17766 = vst [vmem:[#allocation76_spill] sm:$0xff] %v14730_v60  ;;  %v5331_v53 = vadd.f32 %v17772_v30, %v17771_v61  ;;  %v14746_v60 = vadd.f32 %v17773_v7, %v5328_v59  ;;  %v7038_v8 = vrot.slane %v14735_v10, %v13622_v49  ;;  %v17780_v30 = vld [vmem:[#allocation252_spill] sm:$0xff]  ;;  %v17781_v7 = vld [vmem:[#allocation33_spill] sm:$0xff] }
 0x4e8   : > { %v14737_v21 = vpop.permute.xlu1 %6620  ;;  %7005 = vbcast.lane.b32.xlu0 %v7003_v28, 256  ;;  %v17777_v28 = vld [vmem:[#allocation130_spill] sm:$0xff] }
 0x4e9   : > { %17768 = vst [vmem:[#allocation77_spill] sm:$0xff] %v14737_v21  ;;  %v14753_v21 = vadd.f32 %v17775_v9, %v5331_v53  ;;  %v5330_v61 = vadd.f32 %v17778_v32, %v17777_v28  ;;  %v7031_v59 = vrot.slane %v14746_v60, %v13622_v49  ;;  %v17783_v9 = vld [vmem:[#allocation22_spill] sm:$0xff]  ;;  %v17786_v32 = vld [vmem:[#allocation251_spill] sm:$0xff] }
 0x4ea   : > { %7026 = vbcast.lane.b32.xlu1 %v7024_v6, 256  ;;  %v14748_v23 = vpop.permute.xlu0 %6613  ;;  %v17779_v6 = vld [vmem:[#allocation142_spill] sm:$0xff] }
 0x4eb   : > { %17774 = vst [vmem:[#allocation64_spill] sm:$0xff] %v14748_v23  ;;  %v5333_v43 = vadd.f32 %v17780_v30, %v17779_v6  ;;  %v14764_v23 = vadd.f32 %v17781_v7, %v5330_v61  ;;  %v7052_v53 = vrot.slane %v14753_v21, %v13622_v49  ;;  %v17788_v30 = vld [vmem:[#allocation257_spill] sm:$0xff]  ;;  %v17789_v7 = vld [vmem:[#allocation44_spill] sm:$0xff] }
 0x4ec   : > { %v14755_v45 = vpop.permute.xlu1 %6634  ;;  %7019 = vbcast.lane.b32.xlu0 %v7017_v37, 256  ;;  %v17785_v37 = vld [vmem:[#allocation139_spill] sm:$0xff] }
 0x4ed   : > { %17776 = vst [vmem:[#allocation47_spill] sm:$0xff] %v14755_v45  ;;  %v14771_v45 = vadd.f32 %v17783_v9, %v5333_v43  ;;  %v5332_v6 = vadd.f32 %v17786_v32, %v17785_v37  ;;  %v7045_v61 = vrot.slane %v14764_v23, %v13622_v49  ;;  %v17791_v9 = vld [vmem:[#allocation116_spill] sm:$0xff]  ;;  %v17794_v32 = vld [vmem:[#allocation99_spill] sm:$0xff] }
 0x4ee   : > { %7040 = vbcast.lane.b32.xlu1 %v7038_v8, 256  ;;  %v14766_v62 = vpop.permute.xlu0 %6627  ;;  %v17787_v8 = vld [vmem:[#allocation155_spill] sm:$0xff] }
 0x4ef   : > { %17782 = vst [vmem:[#allocation56_spill] sm:$0xff] %v14766_v62  ;;  %v5343_v19 = vadd.f32 %v17788_v30, %v17787_v8  ;;  %v14782_v62 = vadd.f32 %v17789_v7, %v5332_v6  ;;  %v7066_v43 = vrot.slane %v14771_v45, %v13622_v49  ;;  %v17796_v30 = vld [vmem:[#allocation259_spill] sm:$0xff]  ;;  %v17797_v7 = vld [vmem:[#allocation37_spill] sm:$0xff] }
 0x4f0   : > { %v14773_v28 = vpop.permute.xlu1 %6648  ;;  %7033 = vbcast.lane.b32.xlu0 %v7031_v59, 256  ;;  %v17793_v59 = vld [vmem:[#allocation174_spill] sm:$0xff] }
 0x4f1   : > { %17784 = vst [vmem:[#allocation50_spill] sm:$0xff] %v14773_v28  ;;  %v14789_v28 = vadd.f32 %v17791_v9, %v5343_v19  ;;  %v5342_v8 = vadd.f32 %v17794_v32, %v17793_v59  ;;  %v7059_v6 = vrot.slane %v14782_v62, %v13622_v49  ;;  %v17799_v9 = vld [vmem:[#allocation69_spill] sm:$0xff]  ;;  %v17802_v32 = vld [vmem:[#allocation260_spill] sm:$0xff] }
 0x4f2   : > { %7054 = vbcast.lane.b32.xlu1 %v7052_v53, 256  ;;  %v14784_v12 = vpop.permute.xlu0 %6641  ;;  %v17795_v53 = vld [vmem:[#allocation162_spill] sm:$0xff] }
 0x4f3   : > { %17790 = vst [vmem:[#allocation75_spill] sm:$0xff] %v14784_v12  ;;  %v5345_v57 = vadd.f32 %v17796_v30, %v17795_v53  ;;  %v14800_v12 = vadd.f32 %v17797_v7, %v5342_v8  ;;  %v7080_v19 = vrot.slane %v14789_v28, %v13622_v49  ;;  %v17804_v30 = vld [vmem:[#allocation262_spill] sm:$0xff] }
 0x4f4   : > { %v14791_v37 = vpop.permute.xlu1 %6662  ;;  %7047 = vbcast.lane.b32.xlu0 %v7045_v61, 256  ;;  %v17801_v61 = vld [vmem:[#allocation159_spill] sm:$0xff] }
 0x4f5   : > { %17792 = vst [vmem:[#allocation119_spill] sm:$0xff] %v14791_v37  ;;  %v14807_v37 = vadd.f32 %v17799_v9, %v5345_v57  ;;  %v5344_v53 = vadd.f32 %v17802_v32, %v17801_v61  ;;  %v7073_v8 = vrot.slane %v14800_v12, %v13622_v49  ;;  %v17806_v9 = vld [vmem:[#allocation95_spill] sm:$0xff]  ;;  %v17809_v32 = vld [vmem:[#allocation125_spill] sm:$0xff] }
 0x4f6   : > { %7068 = vbcast.lane.b32.xlu1 %v7066_v43, 256  ;;  %v14802_v20 = vpop.permute.xlu0 %6655  ;;  %v17803_v43 = vld [vmem:[#allocation171_spill] sm:$0xff] }
 0x4f7   : > { %17798 = vst [vmem:[#allocation28_spill] sm:$0xff] %v14802_v20  ;;  %v5347_v15 = vadd.f32 %v17804_v30, %v17803_v43  ;;  %v14818_v7 = vadd.f32 %v13827_v16, %v5344_v53  ;;  %v7094_v57 = vrot.slane %v14807_v37, %v13622_v49  ;;  %v17811_v30 = vld [vmem:[#allocation264_spill] sm:$0xff] }
 0x4f8   : > { %v14809_v59 = vpop.permute.xlu1 %6676  ;;  %7061 = vbcast.lane.b32.xlu0 %v7059_v6, 256  ;;  %v17808_v6 = vld [vmem:[#allocation167_spill] sm:$0xff] }
 0x4f9   : > { %17800 = vst [vmem:[#allocation67_spill] sm:$0xff] %v14809_v59  ;;  %v14825_v59 = vadd.f32 %v17806_v9, %v5347_v15  ;;  %v5346_v43 = vadd.f32 %v17809_v32, %v17808_v6  ;;  %v7087_v16 = vrot.slane %v14818_v7, %v13622_v49  ;;  %v17817_v32 = vld [vmem:[#allocation104_spill] sm:$0xff] }
 0x4fa   : > { %7082 = vbcast.lane.b32.xlu1 %v7080_v19, 256  ;;  %v14820_v20 = vpop.permute.xlu0 %6669  ;;  %v17810_v19 = vld [vmem:[#allocation179_spill] sm:$0xff] }
 0x4fb   : > { %17805 = vst [vmem:[#allocation73_spill] sm:$0xff] %v14820_v20  ;;  %v5349_v55 = vadd.f32 %v17811_v30, %v17810_v19  ;;  %v14836_v53 = vadd.f32 %v13845_v3, %v5346_v43  ;;  %v7108_v15 = vrot.slane %v14825_v59, %v13622_v49  ;;  %v17819_v30 = vld [vmem:[#allocation266_spill] sm:$0xff] }
 0x4fc   : > { %v14827_v61 = vpop.permute.xlu1 %6690  ;;  %7075 = vbcast.lane.b32.xlu0 %v7073_v8, 256  ;;  %v17816_v8 = vld [vmem:[#allocation176_spill] sm:$0xff]  ;;  %v17820_v43 = vld [vmem:[#allocation110_spill] sm:$0xff] }
 0x4fd   : > { %17807 = vst [vmem:[#allocation65_spill] sm:$0xff] %v14827_v61  ;;  %17812 = vst [vmem:[#allocation82_spill] sm:$0xff] %v14836_v53  ;;  %v14843_v9 = vadd.f32 %v13854_v1, %v5349_v55  ;;  %v5348_v19 = vadd.f32 %v17817_v32, %v17816_v8  ;;  %v7101_v3 = vrot.slane %v14836_v53, %v13622_v49  ;;  %v17823_v55 = vld [vmem:[#allocation63_spill] sm:$0xff]  ;;  %v17827_v32 = vld [vmem:[#allocation124_spill] sm:$0xff] }
 0x4fe   : > { %7096 = vbcast.lane.b32.xlu1 %v7094_v57, 256  ;;  %v14838_v20 = vpop.permute.xlu0 %6683  ;;  %v17818_v57 = vld [vmem:[#allocation186_spill] sm:$0xff] }
 0x4ff   : > { %17813 = vst [vmem:[#allocation30_spill] sm:$0xff] %v14838_v20  ;;  %17814 = vst [vmem:[#allocation35_spill] sm:$0xff] %v14843_v9  ;;  %v5359_v61 = vadd.f32 %v17819_v30, %v17818_v57  ;;  %v14854_v20 = vadd.f32 %v17820_v43, %v5348_v19  ;;  %v7122_v1 = vrot.slane %v14843_v9, %v13622_v49  ;;  %v17829_v30 = vld [vmem:[#allocation272_spill] sm:$0xff]  ;;  %v17830_v43 = vld [vmem:[#allocation89_spill] sm:$0xff] }
 0x500   : > { %v14845_v6 = vpop.permute.xlu1 %6704  ;;  %7089 = vbcast.lane.b32.xlu0 %v7087_v16, 256  ;;  %v17826_v16 = vld [vmem:[#allocation193_spill] sm:$0xff] }
 0x501   : > { %17815 = vst [vmem:[#allocation80_spill] sm:$0xff] %v14845_v6  ;;  %17821 = vst [vmem:[#allocation94_spill] sm:$0xff] %v14854_v20  ;;  %v14861_v6 = vadd.f32 %v17823_v55, %v5359_v61  ;;  %v5358_v57 = vadd.f32 %v17827_v32, %v17826_v16  ;;  %v7115_v19 = vrot.slane %v14854_v20, %v13622_v49  ;;  %v17833_v55 = vld [vmem:[#allocation123_spill] sm:$0xff]  ;;  %v17837_v32 = vld [vmem:[#allocation149_spill] sm:$0xff] }
 0x502   : > { %7110 = vbcast.lane.b32.xlu1 %v7108_v15, 256  ;;  %v14856_v56 = vpop.permute.xlu0 %6697  ;;  %v17828_v15 = vld [vmem:[#allocation203_spill] sm:$0xff] }
 0x503   : > { %17822 = vst [vmem:[#allocation38_spill] sm:$0xff] %v14856_v56  ;;  %17824 = vst [vmem:[#allocation74_spill] sm:$0xff] %v14861_v6  ;;  %v5361_v53 = vadd.f32 %v17829_v30, %v17828_v15  ;;  %v14872_v56 = vadd.f32 %v17830_v43, %v5358_v57  ;;  %v7136_v61 = vrot.slane %v14861_v6, %v13622_v49  ;;  %v17839_v30 = vld [vmem:[#allocation274_spill] sm:$0xff] }
 0x504   : > { %v14863_v8 = vpop.permute.xlu1 %6718  ;;  %7103 = vbcast.lane.b32.xlu0 %v7101_v3, 256  ;;  %v17836_v3 = vld [vmem:[#allocation191_spill] sm:$0xff]  ;;  %v17840_v43 = vld [vmem:[#allocation66_spill] sm:$0xff] }
 0x505   : > { %17825 = vst [vmem:[#allocation109_spill] sm:$0xff] %v14863_v8  ;;  %17831 = vst [vmem:[#allocation79_spill] sm:$0xff] %v14872_v56  ;;  %v14879_v8 = vadd.f32 %v17833_v55, %v5361_v53  ;;  %v5360_v15 = vadd.f32 %v17837_v32, %v17836_v3  ;;  %v7129_v57 = vrot.slane %v14872_v56, %v13622_v49  ;;  %v17843_v55 = vld [vmem:[#allocation86_spill] sm:$0xff]  ;;  %v17847_v32 = vld [vmem:[#allocation275_spill] sm:$0xff] }
 0x506   : > { %7124 = vbcast.lane.b32.xlu1 %v7122_v1, 256  ;;  %v14874_v9 = vpop.permute.xlu0 %6711  ;;  %v17838_v1 = vld [vmem:[#allocation209_spill] sm:$0xff] }
 0x507   : > { %17832 = vst [vmem:[#allocation85_spill] sm:$0xff] %v14874_v9  ;;  %17834 = vst [vmem:[#allocation128_spill] sm:$0xff] %v14879_v8  ;;  %v5363_v20 = vadd.f32 %v17839_v30, %v17838_v1  ;;  %v14890_v9 = vadd.f32 %v17840_v43, %v5360_v15  ;;  %v7150_v53 = vrot.slane %v14879_v8, %v13622_v49  ;;  %v17849_v30 = vld [vmem:[#allocation269_spill] sm:$0xff]  ;;  %v17850_v43 = vld [vmem:[#allocation122_spill] sm:$0xff] }
 0x508   : > { %v14881_v16 = vpop.permute.xlu1 %6732  ;;  %7117 = vbcast.lane.b32.xlu0 %v7115_v19, 256  ;;  %v17846_v19 = vld [vmem:[#allocation207_spill] sm:$0xff] }
 0x509   : > { %17835 = vst [vmem:[#allocation54_spill] sm:$0xff] %v14881_v16  ;;  %17841 = vst [vmem:[#allocation20_spill] sm:$0xff] %v14890_v9  ;;  %v14897_v16 = vadd.f32 %v17843_v55, %v5363_v20  ;;  %v5362_v1 = vadd.f32 %v17847_v32, %v17846_v19  ;;  %v7143_v15 = vrot.slane %v14890_v9, %v13622_v49  ;;  %v17853_v55 = vld [vmem:[#allocation88_spill] sm:$0xff]  ;;  %v17857_v32 = vld [vmem:[#allocation278_spill] sm:$0xff] }
 0x50a   : > { %7138 = vbcast.lane.b32.xlu1 %v7136_v61, 256  ;;  %v14892_v6 = vpop.permute.xlu0 %6725  ;;  %v17848_v61 = vld [vmem:[#allocation197_spill] sm:$0xff] }
 0x50b   : > { %17842 = vst [vmem:[#allocation158_spill] sm:$0xff] %v14892_v6  ;;  %17844 = vst [vmem:[#allocation108_spill] sm:$0xff] %v14897_v16  ;;  %v5365_v56 = vadd.f32 %v17849_v30, %v17848_v61  ;;  %v14908_v6 = vadd.f32 %v17850_v43, %v5362_v1  ;;  %v7164_v20 = vrot.slane %v14897_v16, %v13622_v49  ;;  %v17859_v30 = vld [vmem:[#allocation285_spill] sm:$0xff] }
 0x50c   : > { %v14899_v3 = vpop.permute.xlu1 %6746  ;;  %7131 = vbcast.lane.b32.xlu0 %v7129_v57, 256  ;;  %v17856_v57 = vld [vmem:[#allocation214_spill] sm:$0xff]  ;;  %v17860_v43 = vld [vmem:[#allocation105_spill] sm:$0xff] }
 0x50d   : > { %17845 = vst [vmem:[#allocation100_spill] sm:$0xff] %v14899_v3  ;;  %17851 = vst [vmem:[#allocation138_spill] sm:$0xff] %v14908_v6  ;;  %v14915_v3 = vadd.f32 %v17853_v55, %v5365_v56  ;;  %v5364_v61 = vadd.f32 %v17857_v32, %v17856_v57  ;;  %v7157_v1 = vrot.slane %v14908_v6, %v13622_v49  ;;  %v17863_v55 = vld [vmem:[#allocation152_spill] sm:$0xff] }
 0x50e   : > { %7152 = vbcast.lane.b32.xlu1 %v7150_v53, 256  ;;  %v14910_v8 = vpop.permute.xlu0 %6739  ;;  %v17858_v53 = vld [vmem:[#allocation231_spill] sm:$0xff]  ;;  %v17867_v32 = vld [vmem:[#allocation284_spill] sm:$0xff] }
 0x50f   : > { %17852 = vst [vmem:[#allocation97_spill] sm:$0xff] %v14910_v8  ;;  %17854 = vst [vmem:[#allocation146_spill] sm:$0xff] %v14915_v3  ;;  %v5375_v9 = vadd.f32 %v17859_v30, %v17858_v53  ;;  %v14926_v8 = vadd.f32 %v17860_v43, %v5364_v61  ;;  %v7178_v56 = vrot.slane %v14915_v3, %v13622_v49  ;;  %v17869_v30 = vld [vmem:[#allocation288_spill] sm:$0xff] }
 0x510   : > { %v14917_v19 = vpop.permute.xlu1 %6760  ;;  %7145 = vbcast.lane.b32.xlu0 %v7143_v15, 256  ;;  %v17866_v15 = vld [vmem:[#allocation237_spill] sm:$0xff]  ;;  %v17870_v43 = vld [vmem:[#allocation84_spill] sm:$0xff] }
 0x511   : > { %17855 = vst [vmem:[#allocation87_spill] sm:$0xff] %v14917_v19  ;;  %17861 = vst [vmem:[#allocation121_spill] sm:$0xff] %v14926_v8  ;;  %v14933_v19 = vadd.f32 %v17863_v55, %v5375_v9  ;;  %v5374_v53 = vadd.f32 %v17867_v32, %v17866_v15  ;;  %v7171_v61 = vrot.slane %v14926_v8, %v13622_v49  ;;  %v17873_v55 = vld [vmem:[#allocation91_spill] sm:$0xff] }
 0x512   : > { %7166 = vbcast.lane.b32.xlu1 %v7164_v20, 256  ;;  %v14928_v16 = vpop.permute.xlu0 %6753  ;;  %v17868_v20 = vld [vmem:[#allocation239_spill] sm:$0xff] }
 0x513   : > { %17862 = vst [vmem:[#allocation114_spill] sm:$0xff] %v14928_v16  ;;  %17864 = vst [vmem:[#allocation163_spill] sm:$0xff] %v14933_v19  ;;  %v5377_v6 = vadd.f32 %v17869_v30, %v17868_v20  ;;  %v14944_v16 = vadd.f32 %v17870_v43, %v5374_v53  ;;  %v7192_v9 = vrot.slane %v14933_v19, %v13622_v49  ;;  %v17877_v32 = vld [vmem:[#allocation287_spill] sm:$0xff]  ;;  %v17879_v30 = vld [vmem:[#allocation281_spill] sm:$0xff] }
 0x514   : > { %v14935_v57 = vpop.permute.xlu1 %6774  ;;  %7159 = vbcast.lane.b32.xlu0 %v7157_v1, 256  ;;  %v17876_v1 = vld [vmem:[#allocation234_spill] sm:$0xff]  ;;  %v17880_v43 = vld [vmem:[#allocation141_spill] sm:$0xff] }
 0x515   : > { %17865 = vst [vmem:[#allocation15_spill] sm:$0xff] %v14935_v57  ;;  %17871 = vst [vmem:[#allocation101_spill] sm:$0xff] %v14944_v16  ;;  %v14951_v57 = vadd.f32 %v17873_v55, %v5377_v6  ;;  %v5376_v20 = vadd.f32 %v17877_v32, %v17876_v1  ;;  %v7185_v53 = vrot.slane %v14944_v16, %v13622_v49  ;;  %v17882_v55 = vld [vmem:[#allocation17_spill] sm:$0xff] }
 0x516   : > { %7180 = vbcast.lane.b32.xlu1 %v7178_v56, 256  ;;  %v14946_v3 = vpop.permute.xlu0 %6767  ;;  %v17878_v56 = vld [vmem:[#allocation223_spill] sm:$0xff]  ;;  %v17885_v32 = vld [vmem:[#allocation289_spill] sm:$0xff] }
 0x517   : > { %17872 = vst [vmem:[#allocation161_spill] sm:$0xff] %v14946_v3  ;;  %17874 = vst [vmem:[#allocation143_spill] sm:$0xff] %v14951_v57  ;;  %v5379_v8 = vadd.f32 %v17879_v30, %v17878_v56  ;;  %v14962_v3 = vadd.f32 %v17880_v43, %v5376_v20  ;;  %v7206_v6 = vrot.slane %v14951_v57, %v13622_v49  ;;  %v17887_v30 = vld [vmem:[#allocation286_spill] sm:$0xff]  ;;  %v17888_v43 = vld [vmem:[#allocation113_spill] sm:$0xff] }
 0x518   : > { %v14953_v15 = vpop.permute.xlu1 %6788  ;;  %7173 = vbcast.lane.b32.xlu0 %v7171_v61, 256  ;;  %v17884_v61 = vld [vmem:[#allocation244_spill] sm:$0xff] }
 0x519   : > { %17875 = vst [vmem:[#allocation21_spill] sm:$0xff] %v14953_v15  ;;  %v14969_v15 = vadd.f32 %v17882_v55, %v5379_v8  ;;  %v5378_v56 = vadd.f32 %v17885_v32, %v17884_v61  ;;  %v7199_v20 = vrot.slane %v14962_v3, %v13622_v49  ;;  %v17890_v55 = vld [vmem:[#allocation166_spill] sm:$0xff]  ;;  %v17892_v32 = vld [vmem:[#allocation183_spill] sm:$0xff] }
 0x51a   : > { %7194 = vbcast.lane.b32.xlu1 %v7192_v9, 256  ;;  %v14964_v19 = vpop.permute.xlu0 %6781  ;;  %v17886_v9 = vld [vmem:[#allocation236_spill] sm:$0xff] }
 0x51b   : > { %17881 = vst [vmem:[#allocation180_spill] sm:$0xff] %v14964_v19  ;;  %v5381_v16 = vadd.f32 %v17887_v30, %v17886_v9  ;;  %v14980_v19 = vadd.f32 %v17888_v43, %v5378_v56  ;;  %v7220_v8 = vrot.slane %v14969_v15, %v13622_v49  ;;  %v17893_v56 = vld [vmem:[#allocation126_spill] sm:$0xff] }
 0x51c   : > { %v14971_v1 = vpop.permute.xlu1 %6802  ;;  %7187 = vbcast.lane.b32.xlu0 %v7185_v53, 256  ;;  %v17891_v53 = vld [vmem:[#allocation227_spill] sm:$0xff] }
 0x51d   : > { %17883 = vst [vmem:[#allocation132_spill] sm:$0xff] %v14971_v1  ;;  %v14987_v1 = vadd.f32 %v17890_v55, %v5381_v16  ;;  %v5380_v9 = vadd.f32 %v17892_v32, %v17891_v53  ;;  %v7248_v53 = vrot.slane %v14431_v17, %v14170_v46 }
 0x51e   : > { %7208 = vbcast.lane.b32.xlu1 %v7206_v6, 256  ;;  %v14982_v57 = vpop.permute.xlu0 %6795  ;;  %v7213_v6 = vrot.slane %v14980_v19, %v13622_v49 }
 0x51f   : > { %17889 = vst [vmem:[#allocation112_spill] sm:$0xff] %v14982_v57  ;;  %v14996_v30 = vadd.f32 %v17893_v56, %v5380_v9  ;;  %v7234_v57 = vrot.slane %v14987_v1, %v13622_v49  ;;  %v7241_v9 = vrot.slane %v14438_v18, %v14170_v46 }
 0x520   : > { %v14989_v61 = vpop.permute.xlu1 %6816  ;;  %7201 = vbcast.lane.b32.xlu0 %v7199_v20, 256 }
 0x521   : > { %v7227_v55 = vrot.slane %v14996_v30, %v13622_v49 }
 0x522   : > { %7222 = vbcast.lane.b32.xlu1 %v7220_v8, 256  ;;  %v14998_v43 = vpop.permute.xlu0 %6809 }
 0x524   : > { %v15002_v16 = vpop.permute.xlu1 %6830  ;;  %7215 = vbcast.lane.b32.xlu0 %v7213_v6, 256  ;;  %v7255_v6 = vrot.slane %v14458_v13, %v14170_v46 }
 0x526   : > { %7236 = vbcast.lane.b32.xlu1 %v7234_v57, 256  ;;  %v15006_v20 = vpop.permute.xlu0 %6823  ;;  %v7262_v57 = vrot.slane %v14447_v47, %v14170_v46 }
 0x528   : > { %v15008_v8 = vpop.permute.xlu1 %6844  ;;  %7229 = vbcast.lane.b32.xlu0 %v7227_v55, 256  ;;  %v7276_v55 = vrot.slane %v14465_v35, %v14170_v46 }
 0x52a   : > { %7250 = vbcast.lane.b32.xlu1 %v7248_v53, 256  ;;  %v15012_v32 = vpop.permute.xlu0 %6837  ;;  %v7269_v53 = vrot.slane %v14474_v52, %v14170_v46 }
 0x52c   : > { %v15016_v56 = vpop.permute.xlu1 %6858  ;;  %7243 = vbcast.lane.b32.xlu0 %v7241_v9, 256  ;;  %v7290_v9 = vrot.slane %v14483_v36, %v14170_v46 }
 0x52e   : > { %7264 = vbcast.lane.b32.xlu1 %v7262_v57, 256  ;;  %v15020_v49 = vpop.permute.xlu0 %6851  ;;  %v7283_v57 = vrot.slane %v14492_v40, %v14170_v46 }
 0x530   : > { %v15024_v17 = vpop.permute.xlu1 %6872  ;;  %7257 = vbcast.lane.b32.xlu0 %v7255_v6, 256  ;;  %v7304_v6 = vrot.slane %v14501_v58, %v14170_v46 }
 0x532   : > { %7278 = vbcast.lane.b32.xlu1 %v7276_v55, 256  ;;  %v15028_v18 = vpop.permute.xlu0 %6865  ;;  %v7297_v55 = vrot.slane %v14512_v51, %v14170_v46 }
 0x534   : > { %v15032_v47 = vpop.permute.xlu1 %6886  ;;  %7271 = vbcast.lane.b32.xlu0 %v7269_v53, 256  ;;  %v7318_v53 = vrot.slane %v14519_v14, %v14170_v46 }
 0x536   : > { %7292 = vbcast.lane.b32.xlu1 %v7290_v9, 256  ;;  %v15036_v13 = vpop.permute.xlu0 %6879  ;;  %v7311_v9 = vrot.slane %v14528_v22, %v14170_v46 }
 0x538   : > { %v15040_v35 = vpop.permute.xlu1 %6900  ;;  %7285 = vbcast.lane.b32.xlu0 %v7283_v57, 256  ;;  %v7332_v57 = vrot.slane %v14537_v5, %v14170_v46 }
 0x53a   : > { %7306 = vbcast.lane.b32.xlu1 %v7304_v6, 256  ;;  %v15044_v52 = vpop.permute.xlu0 %6893  ;;  %v7325_v6 = vrot.slane %v14546_v31, %v14170_v46 }
 0x53c   : > { %v15048_v36 = vpop.permute.xlu1 %6914  ;;  %7299 = vbcast.lane.b32.xlu0 %v7297_v55, 256  ;;  %v7346_v55 = vrot.slane %v14555_v29, %v14170_v46  ;;  %v7374_v29 = vrot.slane %v14589_v34, %v14170_v46 }
 0x53e   : > { %7320 = vbcast.lane.b32.xlu1 %v7318_v53, 256  ;;  %v15052_v40 = vpop.permute.xlu0 %6907  ;;  %v7339_v53 = vrot.slane %v14564_v54, %v14170_v46  ;;  %v7367_v54 = vrot.slane %v14600_v63, %v14170_v46  ;;  %v7395_v63 = vrot.slane %v14638_v4, %v14170_v46  ;;  %v7423_v4 = vrot.slane %v14674_v41, %v14170_v46 }
 0x53f   : > { %v7451_v41 = vrot.slane %v14710_v0, %v14170_v46  ;;  %v7479_v0 = vrot.slane %v14746_v60, %v14170_v46  ;;  %v7507_v60 = vrot.slane %v14782_v62, %v14170_v46  ;;  %v7535_v62 = vrot.slane %v14818_v7, %v14170_v46  ;;  %v17907_v7 = vld [vmem:[#allocation94_spill] sm:$0xff] }
 0x540   : > { %v15056_v58 = vpop.permute.xlu1 %6928  ;;  %7313 = vbcast.lane.b32.xlu0 %v7311_v9, 256  ;;  %v7360_v9 = vrot.slane %v14573_v25, %v14170_v46  ;;  %v7388_v25 = vrot.slane %v14609_v44, %v14170_v46 }
 0x542   : > { %7334 = vbcast.lane.b32.xlu1 %v7332_v57, 256  ;;  %v15060_v51 = vpop.permute.xlu0 %6921  ;;  %v7353_v57 = vrot.slane %v14582_v24, %v14170_v46  ;;  %v7381_v24 = vrot.slane %v14620_v11, %v14170_v46  ;;  %v7409_v11 = vrot.slane %v14656_v33, %v14170_v46  ;;  %v7437_v33 = vrot.slane %v14692_v50, %v14170_v46 }
 0x543   : > { %v7465_v50 = vrot.slane %v14728_v2, %v14170_v46  ;;  %v7493_v2 = vrot.slane %v14764_v23, %v14170_v46  ;;  %v7521_v23 = vrot.slane %v14800_v12, %v14170_v46  ;;  %v17903_v12 = vld [vmem:[#allocation82_spill] sm:$0xff] }
 0x544   : > { %v15064_v14 = vpop.permute.xlu1 %6942  ;;  %7327 = vbcast.lane.b32.xlu0 %v7325_v6, 256 }
 0x546   : > { %7348 = vbcast.lane.b32.xlu1 %v7346_v55, 256  ;;  %v15068_v22 = vpop.permute.xlu0 %6935 }
 0x548   : > { %v15072_v5 = vpop.permute.xlu1 %6956  ;;  %7341 = vbcast.lane.b32.xlu0 %v7339_v53, 256 }
 0x54a   : > { %7362 = vbcast.lane.b32.xlu1 %v7360_v9, 256  ;;  %v15076_v31 = vpop.permute.xlu0 %6949  ;;  %v7402_v9 = vrot.slane %v14627_v42, %v14170_v46 }
 0x54c   : > { %v15082_v6 = vpop.permute.xlu1 %6970  ;;  %7355 = vbcast.lane.b32.xlu0 %v7353_v57, 256 }
 0x54e   : > { %7376 = vbcast.lane.b32.xlu1 %v7374_v29, 256  ;;  %v15086_v55 = vpop.permute.xlu0 %6963  ;;  %v7416_v29 = vrot.slane %v14645_v38, %v14170_v46 }
 0x550   : > { %v15090_v53 = vpop.permute.xlu1 %6984  ;;  %7369 = vbcast.lane.b32.xlu0 %v7367_v54, 256 }
 0x552   : > { %7390 = vbcast.lane.b32.xlu1 %v7388_v25, 256  ;;  %v15094_v34 = vpop.permute.xlu0 %6977  ;;  %v7430_v25 = vrot.slane %v14663_v26, %v14170_v46 }
 0x554   : > { %v15098_v57 = vpop.permute.xlu1 %6998  ;;  %7383 = vbcast.lane.b32.xlu0 %v7381_v24, 256 }
 0x556   : > { %7404 = vbcast.lane.b32.xlu1 %v7402_v9, 256  ;;  %v15102_v44 = vpop.permute.xlu0 %6991  ;;  %v7444_v9 = vrot.slane %v14681_v27, %v14170_v46 }
 0x558   : > { %v15106_v54 = vpop.permute.xlu1 %7012  ;;  %7397 = vbcast.lane.b32.xlu0 %v7395_v63, 256 }
 0x55a   : > { %7418 = vbcast.lane.b32.xlu1 %v7416_v29, 256  ;;  %v15110_v42 = vpop.permute.xlu0 %7005  ;;  %v7458_v29 = vrot.slane %v14699_v39, %v14170_v46 }
 0x55c   : > { %v15114_v24 = vpop.permute.xlu1 %7026  ;;  %7411 = vbcast.lane.b32.xlu0 %v7409_v11, 256 }
 0x55e   : > { %7432 = vbcast.lane.b32.xlu1 %v7430_v25, 256  ;;  %v15118_v38 = vpop.permute.xlu0 %7019  ;;  %v7472_v25 = vrot.slane %v14717_v48, %v14170_v46 }
 0x560   : > { %v15122_v63 = vpop.permute.xlu1 %7040  ;;  %7425 = vbcast.lane.b32.xlu0 %v7423_v4, 256 }
 0x562   : > { %7446 = vbcast.lane.b32.xlu1 %v7444_v9, 256  ;;  %v15126_v26 = vpop.permute.xlu0 %7033  ;;  %v7486_v9 = vrot.slane %v14735_v10, %v14170_v46 }
 0x564   : > { %v15130_v11 = vpop.permute.xlu1 %7054  ;;  %7439 = vbcast.lane.b32.xlu0 %v7437_v33, 256 }
 0x566   : > { %7460 = vbcast.lane.b32.xlu1 %v7458_v29, 256  ;;  %v15134_v27 = vpop.permute.xlu0 %7047  ;;  %v7500_v29 = vrot.slane %v14753_v21, %v14170_v46 }
 0x568   : > { %v15138_v4 = vpop.permute.xlu1 %7068  ;;  %7453 = vbcast.lane.b32.xlu0 %v7451_v41, 256 }
 0x56a   : > { %7474 = vbcast.lane.b32.xlu1 %v7472_v25, 256  ;;  %v15142_v39 = vpop.permute.xlu0 %7061  ;;  %v7514_v25 = vrot.slane %v14771_v45, %v14170_v46 }
 0x56c   : > { %v15146_v33 = vpop.permute.xlu1 %7082  ;;  %7467 = vbcast.lane.b32.xlu0 %v7465_v50, 256 }
 0x56e   : > { %7488 = vbcast.lane.b32.xlu1 %v7486_v9, 256  ;;  %v15150_v48 = vpop.permute.xlu0 %7075  ;;  %v7528_v9 = vrot.slane %v14789_v28, %v14170_v46 }
 0x56f   : > { %17894 = vst [vmem:[#allocation181_spill] sm:$0xff] %v15150_v48  ;;  %v10133_v48 = vmov 1934713408  }
 0x570   : > { %v15154_v41 = vpop.permute.xlu1 %7096  ;;  %7481 = vbcast.lane.b32.xlu0 %v7479_v0, 256 }
 0x572   : > { %7502 = vbcast.lane.b32.xlu1 %v7500_v29, 256  ;;  %v15158_v10 = vpop.permute.xlu0 %7089  ;;  %v7542_v29 = vrot.slane %v14807_v37, %v14170_v46 }
 0x573   : > { %17895 = vst [vmem:[#allocation156_spill] sm:$0xff] %v15158_v10 }
 0x574   : > { %v15162_v50 = vpop.permute.xlu1 %7110  ;;  %7495 = vbcast.lane.b32.xlu0 %v7493_v2, 256 }
 0x575   : > { %17896 = vst [vmem:[#allocation34_spill] sm:$0xff] %v15162_v50  ;;  %v17936_v50 = vld [vmem:[#allocation164_spill] sm:$0xff] }
 0x576   : > { %7516 = vbcast.lane.b32.xlu1 %v7514_v25, 256  ;;  %v15166_v21 = vpop.permute.xlu0 %7103  ;;  %v7556_v25 = vrot.slane %v14825_v59, %v14170_v46 }
 0x577   : > { %17897 = vst [vmem:[#allocation188_spill] sm:$0xff] %v15166_v21 }
 0x578   : > { %v15170_v0 = vpop.permute.xlu1 %7124  ;;  %7509 = vbcast.lane.b32.xlu0 %v7507_v60, 256 }
 0x579   : > { %17898 = vst [vmem:[#allocation150_spill] sm:$0xff] %v15170_v0  ;;  %v17938_v0 = vld [vmem:[#allocation24_spill] sm:$0xff] }
 0x57a   : > { %7530 = vbcast.lane.b32.xlu1 %v7528_v9, 256  ;;  %v15174_v45 = vpop.permute.xlu0 %7117  ;;  %v7549_v9 = vrot.slane %v17903_v12, %v14170_v46  ;;  %v17911_v12 = vld [vmem:[#allocation79_spill] sm:$0xff] }
 0x57b   : > { %17899 = vst [vmem:[#allocation41_spill] sm:$0xff] %v15174_v45  ;;  %v17934_v45 = vld [vmem:[#allocation132_spill] sm:$0xff] }
 0x57c   : > { %v15178_v2 = vpop.permute.xlu1 %7138  ;;  %7523 = vbcast.lane.b32.xlu0 %v7521_v23, 256  ;;  %v17905_v23 = vld [vmem:[#allocation35_spill] sm:$0xff] }
 0x57d   : > { %17900 = vst [vmem:[#allocation185_spill] sm:$0xff] %v15178_v2 }
 0x57e   : > { %7544 = vbcast.lane.b32.xlu1 %v7542_v29, 256  ;;  %v15182_v28 = vpop.permute.xlu0 %7131  ;;  %v7570_v29 = vrot.slane %v17905_v23, %v14170_v46 }
 0x57f   : > { %17901 = vst [vmem:[#allocation175_spill] sm:$0xff] %v15182_v28  ;;  %v7563_v28 = vrot.slane %v17907_v7, %v14170_v46  ;;  %v17915_v7 = vld [vmem:[#allocation20_spill] sm:$0xff] }
 0x580   : > { %v15186_v60 = vpop.permute.xlu1 %7152  ;;  %7537 = vbcast.lane.b32.xlu0 %v7535_v62, 256  ;;  %v17909_v62 = vld [vmem:[#allocation74_spill] sm:$0xff] }
 0x581   : > { %17902 = vst [vmem:[#allocation57_spill] sm:$0xff] %v15186_v60 }
 0x582   : > { %7558 = vbcast.lane.b32.xlu1 %v7556_v25, 256  ;;  %v15190_v37 = vpop.permute.xlu0 %7145  ;;  %v7584_v25 = vrot.slane %v17909_v62, %v14170_v46 }
 0x583   : > { %17904 = vst [vmem:[#allocation204_spill] sm:$0xff] %v15190_v37  ;;  %v7577_v37 = vrot.slane %v17911_v12, %v14170_v46  ;;  %v17919_v12 = vld [vmem:[#allocation138_spill] sm:$0xff] }
 0x584   : > { %v15194_v2 = vpop.permute.xlu1 %7166  ;;  %7551 = vbcast.lane.b32.xlu0 %v7549_v9, 256  ;;  %v17913_v9 = vld [vmem:[#allocation128_spill] sm:$0xff] }
 0x585   : > { %17906 = vst [vmem:[#allocation169_spill] sm:$0xff] %v15194_v2 }
 0x586   : > { %7572 = vbcast.lane.b32.xlu1 %v7570_v29, 256  ;;  %v15198_v59 = vpop.permute.xlu0 %7159  ;;  %v7598_v29 = vrot.slane %v17913_v9, %v14170_v46 }
 0x587   : > { %17908 = vst [vmem:[#allocation290_spill] sm:$0xff] %v15198_v59  ;;  %v7591_v59 = vrot.slane %v17915_v7, %v14170_v46  ;;  %v17923_v7 = vld [vmem:[#allocation121_spill] sm:$0xff] }
 0x588   : > { %v15202_v60 = vpop.permute.xlu1 %7180  ;;  %7565 = vbcast.lane.b32.xlu0 %v7563_v28, 256  ;;  %v17917_v28 = vld [vmem:[#allocation108_spill] sm:$0xff] }
 0x589   : > { %17910 = vst [vmem:[#allocation39_spill] sm:$0xff] %v15202_v60 }
 0x58a   : > { %7586 = vbcast.lane.b32.xlu1 %v7584_v25, 256  ;;  %v15206_v23 = vpop.permute.xlu0 %7173  ;;  %v7612_v25 = vrot.slane %v17917_v28, %v14170_v46 }
 0x58b   : > { %17912 = vst [vmem:[#allocation202_spill] sm:$0xff] %v15206_v23  ;;  %v7605_v23 = vrot.slane %v17919_v12, %v14170_v46  ;;  %v17927_v12 = vld [vmem:[#allocation101_spill] sm:$0xff] }
 0x58c   : > { %v15210_v2 = vpop.permute.xlu1 %7194  ;;  %7579 = vbcast.lane.b32.xlu0 %v7577_v37, 256  ;;  %v17921_v37 = vld [vmem:[#allocation146_spill] sm:$0xff] }
 0x58d   : > { %17914 = vst [vmem:[#allocation70_spill] sm:$0xff] %v15210_v2 }
 0x58e   : > { %7600 = vbcast.lane.b32.xlu1 %v7598_v29, 256  ;;  %v15214_v62 = vpop.permute.xlu0 %7187  ;;  %v7626_v29 = vrot.slane %v17921_v37, %v14170_v46 }
 0x58f   : > { %17916 = vst [vmem:[#allocation208_spill] sm:$0xff] %v15214_v62  ;;  %v7619_v62 = vrot.slane %v17923_v7, %v14170_v46  ;;  %v7647_v7 = vrot.slane %v14962_v3, %v14170_v46 }
 0x590   : > { %v15218_v60 = vpop.permute.xlu1 %7208  ;;  %7593 = vbcast.lane.b32.xlu0 %v7591_v59, 256  ;;  %v17925_v59 = vld [vmem:[#allocation163_spill] sm:$0xff] }
 0x591   : > { %17918 = vst [vmem:[#allocation291_spill] sm:$0xff] %v15218_v60 }
 0x592   : > { %7614 = vbcast.lane.b32.xlu1 %v7612_v25, 256  ;;  %v15222_v9 = vpop.permute.xlu0 %7201  ;;  %v7640_v25 = vrot.slane %v17925_v59, %v14170_v46  ;;  %v17930_v59 = vld [vmem:[#allocation270_spill] sm:$0xff] }
 0x593   : > { %17920 = vst [vmem:[#allocation292_spill] sm:$0xff] %v15222_v9  ;;  %v7633_v9 = vrot.slane %v17927_v12, %v14170_v46  ;;  %v17933_v12 = vld [vmem:[#allocation131_spill] sm:$0xff] }
 0x594   : > { %v15226_v2 = vpop.permute.xlu1 %7222  ;;  %7607 = vbcast.lane.b32.xlu0 %v7605_v23, 256  ;;  %v17929_v23 = vld [vmem:[#allocation143_spill] sm:$0xff] }
 0x595   : > { %17922 = vst [vmem:[#allocation62_spill] sm:$0xff] %v15226_v2 }
 0x596   : > { %7628 = vbcast.lane.b32.xlu1 %v7626_v29, 256  ;;  %v15230_v28 = vpop.permute.xlu0 %7215  ;;  %v7654_v29 = vrot.slane %v17929_v23, %v14170_v46  ;;  %v7668_v23 = vrot.slane %v14969_v15, %v14170_v46 }
 0x597   : > { %17924 = vst [vmem:[#allocation212_spill] sm:$0xff] %v15230_v28  ;;  %v17932_v28 = vld [vmem:[#allocation276_spill] sm:$0xff] }
 0x598   : > { %v15234_v60 = vpop.permute.xlu1 %7236  ;;  %7621 = vbcast.lane.b32.xlu0 %v7619_v62, 256  ;;  %v17931_v62 = vld [vmem:[#allocation106_spill] sm:$0xff] }
 0x599   : > { %17926 = vst [vmem:[#allocation48_spill] sm:$0xff] %v15234_v60 }
 0x59a   : > { %7642 = vbcast.lane.b32.xlu1 %v7640_v25, 256  ;;  %v15238_v37 = vpop.permute.xlu0 %7229  ;;  %v7688_v25 = vsel %vm7686_vm8, %v17931_v62, %v17930_v59  ;;  %v17935_v62 = vld [vmem:[#allocation210_spill] sm:$0xff] }
 0x59b   : > { %17928 = vst [vmem:[#allocation195_spill] sm:$0xff] %v15238_v37  ;;  %v7690_v37 = vsel %vm7686_vm8, %v17933_v12, %v17932_v28  ;;  %v7687_v28 = vsel %vm7686_vm8, %v17936_v50, %v17935_v62  ;;  %v17937_v12 = vld [vmem:[#allocation205_spill] sm:$0xff]  ;;  %v7682_v50 = vrot.slane %v14987_v1, %v14170_v46 }
 0x59c   : > { %v7251_v2 = vpop.permute.xlu1 %7250  ;;  %7635 = vbcast.lane.b32.xlu0 %v7633_v9, 256  ;;  %v7753_v9 = vsel %vm7751_vm9, %v7688_v25, %v17934_v45  ;;  %v7689_v15 = vsel %vm7686_vm8, %v17938_v0, %v17937_v12  ;;  %v7948_v45 = vunpack.c.l.s4 %v10133_v48  ;;  %v17941_v12 = vld [vmem:[#allocation273_spill] sm:$0xff] }
 0x59d   : > { %v7818_v3 = vsel %vm7816_vm10, %v7753_v9, %v7251_v2 }
 0x59e   : > { %7656 = vbcast.lane.b32.xlu1 %v7654_v29, 256  ;;  %v7244_v60 = vpop.permute.xlu0 %7243  ;;  %v7755_v29 = vsel %vm7751_vm9, %v7690_v37, %v14989_v61  ;;  %v7661_v61 = vrot.slane %v14980_v19, %v14170_v46  ;;  %v17939_v37 = vld [vmem:[#allocation112_spill] sm:$0xff]  ;;  %v7675_v19 = vrot.slane %v14996_v30, %v14170_v46  ;;  %v7949_v62 = vunpack.c.0.s8 %v7948_v45  ;;  %v17945_v30 = vld [vmem:[#allocation279_spill] sm:$0xff] }
 0x59f   : > { %v7752_v2 = vsel %vm7751_vm9, %v7687_v28, %v17939_v37  ;;  %v17940_v28 = vld [vmem:[#allocation14_spill] sm:$0xff]  ;;  %v17943_v37 = vld [vmem:[#allocation220_spill] sm:$0xff]  ;;  %v17946_v45 = vld [vmem:[#allocation107_spill] sm:$0xff] }
 0x5a0   : > { %v7265_v21 = vpop.permute.xlu1 %7264  ;;  %7649 = vbcast.lane.b32.xlu0 %v7647_v7, 256  ;;  %v7817_v0 = vsel %vm7816_vm10, %v7752_v2, %v7244_v60  ;;  %v17944_v2 = vld [vmem:[#allocation135_spill] sm:$0xff] }
 0x5a1   : > { %v7820_v59 = vsel %vm7816_vm10, %v7755_v29, %v7265_v21  ;;  %v7754_v21 = vsel %vm7751_vm9, %v7689_v15, %v14998_v43  ;;  %v17942_v15 = vld [vmem:[#allocation182_spill] sm:$0xff]  ;;  %v7691_v46 = vsel %vm7686_vm8, %v17944_v2, %v17943_v37 }
 0x5a2   : > { %v7898_v10 = vcombine.high %v7818_v3, %v7820_v59  ;;  %7670 = vbcast.lane.b32.xlu1 %v7668_v23, 256  ;;  %v7897_v7 = vcombine.low %v7818_v3, %v7820_v59  ;;  %v7258_v25 = vpop.permute.xlu0 %7257 }
 0x5a3   : > { %v7819_v9 = vsel %vm7816_vm10, %v7754_v21, %v7258_v25  ;;  %v7694_v21 = vsel %vm7686_vm8, %v17946_v45, %v17945_v30  ;;  %v7756_v30 = vsel %vm7751_vm9, %v7691_v46, %v15006_v20  ;;  %v17952_v20 = vld [vmem:[#allocation229_spill] sm:$0xff]  ;;  %v17953_v46 = vld [vmem:[#allocation42_spill] sm:$0xff] }
 0x5a4   : > { %v7279_v48 = vpop.permute.xlu1 %7278  ;;  %v7881_v23 = vcombine.low %v7817_v0, %v7819_v9  ;;  %v7882_v29 = vcombine.high %v7817_v0, %v7819_v9  ;;  %7663 = vbcast.lane.b32.xlu0 %v7661_v61, 256  ;;  %v7905_v43 = vrot.slane %v7897_v7, %v17940_v28  ;;  %v15278_v3 = vrot.slane %v7898_v10, %v17940_v28  ;;  %v17947_v10 = vld [vmem:[#allocation216_spill] sm:$0xff]  ;;  %v17948_v7 = vld [vmem:[#allocation173_spill] sm:$0xff] }
 0x5a5   : > { %v7692_v61 = vsel %vm7686_vm8, %v17942_v15, %v17941_v12  ;;  %v7693_v25 = vsel %vm7686_vm8, %v17948_v7, %v17947_v10  ;;  %v7759_v0 = vsel %vm7751_vm9, %v7694_v21, %v15008_v8  ;;  %v17949_v12 = vld [vmem:[#allocation280_spill] sm:$0xff]  ;;  %v17951_v21 = vld [vmem:[#allocation13_spill] sm:$0xff] }
 0x5a6   : > { %7684 = vbcast.lane.b32.xlu1 %v7682_v50, 256  ;;  %v7889_v1 = vrot.slane %v7881_v23, %v17940_v28  ;;  %v15282_v60 = vrot.slane %v7882_v29, %v17940_v28  ;;  %v7272_v59 = vpop.permute.xlu0 %7271  ;;  %v17950_v15 = vld [vmem:[#allocation160_spill] sm:$0xff]  ;;  %v7757_v2 = vsel %vm7751_vm9, %v7692_v61, %v15002_v16  ;;  %v7758_v45 = vsel %vm7751_vm9, %v7693_v25, %v15012_v32  ;;  %v17955_v32 = vld [vmem:[#allocation190_spill] sm:$0xff] }
 0x5a7   : > { %v7696_v37 = vsel %vm7686_vm8, %v17950_v15, %v17949_v12  ;;  %v15313_v10 = vsub.s32 %v7949_v62, %v17951_v21 }
 0x5a8   : > { %v7293_v50 = vpop.permute.xlu1 %7292  ;;  %v7946_v9 = vcombine.high %v7889_v1, %v7905_v43  ;;  %v7961_v23 = vcombine.low %v15282_v60, %v15278_v3  ;;  %v7962_v29 = vcombine.high %v15282_v60, %v15278_v3  ;;  %7677 = vbcast.lane.b32.xlu0 %v7675_v19, 256  ;;  %v7822_v19 = vsel %vm7816_vm10, %v7757_v2, %v7279_v48  ;;  %v17956_v48 = vld [vmem:[#allocation225_spill] sm:$0xff] }
 0x5a9   : > { %v7824_v8 = vsel %vm7816_vm10, %v7759_v0, %v7293_v50  ;;  %v7821_v3 = vsel %vm7816_vm10, %v7756_v30, %v7272_v59  ;;  %v7945_v7 = vcombine.low %v7889_v1, %v7905_v43  ;;  %v7695_v50 = vsel %vm7686_vm8, %v17953_v46, %v17952_v20  ;;  %v17954_v0 = vld [vmem:[#allocation283_spill] sm:$0xff]  ;;  %v17957_v2 = vld [vmem:[#allocation153_spill] sm:$0xff]  ;;  %v17958_v43 = vld [vmem:[#allocation282_spill] sm:$0xff] }
 0x5aa   : > { %v7286_v60 = vpop.permute.xlu0 %7285  ;;  %v7929_v12 = vcombine.low %v7822_v19, %v7824_v8  ;;  %v7930_v15 = vcombine.high %v7822_v19, %v7824_v8  ;;  %v7698_v62 = vsel %vm7686_vm8, %v17955_v32, %v17954_v0  ;;  %v7697_v59 = vsel %vm7686_vm8, %v17957_v2, %v17956_v48  ;;  %v17959_v1 = vld [vmem:[#allocation29_spill] sm:$0xff]  ;;  %v17960_v8 = vld [vmem:[#allocation218_spill] sm:$0xff] }
 0x5ab   : > { %v7823_v16 = vsel %vm7816_vm10, %v7758_v45, %v7286_v60  ;;  %v7700_v30 = vsel %vm7686_vm8, %v17959_v1, %v17958_v43  ;;  %v17961_v45 = vld [vmem:[#allocation194_spill] sm:$0xff]  ;;  %v7761_v60 = vsel %vm7751_vm9, %v7696_v37, %v15016_v56  ;;  %v7760_v32 = vsel %vm7751_vm9, %v7695_v50, %v15020_v49 }
 0x5ac   : > { %v7307_v61 = vpop.permute.xlu1 %7306  ;;  %v7913_v25 = vcombine.low %v7821_v3, %v7823_v16  ;;  %v7914_v21 = vcombine.high %v7821_v3, %v7823_v16  ;;  %v7699_v19 = vsel %vm7686_vm8, %v17961_v45, %v17960_v8  ;;  %v7937_v20 = vrot.slane %v7929_v12, %v17940_v28 }
 0x5ad   : > { %v7944_v46 = vrot.slane %v7930_v15, %v17940_v28  ;;  %v7763_v48 = vsel %vm7751_vm9, %v7698_v62, %v15024_v17  ;;  %v7762_v2 = vsel %vm7751_vm9, %v7697_v59, %v15028_v18  ;;  %v15346_v56 = vrot.slane %v7945_v7, %v15313_v10 }
 0x5ae   : > { %v7921_v3 = vrot.slane %v7913_v25, %v17940_v28  ;;  %v7928_v16 = vrot.slane %v7914_v21, %v17940_v28  ;;  %v7300_v0 = vpop.permute.xlu0 %7299  ;;  %v15349_v21 = vrot.slane %v7946_v9, %v15313_v10  ;;  %v15352_v1 = vrot.slane %v7961_v23, %v15313_v10 }
 0x5af   : > { %v7826_v49 = vsel %vm7816_vm10, %v7761_v60, %v7307_v61  ;;  %v7825_v62 = vsel %vm7816_vm10, %v7760_v32, %v7300_v0  ;;  %v15371_v60 = vrot.slane %v7962_v29, %v15313_v10  ;;  %v17972_v32 = vld [vmem:[#allocation49_spill] sm:$0xff] }
 0x5b0   : > { %v7321_v37 = vpop.permute.xlu1 %7320  ;;  %v7977_v12 = vcombine.low %v7921_v3, %v7937_v20  ;;  %v7978_v15 = vcombine.high %v7921_v3, %v7937_v20  ;;  %v7993_v43 = vcombine.low %v7928_v16, %v7944_v46  ;;  %v7994_v25 = vcombine.high %v7928_v16, %v7944_v46 }
 0x5b1   : > { %v7828_v17 = vsel %vm7816_vm10, %v7763_v48, %v7321_v37  ;;  %17963 = vst [vmem:[#allocation294_spill] sm:$0xff] %v15371_v60  ;;  %v18082_v60 = vld [vmem:[#allocation177_spill] sm:$0xff] }
 0x5b2   : > { %v15357_v18 = vrot.slane %v7977_v12, %v15313_v10  ;;  %v15360_v7 = vrot.slane %v7978_v15, %v15313_v10  ;;  %v15363_v50 = vrot.slane %v7993_v43, %v15313_v10  ;;  %v7314_v9 = vpop.permute.xlu0 %7313  ;;  %v15367_v59 = vrot.slane %v7994_v25, %v15313_v10  ;;  %v17964_v43 = vld [vmem:[#allocation277_spill] sm:$0xff]  ;;  %v17965_v25 = vld [vmem:[#allocation170_spill] sm:$0xff] }
 0x5b3   : > { %v8033_v23 = vcombine.low %v7826_v49, %v7828_v17  ;;  %v8034_v8 = vcombine.high %v7826_v49, %v7828_v17  ;;  %v7827_v61 = vsel %vm7816_vm10, %v7762_v2, %v7314_v9  ;;  %v7702_v49 = vsel %vm7686_vm8, %v17965_v25, %v17964_v43  ;;  %v17967_v43 = vld [vmem:[#allocation53_spill] sm:$0xff] }
 0x5b4   : > { %17962 = vst [vmem:[#allocation293_spill] sm:$0xff] %v15367_v59  ;;  %v7335_v45 = vpop.permute.xlu1 %7334  ;;  %v8017_v20 = vcombine.low %v7825_v62, %v7827_v61  ;;  %v8018_v46 = vcombine.high %v7825_v62, %v7827_v61  ;;  %v8010_v3 = vcombine.high %v15346_v56, %v15357_v18  ;;  %v7765_v9 = vsel %vm7751_vm9, %v7700_v30, %v15032_v47  ;;  %v18081_v59 = vld [vmem:[#allocation158_spill] sm:$0xff] }
 0x5b5   : > { %v8041_v16 = vrot.slane %v8033_v23, %v17940_v28  ;;  %v15377_v0 = vrot.slane %v8034_v8, %v17940_v28  ;;  %v7767_v8 = vsel %vm7751_vm9, %v7702_v49, %v15040_v35  ;;  %v7764_v23 = vsel %vm7751_vm9, %v7699_v19, %v15036_v13  ;;  %v17968_v35 = vld [vmem:[#allocation147_spill] sm:$0xff] }
 0x5b6   : > { %v8025_v2 = vrot.slane %v8017_v20, %v17940_v28  ;;  %v15385_v29 = vrot.slane %v8018_v46, %v17940_v28  ;;  %v7328_v37 = vpop.permute.xlu0 %7327  ;;  %8977 = vrot.lane.b32.xlu0 %v8010_v3, %s10134_s14  ;;  %v17966_v3 = vld [vmem:[#allocation211_spill] sm:$0xff] }
 0x5b7   : > { %v7701_v25 = vsel %vm7686_vm8, %v17967_v43, %v17966_v3  ;;  %v17969_v49 = vld [vmem:[#allocation199_spill] sm:$0xff] }
 0x5b8   : > { %v7349_v17 = vpop.permute.xlu1 %7348  ;;  %v8082_v61 = vcombine.high %v8025_v2, %v8041_v16  ;;  %v8097_v20 = vcombine.low %v15385_v29, %v15377_v0  ;;  %v8098_v46 = vcombine.high %v15385_v29, %v15377_v0  ;;  %v7704_v15 = vsel %vm7686_vm8, %v17969_v49, %v17968_v35  ;;  %v17970_v19 = vld [vmem:[#allocation51_spill] sm:$0xff]  ;;  %v17973_v35 = vld [vmem:[#allocation36_spill] sm:$0xff] }
 0x5b9   : > { %v7832_v62 = vsel %vm7816_vm10, %v7767_v8, %v7349_v17  ;;  %v7766_v12 = vsel %vm7751_vm9, %v7701_v25, %v15044_v52  ;;  %v7830_v0 = vsel %vm7816_vm10, %v7765_v9, %v7335_v45  ;;  %v7829_v29 = vsel %vm7816_vm10, %v7764_v23, %v7328_v37  ;;  %v17971_v17 = vld [vmem:[#allocation178_spill] sm:$0xff]  ;;  %v17974_v45 = vld [vmem:[#allocation55_spill] sm:$0xff]  ;;  %v17979_v23 = vld [vmem:[#allocation213_spill] sm:$0xff] }
 0x5ba   : > { %v7342_v3 = vpop.permute.xlu0 %7341  ;;  %v8081_v43 = vcombine.low %v8025_v2, %v8041_v16  ;;  %v8065_v48 = vcombine.low %v7830_v0, %v7832_v62  ;;  %v8066_v47 = vcombine.high %v7830_v0, %v7832_v62  ;;  %v7703_v8 = vsel %vm7686_vm8, %v17971_v17, %v17970_v19  ;;  %v17975_v9 = vld [vmem:[#allocation198_spill] sm:$0xff]  ;;  %v17976_v16 = vld [vmem:[#allocation40_spill] sm:$0xff] }
 0x5bb   : > { %v7831_v30 = vsel %vm7816_vm10, %v7766_v12, %v7342_v3  ;;  %v7706_v49 = vsel %vm7686_vm8, %v17973_v35, %v17972_v32  ;;  %v7705_v37 = vsel %vm7686_vm8, %v17975_v9, %v17974_v45  ;;  %v17977_v2 = vld [vmem:[#allocation148_spill] sm:$0xff]  ;;  %v17978_v12 = vld [vmem:[#allocation26_spill] sm:$0xff]  ;;  %v7769_v3 = vsel %vm7751_vm9, %v7704_v15, %v15048_v36 }
 0x5bc   : > { %v7363_v13 = vpop.permute.xlu1 %7362  ;;  %v8049_v52 = vcombine.low %v7829_v29, %v7831_v30  ;;  %v8050_v25 = vcombine.high %v7829_v29, %v7831_v30  ;;  %v7708_v62 = vsel %vm7686_vm8, %v17977_v2, %v17976_v16  ;;  %v7707_v0 = vsel %vm7686_vm8, %v17979_v23, %v17978_v12 }
 0x5bd   : > { %v8073_v19 = vrot.slane %v8065_v48, %v17940_v28  ;;  %v8080_v32 = vrot.slane %v8066_v47, %v17940_v28  ;;  %v7768_v35 = vsel %vm7751_vm9, %v7703_v8, %v15052_v40  ;;  %v7771_v45 = vsel %vm7751_vm9, %v7706_v49, %v15056_v58 }
 0x5be   : > { %v8057_v29 = vrot.slane %v8049_v52, %v17940_v28  ;;  %v8064_v30 = vrot.slane %v8050_v25, %v17940_v28  ;;  %v7356_v17 = vpop.permute.xlu0 %7355  ;;  %v7770_v9 = vsel %vm7751_vm9, %v7705_v37, %v15060_v51  ;;  %v15451_v36 = vrot.slane %v8081_v43, %v15313_v10 }
 0x5bf   : > { %v15454_v25 = vrot.slane %v8082_v61, %v15313_v10  ;;  %v15457_v2 = vrot.slane %v8097_v20, %v15313_v10  ;;  %v7834_v40 = vsel %vm7816_vm10, %v7769_v3, %v7363_v13  ;;  %v7833_v49 = vsel %vm7816_vm10, %v7768_v35, %v7356_v17  ;;  %v18008_v35 = vld [vmem:[#allocation27_spill] sm:$0xff] }
 0x5c0   : > { %v7377_v48 = vpop.permute.xlu1 %7376  ;;  %v8113_v15 = vcombine.low %v8057_v29, %v8073_v19  ;;  %v8114_v47 = vcombine.high %v8057_v29, %v8073_v19  ;;  %v8129_v16 = vcombine.low %v8064_v30, %v8080_v32  ;;  %v8130_v52 = vcombine.high %v8064_v30, %v8080_v32 }
 0x5c1   : > { %17980 = vst [vmem:[#allocation72_spill] sm:$0xff] %v15457_v2  ;;  %v7836_v58 = vsel %vm7816_vm10, %v7771_v45, %v7377_v48  ;;  %v15476_v3 = vrot.slane %v8098_v46, %v15313_v10  ;;  %v18098_v2 = vld [vmem:[#allocation118_spill] sm:$0xff] }
 0x5c2   : > { %v15462_v51 = vrot.slane %v8113_v15, %v15313_v10  ;;  %v15465_v43 = vrot.slane %v8114_v47, %v15313_v10  ;;  %v15468_v8 = vrot.slane %v8129_v16, %v15313_v10  ;;  %v7370_v61 = vpop.permute.xlu0 %7369  ;;  %v15472_v37 = vrot.slane %v8130_v52, %v15313_v10  ;;  %v17984_v16 = vld [vmem:[#allocation71_spill] sm:$0xff]  ;;  %v17985_v52 = vld [vmem:[#allocation189_spill] sm:$0xff] }
 0x5c3   : > { %v8169_v20 = vcombine.low %v7834_v40, %v7836_v58  ;;  %v8170_v12 = vcombine.high %v7834_v40, %v7836_v58  ;;  %v7835_v13 = vsel %vm7816_vm10, %v7770_v9, %v7370_v61  ;;  %17983 = vst [vmem:[#allocation232_spill] sm:$0xff] %v15476_v3  ;;  %v7710_v40 = vsel %vm7686_vm8, %v17985_v52, %v17984_v16  ;;  %v17987_v16 = vld [vmem:[#allocation59_spill] sm:$0xff]  ;;  %v18054_v3 = vld [vmem:[#allocation188_spill] sm:$0xff] }
 0x5c4   : > { %17981 = vst [vmem:[#allocation219_spill] sm:$0xff] %v15468_v8  ;;  %17982 = vst [vmem:[#allocation103_spill] sm:$0xff] %v15472_v37  ;;  %v7391_v23 = vpop.permute.xlu1 %7390  ;;  %v8153_v19 = vcombine.low %v7833_v49, %v7835_v13  ;;  %v8154_v32 = vcombine.high %v7833_v49, %v7835_v13  ;;  %v8146_v29 = vcombine.high %v15451_v36, %v15462_v51  ;;  %v18097_v8 = vld [vmem:[#allocation100_spill] sm:$0xff] }
 0x5c5   : > { %v8177_v30 = vrot.slane %v8169_v20, %v17940_v28  ;;  %v15482_v17 = vrot.slane %v8170_v12, %v17940_v28  ;;  %v7775_v12 = vsel %vm7751_vm9, %v7710_v40, %v15072_v5  ;;  %v7773_v61 = vsel %vm7751_vm9, %v7708_v62, %v15064_v14  ;;  %v17988_v14 = vld [vmem:[#allocation43_spill] sm:$0xff]  ;;  %v17989_v62 = vld [vmem:[#allocation206_spill] sm:$0xff] }
 0x5c6   : > { %v8161_v9 = vrot.slane %v8153_v19, %v17940_v28  ;;  %v15490_v46 = vrot.slane %v8154_v32, %v17940_v28  ;;  %v7384_v48 = vpop.permute.xlu0 %7383  ;;  %8979 = vrot.lane.b32.xlu1 %v8146_v29, %s10134_s14  ;;  %v17986_v29 = vld [vmem:[#allocation23_spill] sm:$0xff]  ;;  %v7772_v20 = vsel %vm7751_vm9, %v7707_v0, %v15068_v22  ;;  %v7838_v40 = vsel %vm7816_vm10, %v7773_v61, %v7391_v23  ;;  %v17992_v23 = vld [vmem:[#allocation46_spill] sm:$0xff] }
 0x5c7   : > { %v7709_v52 = vsel %vm7686_vm8, %v17987_v16, %v17986_v29  ;;  %v7837_v47 = vsel %vm7816_vm10, %v7772_v20, %v7384_v48  ;;  %v7712_v22 = vsel %vm7686_vm8, %v17989_v62, %v17988_v14  ;;  %v17990_v0 = vld [vmem:[#allocation31_spill] sm:$0xff]  ;;  %v17993_v61 = vld [vmem:[#allocation222_spill] sm:$0xff]  ;;  %v17996_v20 = vld [vmem:[#allocation61_spill] sm:$0xff] }
 0x5c8   : > { %v7405_v58 = vpop.permute.xlu1 %7404  ;;  %v8218_v13 = vcombine.high %v8161_v9, %v8177_v30  ;;  %v8233_v19 = vcombine.low %v15490_v46, %v15482_v17  ;;  %v8234_v32 = vcombine.high %v15490_v46, %v15482_v17  ;;  %v7774_v5 = vsel %vm7751_vm9, %v7709_v52, %v15076_v31 }
 0x5c9   : > { %v7840_v49 = vsel %vm7816_vm10, %v7775_v12, %v7405_v58  ;;  %v8217_v46 = vcombine.low %v8161_v9, %v8177_v30  ;;  %v17991_v58 = vld [vmem:[#allocation221_spill] sm:$0xff]  ;;  %v7714_v48 = vsel %vm7686_vm8, %v17993_v61, %v17992_v23  ;;  %v17994_v30 = vld [vmem:[#allocation32_spill] sm:$0xff] }
 0x5ca   : > { %v7398_v17 = vpop.permute.xlu0 %7397  ;;  %v8201_v15 = vcombine.low %v7838_v40, %v7840_v49  ;;  %v8202_v45 = vcombine.high %v7838_v40, %v7840_v49  ;;  %v7711_v12 = vsel %vm7686_vm8, %v17991_v58, %v17990_v0  ;;  %v17995_v9 = vld [vmem:[#allocation228_spill] sm:$0xff]  ;;  %v7779_v23 = vsel %vm7751_vm9, %v7714_v48, %v15090_v53 }
 0x5cb   : > { %v7839_v29 = vsel %vm7816_vm10, %v7774_v5, %v7398_v17  ;;  %v7713_v49 = vsel %vm7686_vm8, %v17995_v9, %v17994_v30  ;;  %v17997_v5 = vld [vmem:[#allocation226_spill] sm:$0xff]  ;;  %v7777_v17 = vsel %vm7751_vm9, %v7712_v22, %v15082_v6  ;;  %v7776_v58 = vsel %vm7751_vm9, %v7711_v12, %v15086_v55 }
 0x5cc   : > { %v7419_v16 = vpop.permute.xlu1 %7418  ;;  %v8185_v31 = vcombine.low %v7837_v47, %v7839_v29  ;;  %v8186_v52 = vcombine.high %v7837_v47, %v7839_v29  ;;  %v7716_v40 = vsel %vm7686_vm8, %v17997_v5, %v17996_v20  ;;  %v8209_v14 = vrot.slane %v8201_v15, %v17940_v28 }
 0x5cd   : > { %v8216_v62 = vrot.slane %v8202_v45, %v17940_v28  ;;  %v7778_v61 = vsel %vm7751_vm9, %v7713_v49, %v15094_v34  ;;  %v15553_v6 = vrot.slane %v8217_v46, %v15313_v10  ;;  %v15559_v9 = vrot.slane %v8233_v19, %v15313_v10 }
 0x5ce   : > { %v8193_v47 = vrot.slane %v8185_v31, %v17940_v28  ;;  %v8200_v29 = vrot.slane %v8186_v52, %v17940_v28  ;;  %v7412_v0 = vpop.permute.xlu0 %7411  ;;  %v15556_v52 = vrot.slane %v8218_v13, %v15313_v10  ;;  %v7842_v55 = vsel %vm7816_vm10, %v7777_v17, %v7419_v16 }
 0x5cf   : > { %17998 = vst [vmem:[#allocation295_spill] sm:$0xff] %v15553_v6  ;;  %v7841_v48 = vsel %vm7816_vm10, %v7776_v58, %v7412_v0  ;;  %v15578_v17 = vrot.slane %v8234_v32, %v15313_v10  ;;  %v18046_v58 = vld [vmem:[#allocation67_spill] sm:$0xff] }
 0x5d0   : > { %v7433_v15 = vpop.permute.xlu1 %7432  ;;  %v8249_v22 = vcombine.low %v8193_v47, %v8209_v14  ;;  %v8250_v45 = vcombine.high %v8193_v47, %v8209_v14  ;;  %v8265_v30 = vcombine.low %v8200_v29, %v8216_v62  ;;  %v8266_v31 = vcombine.high %v8200_v29, %v8216_v62 }
 0x5d1   : > { %v7844_v53 = vsel %vm7816_vm10, %v7779_v23, %v7433_v15  ;;  %18001 = vst [vmem:[#allocation230_spill] sm:$0xff] %v15578_v17 }
 0x5d2   : > { %v15564_v34 = vrot.slane %v8249_v22, %v15313_v10  ;;  %v15567_v46 = vrot.slane %v8250_v45, %v15313_v10  ;;  %v15570_v12 = vrot.slane %v8265_v30, %v15313_v10  ;;  %v7426_v13 = vpop.permute.xlu0 %7425  ;;  %v15574_v49 = vrot.slane %v8266_v31, %v15313_v10  ;;  %v18002_v30 = vld [vmem:[#allocation58_spill] sm:$0xff]  ;;  %v18003_v31 = vld [vmem:[#allocation215_spill] sm:$0xff]  ;;  %v18007_v45 = vld [vmem:[#allocation16_spill] sm:$0xff] }
 0x5d3   : > { %v8305_v19 = vcombine.low %v7842_v55, %v7844_v53  ;;  %v8306_v20 = vcombine.high %v7842_v55, %v7844_v53  ;;  %v7843_v16 = vsel %vm7816_vm10, %v7778_v61, %v7426_v13  ;;  %v7718_v55 = vsel %vm7686_vm8, %v18003_v31, %v18002_v30  ;;  %v18005_v30 = vld [vmem:[#allocation217_spill] sm:$0xff] }
 0x5d4   : > { %17999 = vst [vmem:[#allocation200_spill] sm:$0xff] %v15564_v34  ;;  %18000 = vst [vmem:[#allocation96_spill] sm:$0xff] %v15574_v49  ;;  %v7447_v5 = vpop.permute.xlu1 %7446  ;;  %v8289_v14 = vcombine.low %v7841_v48, %v7843_v16  ;;  %v8290_v62 = vcombine.high %v7841_v48, %v7843_v16  ;;  %v8282_v47 = vcombine.high %v15553_v6, %v15564_v34  ;;  %v18006_v48 = vld [vmem:[#allocation45_spill] sm:$0xff] }
 0x5d5   : > { %v8313_v29 = vrot.slane %v8305_v19, %v17940_v28  ;;  %v15584_v0 = vrot.slane %v8306_v20, %v17940_v28  ;;  %v7783_v20 = vsel %vm7751_vm9, %v7718_v55, %v15106_v54  ;;  %v7717_v13 = vsel %vm7686_vm8, %v18007_v45, %v18006_v48 }
 0x5d6   : > { %v8297_v61 = vrot.slane %v8289_v14, %v17940_v28  ;;  %v15592_v32 = vrot.slane %v8290_v62, %v17940_v28  ;;  %v7440_v15 = vpop.permute.xlu0 %7439  ;;  %8981 = vrot.lane.b32.xlu0 %v8282_v47, %s10134_s14  ;;  %v18004_v47 = vld [vmem:[#allocation19_spill] sm:$0xff]  ;;  %v7781_v19 = vsel %vm7751_vm9, %v7716_v40, %v15098_v57  ;;  %v7782_v22 = vsel %vm7751_vm9, %v7717_v13, %v15110_v42  ;;  %v18012_v13 = vld [vmem:[#allocation93_spill] sm:$0xff] }
 0x5d7   : > { %v7715_v31 = vsel %vm7686_vm8, %v18005_v30, %v18004_v47  ;;  %v18009_v57 = vld [vmem:[#allocation243_spill] sm:$0xff] }
 0x5d8   : > { %v7461_v53 = vpop.permute.xlu1 %7460  ;;  %v8354_v16 = vcombine.high %v8297_v61, %v8313_v29  ;;  %v8369_v14 = vcombine.low %v15592_v32, %v15584_v0  ;;  %v8370_v62 = vcombine.high %v15592_v32, %v15584_v0  ;;  %v7780_v55 = vsel %vm7751_vm9, %v7715_v31, %v15102_v44  ;;  %v18010_v44 = vld [vmem:[#allocation134_spill] sm:$0xff] }
 0x5d9   : > { %v7848_v54 = vsel %vm7816_vm10, %v7783_v20, %v7461_v53  ;;  %v7846_v0 = vsel %vm7816_vm10, %v7781_v19, %v7447_v5  ;;  %v7845_v47 = vsel %vm7816_vm10, %v7780_v55, %v7440_v15  ;;  %v7720_v40 = vsel %vm7686_vm8, %v18009_v57, %v18008_v35  ;;  %v18011_v31 = vld [vmem:[#allocation242_spill] sm:$0xff]  ;;  %v18015_v55 = vld [vmem:[#allocation140_spill] sm:$0xff] }
 0x5da   : > { %v7454_v32 = vpop.permute.xlu0 %7453  ;;  %v8337_v30 = vcombine.low %v7846_v0, %v7848_v54  ;;  %v8338_v23 = vcombine.high %v7846_v0, %v7848_v54  ;;  %v7719_v42 = vsel %vm7686_vm8, %v18011_v31, %v18010_v44  ;;  %v18013_v5 = vld [vmem:[#allocation154_spill] sm:$0xff]  ;;  %v18017_v44 = vld [vmem:[#allocation253_spill] sm:$0xff] }
 0x5db   : > { %v7847_v45 = vsel %vm7816_vm10, %v7782_v22, %v7454_v32  ;;  %v7722_v19 = vsel %vm7686_vm8, %v18013_v5, %v18012_v13  ;;  %v18014_v15 = vld [vmem:[#allocation78_spill] sm:$0xff]  ;;  %v8353_v22 = vcombine.low %v8297_v61, %v8313_v29  ;;  %v7785_v13 = vsel %vm7751_vm9, %v7720_v40, %v15114_v24 }
 0x5dc   : > { %v7475_v48 = vpop.permute.xlu1 %7474  ;;  %v8321_v53 = vcombine.low %v7845_v47, %v7847_v45  ;;  %v8322_v20 = vcombine.high %v7845_v47, %v7847_v45  ;;  %v7721_v54 = vsel %vm7686_vm8, %v18015_v55, %v18014_v15  ;;  %v8345_v0 = vrot.slane %v8337_v30, %v17940_v28  ;;  %v18016_v57 = vld [vmem:[#allocation90_spill] sm:$0xff] }
 0x5dd   : > { %v8352_v32 = vrot.slane %v8338_v23, %v17940_v28  ;;  %v7724_v31 = vsel %vm7686_vm8, %v18017_v44, %v18016_v57  ;;  %v7784_v5 = vsel %vm7751_vm9, %v7719_v42, %v15118_v38  ;;  %v7787_v29 = vsel %vm7751_vm9, %v7722_v19, %v15122_v63 }
 0x5de   : > { %v8329_v35 = vrot.slane %v8321_v53, %v17940_v28  ;;  %v8336_v47 = vrot.slane %v8322_v20, %v17940_v28  ;;  %v7468_v45 = vpop.permute.xlu0 %7467  ;;  %v7786_v20 = vsel %vm7751_vm9, %v7721_v54, %v15126_v26  ;;  %v15658_v55 = vrot.slane %v8353_v22, %v15313_v10 }
 0x5df   : > { %v15661_v57 = vrot.slane %v8354_v16, %v15313_v10  ;;  %v7850_v42 = vsel %vm7816_vm10, %v7785_v13, %v7475_v48  ;;  %v7849_v16 = vsel %vm7816_vm10, %v7784_v5, %v7468_v45 }
 0x5e0   : > { %v7489_v61 = vpop.permute.xlu1 %7488  ;;  %v8385_v23 = vcombine.low %v8329_v35, %v8345_v0  ;;  %v8386_v30 = vcombine.high %v8329_v35, %v8345_v0  ;;  %v8401_v53 = vcombine.low %v8336_v47, %v8352_v32  ;;  %v8402_v15 = vcombine.high %v8336_v47, %v8352_v32  ;;  %18018 = vst [vmem:[#allocation115_spill] sm:$0xff] %v15658_v55 }
 0x5e1   : > { %v7852_v24 = vsel %vm7816_vm10, %v7787_v29, %v7489_v61  ;;  %v15680_v32 = vrot.slane %v8369_v14, %v15313_v10  ;;  %v15683_v35 = vrot.slane %v8370_v62, %v15313_v10 }
 0x5e2   : > { %v15665_v38 = vrot.slane %v8385_v23, %v15313_v10  ;;  %v15668_v63 = vrot.slane %v8386_v30, %v15313_v10  ;;  %v15671_v40 = vrot.slane %v8401_v53, %v15313_v10  ;;  %v7482_v26 = vpop.permute.xlu0 %7481  ;;  %v15675_v19 = vrot.slane %v8402_v15, %v15313_v10  ;;  %v18024_v30 = vld [vmem:[#allocation77_spill] sm:$0xff]  ;;  %v18025_v53 = vld [vmem:[#allocation255_spill] sm:$0xff] }
 0x5e3   : > { %v8442_v54 = vcombine.high %v7850_v42, %v7852_v24  ;;  %v7851_v22 = vsel %vm7816_vm10, %v7786_v20, %v7482_v26  ;;  %18022 = vst [vmem:[#allocation102_spill] sm:$0xff] %v15680_v32  ;;  %18023 = vst [vmem:[#allocation238_spill] sm:$0xff] %v15683_v35  ;;  %v8441_v44 = vcombine.low %v7850_v42, %v7852_v24  ;;  %v18029_v24 = vld [vmem:[#allocation98_spill] sm:$0xff] }
 0x5e4   : > { %18019 = vst [vmem:[#allocation240_spill] sm:$0xff] %v15665_v38  ;;  %18020 = vst [vmem:[#allocation296_spill] sm:$0xff] %v15671_v40  ;;  %v7503_v0 = vpop.permute.xlu1 %7502  ;;  %v8426_v47 = vcombine.high %v7849_v16, %v7851_v22  ;;  %v8418_v48 = vcombine.high %v15658_v55, %v15665_v38  ;;  %v8425_v13 = vcombine.low %v7849_v16, %v7851_v22  ;;  %v18026_v16 = vld [vmem:[#allocation76_spill] sm:$0xff] }
 0x5e5   : > { %18021 = vst [vmem:[#allocation297_spill] sm:$0xff] %v15675_v19  ;;  %v15692_v5 = vrot.slane %v8442_v54, %v17940_v28  ;;  %v7726_v15 = vsel %vm7686_vm8, %v18025_v53, %v18024_v30  ;;  %v18027_v54 = vld [vmem:[#allocation151_spill] sm:$0xff]  ;;  %v18028_v53 = vld [vmem:[#allocation64_spill] sm:$0xff]  ;;  %v7789_v26 = vsel %vm7751_vm9, %v7724_v31, %v15130_v11 }
 0x5e6   : > { %v15695_v14 = vrot.slane %v8426_v47, %v17940_v28  ;;  %v7496_v62 = vpop.permute.xlu0 %7495  ;;  %8983 = vrot.lane.b32.xlu1 %v8418_v48, %s10134_s14  ;;  %v7723_v22 = vsel %vm7686_vm8, %v18027_v54, %v18026_v16  ;;  %v7791_v47 = vsel %vm7751_vm9, %v7726_v15, %v15138_v4  ;;  %v7725_v42 = vsel %vm7686_vm8, %v18029_v24, %v18028_v53  ;;  %v18092_v55 = vld [vmem:[#allocation192_spill] sm:$0xff] }
 0x5e7   : > { %v15726_v23 = vrot.slane %v8425_v13, %v17940_v28  ;;  %v7788_v4 = vsel %vm7751_vm9, %v7723_v22, %v15134_v27  ;;  %v7790_v15 = vsel %vm7751_vm9, %v7725_v42, %v15142_v39  ;;  %v18031_v22 = vld [vmem:[#allocation25_spill] sm:$0xff] }
 0x5e8   : > { %v7517_v20 = vpop.permute.xlu1 %7516  ;;  %v8505_v48 = vcombine.low %v15695_v14, %v15692_v5  ;;  %v8506_v30 = vcombine.high %v15695_v14, %v15692_v5  ;;  %v15734_v5 = vrot.slane %v8441_v44, %v17940_v28  ;;  %v7854_v14 = vsel %vm7816_vm10, %v7789_v26, %v7503_v0  ;;  %v18030_v26 = vld [vmem:[#allocation47_spill] sm:$0xff] }
 0x5e9   : > { %v7856_v16 = vsel %vm7816_vm10, %v7791_v47, %v7517_v20  ;;  %v7853_v54 = vsel %vm7816_vm10, %v7788_v4, %v7496_v62  ;;  %v18032_v4 = vld [vmem:[#allocation56_spill] sm:$0xff] }
 0x5ea   : > { %v7510_v24 = vpop.permute.xlu0 %7509  ;;  %v8473_v11 = vcombine.low %v7854_v14, %v7856_v16  ;;  %v8474_v31 = vcombine.high %v7854_v14, %v7856_v16  ;;  %v8489_v27 = vcombine.low %v15726_v23, %v15734_v5  ;;  %v7728_v16 = vsel %vm7686_vm8, %v18031_v22, %v18030_v26 }
 0x5eb   : > { %v7855_v13 = vsel %vm7816_vm10, %v7790_v15, %v7510_v24  ;;  %v18033_v15 = vld [vmem:[#allocation145_spill] sm:$0xff]  ;;  %v18034_v24 = vld [vmem:[#allocation50_spill] sm:$0xff] }
 0x5ec   : > { %v7531_v53 = vpop.permute.xlu1 %7530  ;;  %v8457_v20 = vcombine.low %v7853_v54, %v7855_v13  ;;  %v8458_v47 = vcombine.high %v7853_v54, %v7855_v13  ;;  %v15742_v39 = vrot.slane %v8473_v11, %v17940_v28  ;;  %v8488_v44 = vrot.slane %v8474_v31, %v17940_v28  ;;  %v18035_v54 = vld [vmem:[#allocation256_spill] sm:$0xff]  ;;  %v18036_v13 = vld [vmem:[#allocation75_spill] sm:$0xff]  ;;  %v18037_v31 = vld [vmem:[#allocation165_spill] sm:$0xff] }
 0x5ed   : > { %v7727_v14 = vsel %vm7686_vm8, %v18033_v15, %v18032_v4  ;;  %v7730_v11 = vsel %vm7686_vm8, %v18035_v54, %v18034_v24  ;;  %v7793_v4 = vsel %vm7751_vm9, %v7728_v16, %v15146_v33  ;;  %v18038_v15 = vld [vmem:[#allocation181_spill] sm:$0xff]  ;;  %v18039_v24 = vld [vmem:[#allocation156_spill] sm:$0xff] }
 0x5ee   : > { %v15746_v0 = vrot.slane %v8457_v20, %v17940_v28  ;;  %v8472_v62 = vrot.slane %v8458_v47, %v17940_v28  ;;  %v7524_v42 = vpop.permute.xlu0 %7523  ;;  %v7729_v20 = vsel %vm7686_vm8, %v18037_v31, %v18036_v13  ;;  %v7795_v47 = vsel %vm7751_vm9, %v7730_v11, %v15154_v41 }
 0x5ef   : > { %v7792_v29 = vsel %vm7751_vm9, %v7727_v14, %v18038_v15  ;;  %v7794_v54 = vsel %vm7751_vm9, %v7729_v20, %v18039_v24  ;;  %v15773_v31 = vrot.slane %v8489_v27, %v15313_v10  ;;  %v15788_v27 = vrot.slane %v8505_v48, %v15313_v10  ;;  %v18044_v15 = vld [vmem:[#allocation261_spill] sm:$0xff] }
 0x5f0   : > { %v7545_v61 = vpop.permute.xlu1 %7544  ;;  %v8521_v45 = vcombine.low %v15746_v0, %v15742_v39  ;;  %v8537_v26 = vcombine.low %v8472_v62, %v8488_v44  ;;  %v8538_v22 = vcombine.high %v8472_v62, %v8488_v44  ;;  %v7858_v44 = vsel %vm7816_vm10, %v7793_v4, %v7531_v53 }
 0x5f1   : > { %v7860_v13 = vsel %vm7816_vm10, %v7795_v47, %v7545_v61  ;;  %18040 = vst [vmem:[#allocation81_spill] sm:$0xff] %v15773_v31  ;;  %v7857_v16 = vsel %vm7816_vm10, %v7792_v29, %v7524_v42 }
 0x5f2   : > { %v15776_v41 = vrot.slane %v8521_v45, %v15313_v10  ;;  %v15779_v11 = vrot.slane %v8537_v26, %v15313_v10  ;;  %v7538_v33 = vpop.permute.xlu0 %7537  ;;  %v15783_v62 = vrot.slane %v8538_v22, %v15313_v10  ;;  %v8578_v14 = vcombine.high %v7858_v44, %v7860_v13  ;;  %v18043_v26 = vld [vmem:[#allocation119_spill] sm:$0xff] }
 0x5f3   : > { %v7859_v61 = vsel %vm7816_vm10, %v7794_v54, %v7538_v33  ;;  %v7732_v53 = vsel %vm7686_vm8, %v18044_v15, %v18043_v26  ;;  %v15796_v22 = vrot.slane %v8506_v30, %v15313_v10  ;;  %v8577_v4 = vcombine.low %v7858_v44, %v7860_v13  ;;  %v18047_v26 = vld [vmem:[#allocation83_spill] sm:$0xff]  ;;  %v18053_v13 = vld [vmem:[#allocation34_spill] sm:$0xff] }
 0x5f4   : > { %18041 = vst [vmem:[#allocation224_spill] sm:$0xff] %v15776_v41  ;;  %18042 = vst [vmem:[#allocation298_spill] sm:$0xff] %v15783_v62  ;;  %v7559_v20 = vpop.permute.xlu1 %7558  ;;  %v8562_v45 = vcombine.high %v7857_v16, %v7859_v61  ;;  %v8554_v47 = vcombine.high %v15773_v31, %v15776_v41  ;;  %v8561_v29 = vcombine.low %v7857_v16, %v7859_v61  ;;  %v18049_v61 = vld [vmem:[#allocation129_spill] sm:$0xff]  ;;  %v18065_v62 = vld [vmem:[#allocation172_spill] sm:$0xff] }
 0x5f5   : > { %18045 = vst [vmem:[#allocation299_spill] sm:$0xff] %v15796_v22  ;;  %v8592_v42 = vrot.slane %v8578_v14, %v17940_v28  ;;  %v7734_v30 = vsel %vm7686_vm8, %v18047_v26, %v18046_v58  ;;  %v18048_v14 = vld [vmem:[#allocation28_spill] sm:$0xff]  ;;  %v18051_v58 = vld [vmem:[#allocation73_spill] sm:$0xff]  ;;  %v7797_v37 = vsel %vm7751_vm9, %v7732_v53, %v18053_v13  ;;  %v18067_v22 = vld [vmem:[#allocation263_spill] sm:$0xff] }
 0x5f6   : > { %v8576_v24 = vrot.slane %v8562_v45, %v17940_v28  ;;  %v7552_v54 = vpop.permute.xlu0 %7551  ;;  %8985 = vrot.lane.b32.xlu0 %v8554_v47, %s10134_s14  ;;  %v7731_v45 = vsel %vm7686_vm8, %v18049_v61, %v18048_v14  ;;  %v18050_v47 = vld [vmem:[#allocation150_spill] sm:$0xff]  ;;  %v18052_v26 = vld [vmem:[#allocation157_spill] sm:$0xff]  ;;  %v15825_v44 = vrot.slane %v8561_v29, %v17940_v28 }
 0x5f7   : > { %v7799_v33 = vsel %vm7751_vm9, %v7734_v30, %v18050_v47  ;;  %v7733_v35 = vsel %vm7686_vm8, %v18052_v26, %v18051_v58  ;;  %v7796_v14 = vsel %vm7751_vm9, %v7731_v45, %v18054_v3  ;;  %v18055_v61 = vld [vmem:[#allocation41_spill] sm:$0xff] }
 0x5f8   : > { %v7573_v15 = vpop.permute.xlu1 %7572  ;;  %v8641_v48 = vcombine.low %v8576_v24, %v8592_v42  ;;  %v8642_v19 = vcombine.high %v8576_v24, %v8592_v42  ;;  %v7798_v30 = vsel %vm7751_vm9, %v7733_v35, %v18055_v61  ;;  %v15833_v42 = vrot.slane %v8577_v4, %v17940_v28 }
 0x5f9   : > { %v7864_v16 = vsel %vm7816_vm10, %v7799_v33, %v7573_v15  ;;  %v7862_v24 = vsel %vm7816_vm10, %v7797_v37, %v7559_v20  ;;  %v7861_v58 = vsel %vm7816_vm10, %v7796_v14, %v7552_v54 }
 0x5fa   : > { %v7566_v47 = vpop.permute.xlu0 %7565  ;;  %v8609_v53 = vcombine.low %v7862_v24, %v7864_v16  ;;  %v8610_v13 = vcombine.high %v7862_v24, %v7864_v16  ;;  %v8625_v3 = vcombine.low %v15825_v44, %v15833_v42  ;;  %v18057_v24 = vld [vmem:[#allocation258_spill] sm:$0xff]  ;;  %v15884_v17 = vrot.slane %v8641_v48, %v15313_v10 }
 0x5fb   : > { %v7863_v29 = vsel %vm7816_vm10, %v7798_v30, %v7566_v47  ;;  %v18056_v30 = vld [vmem:[#allocation65_spill] sm:$0xff] }
 0x5fc   : > { %v7587_v26 = vpop.permute.xlu1 %7586  ;;  %v8593_v33 = vcombine.low %v7861_v58, %v7863_v29  ;;  %v8594_v15 = vcombine.high %v7861_v58, %v7863_v29  ;;  %v15841_v35 = vrot.slane %v8609_v53, %v17940_v28  ;;  %v8624_v4 = vrot.slane %v8610_v13, %v17940_v28  ;;  %v18058_v58 = vld [vmem:[#allocation38_spill] sm:$0xff]  ;;  %v18059_v53 = vld [vmem:[#allocation168_spill] sm:$0xff]  ;;  %18071 = vst [vmem:[#allocation300_spill] sm:$0xff] %v15884_v17  ;;  %v18094_v17 = vld [vmem:[#allocation267_spill] sm:$0xff] }
 0x5fd   : > { %v7736_v47 = vsel %vm7686_vm8, %v18057_v24, %v18056_v30  ;;  %v7737_v13 = vsel %vm7686_vm8, %v18059_v53, %v18058_v58  ;;  %v18060_v29 = vld [vmem:[#allocation204_spill] sm:$0xff] }
 0x5fe   : > { %v15845_v37 = vrot.slane %v8593_v33, %v17940_v28  ;;  %v8608_v20 = vrot.slane %v8594_v15, %v17940_v28  ;;  %v7580_v54 = vpop.permute.xlu0 %7579  ;;  %v7802_v33 = vsel %vm7751_vm9, %v7737_v13, %v18060_v29  ;;  %v15859_v15 = vrot.slane %v8625_v3, %v15313_v10  ;;  %v18066_v24 = vld [vmem:[#allocation80_spill] sm:$0xff]  ;;  %v18069_v13 = vld [vmem:[#allocation175_spill] sm:$0xff]  ;;  %v18070_v29 = vld [vmem:[#allocation57_spill] sm:$0xff] }
 0x5ff   : > { %v7738_v58 = vsel %vm7686_vm8, %v18067_v22, %v18066_v24  ;;  %v18072_v22 = vld [vmem:[#allocation54_spill] sm:$0xff]  ;;  %v18075_v24 = vld [vmem:[#allocation185_spill] sm:$0xff] }
 0x600   : > { %v7601_v16 = vpop.permute.xlu1 %7600  ;;  %v8657_v45 = vcombine.low %v15845_v37, %v15841_v35  ;;  %v8673_v14 = vcombine.low %v8608_v20, %v8624_v4  ;;  %v8674_v61 = vcombine.high %v8608_v20, %v8624_v4  ;;  %18061 = vst [vmem:[#allocation117_spill] sm:$0xff] %v15859_v15  ;;  %v18064_v20 = vld [vmem:[#allocation30_spill] sm:$0xff]  ;;  %v7803_v49 = vsel %vm7751_vm9, %v7738_v58, %v18070_v29  ;;  %v18080_v29 = vld [vmem:[#allocation184_spill] sm:$0xff] }
 0x601   : > { %v7735_v30 = vsel %vm7686_vm8, %v18065_v62, %v18064_v20  ;;  %v18073_v20 = vld [vmem:[#allocation265_spill] sm:$0xff]  ;;  %v7801_v48 = vsel %vm7751_vm9, %v7736_v47, %v18075_v24  ;;  %v18078_v24 = vld [vmem:[#allocation39_spill] sm:$0xff]  ;;  %v7741_v47 = vsel %vm7686_vm8, %v18082_v60, %v18081_v59 }
 0x602   : > { %v15862_v41 = vrot.slane %v8657_v45, %v15313_v10  ;;  %v15865_v31 = vrot.slane %v8673_v14, %v15313_v10  ;;  %v7594_v4 = vpop.permute.xlu0 %7593  ;;  %v15874_v53 = vrot.slane %v8674_v61, %v15313_v10  ;;  %v7800_v14 = vsel %vm7751_vm9, %v7735_v30, %v18069_v13 }
 0x603   : > { %v15877_v3 = vsel %vm7816_vm10, %v7802_v33, %v7594_v4  ;;  %v7742_v61 = vsel %vm7686_vm8, %v18073_v20, %v18072_v22  ;;  %v15892_v33 = vrot.slane %v8642_v19, %v15313_v10  ;;  %v15895_v4 = vsel %vm7816_vm10, %v7800_v14, %v7580_v54  ;;  %v18077_v22 = vld [vmem:[#allocation120_spill] sm:$0xff] }
 0x604   : > { %18062 = vst [vmem:[#allocation245_spill] sm:$0xff] %v15862_v41  ;;  %18063 = vst [vmem:[#allocation111_spill] sm:$0xff] %v15865_v31  ;;  %v7615_v45 = vpop.permute.xlu1 %7614  ;;  %v8690_v62 = vcombine.high %v15859_v15, %v15862_v41  ;;  %v15898_v30 = vsel %vm7816_vm10, %v7803_v49, %v7601_v16  ;;  %v8697_v58 = vcombine.low %v15895_v4, %v15877_v3  ;;  %v18083_v41 = vld [vmem:[#allocation169_spill] sm:$0xff]  ;;  %v18093_v31 = vld [vmem:[#allocation87_spill] sm:$0xff] }
 0x605   : > { %18068 = vst [vmem:[#allocation235_spill] sm:$0xff] %v15874_v53  ;;  %18074 = vst [vmem:[#allocation301_spill] sm:$0xff] %v15892_v33  ;;  %v15910_v54 = vsel %vm7816_vm10, %v7801_v48, %v7587_v26  ;;  %v7807_v19 = vsel %vm7751_vm9, %v7742_v61, %v18078_v24  ;;  %v18079_v48 = vld [vmem:[#allocation85_spill] sm:$0xff]  ;;  %v7746_v40 = vsel %vm7686_vm8, %v18094_v17, %v18093_v31 }
 0x606   : > { %v7608_v13 = vpop.permute.xlu0 %7607  ;;  %8987 = vrot.lane.b32.xlu1 %v8690_v62, %s10134_s14  ;;  %v18076_v62 = vld [vmem:[#allocation109_spill] sm:$0xff]  ;;  %v8713_v26 = vcombine.low %v15910_v54, %v15898_v30  ;;  %v7739_v16 = vsel %vm7686_vm8, %v18080_v29, %v18079_v48  ;;  %v15941_v53 = vrot.slane %v8697_v58, %v17940_v28 }
 0x607   : > { %v7740_v20 = vsel %vm7686_vm8, %v18077_v22, %v18076_v62  ;;  %v18084_v62 = vld [vmem:[#allocation290_spill] sm:$0xff] }
 0x608   : > { %v7629_v49 = vpop.permute.xlu1 %7628  ;;  %v7805_v14 = vsel %vm7751_vm9, %v7740_v20, %v18083_v41  ;;  %v7804_v61 = vsel %vm7751_vm9, %v7739_v16, %v18084_v62  ;;  %v18085_v22 = vld [vmem:[#allocation202_spill] sm:$0xff] }
 0x609   : > { %v15934_v15 = vsel %vm7816_vm10, %v7807_v19, %v7629_v49  ;;  %v7806_v24 = vsel %vm7751_vm9, %v7741_v47, %v18085_v22  ;;  %v15944_v29 = vsel %vm7816_vm10, %v7805_v14, %v7615_v45  ;;  %v15947_v59 = vsel %vm7816_vm10, %v7804_v61, %v7608_v13  ;;  %v18086_v62 = vld [vmem:[#allocation114_spill] sm:$0xff]  ;;  %v18087_v61 = vld [vmem:[#allocation187_spill] sm:$0xff] }
 0x60a   : > { %v7622_v48 = vpop.permute.xlu0 %7621  ;;  %v8745_v60 = vcombine.low %v15944_v29, %v15934_v15  ;;  %v15955_v49 = vrot.slane %v8713_v26, %v17940_v28  ;;  %v7745_v22 = vsel %vm7686_vm8, %v18087_v61, %v18086_v62 }
 0x60b   : > { %v15952_v41 = vsel %vm7816_vm10, %v7806_v24, %v7622_v48  ;;  %v18088_v24 = vld [vmem:[#allocation292_spill] sm:$0xff] }
 0x60c   : > { %v7643_v19 = vpop.permute.xlu1 %7642  ;;  %v8729_v58 = vcombine.low %v15947_v59, %v15952_v41  ;;  %v8761_v45 = vcombine.low %v15941_v53, %v15955_v49  ;;  %v8753_v16 = vrot.slane %v8745_v60, %v17940_v28  ;;  %v7810_v26 = vsel %vm7751_vm9, %v7745_v22, %v18088_v24  ;;  %v18091_v60 = vld [vmem:[#allocation97_spill] sm:$0xff]  ;;  %v18095_v22 = vld [vmem:[#allocation208_spill] sm:$0xff]  ;;  %v18096_v24 = vld [vmem:[#allocation291_spill] sm:$0xff] }
 0x60e   : > { %v8737_v13 = vrot.slane %v8729_v58, %v17940_v28  ;;  %v7636_v47 = vpop.permute.xlu0 %7635  ;;  %v15969_v48 = vrot.slane %v8761_v45, %v15313_v10  ;;  %v7743_v58 = vsel %vm7686_vm8, %v18092_v55, %v18091_v60  ;;  %v7744_v55 = vsel %vm7686_vm8, %v18098_v2, %v18097_v8  ;;  %v18102_v2 = vld [vmem:[#allocation21_spill] sm:$0xff]  ;;  %v18103_v8 = vld [vmem:[#allocation271_spill] sm:$0xff] }
 0x60f   : > { %v7808_v45 = vsel %vm7751_vm9, %v7743_v58, %v18095_v22  ;;  %v18100_v58 = vld [vmem:[#allocation15_spill] sm:$0xff]  ;;  %v18101_v22 = vld [vmem:[#allocation268_spill] sm:$0xff] }
 0x610   : > { %v7657_v14 = vpop.permute.xlu1 %7656  ;;  %v8793_v20 = vcombine.low %v8737_v13, %v8753_v16  ;;  %18089 = vst [vmem:[#allocation92_spill] sm:$0xff] %v15969_v48  ;;  %v15993_v60 = vsel %vm7816_vm10, %v7808_v45, %v7636_v47  ;;  %v7750_v47 = vsel %vm7686_vm8, %v18103_v8, %v18102_v2  ;;  %v18107_v2 = vld [vmem:[#allocation180_spill] sm:$0xff]  ;;  %v18109_v8 = vld [vmem:[#allocation62_spill] sm:$0xff] }
 0x612   : > { %v15972_v33 = vrot.slane %v8793_v20, %v15313_v10  ;;  %v7650_v38 = vpop.permute.xlu0 %7649  ;;  %v7811_v20 = vsel %vm7751_vm9, %v7746_v40, %v18096_v24  ;;  %v7748_v24 = vsel %vm7686_vm8, %v18101_v22, %v18100_v58  ;;  %v8522_v58 = vcombine.high %v15746_v0, %v15742_v39  ;;  %v18111_v39 = vld [vmem:[#allocation195_spill] sm:$0xff] }
 0x613   : > { %v15981_v62 = vsel %vm7816_vm10, %v7810_v26, %v7650_v38  ;;  %v15996_v17 = vsel %vm7816_vm10, %v7811_v20, %v7657_v14  ;;  %v18099_v38 = vld [vmem:[#allocation70_spill] sm:$0xff]  ;;  %v7813_v20 = vsel %vm7751_vm9, %v7748_v24, %v18109_v8 }
 0x614   : > { %18090 = vst [vmem:[#allocation233_spill] sm:$0xff] %v15972_v33  ;;  %v7671_v61 = vpop.permute.xlu1 %7670  ;;  %v8826_v32 = vcombine.high %v15969_v48, %v15972_v33  ;;  %v7809_v31 = vsel %vm7751_vm9, %v7744_v55, %v18099_v38  ;;  %v8833_v26 = vcombine.low %v15993_v60, %v15981_v62  ;;  %v18104_v55 = vld [vmem:[#allocation161_spill] sm:$0xff]  ;;  %v8490_v33 = vcombine.high %v15726_v23, %v15734_v5 }
 0x615   : > { %v16010_v14 = vsel %vm7816_vm10, %v7809_v31, %v7643_v19  ;;  %v18105_v38 = vld [vmem:[#allocation201_spill] sm:$0xff]  ;;  %v18108_v19 = vld [vmem:[#allocation196_spill] sm:$0xff]  ;;  %v16039_v48 = vsel %vm7816_vm10, %v7813_v20, %v7671_v61  ;;  %v18112_v23 = vcombine.low %v15349_v21, %v15360_v7  ;;  %v8794_v61 = vcombine.high %v8737_v13, %v8753_v16 }
 0x616   : > { %v7664_v40 = vpop.permute.xlu0 %7663  ;;  %8989 = vrot.lane.b32.xlu0 %v8826_v32, %s10134_s14  ;;  %v7747_v34 = vsel %vm7686_vm8, %v18105_v38, %v18104_v55  ;;  %v18106_v32 = vld [vmem:[#allocation48_spill] sm:$0xff]  ;;  %v8849_v22 = vcombine.low %v16010_v14, %v15996_v17  ;;  %v7749_v31 = vsel %vm7686_vm8, %v18108_v19, %v18107_v2  ;;  %v8504_v20 = vrot.slane %v8490_v33, %v15313_v10 }
 0x617   : > { %v7815_v6 = vsel %vm7751_vm9, %v7750_v47, %v18106_v32  ;;  %v18110_v47 = vld [vmem:[#allocation212_spill] sm:$0xff]  ;;  %v7814_v0 = vsel %vm7751_vm9, %v7749_v31, %v18111_v39  ;;  %v8841_v32 = vrot.slane %v8833_v26, %v17940_v28  ;;  %v8536_v26 = vrot.slane %v8522_v58, %v15313_v10 }
 0x618   : > { %v7685_v45 = vpop.permute.xlu1 %7684  ;;  %v7812_v38 = vsel %vm7751_vm9, %v7747_v34, %v18110_v47  ;;  %v8857_v24 = vrot.slane %v8849_v22, %v17940_v28  ;;  %v18113_v58 = vcombine.low %v15556_v52, %v15567_v46  ;;  %v8808_v16 = vrot.slane %v8794_v61, %v15313_v10 }
 0x619   : > { %v16031_v55 = vsel %vm7816_vm10, %v7815_v6, %v7685_v45  ;;  %v16046_v6 = vsel %vm7816_vm10, %v7812_v38, %v7664_v40  ;;  %v8762_v40 = vcombine.high %v15941_v53, %v15955_v49  ;;  %v8555_v22 = vcombine.low %v8504_v20, %v8536_v26 }
 0x61a   : > { %v7678_v2 = vpop.permute.xlu0 %7677  ;;  %9009 = vrot.lane.b32.xlu0 %v18112_v23, %s10135_s22  ;;  %v8881_v34 = vcombine.low %v16039_v48, %v16031_v55  ;;  %v8897_v19 = vcombine.low %v8841_v32, %v8857_v24  ;;  %v18114_v23 = vcombine.low %v15346_v56, %v15357_v18  ;;  %v8626_v61 = vcombine.high %v15825_v44, %v15833_v42 }
 0x61b   : > { %v16051_v5 = vsel %vm7816_vm10, %v7814_v0, %v7678_v2  ;;  %v8776_v47 = vrot.slane %v8762_v40, %v15313_v10  ;;  %v8658_v0 = vcombine.high %v15845_v37, %v15841_v35  ;;  %v18116_v35 = vcombine.low %v15454_v25, %v15465_v43 }
 0x61c   : > { %v8865_v45 = vcombine.low %v16046_v6, %v16051_v5  ;;  %v8889_v31 = vrot.slane %v8881_v34, %v17940_v28  ;;  %v16069_v33 = vrot.slane %v8897_v19, %v15313_v10  ;;  %v8640_v18 = vrot.slane %v8626_v61, %v15313_v10  ;;  %v18125_v61 = vld [vmem:[#allocation295_spill] sm:$0xff] }
 0x61d   : > { %v8827_v49 = vcombine.low %v8776_v47, %v8808_v16  ;;  %v8672_v37 = vrot.slane %v8658_v0, %v15313_v10  ;;  %v8898_v40 = vcombine.high %v8841_v32, %v8857_v24  ;;  %v18117_v44 = vcombine.high %v15556_v52, %v15567_v46 }
 0x61e   : > { %v8873_v8 = vrot.slane %v8865_v45, %v17940_v28  ;;  %9013 = vrot.lane.b32.xlu0 %v18113_v58, %s10135_s22  ;;  %v18115_v45 = vcombine.high %v15349_v21, %v15360_v7  ;;  %v18118_v21 = vcombine.low %v15661_v57, %v15668_v63  ;;  %v8556_v42 = vcombine.high %v8504_v20, %v8536_v26 }
 0x61f   : > { %v8691_v19 = vcombine.low %v8640_v18, %v8672_v37  ;;  %v8912_v58 = vrot.slane %v8898_v40, %v15313_v10  ;;  %v8730_v32 = vcombine.high %v15947_v59, %v15952_v41  ;;  %v8828_v52 = vcombine.high %v8776_v47, %v8808_v16  ;;  %v18133_v40 = vld [vmem:[#allocation102_spill] sm:$0xff] }
 0x620   : > { %v8929_v13 = vcombine.low %v8873_v8, %v8889_v31  ;;  %v8930_v56 = vcombine.high %v8873_v8, %v8889_v31  ;;  %v8698_v24 = vcombine.high %v15895_v4, %v15877_v3  ;;  %v8746_v31 = vcombine.high %v15944_v29, %v15934_v15 }
 0x621   : > { %v8714_v26 = vcombine.high %v15910_v54, %v15898_v30  ;;  %v8744_v20 = vrot.slane %v8730_v32, %v17940_v28  ;;  %v18119_v59 = vcombine.low %v15451_v36, %v15462_v51  ;;  %v18120_v4 = vcombine.low %v15352_v1, %v15363_v50  ;;  %v18140_v32 = vld [vmem:[#allocation115_spill] sm:$0xff] }
 0x622   : > { %v16072_v53 = vrot.slane %v8929_v13, %v15313_v10  ;;  %9017 = vrot.lane.b32.xlu0 %v8555_v22, %s10135_s22  ;;  %v8944_v7 = vrot.slane %v8930_v56, %v15313_v10  ;;  %v8712_v3 = vrot.slane %v8698_v24, %v17940_v28  ;;  %v8760_v15 = vrot.slane %v8746_v31, %v17940_v28 }
 0x623   : > { %v18121_v30 = vcombine.high %v15454_v25, %v15465_v43  ;;  %v8728_v36 = vrot.slane %v8714_v26, %v17940_v28  ;;  %v18122_v29 = vcombine.low %v15559_v9, %v15570_v12  ;;  %v18123_v16 = vcombine.high %v15661_v57, %v15668_v63 }
 0x624   : > { %v8962_v38 = vcombine.high %v16069_v33, %v16072_v53  ;;  %v8961_v39 = vcombine.low %v16069_v33, %v16072_v53  ;;  %v8963_v46 = vcombine.low %v8912_v58, %v8944_v7  ;;  %v8809_v51 = vcombine.low %v8744_v20, %v8760_v15 }
 0x625   : > { %v8777_v54 = vcombine.low %v8712_v3, %v8728_v36  ;;  %v8692_v22 = vcombine.high %v8640_v18, %v8672_v37  ;;  %v18124_v43 = vcombine.low %v15788_v27, %v15779_v11  ;;  %v8866_v47 = vcombine.high %v16046_v6, %v16051_v5  ;;  %v18126_v6 = vld [vmem:[#allocation200_spill] sm:$0xff] }
 0x626   : > { %9021 = vrot.lane.b32.xlu0 %v8827_v49, %s10135_s22  ;;  %8991 = vrot.lane.b32.xlu1 %v8962_v38, %s10134_s14  ;;  %v8817_v13 = vrot.slane %v8809_v51, %v15313_v10  ;;  %v8964_v38 = vcombine.high %v8912_v58, %v8944_v7  ;;  %v8834_v57 = vcombine.high %v15993_v60, %v15981_v62  ;;  %v18137_v7 = vld [vmem:[#allocation300_spill] sm:$0xff] }
 0x627   : > { %v8785_v25 = vrot.slane %v8777_v54, %v15313_v10  ;;  %v8882_v63 = vcombine.high %v16039_v48, %v16031_v55  ;;  %v8850_v0 = vcombine.high %v16010_v14, %v15996_v17  ;;  %v18127_v5 = vcombine.low %v18125_v61, %v18126_v6  ;;  %v18129_v17 = vld [vmem:[#allocation72_spill] sm:$0xff]  ;;  %v18130_v14 = vld [vmem:[#allocation219_spill] sm:$0xff] }
 0x628   : > { %v8978_v2 = vpop.permute.xlu0 %8977  ;;  %v8848_v62 = vrot.slane %v8834_v57, %v17940_v28  ;;  %v18128_v60 = vcombine.high %v15352_v1, %v15363_v50  ;;  %v18131_v55 = vcombine.low %v18129_v17, %v18130_v14  ;;  %v18132_v18 = vcombine.high %v15559_v9, %v15570_v12 }
 0x629   : > { %v16087_v34 = vsel %vm9193_vm11, %v18114_v23, %v8978_v2  ;;  %v8829_v49 = vcombine.low %v8785_v25, %v8817_v13  ;;  %v8880_v2 = vrot.slane %v8866_v47, %v17940_v28  ;;  %v8896_v48 = vrot.slane %v8882_v63, %v17940_v28  ;;  %v18156_v47 = vld [vmem:[#allocation224_spill] sm:$0xff] }
 0x62a   : > { %9041 = vrot.lane.b32.xlu0 %v18115_v45, %s10136_s28  ;;  %9011 = vrot.lane.b32.xlu1 %v18116_v35, %s10135_s22  ;;  %v8864_v35 = vrot.slane %v8850_v0, %v17940_v28  ;;  %v18136_v28 = vcombine.high %v15788_v27, %v15779_v11  ;;  %v8830_v9 = vcombine.high %v8785_v25, %v8817_v13  ;;  %v18143_v11 = vld [vmem:[#allocation294_spill] sm:$0xff]  ;;  %v18144_v27 = vld [vmem:[#allocation293_spill] sm:$0xff]  ;;  %v18151_v13 = vld [vmem:[#allocation299_spill] sm:$0xff] }
 0x62b   : > { %v8945_v37 = vcombine.low %v8880_v2, %v8896_v48  ;;  %v18145_v31 = vcombine.low %v18143_v11, %v18144_v27  ;;  %v18146_v26 = vcombine.high %v18129_v17, %v18130_v14  ;;  %v18158_v57 = vcombine.high %v18143_v11, %v18144_v27  ;;  %v18159_v63 = vld [vmem:[#allocation232_spill] sm:$0xff]  ;;  %v18160_v0 = vld [vmem:[#allocation103_spill] sm:$0xff]  ;;  %v18164_v17 = vld [vmem:[#allocation297_spill] sm:$0xff] }
 0x62c   : > { %v8913_v56 = vcombine.low %v8848_v62, %v8864_v35  ;;  %v8946_v61 = vcombine.high %v8880_v2, %v8896_v48  ;;  %v8914_v6 = vcombine.high %v8848_v62, %v8864_v35  ;;  %v18167_v2 = vld [vmem:[#allocation301_spill] sm:$0xff]  ;;  %v18168_v62 = vld [vmem:[#allocation235_spill] sm:$0xff] }
 0x62d   : > { %v8953_v1 = vrot.slane %v8945_v37, %v15313_v10  ;;  %v18169_v48 = vcombine.low %v18167_v2, %v18168_v62 }
 0x62e   : > { %9045 = vrot.lane.b32.xlu0 %v18117_v44, %s10136_s28  ;;  %9015 = vrot.lane.b32.xlu1 %v18118_v21, %s10135_s22  ;;  %v18134_v44 = vld [vmem:[#allocation296_spill] sm:$0xff]  ;;  %v8921_v50 = vrot.slane %v8913_v56, %v15313_v10  ;;  %v8928_v37 = vrot.slane %v8914_v6, %v15313_v10 }
 0x62f   : > { %v18135_v21 = vcombine.low %v18133_v40, %v18134_v44  ;;  %v18150_v54 = vcombine.high %v18133_v40, %v18134_v44  ;;  %v18170_v44 = vld [vmem:[#allocation117_spill] sm:$0xff] }
 0x630   : > { %v8965_v12 = vcombine.low %v8921_v50, %v8953_v1 }
 0x632   : > { %9049 = vrot.lane.b32.xlu0 %v8556_v42, %s10136_s28  ;;  %9019 = vrot.lane.b32.xlu1 %v8691_v19, %s10135_s22  ;;  %v18138_v42 = vld [vmem:[#allocation111_spill] sm:$0xff] }
 0x633   : > { %v18139_v19 = vcombine.low %v18137_v7, %v18138_v42 }
 0x636   : > { %9053 = vrot.lane.b32.xlu0 %v8828_v52, %s10136_s28  ;;  %9023 = vrot.lane.b32.xlu1 %v8963_v46, %s10135_s22  ;;  %v18141_v52 = vld [vmem:[#allocation240_spill] sm:$0xff] }
 0x637   : > { %v18142_v46 = vcombine.low %v18140_v32, %v18141_v52 }
 0x638   : > { %v8980_v8 = vpop.permute.xlu1 %8979 }
 0x639   : > { %v16128_v41 = vsel %vm9193_vm11, %v18119_v59, %v8980_v8  ;;  %v8810_v8 = vcombine.high %v8744_v20, %v8760_v15  ;;  %v8778_v59 = vcombine.high %v8712_v3, %v8728_v36  ;;  %v18154_v20 = vcombine.high %v18137_v7, %v18138_v42 }
 0x63a   : > { %9073 = vrot.lane.b32.xlu0 %v18120_v4, %s10137_s29  ;;  %9043 = vrot.lane.b32.xlu1 %v18121_v30, %s10136_s28  ;;  %v18147_v4 = vld [vmem:[#allocation230_spill] sm:$0xff]  ;;  %v18148_v30 = vld [vmem:[#allocation96_spill] sm:$0xff]  ;;  %v8966_v15 = vcombine.high %v8921_v50, %v8953_v1  ;;  %v18173_v50 = vcombine.high %v18159_v63, %v18160_v0  ;;  %v18175_v7 = vcombine.high %v18167_v2, %v18168_v62 }
 0x63b   : > { %v18149_v51 = vcombine.low %v18147_v4, %v18148_v30 }
 0x63e   : > { %9077 = vrot.lane.b32.xlu0 %v18122_v29, %s10137_s29  ;;  %9047 = vrot.lane.b32.xlu1 %v18123_v16, %s10136_s28  ;;  %v8824_v29 = vrot.slane %v8810_v8, %v15313_v10  ;;  %v8792_v16 = vrot.slane %v8778_v59, %v15313_v10 }
 0x640   : > { %v8831_v3 = vcombine.low %v8792_v16, %v8824_v29  ;;  %v8832_v35 = vcombine.high %v8792_v16, %v8824_v29 }
 0x642   : > { %9081 = vrot.lane.b32.xlu0 %v18124_v43, %s10137_s29  ;;  %9051 = vrot.lane.b32.xlu1 %v8692_v22, %s10136_s28  ;;  %v18152_v22 = vld [vmem:[#allocation298_spill] sm:$0xff]  ;;  %v18155_v43 = vld [vmem:[#allocation81_spill] sm:$0xff] }
 0x643   : > { %v18153_v25 = vcombine.low %v18151_v13, %v18152_v22  ;;  %v18166_v56 = vcombine.high %v18151_v13, %v18152_v22 }
 0x646   : > { %9085 = vrot.lane.b32.xlu0 %v8829_v49, %s10137_s29  ;;  %9055 = vrot.lane.b32.xlu1 %v8964_v38, %s10136_s28  ;;  %v18157_v49 = vcombine.low %v18155_v43, %v18156_v47 }
 0x648   : > { %v8982_v23 = vpop.permute.xlu0 %8981 }
 0x649   : > { %v16171_v45 = vsel %vm9193_vm11, %v18127_v5, %v8982_v23  ;;  %v18161_v23 = vcombine.low %v18159_v63, %v18160_v0  ;;  %v18162_v5 = vcombine.high %v18147_v4, %v18148_v30 }
 0x64a   : > { %9105 = vrot.lane.b32.xlu0 %v18128_v60, %s10138_s30  ;;  %9075 = vrot.lane.b32.xlu1 %v18131_v55, %s10137_s29  ;;  %v18163_v60 = vld [vmem:[#allocation238_spill] sm:$0xff]  ;;  %v8960_v55 = vrot.slane %v8946_v61, %v15313_v10 }
 0x64b   : > { %v18165_v14 = vcombine.low %v18163_v60, %v18164_v17 }
 0x64c   : > { %v8968_v42 = vcombine.high %v8928_v37, %v8960_v55 }
 0x64e   : > { %9109 = vrot.lane.b32.xlu0 %v18132_v18, %s10138_s30  ;;  %9079 = vrot.lane.b32.xlu1 %v18135_v21, %s10137_s29  ;;  %v8967_v18 = vcombine.low %v8928_v37, %v8960_v55  ;;  %v18171_v21 = vld [vmem:[#allocation245_spill] sm:$0xff] }
 0x64f   : > { %v18172_v1 = vcombine.low %v18170_v44, %v18171_v21 }
 0x652   : > { %9113 = vrot.lane.b32.xlu0 %v18136_v28, %s10138_s30  ;;  %9083 = vrot.lane.b32.xlu1 %v18139_v19, %s10137_s29  ;;  %v18174_v28 = vcombine.high %v18163_v60, %v18164_v17 }
 0x656   : > { %9117 = vrot.lane.b32.xlu0 %v8830_v9, %s10138_s30  ;;  %9087 = vrot.lane.b32.xlu1 %v8965_v12, %s10137_s29  ;;  %v18176_v9 = vld [vmem:[#allocation92_spill] sm:$0xff]  ;;  %v18177_v12 = vld [vmem:[#allocation233_spill] sm:$0xff] }
 0x658   : > { %v8984_v58 = vpop.permute.xlu1 %8983 }
 0x659   : > { %v9197_v24 = vsel %vm9193_vm11, %v18142_v46, %v8984_v58  ;;  %v18178_v58 = vcombine.low %v18176_v9, %v18177_v12 }
 0x65a   : > { %9137 = vrot.lane.b32.xlu0 %v18145_v31, %s10139_s13  ;;  %9107 = vrot.lane.b32.xlu1 %v18146_v26, %s10138_s30 }
 0x65e   : > { %9141 = vrot.lane.b32.xlu0 %v18149_v51, %s10139_s13  ;;  %9111 = vrot.lane.b32.xlu1 %v18150_v54, %s10138_s30 }
 0x662   : > { %9145 = vrot.lane.b32.xlu0 %v18153_v25, %s10139_s13  ;;  %9115 = vrot.lane.b32.xlu1 %v18154_v20, %s10138_s30 }
 0x666   : > { %9149 = vrot.lane.b32.xlu0 %v8831_v3, %s10139_s13  ;;  %9119 = vrot.lane.b32.xlu1 %v8966_v15, %s10138_s30 }
 0x668   : > { %v8986_v36 = vpop.permute.xlu0 %8985 }
 0x669   : > { %v9198_v38 = vsel %vm9193_vm11, %v18157_v49, %v8986_v36 }
 0x66a   : > { %9169 = vrot.lane.b32.xlu0 %v18158_v57, %s10140_s12  ;;  %9139 = vrot.lane.b32.xlu1 %v18161_v23, %s10139_s13 }
 0x66e   : > { %9173 = vrot.lane.b32.xlu0 %v18162_v5, %s10140_s12  ;;  %9143 = vrot.lane.b32.xlu1 %v18165_v14, %s10139_s13 }
 0x672   : > { %9177 = vrot.lane.b32.xlu0 %v18166_v56, %s10140_s12  ;;  %9147 = vrot.lane.b32.xlu1 %v18169_v48, %s10139_s13 }
 0x676   : > { %9181 = vrot.lane.b32.xlu0 %v8832_v35, %s10140_s12  ;;  %9151 = vrot.lane.b32.xlu1 %v8967_v18, %s10139_s13 }
 0x678   : > { %v8988_v40 = vpop.permute.xlu1 %8987 }
 0x679   : > { %v9199_v10 = vsel %vm9193_vm11, %v18172_v1, %v8988_v40 }
 0x67a   : > { %9171 = vrot.lane.b32.xlu1 %v18173_v50, %s10140_s12 }
 0x67e   : > { %9175 = vrot.lane.b32.xlu1 %v18174_v28, %s10140_s12 }
 0x682   : > { %9179 = vrot.lane.b32.xlu1 %v18175_v7, %s10140_s12 }
 0x686   : > { %9183 = vrot.lane.b32.xlu1 %v8968_v42, %s10140_s12 }
 0x688   : > { %v8990_v19 = vpop.permute.xlu0 %8989 }
 0x689   : > { %v9200_v32 = vsel %vm9193_vm11, %v18178_v58, %v8990_v19 }
 0x68c   : > { %v9010_v52 = vpop.permute.xlu0 %9009 }
 0x68d   : > { %v9203_v46 = vsel %vm9202_vm12, %v16087_v34, %v9010_v52 }
 0x690   : > { %v9014_v11 = vpop.permute.xlu0 %9013 }
 0x691   : > { %v9205_v27 = vsel %vm9202_vm12, %v16171_v45, %v9014_v11 }
 0x694   : > { %v9018_v31 = vpop.permute.xlu0 %9017 }
 0x695   : > { %v16286_v26 = vsel %vm9202_vm12, %v9198_v38, %v9018_v31 }
 0x698   : > { %v9022_v8 = vpop.permute.xlu0 %9021  ;;  %v8992_v59 = vpop.permute.xlu1 %8991 }
 0x699   : > { %v16289_v4 = vsel %vm9202_vm12, %v9200_v32, %v9022_v8  ;;  %v9201_v30 = vsel %vm9193_vm11, %v8961_v39, %v8992_v59 }
 0x69c   : > { %v9042_v51 = vpop.permute.xlu0 %9041  ;;  %v9012_v34 = vpop.permute.xlu1 %9011 }
 0x69d   : > { %v16297_v54 = vsel %vm9202_vm12, %v16128_v41, %v9012_v34  ;;  %v9212_v62 = vsel %vm9211_vm13, %v9203_v46, %v9042_v51 }
 0x6a0   : > { %v9046_v45 = vpop.permute.xlu0 %9045  ;;  %v9016_v29 = vpop.permute.xlu1 %9015 }
 0x6a1   : > { %v16300_v16 = vsel %vm9202_vm12, %v9197_v24, %v9016_v29  ;;  %v9214_v21 = vsel %vm9211_vm13, %v9205_v27, %v9046_v45 }
 0x6a4   : > { %v9050_v13 = vpop.permute.xlu0 %9049  ;;  %v9020_v22 = vpop.permute.xlu1 %9019 }
 0x6a5   : > { %v16303_v25 = vsel %vm9202_vm12, %v9199_v10, %v9020_v22  ;;  %v9216_v19 = vsel %vm9211_vm13, %v16286_v26, %v9050_v13 }
 0x6a8   : > { %v9054_v20 = vpop.permute.xlu0 %9053  ;;  %v9024_v33 = vpop.permute.xlu1 %9023 }
 0x6a9   : > { %v16306_v53 = vsel %vm9202_vm12, %v9201_v30, %v9024_v33  ;;  %v9218_v11 = vsel %vm9211_vm13, %v16289_v4, %v9054_v20 }
 0x6ac   : > { %v9074_v39 = vpop.permute.xlu0 %9073  ;;  %v16308_v3 = vpop.permute.xlu1 %9043 }
 0x6ad   : > { %v9220_v48 = vsel %vm1934_vm1, %v9212_v62, %v9074_v39  ;;  %v9213_v51 = vsel %vm9211_vm13, %v16297_v54, %v16308_v3 }
 0x6b0   : > { %v9078_v41 = vpop.permute.xlu0 %9077  ;;  %v16310_v15 = vpop.permute.xlu1 %9047 }
 0x6b1   : > { %v9222_v10 = vsel %vm1934_vm1, %v9214_v21, %v9078_v41  ;;  %v9215_v22 = vsel %vm9211_vm13, %v16300_v16, %v16310_v15 }
 0x6b4   : > { %v9082_v36 = vpop.permute.xlu0 %9081  ;;  %v16312_v24 = vpop.permute.xlu1 %9051 }
 0x6b5   : > { %v9224_v12 = vsel %vm1934_vm1, %v9216_v19, %v9082_v36  ;;  %v9217_v41 = vsel %vm9211_vm13, %v16303_v25, %v16312_v24 }
 0x6b8   : > { %v9086_v43 = vpop.permute.xlu0 %9085  ;;  %v16314_v47 = vpop.permute.xlu1 %9055 }
 0x6b9   : > { %v9226_v31 = vsel %vm1934_vm1, %v9218_v11, %v9086_v43 }
 0x6bc   : > { %v9106_v49 = vpop.permute.xlu0 %9105  ;;  %v9076_v38 = vpop.permute.xlu1 %9075 }
 0x6bd   : > { %v9229_v35 = vsel %vm9228_vm14, %v9220_v48, %v9106_v49  ;;  %v9221_v4 = vsel %vm1934_vm1, %v9213_v51, %v9076_v38  ;;  %v9219_v38 = vsel %vm9211_vm13, %v16306_v53, %v16314_v47 }
 0x6c0   : > { %v9110_v57 = vpop.permute.xlu0 %9109  ;;  %v9080_v63 = vpop.permute.xlu1 %9079 }
 0x6c1   : > { %v9231_v50 = vsel %vm9228_vm14, %v9222_v10, %v9110_v57  ;;  %v9223_v54 = vsel %vm1934_vm1, %v9215_v22, %v9080_v63 }
 0x6c4   : > { %v9114_v0 = vpop.permute.xlu0 %9113  ;;  %v16316_v23 = vpop.permute.xlu1 %9083 }
 0x6c5   : > { %v9233_v58 = vsel %vm9228_vm14, %v9224_v12, %v9114_v0  ;;  %v9225_v16 = vsel %vm1934_vm1, %v9217_v41, %v16316_v23 }
 0x6c8   : > { %v9118_v61 = vpop.permute.xlu0 %9117  ;;  %v16318_v6 = vpop.permute.xlu1 %9087 }
 0x6c9   : > { %v9235_v26 = vsel %vm9228_vm14, %v9226_v31, %v9118_v61  ;;  %v9227_v25 = vsel %vm1934_vm1, %v9219_v38, %v16318_v6 }
 0x6cc   : > { %v9138_v5 = vpop.permute.xlu0 %9137  ;;  %v9108_v60 = vpop.permute.xlu1 %9107 }
 0x6cd   : > { %v9238_v18 = vsel %vm9237_vm15, %v9229_v35, %v9138_v5  ;;  %v9230_v45 = vsel %vm9228_vm14, %v9221_v4, %v9108_v60 }
 0x6d0   : > { %v9142_v17 = vpop.permute.xlu0 %9141  ;;  %v9112_v14 = vpop.permute.xlu1 %9111 }
 0x6d1   : > { %v9240_v28 = vsel %vm9237_vm15, %v9231_v50, %v9142_v17  ;;  %v9232_v33 = vsel %vm9228_vm14, %v9223_v54, %v9112_v14 }
 0x6d4   : > { %v9146_v55 = vpop.permute.xlu0 %9145  ;;  %v9116_v37 = vpop.permute.xlu1 %9115 }
 0x6d5   : > { %v9242_v32 = vsel %vm9237_vm15, %v9233_v58, %v9146_v55  ;;  %v9234_v15 = vsel %vm9228_vm14, %v9225_v16, %v9116_v37 }
 0x6d8   : > { %v9150_v56 = vpop.permute.xlu0 %9149  ;;  %v9120_v2 = vpop.permute.xlu1 %9119 }
 0x6d9   : > { %v9244_v8 = vsel %vm9237_vm15, %v9235_v26, %v9150_v56  ;;  %v9236_v24 = vsel %vm9228_vm14, %v9227_v25, %v9120_v2 }
 0x6dc   : > { %v9170_v40 = vpop.permute.xlu0 %9169  ;;  %v9140_v44 = vpop.permute.xlu1 %9139 }
 0x6dd   : > { %v9247_v1 = vsel %vm9246_vm0, %v9238_v18, %v9170_v40  ;;  %v9239_v29 = vsel %vm9237_vm15, %v9230_v45, %v9140_v44 }
 0x6de   : > { %9256 = vst.msk [vmem:[%s16328_s11] sm:$0xff] %vm9255_vm2, %v9247_v1 }
 0x6e0   : > { %v9174_v7 = vpop.permute.xlu0 %9173  ;;  %v9144_v42 = vpop.permute.xlu1 %9143 }
 0x6e1   : > { %v9249_v9 = vsel %vm9246_vm0, %v9240_v28, %v9174_v7  ;;  %v9241_v39 = vsel %vm9237_vm15, %v9232_v33, %v9144_v42 }
 0x6e2   : > { %9258 = vst.msk [vmem:[%s16328_s11 + $0x10] sm:$0xff] %vm9255_vm2, %v9249_v9 }
 0x6e4   : > { %v9178_v52 = vpop.permute.xlu0 %9177  ;;  %v9148_v46 = vpop.permute.xlu1 %9147 }
 0x6e5   : > { %v9251_v27 = vsel %vm9246_vm0, %v9242_v32, %v9178_v52  ;;  %v9243_v43 = vsel %vm9237_vm15, %v9234_v15, %v9148_v46 }
 0x6e6   : > { %9260 = vst.msk [vmem:[%s16328_s11 + $0x20] sm:$0xff] %vm9255_vm2, %v9251_v27 }
 0x6e8   : > { %v9182_v59 = vpop.permute.xlu0 %9181  ;;  %v9152_v30 = vpop.permute.xlu1 %9151 }
 0x6e9   : > { %v9253_v34 = vsel %vm9246_vm0, %v9244_v8, %v9182_v59  ;;  %v9245_v63 = vsel %vm9237_vm15, %v9236_v24, %v9152_v30 }
 0x6ea   : > { %9262 = vst.msk [vmem:[%s16328_s11 + $0x30] sm:$0xff] %vm9255_vm2, %v9253_v34 }
 0x6ec   : > { %v9172_v13 = vpop.permute.xlu1 %9171 }
 0x6ed   : > { %v9248_v20 = vsel %vm9246_vm0, %v9239_v29, %v9172_v13 }
 0x6ee   : > { %9257 = vst.msk [vmem:[%s16328_s11 + $0x8] sm:$0xff] %vm9255_vm2, %v9248_v20 }
 0x6f0   : > { %v9176_v3 = vpop.permute.xlu1 %9175 }
 0x6f1   : > { %v9250_v36 = vsel %vm9246_vm0, %v9241_v39, %v9176_v3 }
 0x6f2   : > { %9259 = vst.msk [vmem:[%s16328_s11 + $0x18] sm:$0xff] %vm9255_vm2, %v9250_v36 }
 0x6f4   : > { %v9180_v49 = vpop.permute.xlu1 %9179 }
 0x6f5   : > { %v9252_v57 = vsel %vm9246_vm0, %v9243_v43, %v9180_v49 }
 0x6f6   : > { %9261 = vst.msk [vmem:[%s16328_s11 + $0x28] sm:$0xff] %vm9255_vm2, %v9252_v57 }
 0x6f8   : > { %v9184_v0 = vpop.permute.xlu1 %9183 }
 0x6f9   : > { %v9254_v23 = vsel %vm9246_vm0, %v9245_v63, %v9184_v0 }
 0x6fa   : > { %9263 = vst.msk [vmem:[%s16328_s11 + $0x38] sm:$0xff] %vm9255_vm2, %v9254_v23 }
 0x6fb PF: > { %s21_s20 = sadd.s32 1, %s10121_s20   ;;  %s18179_s5 = sld [smem:[#allocation12_spill]] }
 0x6fc   : > { %p18_p2 = scmp.ge.s32.totalorder %s21_s20, 4   ;;  %s18180_s15 = smov %s10105_s16 }
 0x6fd   : > { %s18181_s16 = smov %s10109_s17  ;;  %s18182_s17 = smov %s10213_s26 }
 0x6fe   : > { %s18183_s18 = smov %s10117_s19  ;;  %20 = sbr.rel (!%p18_p2) target bundleno = 11 (0xb), region = 106 }
 0x701   : > { %s18184_s19 = smov %s18179_s5 }
 0x703   :  { %9294 = vsyncpa [#allocation3], 1 }
 0x704   :  { %9296 = vsyncpa [#allocation3 + $0x1], 1 }
 0x705   :  { %9297 = vsyncpa [#allocation5], 1 }
 0x706   :  { %9299 = vsyncpa [#allocation5 + $0x1], 1 }
 0x707   :  { %9300 = vsyncpa [#allocation8], 1 }

</bundles_post_ra>
